<compile_context>
chip_gen: v5e
topology: v5e:2x2
jax: 0.10.0
libtpu: 0.0.40
codegen_flags: <defaults>
</compile_context>

<pallas_src>
import functools
import math

import jax
import jax.numpy as jnp
from jax.experimental import pallas as pl
from jax.experimental.pallas import tpu as pltpu


# ----------------------------------------------------------------------------
# Pallas kernel: full encoder stack. grid = (batch, layer); activations live
# in a VMEM scratch across the layer axis.
# ----------------------------------------------------------------------------
def _encoder_stack_kernel(x_ref, srcmask_ref, kpbias_ref,
                          win_ref, bin_ref, wo_ref, bo_ref,
                          w1_ref, b1_ref, w2_ref, b2_ref,
                          g1_ref, be1_ref, g2_ref, be2_ref,
                          o_ref, x_scr,
                          *, num_heads, head_dim, eps):
    layer = pl.program_id(1)
    n_layers = pl.num_programs(1)
    d_model = num_heads * head_dim
    S = x_scr.shape[0]

    # First layer of this batch element: load the input into the resident scratch.
    @pl.when(layer == 0)
    def _():
        x_scr[...] = x_ref[0].astype(jnp.float32)

    x = x_scr[...]                                      # (S, D) f32, VMEM-resident
    # additive mask rebuilt in-register: shared (S,S) + per-batch key-pad row (1,S)
    mask = srcmask_ref[...] + kpbias_ref[0]             # (S, S) f32

    # --- fused QKV projection (bf16 MXU, f32 accumulation) ---
    x_bf = x.astype(jnp.bfloat16)
    qkv = jnp.dot(x_bf, win_ref[0],
                  preferred_element_type=jnp.float32) + bin_ref[0]   # (S, 3D) f32
    scale = 1.0 / math.sqrt(head_dim)
    q = qkv[:, 0 * d_model:1 * d_model] * scale          # fold scale into q once
    k = qkv[:, 1 * d_model:2 * d_model]
    v = qkv[:, 2 * d_model:3 * d_model]

    # --- head-packed scaled dot-product attention (single batched matmuls) ---
    qh = q.reshape(S, num_heads, head_dim).astype(jnp.bfloat16)
    kh = k.reshape(S, num_heads, head_dim).astype(jnp.bfloat16)
    vh = v.reshape(S, num_heads, head_dim).astype(jnp.bfloat16)
    s = jnp.einsum("qhd,khd->hqk", qh, kh,
                   preferred_element_type=jnp.float32)   # (H, S, S) f32
    s = s + mask[None, :, :]
    s = s - jnp.max(s, axis=-1, keepdims=True)
    p = jnp.exp(s)
    p = p * pl.reciprocal(jnp.sum(p, axis=-1, keepdims=True), approx=True)
    ctx = jnp.einsum("hqk,khd->qhd", p.astype(jnp.bfloat16), vh,
                     preferred_element_type=jnp.float32) # (S, H, hd) f32
    attn = ctx.reshape(S, d_model)

    # --- output projection + residual + LayerNorm1 (f32 statistics) ---
    attn = jnp.dot(attn.astype(jnp.bfloat16), wo_ref[0],
                   preferred_element_type=jnp.float32) + bo_ref[0]
    x1 = x + attn
    mu = jnp.mean(x1, axis=-1, keepdims=True)
    var = jnp.mean((x1 - mu) ** 2, axis=-1, keepdims=True)
    x1 = (x1 - mu) * jax.lax.rsqrt(var + eps) * g1_ref[0] + be1_ref[0]

    # --- feed-forward + residual + LayerNorm2 ---
    h1 = jnp.dot(x1.astype(jnp.bfloat16), w1_ref[0],
                 preferred_element_type=jnp.float32) + b1_ref[0]
    h1 = jnp.maximum(h1, 0.0)
    ff = jnp.dot(h1.astype(jnp.bfloat16), w2_ref[0],
                 preferred_element_type=jnp.float32) + b2_ref[0]
    x2 = x1 + ff
    mu2 = jnp.mean(x2, axis=-1, keepdims=True)
    var2 = jnp.mean((x2 - mu2) ** 2, axis=-1, keepdims=True)
    x2 = (x2 - mu2) * jax.lax.rsqrt(var2 + eps) * g2_ref[0] + be2_ref[0]

    # carry activations to the next layer; write output only after the last one
    x_scr[...] = x2

    @pl.when(layer == n_layers - 1)
    def _():
        o_ref[0] = x2.astype(o_ref.dtype)


# ----------------------------------------------------------------------------
# Wrapper: one pallas_call for the whole stack.
# ----------------------------------------------------------------------------
def encoder_forward(src, src_mask, src_key_padding_mask, stacked_params,
                    *, num_heads, eps=1e-5):
    """src: (B, S, D) f32; src_mask: (S, S) additive f32 or None;
    src_key_padding_mask: (B, S) bool (True = padded) or None.
    stacked_params: dict of per-layer-stacked weights, leading dim = n_layers."""
    B, S, D = src.shape
    L = stacked_params["win"].shape[0]
    dff = stacked_params["w1"].shape[-1]
    head_dim = D // num_heads

    src_mask_f = (jnp.zeros((S, S), jnp.float32) if src_mask is None
                  else src_mask.astype(jnp.float32))
    if src_key_padding_mask is None:
        kp_bias = jnp.zeros((B, 1, S), jnp.float32)
    else:
        kp_bias = jnp.where(src_key_padding_mask, -1e9, 0.0).astype(jnp.float32)[:, None, :]

    # weights in bf16 for the MXU; biases / LN params stay f32 (added post-acc)
    win = stacked_params["win"].astype(jnp.bfloat16)
    wo = stacked_params["wo"].astype(jnp.bfloat16)
    w1 = stacked_params["w1"].astype(jnp.bfloat16)
    w2 = stacked_params["w2"].astype(jnp.bfloat16)

    kernel = functools.partial(_encoder_stack_kernel, num_heads=num_heads,
                               head_dim=head_dim, eps=eps)

    def wspec(shape):
        # per-layer block: leading layer dim indexed by the layer grid axis
        return pl.BlockSpec((1,) + tuple(shape[1:]),
                            lambda b, l: (l,) + (0,) * (len(shape) - 1))

    in_specs = [
        pl.BlockSpec((1, S, D), lambda b, l: (b, 0, 0)),   # x (read at layer 0)
        pl.BlockSpec((S, S), lambda b, l: (0, 0)),         # shared src_mask (resident)
        pl.BlockSpec((1, 1, S), lambda b, l: (b, 0, 0)),   # per-batch key-pad bias row
        wspec(win.shape), wspec(stacked_params["bin"].shape),
        wspec(wo.shape), wspec(stacked_params["bo"].shape),
        wspec(w1.shape), wspec(stacked_params["b1"].shape),
        wspec(w2.shape), wspec(stacked_params["b2"].shape),
        wspec(stacked_params["g1"].shape), wspec(stacked_params["be1"].shape),
        wspec(stacked_params["g2"].shape), wspec(stacked_params["be2"].shape),
    ]

    flops_per_tok = 2 * D * (3 * D + D + 2 * dff) + 4 * S * D
    cost = pl.CostEstimate(
        flops=int(B * L * S * flops_per_tok),
        transcendentals=int(B * L * num_heads * S * S),
        bytes_accessed=int(2 * src.size * 4
                           + B * 2 * (win.size + wo.size + w1.size + w2.size)
                           + src_mask_f.size * 4 + kp_bias.size * 4),
    )

    return pl.pallas_call(
        kernel,
        out_shape=jax.ShapeDtypeStruct((B, S, D), src.dtype),
        grid_spec=pltpu.PrefetchScalarGridSpec(
            num_scalar_prefetch=0,
            grid=(B, L),
            in_specs=in_specs,
            out_specs=pl.BlockSpec((1, S, D), lambda b, l: (b, 0, 0)),
            scratch_shapes=[pltpu.VMEM((S, D), jnp.float32)],   # resident activations
        ),
        compiler_params=pltpu.CompilerParams(
            dimension_semantics=("parallel", "arbitrary"),
            vmem_limit_bytes=48 * 1024 * 1024,
        ),
        cost_estimate=cost,
    )(src, src_mask_f, kp_bias,
      win, stacked_params["bin"], wo, stacked_params["bo"],
      w1, stacked_params["b1"], w2, stacked_params["b2"],
      stacked_params["g1"], stacked_params["be1"],
      stacked_params["g2"], stacked_params["be2"])


# ----------------------------------------------------------------------------
# Parameter init. `clones()` in the PyTorch module deep-copies one layer, so
# all layers are identical at init; the kernel nevertheless supports distinct
# per-layer weights (as after training), which we use here to exercise the
# per-layer weight indexing.
# ----------------------------------------------------------------------------
def init_stacked_params(key, d_model, dff, n_layers):
    def one(k):
        ks = jax.random.split(k, 4)
        s = 0.05
        return {
            "win": jax.random.normal(ks[0], (d_model, 3 * d_model), jnp.float32) * s,
            "bin": jnp.zeros((1, 3 * d_model), jnp.float32),
            "wo":  jax.random.normal(ks[1], (d_model, d_model), jnp.float32) * s,
            "bo":  jnp.zeros((1, d_model), jnp.float32),
            "w1":  jax.random.normal(ks[2], (d_model, dff), jnp.float32) * s,
            "b1":  jnp.zeros((1, dff), jnp.float32),
            "w2":  jax.random.normal(ks[3], (dff, d_model), jnp.float32) * s,
            "b2":  jnp.zeros((1, d_model), jnp.float32),
            "g1":  jnp.ones((1, d_model), jnp.float32),
            "be1": jnp.zeros((1, d_model), jnp.float32),
            "g2":  jnp.ones((1, d_model), jnp.float32),
            "be2": jnp.zeros((1, d_model), jnp.float32),
        }
    layers = [one(k) for k in jax.random.split(key, n_layers)]
    return {name: jnp.stack([lp[name] for lp in layers]) for name in layers[0]}


# ----------------------------------------------------------------------------
# Pure-JAX f32 reference (correctness check only).
# ----------------------------------------------------------------------------
def _ref_layer(x, src_mask, kpm, p, num_heads, eps=1e-5):
    B, S, D = x.shape
    dh = D // num_heads
    add_mask = (src_mask[None].astype(jnp.float32)
                + jnp.where(kpm[:, None, :], -1e9, 0.0))
    qkv = x @ p["win"] + p["bin"][0]
    q, k, v = qkv[..., :D], qkv[..., D:2 * D], qkv[..., 2 * D:]
    q = q.reshape(B, S, num_heads, dh).transpose(0, 2, 1, 3)
    k = k.reshape(B, S, num_heads, dh).transpose(0, 2, 1, 3)
    v = v.reshape(B, S, num_heads, dh).transpose(0, 2, 1, 3)
    s = jnp.einsum("bhqd,bhkd->bhqk", q, k) / math.sqrt(dh) + add_mask[:, None]
    pattn = jax.nn.softmax(s, axis=-1)
    a = jnp.einsum("bhqk,bhkd->bhqd", pattn, v).transpose(0, 2, 1, 3).reshape(B, S, D)
    a = a @ p["wo"] + p["bo"][0]
    x1 = x + a
    x1 = (x1 - x1.mean(-1, keepdims=True)) * jax.lax.rsqrt(x1.var(-1, keepdims=True) + eps) \
         * p["g1"][0] + p["be1"][0]
    f = jnp.maximum(x1 @ p["w1"] + p["b1"][0], 0.0) @ p["w2"] + p["b2"][0]
    x2 = x1 + f
    x2 = (x2 - x2.mean(-1, keepdims=True)) * jax.lax.rsqrt(x2.var(-1, keepdims=True) + eps) \
         * p["g2"][0] + p["be2"][0]
    return x2


if __name__ == "__main__":
    # small but TPU-friendly shapes (lane/sublane aligned)
    B, S, D, NH, DFF, N_LAYERS = 2, 32, 128, 4, 256, 2

    key = jax.random.PRNGKey(0)
    k_x, k_p = jax.random.split(key)
    src = jax.random.normal(k_x, (B, S, D), jnp.float32)

    # src_mask: additive float attention mask (here zeros = no structural masking)
    src_mask = jnp.zeros((S, S), jnp.float32)
    # key padding mask: pad out the last 4 key positions of batch element 1
    src_key_padding_mask = jnp.zeros((B, S), dtype=bool).at[1, S - 4:].set(True)

    params = init_stacked_params(k_p, D, DFF, N_LAYERS)

    out = encoder_forward(src, src_mask, src_key_padding_mask, params, num_heads=NH)
    out = jax.block_until_ready(out)

    # correctness check vs. pure-JAX f32 reference (kernel matmuls are bf16,
    # so tolerance is loosened accordingly)
    ref = src
    for l in range(N_LAYERS):
        p_l = {name: v[l] for name, v in params.items()}
        ref = _ref_layer(ref, src_mask, src_key_padding_mask, p_l, NH)
    max_err = float(jnp.max(jnp.abs(out - ref)))
    assert jnp.allclose(out, ref, atol=5e-2, rtol=5e-2), \
        f"mismatch vs reference, max abs err = {max_err}"

    print("KERNEL_OK")
</pallas_src>

<mosaic_0001>
module attributes {stable_mosaic.version = 11 : i64} {
  func.func @_encoder_stack_kernel(%arg0: i32, %arg1: i32, %arg2: memref<1x32x128xf32, #tpu.memory_space<vmem>>, %arg3: memref<32x32xf32, #tpu.memory_space<vmem>>, %arg4: memref<1x1x32xf32, #tpu.memory_space<vmem>>, %arg5: memref<1x128x384xbf16, #tpu.memory_space<vmem>>, %arg6: memref<1x1x384xf32, #tpu.memory_space<vmem>>, %arg7: memref<1x128x128xbf16, #tpu.memory_space<vmem>>, %arg8: memref<1x1x128xf32, #tpu.memory_space<vmem>>, %arg9: memref<1x128x256xbf16, #tpu.memory_space<vmem>>, %arg10: memref<1x1x256xf32, #tpu.memory_space<vmem>>, %arg11: memref<1x256x128xbf16, #tpu.memory_space<vmem>>, %arg12: memref<1x1x128xf32, #tpu.memory_space<vmem>>, %arg13: memref<1x1x128xf32, #tpu.memory_space<vmem>>, %arg14: memref<1x1x128xf32, #tpu.memory_space<vmem>>, %arg15: memref<1x1x128xf32, #tpu.memory_space<vmem>>, %arg16: memref<1x1x128xf32, #tpu.memory_space<vmem>>, %arg17: memref<1x32x128xf32, #tpu.memory_space<vmem>>, %arg18: memref<32x128xf32, #tpu.memory_space<vmem>>) attributes {dimension_semantics = [#tpu.dimension_semantics<parallel>, #tpu.dimension_semantics<arbitrary>], iteration_bounds = array<i64: 2, 2>, scalar_prefetch = 0 : i64, scratch_operands = 1 : i64, tpu.core_type = #tpu.core_type<tc>, window_params = [{transform_indices = @transform_0, window_bounds = array<i64: 1, 32, 128>}, {pipeline_mode = #tpu.pipeline_mode<synchronous>, transform_indices = @transform_1, window_bounds = array<i64: 32, 32>}, {transform_indices = @transform_2, window_bounds = array<i64: 1, 1, 32>}, {transform_indices = @transform_3, window_bounds = array<i64: 1, 128, 384>}, {transform_indices = @transform_4, window_bounds = array<i64: 1, 1, 384>}, {transform_indices = @transform_5, window_bounds = array<i64: 1, 128, 128>}, {transform_indices = @transform_6, window_bounds = array<i64: 1, 1, 128>}, {transform_indices = @transform_7, window_bounds = array<i64: 1, 128, 256>}, {transform_indices = @transform_8, window_bounds = array<i64: 1, 1, 256>}, {transform_indices = @transform_9, window_bounds = array<i64: 1, 256, 128>}, {transform_indices = @transform_10, window_bounds = array<i64: 1, 1, 128>}, {transform_indices = @transform_11, window_bounds = array<i64: 1, 1, 128>}, {transform_indices = @transform_12, window_bounds = array<i64: 1, 1, 128>}, {transform_indices = @transform_13, window_bounds = array<i64: 1, 1, 128>}, {transform_indices = @transform_14, window_bounds = array<i64: 1, 1, 128>}, {transform_indices = @transform_15, window_bounds = array<i64: 1, 32, 128>}]} {
    %c0_i32 = arith.constant 0 : i32
    %0 = arith.cmpi eq, %arg1, %c0_i32 : i32
    %1 = arith.extui %0 : i1 to i32
    %c0_i32_0 = arith.constant 0 : i32
    %2 = arith.cmpi ne, %1, %c0_i32_0 : i32
    scf.if %2 {
      %c0_65 = arith.constant 0 : index
      %c0_66 = arith.constant 0 : index
      %c0_67 = arith.constant 0 : index
      %130 = vector.load %arg2[%c0_65, %c0_66, %c0_67] : memref<1x32x128xf32, #tpu.memory_space<vmem>>, vector<1x32x128xf32>
      %131 = vector.shape_cast %130 : vector<1x32x128xf32> to vector<32x128xf32>
      %c0_68 = arith.constant 0 : index
      %c0_69 = arith.constant 0 : index
      %132 = vector.load %arg18[%c0_68, %c0_69] : memref<32x128xf32, #tpu.memory_space<vmem>>, vector<32x128xf32>
      tpu.vector_store %arg18[%c0_68, %c0_69], %131 {strides = array<i32>} : memref<32x128xf32, #tpu.memory_space<vmem>>, vector<32x128xf32>,
    } else {
    }
    %c0 = arith.constant 0 : index
    %c0_1 = arith.constant 0 : index
    %3 = vector.load %arg18[%c0, %c0_1] : memref<32x128xf32, #tpu.memory_space<vmem>>, vector<32x128xf32>
    %c0_2 = arith.constant 0 : index
    %c0_3 = arith.constant 0 : index
    %4 = vector.load %arg3[%c0_2, %c0_3] : memref<32x32xf32, #tpu.memory_space<vmem>>, vector<32x32xf32>
    %c0_4 = arith.constant 0 : index
    %c0_5 = arith.constant 0 : index
    %c0_6 = arith.constant 0 : index
    %5 = vector.load %arg4[%c0_4, %c0_5, %c0_6] : memref<1x1x32xf32, #tpu.memory_space<vmem>>, vector<1x1x32xf32>
    %6 = vector.shape_cast %5 : vector<1x1x32xf32> to vector<1x32xf32>
    %7 = vector.broadcast %6 : vector<1x32xf32> to vector<32x32xf32>
    %8 = arith.addf %4, %7 : vector<32x32xf32>
    %9 = arith.truncf %3 : vector<32x128xf32> to vector<32x128xbf16>
    %c0_7 = arith.constant 0 : index
    %c0_8 = arith.constant 0 : index
    %c0_9 = arith.constant 0 : index
    %10 = vector.load %arg5[%c0_7, %c0_8, %c0_9] : memref<1x128x384xbf16, #tpu.memory_space<vmem>>, vector<1x128x384xbf16>
    %11 = vector.shape_cast %10 : vector<1x128x384xbf16> to vector<128x384xbf16>
    %cst = arith.constant dense<0.000000e+00> : vector<32x384xf32>
    %12 = tpu.matmul %9, %11, %cst {dimension_numbers = #tpu.dot_dimension_numbers<[1], [0], [0], [1], [0, 0, 1, 1], [], []>} : vector<32x128xbf16>, vector<128x384xbf16>, vector<32x384xf32> -> vector<32x384xf32>
    %c0_10 = arith.constant 0 : index
    %c0_11 = arith.constant 0 : index
    %c0_12 = arith.constant 0 : index
    %13 = vector.load %arg6[%c0_10, %c0_11, %c0_12] : memref<1x1x384xf32, #tpu.memory_space<vmem>>, vector<1x1x384xf32>
    %14 = vector.shape_cast %13 : vector<1x1x384xf32> to vector<1x384xf32>
    %15 = vector.broadcast %14 : vector<1x384xf32> to vector<32x384xf32>
    %16 = arith.addf %12, %15 : vector<32x384xf32>
    %17 = vector.extract_strided_slice %16 {offsets = [0, 0], sizes = [32, 128], strides = [1, 1]} : vector<32x384xf32> to vector<32x128xf32>
    %cst_13 = arith.constant 0.176776692 : f32
    %18 = vector.broadcast %cst_13 : f32 to vector<32x128xf32>
    %19 = arith.mulf %17, %18 : vector<32x128xf32>
    %20 = vector.extract_strided_slice %16 {offsets = [0, 128], sizes = [32, 128], strides = [1, 1]} : vector<32x384xf32> to vector<32x128xf32>
    %21 = vector.extract_strided_slice %16 {offsets = [0, 256], sizes = [32, 128], strides = [1, 1]} : vector<32x384xf32> to vector<32x128xf32>
    %22 = vector.shape_cast %19 : vector<32x128xf32> to vector<32x4x32xf32>
    %23 = arith.truncf %22 : vector<32x4x32xf32> to vector<32x4x32xbf16>
    %24 = vector.shape_cast %20 : vector<32x128xf32> to vector<32x4x32xf32>
    %25 = arith.truncf %24 : vector<32x4x32xf32> to vector<32x4x32xbf16>
    %26 = vector.shape_cast %21 : vector<32x128xf32> to vector<32x4x32xf32>
    %27 = arith.truncf %26 : vector<32x4x32xf32> to vector<32x4x32xbf16>
    "tpu.trace_start"() <{level = 10 : i32, message = "qhd,khd->hqk"}> : () -> ()
    %cst_14 = arith.constant dense<0.000000e+00> : vector<4x32x32xf32>
    %28 = tpu.matmul %23, %25, %cst_14 {dimension_numbers = #tpu.dot_dimension_numbers<[2], [2], [0], [0], [0, 1, 0, 0, 1, 0], [1], [1]>} : vector<32x4x32xbf16>, vector<32x4x32xbf16>, vector<4x32x32xf32> -> vector<4x32x32xf32>
    "tpu.trace_stop"() : () -> ()
    %29 = vector.shape_cast %8 : vector<32x32xf32> to vector<1x32x32xf32>
    %30 = vector.broadcast %29 : vector<1x32x32xf32> to vector<4x32x32xf32>
    %31 = arith.addf %28, %30 : vector<4x32x32xf32>
    %cst_15 = arith.constant dense<0xFF800000> : vector<4x32xf32>
    %32 = vector.multi_reduction <maximumf>, %31, %cst_15 [2] : vector<4x32x32xf32> to vector<4x32xf32>
    %33 = vector.shape_cast %32 : vector<4x32xf32> to vector<4x32x1xf32>
    %34 = vector.broadcast %33 : vector<4x32x1xf32> to vector<4x32x32xf32>
    %35 = arith.subf %31, %34 : vector<4x32x32xf32>
    %36 = math.exp %35 : vector<4x32x32xf32>
    %cst_16 = arith.constant dense<0.000000e+00> : vector<4x32xf32>
    %37 = vector.multi_reduction <add>, %36, %cst_16 [2] : vector<4x32x32xf32> to vector<4x32xf32>
    %38 = vector.shape_cast %37 : vector<4x32xf32> to vector<4x32x1xf32>
    %39 = tpu.reciprocal %38 {approx = true} : vector<4x32x1xf32> -> vector<4x32x1xf32>
    %40 = vector.broadcast %39 : vector<4x32x1xf32> to vector<4x32x32xf32>
    %41 = arith.mulf %36, %40 : vector<4x32x32xf32>
    %42 = arith.truncf %41 : vector<4x32x32xf32> to vector<4x32x32xbf16>
    "tpu.trace_start"() <{level = 10 : i32, message = "hqk,khd->qhd"}> : () -> ()
    %cst_17 = arith.constant dense<0.000000e+00> : vector<4x32x32xf32>
    %43 = tpu.matmul %27, %42, %cst_17 {dimension_numbers = #tpu.dot_dimension_numbers<[0], [2], [2], [1], [0, 1, 0, 2, 1, 1], [1], [0]>} : vector<32x4x32xbf16>, vector<4x32x32xbf16>, vector<4x32x32xf32> -> vector<4x32x32xf32>
    %44 = tpu.transpose %43, [2, 0, 1] : vector<4x32x32xf32> -> vector<32x4x32xf32>
    "tpu.trace_stop"() : () -> ()
    %45 = vector.shape_cast %44 : vector<32x4x32xf32> to vector<32x128xf32>
    %46 = arith.truncf %45 : vector<32x128xf32> to vector<32x128xbf16>
    %c0_18 = arith.constant 0 : index
    %c0_19 = arith.constant 0 : index
    %c0_20 = arith.constant 0 : index
    %47 = vector.load %arg7[%c0_18, %c0_19, %c0_20] : memref<1x128x128xbf16, #tpu.memory_space<vmem>>, vector<1x128x128xbf16>
    %48 = vector.shape_cast %47 : vector<1x128x128xbf16> to vector<128x128xbf16>
    %cst_21 = arith.constant dense<0.000000e+00> : vector<32x128xf32>
    %49 = tpu.matmul %46, %48, %cst_21 {dimension_numbers = #tpu.dot_dimension_numbers<[1], [0], [0], [1], [0, 0, 1, 1], [], []>} : vector<32x128xbf16>, vector<128x128xbf16>, vector<32x128xf32> -> vector<32x128xf32>
    %c0_22 = arith.constant 0 : index
    %c0_23 = arith.constant 0 : index
    %c0_24 = arith.constant 0 : index
    %50 = vector.load %arg8[%c0_22, %c0_23, %c0_24] : memref<1x1x128xf32, #tpu.memory_space<vmem>>, vector<1x1x128xf32>
    %51 = vector.shape_cast %50 : vector<1x1x128xf32> to vector<1x128xf32>
    %52 = vector.broadcast %51 : vector<1x128xf32> to vector<32x128xf32>
    %53 = arith.addf %49, %52 : vector<32x128xf32>
    %54 = arith.addf %3, %53 : vector<32x128xf32>
    %cst_25 = arith.constant dense<0.000000e+00> : vector<32xf32>
    %55 = vector.multi_reduction <add>, %54, %cst_25 [1] : vector<32x128xf32> to vector<32xf32>
    %56 = vector.shape_cast %55 : vector<32xf32> to vector<32x1xf32>
    %cst_26 = arith.constant 1.280000e+02 : f32
    %57 = vector.broadcast %cst_26 : f32 to vector<32x1xf32>
    %58 = arith.divf %56, %57 : vector<32x1xf32>
    %59 = vector.broadcast %58 : vector<32x1xf32> to vector<32x128xf32>
    %60 = arith.subf %54, %59 : vector<32x128xf32>
    %61 = arith.mulf %60, %60 : vector<32x128xf32>
    %cst_27 = arith.constant dense<0.000000e+00> : vector<32xf32>
    %62 = vector.multi_reduction <add>, %61, %cst_27 [1] : vector<32x128xf32> to vector<32xf32>
    %63 = vector.shape_cast %62 : vector<32xf32> to vector<32x1xf32>
    %cst_28 = arith.constant 1.280000e+02 : f32
    %64 = vector.broadcast %cst_28 : f32 to vector<32x1xf32>
    %65 = arith.divf %63, %64 : vector<32x1xf32>
    %66 = vector.broadcast %58 : vector<32x1xf32> to vector<32x128xf32>
    %67 = arith.subf %54, %66 : vector<32x128xf32>
    %cst_29 = arith.constant 9.99999974E-6 : f32
    %68 = vector.broadcast %cst_29 : f32 to vector<32x1xf32>
    %69 = arith.addf %65, %68 : vector<32x1xf32>
    %70 = math.rsqrt %69 : vector<32x1xf32>
    %71 = vector.broadcast %70 : vector<32x1xf32> to vector<32x128xf32>
    %72 = arith.mulf %67, %71 : vector<32x128xf32>
    %c0_30 = arith.constant 0 : index
    %c0_31 = arith.constant 0 : index
    %c0_32 = arith.constant 0 : index
    %73 = vector.load %arg13[%c0_30, %c0_31, %c0_32] : memref<1x1x128xf32, #tpu.memory_space<vmem>>, vector<1x1x128xf32>
    %74 = vector.shape_cast %73 : vector<1x1x128xf32> to vector<1x128xf32>
    %75 = vector.broadcast %74 : vector<1x128xf32> to vector<32x128xf32>
    %76 = arith.mulf %72, %75 : vector<32x128xf32>
    %c0_33 = arith.constant 0 : index
    %c0_34 = arith.constant 0 : index
    %c0_35 = arith.constant 0 : index
    %77 = vector.load %arg14[%c0_33, %c0_34, %c0_35] : memref<1x1x128xf32, #tpu.memory_space<vmem>>, vector<1x1x128xf32>
    %78 = vector.shape_cast %77 : vector<1x1x128xf32> to vector<1x128xf32>
    %79 = vector.broadcast %78 : vector<1x128xf32> to vector<32x128xf32>
    %80 = arith.addf %76, %79 : vector<32x128xf32>
    %81 = arith.truncf %80 : vector<32x128xf32> to vector<32x128xbf16>
    %c0_36 = arith.constant 0 : index
    %c0_37 = arith.constant 0 : index
    %c0_38 = arith.constant 0 : index
    %82 = vector.load %arg9[%c0_36, %c0_37, %c0_38] : memref<1x128x256xbf16, #tpu.memory_space<vmem>>, vector<1x128x256xbf16>
    %83 = vector.shape_cast %82 : vector<1x128x256xbf16> to vector<128x256xbf16>
    %cst_39 = arith.constant dense<0.000000e+00> : vector<32x256xf32>
    %84 = tpu.matmul %81, %83, %cst_39 {dimension_numbers = #tpu.dot_dimension_numbers<[1], [0], [0], [1], [0, 0, 1, 1], [], []>} : vector<32x128xbf16>, vector<128x256xbf16>, vector<32x256xf32> -> vector<32x256xf32>
    %c0_40 = arith.constant 0 : index
    %c0_41 = arith.constant 0 : index
    %c0_42 = arith.constant 0 : index
    %85 = vector.load %arg10[%c0_40, %c0_41, %c0_42] : memref<1x1x256xf32, #tpu.memory_space<vmem>>, vector<1x1x256xf32>
    %86 = vector.shape_cast %85 : vector<1x1x256xf32> to vector<1x256xf32>
    %87 = vector.broadcast %86 : vector<1x256xf32> to vector<32x256xf32>
    %88 = arith.addf %84, %87 : vector<32x256xf32>
    %cst_43 = arith.constant 0.000000e+00 : f32
    %89 = vector.broadcast %cst_43 : f32 to vector<32x256xf32>
    %90 = arith.maximumf %88, %89 : vector<32x256xf32>
    %91 = arith.truncf %90 : vector<32x256xf32> to vector<32x256xbf16>
    %c0_44 = arith.constant 0 : index
    %c0_45 = arith.constant 0 : index
    %c0_46 = arith.constant 0 : index
    %92 = vector.load %arg11[%c0_44, %c0_45, %c0_46] : memref<1x256x128xbf16, #tpu.memory_space<vmem>>, vector<1x256x128xbf16>
    %93 = vector.shape_cast %92 : vector<1x256x128xbf16> to vector<256x128xbf16>
    %cst_47 = arith.constant dense<0.000000e+00> : vector<32x128xf32>
    %94 = tpu.matmul %91, %93, %cst_47 {dimension_numbers = #tpu.dot_dimension_numbers<[1], [0], [0], [1], [0, 0, 1, 1], [], []>} : vector<32x256xbf16>, vector<256x128xbf16>, vector<32x128xf32> -> vector<32x128xf32>
    %c0_48 = arith.constant 0 : index
    %c0_49 = arith.constant 0 : index
    %c0_50 = arith.constant 0 : index
    %95 = vector.load %arg12[%c0_48, %c0_49, %c0_50] : memref<1x1x128xf32, #tpu.memory_space<vmem>>, vector<1x1x128xf32>
    %96 = vector.shape_cast %95 : vector<1x1x128xf32> to vector<1x128xf32>
    %97 = vector.broadcast %96 : vector<1x128xf32> to vector<32x128xf32>
    %98 = arith.addf %94, %97 : vector<32x128xf32>
    %99 = arith.addf %80, %98 : vector<32x128xf32>
    %cst_51 = arith.constant dense<0.000000e+00> : vector<32xf32>
    %100 = vector.multi_reduction <add>, %99, %cst_51 [1] : vector<32x128xf32> to vector<32xf32>
    %101 = vector.shape_cast %100 : vector<32xf32> to vector<32x1xf32>
    %cst_52 = arith.constant 1.280000e+02 : f32
    %102 = vector.broadcast %cst_52 : f32 to vector<32x1xf32>
    %103 = arith.divf %101, %102 : vector<32x1xf32>
    %104 = vector.broadcast %103 : vector<32x1xf32> to vector<32x128xf32>
    %105 = arith.subf %99, %104 : vector<32x128xf32>
    %106 = arith.mulf %105, %105 : vector<32x128xf32>
    %cst_53 = arith.constant dense<0.000000e+00> : vector<32xf32>
    %107 = vector.multi_reduction <add>, %106, %cst_53 [1] : vector<32x128xf32> to vector<32xf32>
    %108 = vector.shape_cast %107 : vector<32xf32> to vector<32x1xf32>
    %cst_54 = arith.constant 1.280000e+02 : f32
    %109 = vector.broadcast %cst_54 : f32 to vector<32x1xf32>
    %110 = arith.divf %108, %109 : vector<32x1xf32>
    %111 = vector.broadcast %103 : vector<32x1xf32> to vector<32x128xf32>
    %112 = arith.subf %99, %111 : vector<32x128xf32>
    %cst_55 = arith.constant 9.99999974E-6 : f32
    %113 = vector.broadcast %cst_55 : f32 to vector<32x1xf32>
    %114 = arith.addf %110, %113 : vector<32x1xf32>
    %115 = math.rsqrt %114 : vector<32x1xf32>
    %116 = vector.broadcast %115 : vector<32x1xf32> to vector<32x128xf32>
    %117 = arith.mulf %112, %116 : vector<32x128xf32>
    %c0_56 = arith.constant 0 : index
    %c0_57 = arith.constant 0 : index
    %c0_58 = arith.constant 0 : index
    %118 = vector.load %arg15[%c0_56, %c0_57, %c0_58] : memref<1x1x128xf32, #tpu.memory_space<vmem>>, vector<1x1x128xf32>
    %119 = vector.shape_cast %118 : vector<1x1x128xf32> to vector<1x128xf32>
    %120 = vector.broadcast %119 : vector<1x128xf32> to vector<32x128xf32>
    %121 = arith.mulf %117, %120 : vector<32x128xf32>
    %c0_59 = arith.constant 0 : index
    %c0_60 = arith.constant 0 : index
    %c0_61 = arith.constant 0 : index
    %122 = vector.load %arg16[%c0_59, %c0_60, %c0_61] : memref<1x1x128xf32, #tpu.memory_space<vmem>>, vector<1x1x128xf32>
    %123 = vector.shape_cast %122 : vector<1x1x128xf32> to vector<1x128xf32>
    %124 = vector.broadcast %123 : vector<1x128xf32> to vector<32x128xf32>
    %125 = arith.addf %121, %124 : vector<32x128xf32>
    %c0_62 = arith.constant 0 : index
    %c0_63 = arith.constant 0 : index
    %126 = vector.load %arg18[%c0_62, %c0_63] : memref<32x128xf32, #tpu.memory_space<vmem>>, vector<32x128xf32>
    tpu.vector_store %arg18[%c0_62, %c0_63], %125 {strides = array<i32>} : memref<32x128xf32, #tpu.memory_space<vmem>>, vector<32x128xf32>,
    %c1_i32 = arith.constant 1 : i32
    %127 = arith.cmpi eq, %arg1, %c1_i32 : i32
    %128 = arith.extui %127 : i1 to i32
    %c0_i32_64 = arith.constant 0 : i32
    %129 = arith.cmpi ne, %128, %c0_i32_64 : i32
    scf.if %129 {
      %c0_65 = arith.constant 0 : index
      %c0_66 = arith.constant 0 : index
      %c0_67 = arith.constant 0 : index
      %130 = vector.load %arg17[%c0_65, %c0_66, %c0_67] : memref<1x32x128xf32, #tpu.memory_space<vmem>>, vector<1x32x128xf32>
      %131 = vector.shape_cast %130 : vector<1x32x128xf32> to vector<32x128xf32>
      %132 = vector.shape_cast %125 : vector<32x128xf32> to vector<1x32x128xf32>
      tpu.vector_store %arg17[%c0_65, %c0_66, %c0_67], %132 {strides = array<i32>} : memref<1x32x128xf32, #tpu.memory_space<vmem>>, vector<1x32x128xf32>,
    } else {
    }
    return
  }
  func.func @transform_0(%arg0: i32, %arg1: i32) -> (i32, i32, i32) {
    %c0_i32 = arith.constant 0 : i32
    %c0_i32_0 = arith.constant 0 : i32
    %c0_i32_1 = arith.constant 0 : i32
    return %arg0, %c0_i32, %c0_i32_0 : i32, i32, i32
  }
  func.func @transform_1(%arg0: i32, %arg1: i32) -> (i32, i32) {
    %c0_i32 = arith.constant 0 : i32
    %c0_i32_0 = arith.constant 0 : i32
    %c0_i32_1 = arith.constant 0 : i32
    return %c0_i32, %c0_i32_0 : i32, i32
  }
  func.func @transform_2(%arg0: i32, %arg1: i32) -> (i32, i32, i32) {
    %c0_i32 = arith.constant 0 : i32
    %c0_i32_0 = arith.constant 0 : i32
    %c0_i32_1 = arith.constant 0 : i32
    return %arg0, %c0_i32, %c0_i32_0 : i32, i32, i32
  }
  func.func @transform_3(%arg0: i32, %arg1: i32) -> (i32, i32, i32) {
    %c0_i32 = arith.constant 0 : i32
    %c0_i32_0 = arith.constant 0 : i32
    %c0_i32_1 = arith.constant 0 : i32
    return %arg1, %c0_i32, %c0_i32_0 : i32, i32, i32
  }
  func.func @transform_4(%arg0: i32, %arg1: i32) -> (i32, i32, i32) {
    %c0_i32 = arith.constant 0 : i32
    %c0_i32_0 = arith.constant 0 : i32
    %c0_i32_1 = arith.constant 0 : i32
    return %arg1, %c0_i32, %c0_i32_0 : i32, i32, i32
  }
  func.func @transform_5(%arg0: i32, %arg1: i32) -> (i32, i32, i32) {
    %c0_i32 = arith.constant 0 : i32
    %c0_i32_0 = arith.constant 0 : i32
    %c0_i32_1 = arith.constant 0 : i32
    return %arg1, %c0_i32, %c0_i32_0 : i32, i32, i32
  }
  func.func @transform_6(%arg0: i32, %arg1: i32) -> (i32, i32, i32) {
    %c0_i32 = arith.constant 0 : i32
    %c0_i32_0 = arith.constant 0 : i32
    %c0_i32_1 = arith.constant 0 : i32
    return %arg1, %c0_i32, %c0_i32_0 : i32, i32, i32
  }
  func.func @transform_7(%arg0: i32, %arg1: i32) -> (i32, i32, i32) {
    %c0_i32 = arith.constant 0 : i32
    %c0_i32_0 = arith.constant 0 : i32
    %c0_i32_1 = arith.constant 0 : i32
    return %arg1, %c0_i32, %c0_i32_0 : i32, i32, i32
  }
  func.func @transform_8(%arg0: i32, %arg1: i32) -> (i32, i32, i32) {
    %c0_i32 = arith.constant 0 : i32
    %c0_i32_0 = arith.constant 0 : i32
    %c0_i32_1 = arith.constant 0 : i32
    return %arg1, %c0_i32, %c0_i32_0 : i32, i32, i32
  }
  func.func @transform_9(%arg0: i32, %arg1: i32) -> (i32, i32, i32) {
    %c0_i32 = arith.constant 0 : i32
    %c0_i32_0 = arith.constant 0 : i32
    %c0_i32_1 = arith.constant 0 : i32
    return %arg1, %c0_i32, %c0_i32_0 : i32, i32, i32
  }
  func.func @transform_10(%arg0: i32, %arg1: i32) -> (i32, i32, i32) {
    %c0_i32 = arith.constant 0 : i32
    %c0_i32_0 = arith.constant 0 : i32
    %c0_i32_1 = arith.constant 0 : i32
    return %arg1, %c0_i32, %c0_i32_0 : i32, i32, i32
  }
  func.func @transform_11(%arg0: i32, %arg1: i32) -> (i32, i32, i32) {
    %c0_i32 = arith.constant 0 : i32
    %c0_i32_0 = arith.constant 0 : i32
    %c0_i32_1 = arith.constant 0 : i32
    return %arg1, %c0_i32, %c0_i32_0 : i32, i32, i32
  }
  func.func @transform_12(%arg0: i32, %arg1: i32) -> (i32, i32, i32) {
    %c0_i32 = arith.constant 0 : i32
    %c0_i32_0 = arith.constant 0 : i32
    %c0_i32_1 = arith.constant 0 : i32
    return %arg1, %c0_i32, %c0_i32_0 : i32, i32, i32
  }
  func.func @transform_13(%arg0: i32, %arg1: i32) -> (i32, i32, i32) {
    %c0_i32 = arith.constant 0 : i32
    %c0_i32_0 = arith.constant 0 : i32
    %c0_i32_1 = arith.constant 0 : i32
    return %arg1, %c0_i32, %c0_i32_0 : i32, i32, i32
  }
  func.func @transform_14(%arg0: i32, %arg1: i32) -> (i32, i32, i32) {
    %c0_i32 = arith.constant 0 : i32
    %c0_i32_0 = arith.constant 0 : i32
    %c0_i32_1 = arith.constant 0 : i32
    return %arg1, %c0_i32, %c0_i32_0 : i32, i32, i32
  }
  func.func @transform_15(%arg0: i32, %arg1: i32) -> (i32, i32, i32) {
    %c0_i32 = arith.constant 0 : i32
    %c0_i32_0 = arith.constant 0 : i32
    %c0_i32_1 = arith.constant 0 : i32
    return %arg0, %c0_i32, %c0_i32_0 : i32, i32, i32
  }
}

</mosaic_0001>

<bundles_post_ra>
// kernel: tpu_custom_call.1
= control target key start
LH: loop header
LB: loop body
LE: loop exit
PB: predicated region body
PF: predicated region fallthrough
CT: control target
= control target key end

     0   :  { %s14966_s0 = inlined_call_operand.hbm [shape: f32[2,32,128], index: 0, kind: input, shape index: {}]   ;;  %s14967_s1 = inlined_call_operand.hbm [shape: f32[32,32], index: 1, kind: input, shape index: {}]   ;;  %s14968_s2 = inlined_call_operand.hbm [shape: f32[2,1,32], index: 2, kind: input, shape index: {}]   ;;  %s14969_s3 = inlined_call_operand.hbm [shape: bf16[2,128,384], index: 3, kind: input, shape index: {}]   ;;  %s14970_s4 = inlined_call_operand.hbm [shape: f32[2,1,384], index: 4, kind: input, shape index: {}]   ;;  %s14971_s5 = inlined_call_operand.hbm [shape: bf16[2,128,128], index: 5, kind: input, shape index: {}]   ;;  %s14972_s6 = inlined_call_operand.vmem [shape: f32[2,1,128], index: 6, kind: input, shape index: {}]   ;;  %s14973_s7 = inlined_call_operand.hbm [shape: bf16[2,128,256], index: 7, kind: input, shape index: {}]   ;;  %s14974_s8 = inlined_call_operand.vmem [shape: f32[2,1,256], index: 8, kind: input, shape index: {}]   ;;  %s14975_s9 = inlined_call_operand.hbm [shape: bf16[2,256,128], index: 9, kind: input, shape index: {}]   ;;  %s14976_s10 = inlined_call_operand.vmem [shape: f32[2,1,128], index: 10, kind: input, shape index: {}]   ;;  %s14977_s11 = inlined_call_operand.vmem [shape: f32[2,1,128], index: 11, kind: input, shape index: {}]   ;;  %s14978_s12 = inlined_call_operand.hbm [shape: f32[2,1,128], index: 12, kind: input, shape index: {}]   ;;  %s14979_s13 = inlined_call_operand.vmem [shape: f32[2,1,128], index: 13, kind: input, shape index: {}]   ;;  %s14980_s14 = inlined_call_operand.hbm [shape: f32[2,1,128], index: 14, kind: input, shape index: {}]   ;;  %s14981_s15 = inlined_call_operand.hbm [shape: f32[2,32,128], index: 15, kind: output, shape index: {}]  }
   0x1   :  { %15100 = sst [smem:[#allocation95_spill]] %s14966_s0 }
   0x2   :  { %15101 = sst [smem:[#allocation96_spill]] %s14967_s1 }
   0x3   :  { %15102 = sst [smem:[#allocation97_spill]] %s14968_s2 }
   0x4   :  { %15103 = sst [smem:[#allocation98_spill]] %s14969_s3 }
   0x5   :  { %15104 = sst [smem:[#allocation99_spill]] %s14970_s4 }
   0x6   :  { %15105 = sst [smem:[#allocation100_spill]] %s14971_s5 }
   0x7   :  { %15106 = sst [smem:[#allocation101_spill]] %s14972_s6 }
   0x8   :  { %15107 = sst [smem:[#allocation102_spill]] %s14973_s7 }
   0x9   :  { %15108 = sst [smem:[#allocation103_spill]] %s14974_s8 }
   0xa   :  { %15109 = sst [smem:[#allocation104_spill]] %s14975_s9 }
   0xb   :  { %15110 = sst [smem:[#allocation105_spill]] %s14976_s10 }
   0xc   :  { %15111 = sst [smem:[#allocation106_spill]] %s14977_s11 }
   0xd   :  { %15112 = sst [smem:[#allocation107_spill]] %s14978_s12 }
   0xe   :  { %15113 = sst [smem:[#allocation108_spill]] %s14979_s13 }
   0xf   :  { %15114 = sst [smem:[#allocation109_spill]] %s14980_s14 }
  0x10   :  { %15115 = sst [smem:[#allocation110_spill]] %s14981_s15 }
  0x11   :  { %20 = vsyncpa [#allocation4], 0 }
  0x12   :  { %22 = vsyncpa [#allocation4 + $0x1], 0 }
  0x13   :  { %23 = vsyncpa [#allocation7], 0 }
  0x14   :  { %24 = vsyncpa [#allocation5], 0 }
  0x15   :  { %26 = vsyncpa [#allocation5 + $0x1], 0  ;;  %s10679_s18 = smov 0   ;;  %s10681_s19 = smov 0  }
  0x16   :  { %s10683_s20 = smov 0   ;;  %s10685_s21 = smov 0  }
  0x17   :  { %s10687_s22 = smov 0   ;;  %s10689_s23 = smov 0  }
  0x18   :  { %s10691_s24 = smov 0   ;;  %s10693_s25 = smov 0  }
  0x19   :  { %s10695_s26 = smov 0   ;;  %s10697_s27 = smov 0  }
  0x1a   :  { %s10699_s28 = smov 0  }
  0x1b LB: > { %15116 = sst [smem:[#allocation22_spill]] %s10546_s19  ;;  %s9041_s29 = sadd.s32 4294967294, %s10582_s28   ;;  %s10582_s28 = sphi %s10699_s28, %s32_s28   ;;  %s10578_s27 = sphi %s10697_s27, %s15469_s27   ;;  %s10574_s26 = sphi %s10695_s26, %s15468_s26   ;;  %s10570_s25 = sphi %s10693_s25, %s15467_s25   ;;  %s10566_s24 = sphi %s10691_s24, %s15466_s24   ;;  %s10562_s23 = sphi %s10689_s23, %s15465_s23   ;;  %s10558_s22 = sphi %s10687_s22, %s15464_s22   ;;  %s10554_s21 = sphi %s10685_s21, %s15463_s21   ;;  %s10550_s20 = sphi %s10683_s20, %s15462_s20   ;;  %s10546_s19 = sphi %s10681_s19, %s15461_s19   ;;  %s10542_s18 = sphi %s10679_s18, %s15460_s18  }
  0x1c   : > { %15117 = sst [smem:[#allocation23_spill]] %s10550_s20  ;;  %s41_s30 = sadd.s32 1, %s10574_s26 }
  0x1d   : > { %15118 = sst [smem:[#allocation24_spill]] %s10554_s21  ;;  %p42_p0 = scmp.ge.s32.totalorder %s41_s30, 2 }
  0x1e   : > { %15119 = sst [smem:[#allocation25_spill]] %s10558_s22  ;;  %s44_s16 = sadd.s32 1, %s10578_s27 }
  0x1f   : > { %15120 = sst [smem:[#allocation26_spill]] %s10562_s23  ;;  %s51_s17 = sadd.s32 1, %s10562_s23 }
  0x20   : > { %15121 = sst [smem:[#allocation27_spill]] %s10566_s24  ;;  %p58_p1 = scmp.ne.s32.totalorder %s10562_s23, %s10558_s22 }
  0x21   : > { %15122 = sst [smem:[#allocation28_spill]] %s10570_s25  ;;  %s15471_s30 = smov (%p42_p0, %s41_s30), 0 }
  0x22   : > { %15123 = sst [smem:[#allocation29_spill]] %s10574_s26  ;;  %s15473_s16 = smov (!%p42_p0, %s44_s16), %s10578_s27 }
  0x23   : > { %15124 = sst [smem:[#allocation30_spill]] %s10578_s27  ;;  %p59_p2 = scmp.eq.s32.totalorder %s10582_s28, 0 }
  0x24   : > { %15125 = sst [smem:[#allocation31_spill]] %s15471_s30  ;;  %p64_p3 = scmp.ne.s32.totalorder %s10558_s22, %s10554_s21 }
  0x25   : > { %p46_p4 = scmp.ge.s32.totalorder %s15473_s16, 2  ;;  %s121_s15 = ssub.s32 %s10574_s26, %s15471_s30 }
  0x26   : > { %p10751_p5 = por %p59_p2, %p58_p1  ;;  %p122_p6 = scmp.eq.s32.totalorder %s121_s15, 0 }
  0x27   : > { %s15475_s16 = smov (%p46_p4, %s15473_s16), 0  ;;  %s124_s13 = sadd.s32 1, %s10550_s20 }
  0x28   : > { %15127 = sst [smem:[#allocation32_spill]] %s15475_s16  ;;  %p131_p7 = scmp.ne.s32.totalorder %s10550_s20, %s10546_s19 }
  0x29   : > { %s48_s11 = ssub.s32 %s10578_s27, %s15475_s16  ;;  %p453_p8 = scmp.eq.s32.totalorder %s9041_s29, 3 }
  0x2a   : > { %p49_p9 = scmp.eq.s32.totalorder %s48_s11, 0  ;;  %p10762_p10 = por %p131_p7, %p59_p2 }
  0x2b   : > { %s10767_s30 = scalar_select %p122_p6, %s10550_s20, %s124_s13  }
  0x2c   : > { %s10770_s8 = scalar_select %p49_p9, %s10562_s23, %s51_s17  }
  0x2d   : > { %15129 = sst [smem:[#allocation33_spill]] %s10767_s30  ;;  %p10775_p11 = por %p453_p8, %p64_p3 }
  0x2e   : > { %15130 = sst [smem:[#allocation34_spill]] %s10770_s8  ;;  %p9483_p12 = scmp.lt.s32.totalorder %s10582_s28, 4 }
  0x2f   : > { %s15131_s15 = scalar_select %p10775_p11, 1, 0 }
  0x30   : > { %s487_s16 = sand.u32 1, %s10582_s28   ;;  %s489_s29 = sand.u32 1, %s10562_s23  }
  0x31   : > { %15132 = sst [smem:[#allocation35_spill]] %s15131_s15  ;;  %s9045_s11 = sshll.u32 %s489_s29, 5 }
  0x32   : > { %s9345_s6 = sshll.u32 %s10578_s27, 5  ;;  %s15133_s0 = sld [smem:[#allocation95_spill]] }
  0x33   : > { %s491_s13 = scalar_lea.vmem [#allocation3], %s9045_s11  ;;  %p9451_p13 = pnand %p9483_p12, %p10751_p5 }
  0x34   : > { %s499_s30 = sshll.u32 %s491_s13, 4  ;;  %p10790_p0 = pnand %p9483_p12, %p10762_p10  ;;  %s500_s30 = int_to_ptr.vmem [resolvable:$true] %s499_s30 }
  0x35   : > { %s15135_s2 = sld [smem:[#allocation97_spill]]  ;;  %s10798_s14 = scalar_lea.sflag [#allocation4], %s487_s16 }
  0x36   : > { %s512_s10 = scalar_lea.vmem [#allocation8], %s489_s29  ;;  %s10806_s8 = sand.u32 1, %s10550_s20  }
  0x37   : > { %s519_s25 = sshll.u32 %s512_s10, 4  ;;  %s9417_s16 = smul.u32 192, %s10574_s26  ;;  %s520_s25 = int_to_ptr.vmem [resolvable:$true] %s519_s25 }
  0x38   : > { %s496_s1 = scalar_lea.hbm %s15133_s0, %s9345_s6  ;;  %s14990_s6 = smov 8  }
  0x39   : > { %s497_s12 = sshll.u32 %s496_s1, 4  ;;  %s14988_s1 = smov 128   ;;  %s498_s12 = int_to_ptr.hbm [resolvable:$true] %s497_s12 }
  0x3a   : > { %9453 = dma.hbm_to_vmem [thread:$0]  (!%p9451_p13), %s498_s12, 512, %s500_s30, %s10798_s14, %s14988_s1, %s14988_s1, %s14990_s6  }
  0x3b   : > { %s515_s23 = scalar_lea.hbm %s15135_s2, %s10578_s27  ;;  %s9416_s15 = smul.u32 192, %s10806_s8 }
  0x3c   : > { %s517_s24 = sshll.u32 %s515_s23, 4  ;;  %s15136_s3 = sld [smem:[#allocation98_spill]]  ;;  %s518_s24 = int_to_ptr.hbm [resolvable:$true] %s517_s24 }
  0x3d   : > { %9456 = dma.hbm_to_vmem [thread:$0]  (!%p9451_p13), %s518_s24, 16, %s520_s25, %s10798_s14  }
  0x3e   : > { %s530_s30 = scalar_lea.vmem [#allocation9], %s9416_s15  ;;  %s9418_s24 = smul.u32 3, %s10806_s8 }
  0x3f   : > { %s538_s29 = sshll.u32 %s530_s30, 4  ;;  %s10586_s10 = smov 192   ;;  %s539_s29 = int_to_ptr.vmem [resolvable:$true] %s538_s29 }
  0x40   : > { %s10587_s25 = smov 12   ;;  %s9419_s1 = smul.u32 3, %s10574_s26 }
  0x41   : > { %s552_s6 = scalar_lea.vmem [#allocation10], %s9418_s24  ;;  %s9049_s2 = sshll.u32 %s10806_s8, 6 }
  0x42   : > { %s535_s12 = scalar_lea.hbm %s15136_s3, %s9417_s16  ;;  %s560_s0 = sshll.u32 %s552_s6, 4  ;;  %s561_s0 = int_to_ptr.vmem [resolvable:$true] %s560_s0 }
  0x43   : > { %s536_s23 = sshll.u32 %s535_s12, 4  ;;  %s15137_s4 = sld [smem:[#allocation99_spill]]  ;;  %s537_s23 = int_to_ptr.hbm [resolvable:$true] %s536_s23 }
  0x44   : > { %9459 = dma.hbm_to_vmem [thread:$0]  (!%p10790_p0), %s537_s23, 3072, %s539_s29, %s10798_s14, %s10586_s10, %s10586_s10, %s10587_s25  }
  0x45   : > { %s9346_s12 = sshll.u32 %s10574_s26, 6  ;;  %s15138_s5 = sld [smem:[#allocation100_spill]] }
  0x46   : > { %s571_s24 = scalar_lea.vmem [#allocation11], %s9049_s2  ;;  %s9052_s25 = sshll.u32 %s10806_s8, 7 }
  0x47   : > { %s579_s6 = sshll.u32 %s571_s24, 4  ;;  %s10589_s11 = smov 4   ;;  %s580_s6 = int_to_ptr.vmem [resolvable:$true] %s579_s6 }
  0x48   : > { %s15139_s7 = sld [smem:[#allocation102_spill]]  ;;  %s15140_s23 = smov 8  }
  0x49   : > { %s556_s15 = scalar_lea.hbm %s15137_s4, %s9419_s1  ;;  %s10588_s1 = smov 64  }
  0x4a   : > { %s558_s13 = sshll.u32 %s556_s15, 4  ;;  %s15142_s9 = sld [smem:[#allocation104_spill]]  ;;  %s559_s13 = int_to_ptr.hbm [resolvable:$true] %s558_s13 }
  0x4b   : > { %9462 = dma.hbm_to_vmem [thread:$0]  (!%p10790_p0), %s559_s13, 48, %s561_s0, %s10798_s14  }
  0x4c   : > { %s576_s29 = scalar_lea.hbm %s15138_s5, %s9346_s12  ;;  %s9347_s0 = sshll.u32 %s10574_s26, 7 }
  0x4d   : > { %s577_s10 = sshll.u32 %s576_s29, 4  ;;  %s599_s13 = scalar_lea.vmem [#allocation12], %s9052_s25  ;;  %s578_s10 = int_to_ptr.hbm [resolvable:$true] %s577_s10 }
  0x4e   : > { %9465 = dma.hbm_to_vmem [thread:$0]  (!%p10790_p0), %s578_s10, 1024, %s580_s6, %s10798_s14, %s10588_s1, %s10588_s1, %s10589_s11  }
  0x4f   : > { %s604_s2 = scalar_lea.hbm %s15139_s7, %s9347_s0  ;;  %s607_s12 = sshll.u32 %s599_s13, 4  ;;  %s608_s12 = int_to_ptr.vmem [resolvable:$true] %s607_s12 }
  0x50   : > { %s605_s30 = sshll.u32 %s604_s2, 4  ;;  %s15141_s29 = smov 128   ;;  %s606_s30 = int_to_ptr.hbm [resolvable:$true] %s605_s30 }
  0x51   : > { %9468 = dma.hbm_to_vmem [thread:$0]  (!%p10790_p0), %s606_s30, 2048, %s608_s12, %s10798_s14, %s15141_s29, %s15141_s29, %s15140_s23  }
  0x52   : > { %s633_s10 = scalar_lea.hbm %s15142_s9, %s9347_s0  ;;  %s628_s16 = scalar_lea.vmem [#allocation13], %s9052_s25 }
  0x53   : > { %s636_s15 = sshll.u32 %s628_s16, 4  ;;  %s634_s2 = sshll.u32 %s633_s10, 4  ;;  %s637_s15 = int_to_ptr.vmem [resolvable:$true] %s636_s15  ;;  %s635_s2 = int_to_ptr.hbm [resolvable:$true] %s634_s2 }
  0x54   : > { %9471 = dma.hbm_to_vmem [thread:$0]  (!%p10790_p0), %s635_s2, 2048, %s637_s15, %s10798_s14, %s10588_s1, %s10588_s1, %s10589_s11  }
  0x55   : > { %s15144_s30 = sld [smem:[#allocation107_spill]]  ;;  %s661_s0 = scalar_lea.vmem [#allocation14], %s10806_s8 }
  0x56   : > { %s668_s6 = sshll.u32 %s661_s0, 4  ;;  %s10858_s25 = sadd.s32 4294967295, %s10582_s28   ;;  %s669_s6 = int_to_ptr.vmem [resolvable:$true] %s668_s6 }
  0x57   : > { %p65_p2 = scmp.eq.s32.totalorder %s10858_s25, 0  ;;  %p137_p4 = scmp.ne.s32.totalorder %s10546_s19, %s10542_s18 }
  0x58   : > { %p447_p5 = scmp.eq.s32.totalorder %s10858_s25, 3  ;;  %p9042_p6 = scmp.ge.s32.totalorder %s10582_s28, 1 }
  0x59   : > { %p10870_p7 = por %p65_p2, %p64_p3  ;;  %p10876_p8 = por %p137_p4, %p65_p2 }
  0x5a   : > { %p10883_p9 = por %p447_p5, %p58_p1  ;;  %p460_p10 = scmp.lt.s32.totalorder %s10582_s28, 5 }
  0x5b   : > { %s664_s24 = scalar_lea.hbm %s15144_s30, %s10574_s26  ;;  %s15148_s10 = sld [smem:[#allocation96_spill]] }
  0x5c   : > { %s666_s4 = sshll.u32 %s664_s24, 4  ;;  %p10891_p3 = pnand %p9042_p6, %p460_p10  ;;  %s667_s4 = int_to_ptr.hbm [resolvable:$true] %s666_s4 }
  0x5d   : > { %9474 = dma.hbm_to_vmem [thread:$0]  (!%p10790_p0), %s667_s4, 16, %s669_s6, %s10798_s14  }
  0x5e   : > { %p9446_p12 = pneg %p10891_p3  ;;  %s10590_s2 = smov [#allocation6]  }
  0x5f   : > { %s473_s13 = sshll.u32 %s10590_s2, 4  ;;  %s15150_s24 = sld [smem:[#allocation109_spill]]  ;;  %s474_s13 = int_to_ptr.vmem [resolvable:$true] %s473_s13 }
  0x60   : > { %p9447_p1 = pnand %p9446_p12, %p65_p2  ;;  %s684_s18 = scalar_lea.vmem [#allocation15], %s10806_s8 }
  0x61   : > { %s471_s16 = sshll.u32 %s15148_s10, 4  ;;  %s691_s11 = sshll.u32 %s684_s18, 4  ;;  %s472_s16 = int_to_ptr.hbm [resolvable:$true] %s471_s16  ;;  %s692_s11 = int_to_ptr.vmem [resolvable:$true] %s691_s11 }
  0x62   : > { %9449 = dma.hbm_to_vmem [thread:$0]  (!%p9447_p1), %s472_s16, 512, %s474_s13, [#allocation7], %s15141_s29, %s15141_s29, %s15140_s23  }
  0x63   : > { %700 = sbr.rel (%p10891_p3) target bundleno = 3658 (0xe4a), region = 80 }
  0x65   : > { %s687_s0 = scalar_lea.hbm %s15150_s24, %s10574_s26 }
  0x66   : > { %s689_s6 = sshll.u32 %s687_s0, 4  ;;  %s690_s6 = int_to_ptr.hbm [resolvable:$true] %s689_s6 }
  0x67   : > { %9477 = dma.hbm_to_vmem [thread:$0]  (!%p10790_p0), %s690_s6, 16, %s692_s11, %s10798_s14  }
  0x68   : > { %s702_s10 = sand.u32 1, %s10858_s25   ;;  %s10914_s2 = sand.u32 1, %s10558_s22  }
  0x69   : > { %s14992_s8 = sshll.u32 %s10914_s2, 5  ;;  %s703_s12 = scalar_lea.sflag [#allocation4], %s702_s10 }
  0x6a   : > { %s10919_s30 = scalar_lea.vmem [#allocation3], %s14992_s8 }
  0x6b   : > { %10521 = dma.done.wait (%p10870_p7), %s703_s12, 512  }
  0x6c   : > { %10523 = vsyncadd (%p10870_p7), %s703_s12, 4294966784 }
  0x6d   : > { %10525 = dma.done.wait (%p65_p2), [#allocation7], 512  }
  0x6e   : > { %10527 = vsyncadd (%p65_p2), [#allocation7], 4294966784 }
  0x6f   : > { %10529 = dma.done.wait (%p10870_p7), %s703_s12, 16  }
  0x70   : > { %10531 = vsyncadd (%p10870_p7), %s703_s12, 4294967280  ;;  %s10935_s14 = sand.u32 1, %s10546_s19  }
  0x71   : > { %s9420_s23 = smul.u32 192, %s10935_s14 }
  0x73   : > { %s10938_s29 = scalar_lea.vmem [#allocation9], %s9420_s23 }
  0x74   : > { %10533 = dma.done.wait (%p10876_p8), %s703_s12, 8272  }
  0x75   : > { %10535 = vsyncadd (%p10876_p8), %s703_s12, 4294959024  ;;  %s15151_s25 = sld [smem:[#allocation27_spill]]  ;;  %s9421_s3 = smul.u32 3, %s10935_s14 }
  0x76   : > { %s9061_s16 = sshll.u32 %s10935_s14, 6  ;;  %s9062_s15 = sshll.u32 %s10935_s14, 7 }
  0x77   : > { %s15153_s12 = sld [smem:[#allocation103_spill]]  ;;  %s10973_s21 = scalar_lea.vmem [#allocation10], %s9421_s3 }
  0x78   : > { %s15154_s5 = sld [smem:[#allocation105_spill]]  ;;  %s10975_s6 = scalar_lea.vmem [#allocation11], %s9061_s16 }
  0x79   : > { %s15155_s26 = sld [smem:[#allocation106_spill]]  ;;  %s10977_s4 = scalar_lea.vmem [#allocation12], %s9062_s15 }
  0x7a   : > { %s15156_s20 = sld [smem:[#allocation108_spill]]  ;;  %s779_s11 = scalar_lea.vmem [#allocation14], %s10935_s14 }
  0x7b   : > { %p889_p13 = scmp.lt.s32.totalorder %s15151_s25, 1  ;;  %s788_s10 = scalar_lea.vmem [#allocation15], %s10935_s14 }
  0x7c   : > { %s15157_s8 = sshll.u32 %s10914_s2, 5  ;;  %p9066_p0 = scmp.ne.s32.totalorder %s15151_s25, 0 }
  0x7d   : > { %s10949_s13 = scalar_select %p889_p13, %s15151_s25, 1 }
  0x7e   : > { %909 = sbr.rel (%p9066_p0) target bundleno = 136 (0x88), region = 124 }
  0x7f   : > { %s9065_s18 = sshll.u32 %s10949_s13, 1  ;;  %s898_s7 = scalar_lea.vmem %s15154_s5, %s10949_s13 }
  0x80   : > { %s10959_s23 = scalar_lea.vmem %s15153_s12, %s9065_s18  ;;  %s901_s22 = scalar_lea.vmem %s15155_s26, %s10949_s13 }
  0x81   : > { %s904_s19 = scalar_lea.vmem %s15156_s20, %s10949_s13  ;;  %s10979_s18 = scalar_lea.vmem [#allocation13], %s9062_s15 }
  0x82   : > { %s10985_s5 = scalar_lea.vmem [#allocation16], %s15157_s8 }
  0x83   : > { %v910_v0 = vld [vmem:[%s10919_s30] sm:$0xff]  ;;  %v911_v1 = vld [vmem:[%s10919_s30 + $0x8] sm:$0xff]  ;;  %v912_v2 = vld [vmem:[%s10919_s30 + $0x10] sm:$0xff] }
  0x84   : > { %914 = vst [vmem:[#allocation2 + $0x10] sm:$0xff] %v910_v0  ;;  %v913_v3 = vld [vmem:[%s10919_s30 + $0x18] sm:$0xff] }
  0x85   : > { %915 = vst [vmem:[#allocation2] sm:$0xff] %v911_v1 }
  0x86   : > { %916 = vst [vmem:[#allocation2 + $0x18] sm:$0xff] %v912_v2 }
  0x87   : > { %917 = vst [vmem:[#allocation2 + $0x8] sm:$0xff] %v913_v3 }
  0x88 PF: > { %v9370_v4 = vld [vmem:[%s10938_s29 + $0xac] sm:$0xf]  ;;  %v9155_v5 = vld [vmem:[%s10938_s29 + $0xb4] sm:$0xf0]  ;;  %v9367_v6 = vld [vmem:[%s10938_s29 + $0x94] sm:$0xf] }
  0x89   : > { %v9158_v7 = vor.u32 %v9370_v4, %v9155_v5  ;;  %v9143_v8 = vld [vmem:[%s10938_s29 + $0x9c] sm:$0xf0]  ;;  %v9153_v9 = vld [vmem:[%s10938_s29 + $0xa8] sm:$0xf]  ;;  %v9371_v10 = vld [vmem:[%s10938_s29 + $0xb0] sm:$0xf0] }
  0x8a   : > { %v9154_v11 = vor.u32 %v9371_v10, %v9153_v9  ;;  %v9141_v12 = vld [vmem:[%s10938_s29 + $0x90] sm:$0xf]  ;;  %v9146_v13 = vor.u32 %v9367_v6, %v9143_v8  ;;  %v9368_v14 = vld [vmem:[%s10938_s29 + $0x98] sm:$0xf0]  ;;  %v9131_v18 = vld [vmem:[%s10938_s29 + $0x84] sm:$0xf0] }
  0x8b   : > { %1123 = vmatpush.bf16.msra.mxu1 %v9158_v7  ;;  %v9161_v15 = vld [vmem:[%s10938_s29 + $0xb0] sm:$0xf]  ;;  %v9372_v16 = vld [vmem:[%s10938_s29 + $0xb8] sm:$0xf0]  ;;  %v9142_v19 = vor.u32 %v9368_v14, %v9141_v12  ;;  %v9129_v21 = vld [vmem:[%s10938_s29 + $0x78] sm:$0xf] }
  0x8c   : > { %1104 = vmatpush.bf16.msra.mxu0 %v9154_v11  ;;  %v9364_v17 = vld [vmem:[%s10938_s29 + $0x7c] sm:$0xf]  ;;  %v9162_v20 = vor.u32 %v9372_v16, %v9161_v15  ;;  %v9365_v22 = vld [vmem:[%s10938_s29 + $0x80] sm:$0xf0]  ;;  %v9149_v23 = vld [vmem:[%s10938_s29 + $0x98] sm:$0xf] }
  0x8d   : > { %v9369_v24 = vld [vmem:[%s10938_s29 + $0xa0] sm:$0xf0]  ;;  %v9134_v26 = vor.u32 %v9364_v17, %v9131_v18  ;;  %v9137_v27 = vld [vmem:[%s10938_s29 + $0x80] sm:$0xf]  ;;  %v9366_v28 = vld [vmem:[%s10938_s29 + $0x88] sm:$0xf0]  ;;  %v9130_v31 = vor.u32 %v9365_v22, %v9129_v21 }
  0x8e   : > { %1142 = vmatpush.bf16.msra.mxu2 %v9162_v20  ;;  %v9150_v25 = vor.u32 %v9369_v24, %v9149_v23  ;;  %v9361_v29 = vld [vmem:[%s10938_s29 + $0x64] sm:$0xf]  ;;  %v9119_v30 = vld [vmem:[%s10938_s29 + $0x6c] sm:$0xf0]  ;;  %v9117_v32 = vld [vmem:[%s10938_s29 + $0x60] sm:$0xf]  ;;  %v9138_v34 = vor.u32 %v9366_v28, %v9137_v27 }
  0x8f   : > { %1124 = vmatpush.bf16.msra.mxu1 %v9146_v13  ;;  %v9362_v33 = vld [vmem:[%s10938_s29 + $0x68] sm:$0xf0]  ;;  %v9122_v35 = vor.u32 %v9361_v29, %v9119_v30  ;;  %v9125_v36 = vld [vmem:[%s10938_s29 + $0x68] sm:$0xf]  ;;  %v9363_v37 = vld [vmem:[%s10938_s29 + $0x70] sm:$0xf0] }
  0x90   : > { %1105 = vmatpush.bf16.msra.mxu0 %v9142_v19  ;;  %v9358_v38 = vld [vmem:[%s10938_s29 + $0x4c] sm:$0xf]  ;;  %v9107_v39 = vld [vmem:[%s10938_s29 + $0x54] sm:$0xf0]  ;;  %v9118_v40 = vor.u32 %v9362_v33, %v9117_v32  ;;  %v9105_v41 = vld [vmem:[%s10938_s29 + $0x48] sm:$0xf]  ;;  %v9126_v43 = vor.u32 %v9363_v37, %v9125_v36 }
  0x91   : > { %v9359_v42 = vld [vmem:[%s10938_s29 + $0x50] sm:$0xf0]  ;;  %v9110_v44 = vor.u32 %v9358_v38, %v9107_v39  ;;  %v9113_v46 = vld [vmem:[%s10938_s29 + $0x50] sm:$0xf]  ;;  %v9360_v47 = vld [vmem:[%s10938_s29 + $0x58] sm:$0xf0] }
  0x92   : > { %1143 = vmatpush.bf16.msra.mxu2 %v9150_v25  ;;  %v9355_v45 = vld [vmem:[%s10938_s29 + $0x34] sm:$0xf]  ;;  %v9095_v48 = vld [vmem:[%s10938_s29 + $0x3c] sm:$0xf0]  ;;  %v9106_v49 = vor.u32 %v9359_v42, %v9105_v41  ;;  %v9093_v50 = vld [vmem:[%s10938_s29 + $0x30] sm:$0xf]  ;;  %v9114_v53 = vor.u32 %v9360_v47, %v9113_v46 }
  0x93   : > { %1125 = vmatpush.bf16.msra.mxu1 %v9134_v26  ;;  %v9356_v51 = vld [vmem:[%s10938_s29 + $0x38] sm:$0xf0]  ;;  %v9101_v52 = vld [vmem:[%s10938_s29 + $0x38] sm:$0xf]  ;;  %v9098_v54 = vor.u32 %v9355_v45, %v9095_v48  ;;  %v9357_v55 = vld [vmem:[%s10938_s29 + $0x40] sm:$0xf0] }
  0x94   : > { %1106 = vmatpush.bf16.msra.mxu0 %v9130_v31  ;;  %v9352_v56 = vld [vmem:[%s10938_s29 + $0x1c] sm:$0xf]  ;;  %v9083_v57 = vld [vmem:[%s10938_s29 + $0x24] sm:$0xf0]  ;;  %v9094_v58 = vor.u32 %v9356_v51, %v9093_v50  ;;  %v9081_v59 = vld [vmem:[%s10938_s29 + $0x18] sm:$0xf]  ;;  %v9102_v61 = vor.u32 %v9357_v55, %v9101_v52 }
  0x95   : > { %v9353_v60 = vld [vmem:[%s10938_s29 + $0x20] sm:$0xf0]  ;;  %v9086_v62 = vor.u32 %v9352_v56, %v9083_v57  ;;  %v9089_v63 = vld [vmem:[%s10938_s29 + $0x20] sm:$0xf]  ;;  %v9354_v0 = vld [vmem:[%s10938_s29 + $0x28] sm:$0xf0] }
  0x96   : > { %1144 = vmatpush.bf16.msra.mxu2 %v9138_v34  ;;  %v9349_v1 = vld [vmem:[%s10938_s29 + $0x4] sm:$0xf]  ;;  %v9071_v2 = vld [vmem:[%s10938_s29 + $0xc] sm:$0xf0]  ;;  %v9082_v3 = vor.u32 %v9353_v60, %v9081_v59  ;;  %v9069_v4 = vld [vmem:[%s10938_s29] sm:$0xf]  ;;  %v9090_v7 = vor.u32 %v9354_v0, %v9089_v63 }
  0x97   : > { %1126 = vmatpush.bf16.msra.mxu1 %v9122_v35  ;;  %v9350_v5 = vld [vmem:[%s10938_s29 + $0x8] sm:$0xf0]  ;;  %v9074_v8 = vor.u32 %v9349_v1, %v9071_v2  ;;  %v919_v9 = vld [vmem:[#allocation2] sm:$0xff]  ;;  %v9077_v10 = vld [vmem:[%s10938_s29 + $0x8] sm:$0xf]  ;;  %s10591_s9 = smov 32  }
  0x98   : > { %1107 = vmatpush.bf16.msra.mxu0 %v9118_v40  ;;  %v918_v6 = vld [vmem:[#allocation2 + $0x10] sm:$0xff]  ;;  %v9070_v12 = vor.u32 %v9350_v5, %v9069_v4  ;;  %v920_v15 = vld [vmem:[#allocation2 + $0x18] sm:$0xff]  ;;  %v921_v16 = vld [vmem:[#allocation2 + $0x8] sm:$0xff]  ;;  %s10592_s20 = smov 64   ;;  %vm1206_vm0 = vcmask 1047556   ;;  %vm4637_vm1 = vcmask 261120  }
  0x99   : > { %v9351_v11 = vld [vmem:[%s10938_s29 + $0x10] sm:$0xf0]  ;;  %v934_v13 = vpack.c.bf16 %v919_v9, %v918_v6  ;;  %v935_v17 = vpack.c.bf16 %v921_v16, %v920_v15  ;;  %v968_v20 = vld [vmem:[%s10973_s21] sm:$0x7]  ;;  %s10593_s21 = smov 96   ;;  %s15303_s26 = scalar_lea.vmem [#allocation8], %s10914_s2 }
  0x9a   : > { %1145 = vmatpush.bf16.msra.mxu2 %v9126_v43  ;;  %v9078_v14 = vor.u32 %v9351_v11, %v9077_v10  ;;  %v971_v21 = vperm.slane %v968_v20, 1  ;;  %v970_v22 = vperm.slane %v968_v20, 0  ;;  %v972_v34 = vperm.slane %v968_v20, 2  ;;  %s15450_s17 = sld [smem:[#allocation101_spill]] }
  0x9b   : > { %1127 = vmatpush.bf16.msra.mxu1 %v9110_v44  ;;  %v10595_v6 = vmov 1934713408   ;;  %vm8092_vm2 = vcmask 523264   ;;  %vm8097_vm3 = vcmask 785408  }
  0x9c   : > { %1108 = vmatpush.bf16.msra.mxu0 %v9106_v49 }
  0x9e   : > { %1146 = vmatpush.bf16.msra.mxu2 %v9114_v53 }
  0x9f   : > { %1128 = vmatpush.bf16.msra.mxu1 %v9098_v54 }
  0xa0   : > { %1109 = vmatpush.bf16.msra.mxu0 %v9094_v58  ;;  %s15451_s29 = scalar_lea.vmem %s15450_s17, %s10949_s13 }
  0xa2   : > { %1147 = vmatpush.bf16.msra.mxu2 %v9102_v61  ;;  %v10594_v61 = vmov 1983009808  }
  0xa3   : > { %1129 = vmatpush.bf16.msra.mxu1 %v9086_v62  ;;  %v1211_v62 = vunpack.c.l.s4 %v10594_v61 }
  0xa4   : > { %1110 = vmatpush.bf16.msra.mxu0 %v9082_v3 }
  0xa5   : > { %v11107_v3 = vunpack.c.0.s8 %v1211_v62 }
  0xa6   : > { %1148 = vmatpush.bf16.msra.mxu2 %v9090_v7  ;;  %v1235_v7 = vunpack.c.l.s4 %v10595_v6 }
  0xa7   : > { %1130 = vmatpush.bf16.msra.mxu1 %v9074_v8  ;;  %15167 = vst [vmem:[#allocation45_spill] sm:$0xff] %v11107_v3 }
  0xa8   : > { %1111 = vmatpush.bf16.msra.mxu0 %v9070_v12 }
  0xaa   : > { %1131 = vmatmul.bf16.vlgmr.msra.gmra.mxu1 %v934_v13  ;;  %1149 = vmatpush.bf16.msra.mxu2 %v9078_v14 }
  0xab   : > { %1112 = vmatmul.bf16.vlgmr.msra.gmra.mxu0 %v934_v13 }
  0xad   : > { %1150 = vmatmul.bf16.vlgmr.msra.gmra.mxu2 %v934_v13  ;;  %v11119_v13 = vunpack.c.0.s8 %v1235_v7 }
  0xba   : > { %1136 = vmatmul.bf16.gmra.mxu1 %v935_v17 }
  0xbb   : > { %1117 = vmatmul.bf16.gmra.mxu0 %v935_v17 }
  0xbd   : > { %1155 = vmatmul.bf16.gmra.mxu2 %v935_v17 }
 0x127   : > { %v1132_v18 = vpop.f32.mrf.mxu1 }
 0x128   : > { %v1113_v19 = vpop.f32.mrf.mxu0  ;;  %v11041_v24 = vadd.f32 %v1132_v18, %v971_v21 }
 0x129   : > { %v1114_v25 = vadd.f32 %v1113_v19, %v970_v22 }
 0x12a   : > { %v1504_v8 = vrot.slane %v11041_v24, 4 }
 0x12b   : > { %v11047_v31 = vmul.f32 0.17677669, %v1114_v25 }
 0x12d   : > { %15158 = vst [vmem:[#allocation36_spill] sm:$0xff] %v11047_v31 }
 0x12f   : > { %v1134_v23 = vpop.f32.mrf.mxu1 }
 0x130   : > { %v11043_v26 = vadd.f32 %v1134_v23, %v971_v21  ;;  %v1115_v27 = vpop.f32.mrf.mxu0  ;;  %v1151_v28 = vpop.f32.mrf.mxu2 }
 0x131   : > { %v1116_v29 = vadd.f32 %v1115_v27, %v970_v22  ;;  %v11056_v38 = vadd.f32 %v1151_v28, %v972_v34 }
 0x132   : > { %v9601_v30 = vpack.i.bf16 %v11043_v26, %v11041_v24 }
 0x133   : > { %v11051_v32 = vmul.f32 0.17677669, %v1116_v29  ;;  %15160 = vst [vmem:[#allocation38_spill] sm:$0xff] %v11056_v38 }
 0x134   : > { %9602 = vrot.lane.b32.xlu1 %v9601_v30, %s10591_s9  ;;  %9597 = vrot.lane.b32.xlu2 %v9601_v30, %s10592_s20 }
 0x135   : > { %15159 = vst [vmem:[#allocation37_spill] sm:$0xff] %v11051_v32  ;;  %9592 = vrot.lane.b32.xlu0 %v9601_v30, %s10593_s21  ;;  %v9616_v35 = vpack.i.bf16 %v11051_v32, %v11047_v31 }
 0x137   : > { %v1137_v33 = vpop.f32.mrf.mxu1 }
 0x138   : > { %v1153_v36 = vpop.f32.mrf.mxu2  ;;  %v1118_v37 = vpop.f32.mrf.mxu0  ;;  %v11065_v42 = vadd.f32 %v1137_v33, %v971_v21 }
 0x139   : > { %v11060_v39 = vadd.f32 %v1153_v36, %v972_v34  ;;  %v1119_v46 = vadd.f32 %v1118_v37, %v970_v22 }
 0x13b   : > { %15161 = vst [vmem:[#allocation39_spill] sm:$0xff] %v11060_v39  ;;  %v9626_v40 = vpack.i.bf16 %v11060_v39, %v11056_v38  ;;  %v11074_v49 = vmul.f32 0.17677669, %v1119_v46 }
 0x13c   : > { %9617 = vrot.lane.b32.xlu2 %v9616_v35, %s10591_s9  ;;  %9612 = vrot.lane.b32.xlu1 %v9616_v35, %s10592_s20 }
 0x13d   : > { %9607 = vrot.lane.b32.xlu0 %v9616_v35, %s10593_s21  ;;  %15162 = vst [vmem:[#allocation40_spill] sm:$0xff] %v11074_v49 }
 0x13f   : > { %v1139_v41 = vpop.f32.mrf.mxu1 }
 0x140   : > { %v11069_v43 = vadd.f32 %v1139_v41, %v971_v21  ;;  %v1120_v44 = vpop.f32.mrf.mxu0  ;;  %v1156_v45 = vpop.f32.mrf.mxu2 }
 0x141   : > { %v1121_v48 = vadd.f32 %v1120_v44, %v970_v22  ;;  %v11085_v53 = vadd.f32 %v1156_v45, %v972_v34 }
 0x142   : > { %v9636_v47 = vpack.i.bf16 %v11069_v43, %v11065_v42 }
 0x143   : > { %v11077_v50 = vmul.f32 0.17677669, %v1121_v48  ;;  %15164 = vst [vmem:[#allocation42_spill] sm:$0xff] %v11085_v53 }
 0x144   : > { %9627 = vrot.lane.b32.xlu2 %v9626_v40, %s10592_s20  ;;  %9632 = vrot.lane.b32.xlu1 %v9626_v40, %s10591_s9 }
 0x145   : > { %9622 = vrot.lane.b32.xlu0 %v9626_v40, %s10593_s21  ;;  %15163 = vst [vmem:[#allocation41_spill] sm:$0xff] %v11077_v50  ;;  %v9656_v51 = vpack.i.bf16 %v11077_v50, %v11074_v49 }
 0x148   : > { %v1158_v52 = vpop.f32.mrf.mxu2 }
 0x149   : > { %v11087_v54 = vadd.f32 %v1158_v52, %v972_v34 }
 0x14b   : > { %15165 = vst [vmem:[#allocation43_spill] sm:$0xff] %v11087_v54  ;;  %v11092_v55 = vpack.i.bf16 %v11087_v54, %v11085_v53 }
 0x14c   : > { %9637 = vrot.lane.b32.xlu1 %v9636_v47, %s10593_s21  ;;  %9647 = vrot.lane.b32.xlu2 %v9636_v47, %s10591_s9 }
 0x14d   : > { %9642 = vrot.lane.b32.xlu0 %v9636_v47, %s10592_s20  ;;  %15166 = vst [vmem:[#allocation44_spill] sm:$0xff] %v11092_v55 }
 0x154   : > { %9657 = vrot.lane.b32.xlu1 %v9656_v51, %s10592_s20  ;;  %9662 = vrot.lane.b32.xlu2 %v9656_v51, %s10591_s9 }
 0x155   : > { %9652 = vrot.lane.b32.xlu0 %v9656_v51, %s10593_s21 }
 0x15c   : > { %9667 = vrot.lane.b32.xlu1 %v11092_v55, %s10593_s21 }
 0x18e   : > { %v11096_v56 = vpop.permute.xlu2 %9597 }
 0x18f   : > { %v9599_v58 = vunpack.i.l.bf16 %v11096_v56 }
 0x191   : > { %v1502_v60 = vrot.slane %v9599_v58, 4  ;;  %v1505_v11 = vsel %vm1206_vm0, %v9599_v58, %v1504_v8 }
 0x192   : > { %v1513_v16 = vperm.slane %v1505_v11, %v11107_v3 }
 0x193   : > { %v1503_v1 = vsel %vm1206_vm0, %v1502_v60, %v11041_v24  ;;  %v9600_v60 = vunpack.i.h.bf16 %v11096_v56 }
 0x194   : > { %v11111_v5 = vperm.slane %v1503_v1, %v11107_v3  ;;  %v1540_v21 = vrot.slane %v1513_v16, 4 }
 0x196   : > { %v1528_v12 = vrot.slane %v11111_v5, 4 }
 0x1a6   : > { %v11098_v57 = vpop.permute.xlu1 %9602 }
 0x1a7   : > { %v9604_v59 = vunpack.i.l.bf16 %v11098_v57  ;;  %v11102_v63 = vpop.permute.xlu0 %9592  ;;  %v9605_v62 = vunpack.i.h.bf16 %v11098_v57 }
 0x1a8   : > { %v9594_v2 = vunpack.i.l.bf16 %v11102_v63  ;;  %v9595_v7 = vunpack.i.h.bf16 %v11102_v63 }
 0x1a9   : > { %v1514_v0 = vrot.slane %v9604_v59, 4 }
 0x1aa   : > { %v1516_v9 = vrot.slane %v9594_v2, 4 }
 0x1ab   : > { %v1515_v4 = vsel %vm1206_vm0, %v1514_v0, %v9594_v2  ;;  %v1558_v2 = vrot.slane %v9600_v60, 4 }
 0x1ac   : > { %v11115_v10 = vperm.slane %v1515_v4, %v11107_v3  ;;  %v1517_v14 = vsel %vm1206_vm0, %v9604_v59, %v1516_v9  ;;  %v1570_v4 = vrot.slane %v9605_v62, 4 }
 0x1ad   : > { %v1525_v18 = vperm.slane %v1517_v14, %v11107_v3  ;;  %v1559_v6 = vsel %vm1206_vm0, %v1558_v2, %v11043_v26  ;;  %v1560_v14 = vrot.slane %v11043_v26, 4 }
 0x1ae   : > { %v1529_v15 = vsel %vm1206_vm0, %v11115_v10, %v1528_v12  ;;  %v11129_v20 = vpop.permute.xlu1 %9612  ;;  %v1571_v8 = vsel %vm1206_vm0, %v1570_v4, %v9595_v7  ;;  %v1565_v9 = vperm.slane %v1559_v6, %v11107_v3  ;;  %v11168_v12 = vpop.permute.xlu2 %9617 }
 0x1af   : > { %v11125_v17 = vpop.permute.xlu0 %9607  ;;  %v1537_v19 = vperm.slane %v1529_v15, %v11119_v13  ;;  %15169 = vst [vmem:[#allocation47_spill] sm:$0xff] %v11129_v20  ;;  %v1541_v23 = vsel %vm1206_vm0, %v1525_v18, %v1540_v21  ;;  %v1538_v30 = vrot.slane %v1525_v18, 4  ;;  %v1577_v56 = vperm.slane %v1571_v8, %v11107_v3 }
 0x1b0   : > { %15168 = vst [vmem:[#allocation46_spill] sm:$0xff] %v11125_v17  ;;  %v1549_v24 = vperm.slane %v1541_v23, %v11119_v13  ;;  %v1584_v11 = vrot.slane %v1565_v9, 4  ;;  %v1572_v15 = vrot.slane %v9595_v7, 4  ;;  %v1526_v18 = vrot.slane %v11115_v10, 4 }
 0x1b1   : > { %v1552_v22 = vrot.slane %v1537_v19, 4  ;;  %v1728_v27 = vpack.c.bf16 %v1537_v19, %v1537_v19  ;;  %v1539_v40 = vsel %vm1206_vm0, %v1538_v30, %v1513_v16  ;;  %15173 = vst [vmem:[#allocation51_spill] sm:$0xff] %v11168_v12  ;;  %v1561_v63 = vsel %vm1206_vm0, %v9600_v60, %v1560_v14 }
 0x1b2   : > { %v1556_v34 = vrot.slane %v1549_v24, 4  ;;  %v1732_v44 = vpack.c.bf16 %v1549_v24, %v1549_v24  ;;  %v1545_v51 = vperm.slane %v1539_v40, %v11119_v13  ;;  %v1585_v57 = vsel %vm1206_vm0, %v1577_v56, %v1584_v11 }
 0x1b3   : > { %v1553_v25 = vsel %vm1206_vm0, 0.0, %v1552_v22  ;;  %v1593_v16 = vperm.slane %v1585_v57, %v11119_v13  ;;  %v1573_v19 = vsel %vm1206_vm0, %v9605_v62, %v1572_v15  ;;  %v1569_v22 = vperm.slane %v1561_v63, %v11107_v3 }
 0x1b4   : > { %v1729_v28 = vpack.c.bf16 %v1553_v25, %v1553_v25  ;;  %v1557_v37 = vsel %vm1206_vm0, 0.0, %v1556_v34  ;;  %v1554_v59 = vrot.slane %v1545_v51, 4  ;;  %v1730_v0 = vpack.c.bf16 %v1545_v51, %v1545_v51 }
 0x1b5   : > { %v1733_v45 = vpack.c.bf16 %v1557_v37, %v1557_v37  ;;  %v1608_v21 = vrot.slane %v1593_v16, 4  ;;  %v1527_v23 = vsel %vm1206_vm0, %v1526_v18, %v11111_v5  ;;  %v1581_v25 = vperm.slane %v1573_v19, %v11107_v3 }
 0x1b6   : > { %9681 = vxpose.binary.xlu1.c.b16.start.end [1/2] (short) (narrow) %v1729_v28, %v1728_v27, 32  ;;  %v11136_v33 = vpop.permute.xlu1 %9632  ;;  %v1555_v61 = vsel %vm1206_vm0, 0.0, %v1554_v59  ;;  %v11179_v24 = vpop.permute.xlu2 %9627  ;;  %v1533_v27 = vperm.slane %v1527_v23, %v11119_v13  ;;  %v1596_v28 = vrot.slane %v1569_v22, 4  ;;  %v1736_v34 = vpack.c.bf16 %v1593_v16, %v1593_v16 }
 0x1b7   : > { %v11134_v29 = vpop.permute.xlu0 %9622  ;;  %15171 = vst [vmem:[#allocation49_spill] sm:$0xff] %v11136_v33  ;;  %v9635_v41 = vunpack.i.h.bf16 %v11136_v33  ;;  %v15001_v47 = vunpack.i.l.bf16 %v11136_v33  ;;  %9671 = vxpose.binary.xlu0.c.b16.start.end [1/2] (short) (narrow) %v1733_v45, %v1732_v44, 32  ;;  %v1731_v1 = vpack.c.bf16 %v1555_v61, %v1555_v61  ;;  %v1609_v26 = vsel %vm1206_vm0, 0.0, %v1608_v21 }
 0x1b8   : > { %15170 = vst [vmem:[#allocation48_spill] sm:$0xff] %v11134_v29  ;;  %v9625_v35 = vunpack.i.h.bf16 %v11134_v29  ;;  %v15000_v36 = vunpack.i.l.bf16 %v11134_v29  ;;  %v1737_v37 = vpack.c.bf16 %v1609_v26, %v1609_v26  ;;  %v1550_v40 = vrot.slane %v1533_v27, 4 }
 0x1b9   : > { %9686 = vxpose.binary.xlu2.c.b16.start.end [1/2] (short) (narrow) %v1731_v1, %v1730_v0, 32  ;;  %15174 = vst [vmem:[#allocation52_spill] sm:$0xff] %v11179_v24  ;;  %v1597_v44 = vsel %vm1206_vm0, %v1581_v25, %v1596_v28  ;;  %v1726_v51 = vpack.c.bf16 %v1533_v27, %v1533_v27  ;;  %v1616_v60 = vrot.slane %v11065_v42, 4  ;;  %v15002_v15 = vunpack.i.l.bf16 %v11179_v24 }
 0x1ba   : > { %v1868_v46 = vrot.slane %v9625_v35, 4  ;;  %v1812_v48 = vrot.slane %v15000_v36, 4  ;;  %v1594_v16 = vrot.slane %v1581_v25, 4  ;;  %v1800_v63 = vrot.slane %v11056_v38, 4 }
 0x1bb   : > { %v1582_v23 = vrot.slane %v1577_v56, 4 }
 0x1bc   : > { %v11152_v52 = vsel %vm1206_vm0, %v9635_v41, %v1868_v46  ;;  %v11157_v58 = vsel %vm1206_vm0, %v15001_v47, %v1812_v48  ;;  %v1551_v46 = vsel %vm1206_vm0, 0.0, %v1550_v40  ;;  %v1605_v48 = vperm.slane %v1597_v44, %v11119_v13 }
 0x1bd   : > { %15172 = vst [vmem:[#allocation50_spill] sm:$0xff] %v11152_v52  ;;  %v1727_v59 = vpack.c.bf16 %v1551_v46, %v1551_v46  ;;  %v1801_v19 = vsel %vm1206_vm0, %v15002_v15, %v1800_v63  ;;  %v1595_v26 = vsel %vm1206_vm0, %v1594_v16, %v1569_v22  ;;  %v1821_v25 = vperm.slane %v11157_v58, %v11107_v3 }
 0x1be   : > { %v11184_v10 = vpop.permute.xlu1 %9637  ;;  %v1612_v61 = vrot.slane %v1605_v48, 4  ;;  %v11194_v62 = vpop.permute.xlu2 %9647  ;;  %v1740_v4 = vpack.c.bf16 %v1605_v48, %v1605_v48  ;;  %v1809_v27 = vperm.slane %v1801_v19, %v11107_v3  ;;  %v1601_v28 = vperm.slane %v1595_v26, %v11119_v13 }
 0x1bf   : > { %v11186_v30 = vpop.permute.xlu0 %9642  ;;  %v9639_v5 = vunpack.i.l.bf16 %v11184_v10  ;;  %v9649_v7 = vunpack.i.l.bf16 %v11194_v62  ;;  %v1834_v22 = vrot.slane %v1821_v25, 4 }
 0x1c0   : > { %v9644_v45 = vunpack.i.l.bf16 %v11186_v30  ;;  %v1613_v2 = vsel %vm1206_vm0, 0.0, %v1612_v61  ;;  %v1836_v40 = vrot.slane %v1809_v27, 4  ;;  %v1610_v44 = vrot.slane %v1601_v28, 4 }
 0x1c1   : > { %v1628_v0 = vrot.slane %v9639_v5, 4  ;;  %v1741_v6 = vpack.c.bf16 %v1613_v2, %v1613_v2 }
 0x1c2   : > { %v1617_v1 = vsel %vm1206_vm0, %v9644_v45, %v1616_v60  ;;  %v11218_v56 = vsel %vm1206_vm0, %v1821_v25, %v1836_v40  ;;  %v1866_v60 = vrot.slane %v9635_v41, 4  ;;  %v1611_v61 = vsel %vm1206_vm0, 0.0, %v1610_v44 }
 0x1c3   : > { %v1625_v8 = vperm.slane %v1617_v1, %v11107_v3  ;;  %v1629_v11 = vsel %vm1206_vm0, %v9649_v7, %v1628_v0  ;;  %15175 = vst [vmem:[#allocation53_spill] sm:$0xff] %v11218_v56  ;;  %v1626_v0 = vrot.slane %v9649_v7, 4  ;;  %v1738_v1 = vpack.c.bf16 %v1601_v28, %v1601_v28 }
 0x1c4   : > { %v1637_v57 = vperm.slane %v1629_v11, %v11107_v3  ;;  %v1739_v2 = vpack.c.bf16 %v1611_v61, %v1611_v61  ;;  %v1614_v16 = vrot.slane %v9644_v45, 4 }
 0x1c5   : > { %v1652_v14 = vrot.slane %v1625_v8, 4 }
 0x1c7   : > { %v1653_v18 = vsel %vm1206_vm0, %v1637_v57, %v1652_v14  ;;  %v1627_v14 = vsel %vm1206_vm0, %v1626_v0, %v9639_v5 }
 0x1c8   : > { %v1661_v21 = vperm.slane %v1653_v18, %v11119_v13  ;;  %v1633_v19 = vperm.slane %v1627_v14, %v11107_v3 }
 0x1ca   : > { %v1638_v5 = vrot.slane %v1633_v19, 4 }
 0x1d6   : > { %9701 = vxpose.binary.xlu1.c.b16.start.end [1/2] (short) (narrow) %v1737_v37, %v1736_v34, 32  ;;  %v1668_v34 = vrot.slane %v1661_v21, 4  ;;  %v1583_v37 = vsel %vm1206_vm0, %v1582_v23, %v1565_v9  ;;  %v14999_v9 = vunpack.i.h.bf16 %v11179_v24 }
 0x1d7   : > { %9676 = vxpose.binary.xlu0.c.b16.start.end [1/2] (short) (narrow) %v1727_v59, %v1726_v51, 32  ;;  %v1589_v48 = vperm.slane %v1583_v37, %v11119_v13  ;;  %v1748_v51 = vpack.c.bf16 %v1661_v21, %v1661_v21  ;;  %v1615_v21 = vsel %vm1206_vm0, %v1614_v16, %v11065_v42  ;;  %v1650_v42 = vrot.slane %v1637_v57, 4 }
 0x1d8   : > { %v1669_v46 = vsel %vm1206_vm0, 0.0, %v1668_v34  ;;  %v1854_v41 = vrot.slane %v14999_v9, 4  ;;  %v1621_v45 = vperm.slane %v1615_v21, %v11107_v3  ;;  %v1672_v16 = vrot.slane %v11069_v43, 4 }
 0x1d9   : > { %9691 = vxpose.binary.xlu2.c.b16.start.end [1/2] (short) (narrow) %v1741_v6, %v1740_v4, 32  ;;  %v1749_v59 = vpack.c.bf16 %v1669_v46, %v1669_v46  ;;  %v1606_v58 = vrot.slane %v1589_v48, 4  ;;  %v11225_v4 = vsel %vm1206_vm0, %v1834_v22, %v1809_v27  ;;  %v1867_v6 = vsel %vm1206_vm0, %v1866_v60, %v9625_v35 }
 0x1da   : > { %15176 = vst [vmem:[#allocation54_spill] sm:$0xff] %v11225_v4  ;;  %v11235_v7 = vperm.slane %v1867_v6, %v11107_v3  ;;  %v1734_v18 = vpack.c.bf16 %v1589_v48, %v1589_v48  ;;  %v1855_v35 = vsel %vm1206_vm0, %v1854_v41, %v11060_v39  ;;  %v1640_v28 = vrot.slane %v1621_v45, 4 }
 0x1db   : > { %v1607_v11 = vsel %vm1206_vm0, 0.0, %v1606_v58  ;;  %v11244_v26 = vperm.slane %v1855_v35, %v11107_v3  ;;  %v1639_v34 = vsel %vm1206_vm0, %v1638_v5, %v1621_v45  ;;  %v1651_v46 = vsel %vm1206_vm0, %v1650_v42, %v1625_v8 }
 0x1dc   : > { %15177 = vst [vmem:[#allocation55_spill] sm:$0xff] %v11235_v7  ;;  %v1735_v63 = vpack.c.bf16 %v1607_v11, %v1607_v11  ;;  %v1878_v23 = vrot.slane %v11235_v7, 4  ;;  %v1645_v25 = vperm.slane %v1639_v34, %v11119_v13  ;;  %v1641_v37 = vsel %vm1206_vm0, %v1633_v19, %v1640_v28 }
 0x1dd   : > { %15178 = vst [vmem:[#allocation56_spill] sm:$0xff] %v11244_v26  ;;  %v1649_v40 = vperm.slane %v1641_v37, %v11119_v13  ;;  %v9650_v6 = vunpack.i.h.bf16 %v11194_v62  ;;  %v9645_v41 = vunpack.i.h.bf16 %v11186_v30 }
 0x1de   : > { %v11249_v27 = vsel %vm1206_vm0, %v1878_v23, %v11244_v26  ;;  %v1662_v44 = vrot.slane %v1645_v25, 4  ;;  %v1742_v60 = vpack.c.bf16 %v1645_v25, %v1645_v25 }
 0x1df   : > { %15179 = vst [vmem:[#allocation57_spill] sm:$0xff] %v11249_v27  ;;  %v1664_v48 = vrot.slane %v1649_v40, 4  ;;  %v1744_v57 = vpack.c.bf16 %v1649_v40, %v1649_v40  ;;  %v1673_v19 = vsel %vm1206_vm0, %v9645_v41, %v1672_v16  ;;  %v1682_v23 = vrot.slane %v9650_v6, 4  ;;  %v11288_v16 = vpop.permute.xlu2 %9662 }
 0x1e0   : > { %v1663_v22 = vsel %vm1206_vm0, 0.0, %v1662_v44  ;;  %v1681_v35 = vperm.slane %v1673_v19, %v11107_v3  ;;  %15182 = vst [vmem:[#allocation60_spill] sm:$0xff] %v11288_v16 }
 0x1e1   : > { %v1743_v61 = vpack.c.bf16 %v1663_v22, %v1663_v22  ;;  %v1665_v58 = vsel %vm1206_vm0, 0.0, %v1664_v48 }
 0x1e2   : > { %v1708_v30 = vrot.slane %v1681_v35, 4 }
 0x1f6   : > { %9711 = vxpose.binary.xlu1.c.b16.start.end [1/2] (short) (narrow) %v1749_v59, %v1748_v51, 32  ;;  %v1657_v51 = vperm.slane %v1651_v46, %v11119_v13  ;;  %v9640_v59 = vunpack.i.h.bf16 %v11184_v10 }
 0x1f7   : > { %9706 = vxpose.binary.xlu0.c.b16.start.end [1/2] (short) (narrow) %v1739_v2, %v1738_v1, 32  ;;  %v1745_v2 = vpack.c.bf16 %v1665_v58, %v1665_v58 }
 0x1f8   : > { %v1666_v0 = vrot.slane %v1657_v51, 4  ;;  %v1684_v1 = vrot.slane %v9640_v59, 4  ;;  %v1746_v14 = vpack.c.bf16 %v1657_v51, %v1657_v51  ;;  %v1683_v28 = vsel %vm1206_vm0, %v1682_v23, %v9640_v59 }
 0x1f9   : > { %9696 = vxpose.binary.xlu2.c.b16.start.end [1/2] (short) (narrow) %v1735_v63, %v1734_v18, 32  ;;  %v1670_v63 = vrot.slane %v9645_v41, 4  ;;  %v1689_v42 = vperm.slane %v1683_v28, %v11107_v3 }
 0x1fa   : > { %v1667_v8 = vsel %vm1206_vm0, 0.0, %v1666_v0  ;;  %v1685_v11 = vsel %vm1206_vm0, %v9650_v6, %v1684_v1 }
 0x1fb   : > { %v1747_v10 = vpack.c.bf16 %v1667_v8, %v1667_v8  ;;  %v1693_v18 = vperm.slane %v1685_v11, %v11107_v3  ;;  %v1671_v21 = vsel %vm1206_vm0, %v1670_v63, %v11069_v43  ;;  %v1694_v6 = vrot.slane %v1689_v42, 4  ;;  %v11283_v11 = vpop.permute.xlu1 %9657  ;;  %v11291_v63 = vpop.permute.xlu0 %9652 }
 0x1fc   : > { %v1677_v5 = vperm.slane %v1671_v21, %v11107_v3  ;;  %15180 = vst [vmem:[#allocation58_spill] sm:$0xff] %v11283_v11 }
 0x1fd   : > { %v1706_v62 = vrot.slane %v1693_v18, 4  ;;  %v1709_v25 = vsel %vm1206_vm0, %v1693_v18, %v1708_v30  ;;  %15183 = vst [vmem:[#allocation61_spill] sm:$0xff] %v11291_v63 }
 0x1fe   : > { %v1696_v37 = vrot.slane %v1677_v5, 4  ;;  %v1717_v40 = vperm.slane %v1709_v25, %v11119_v13  ;;  %v1695_v8 = vsel %vm1206_vm0, %v1694_v6, %v1677_v5 }
 0x1ff   : > { %v1707_v45 = vsel %vm1206_vm0, %v1706_v62, %v1681_v35  ;;  %v1701_v41 = vperm.slane %v1695_v8, %v11119_v13 }
 0x200   : > { %v1713_v34 = vperm.slane %v1707_v45, %v11119_v13  ;;  %v1697_v43 = vsel %vm1206_vm0, %v1689_v42, %v1696_v37  ;;  %v1724_v46 = vrot.slane %v1717_v40, 4  ;;  %v1756_v58 = vpack.c.bf16 %v1717_v40, %v1717_v40 }
 0x201   : > { %v1705_v22 = vperm.slane %v1697_v43, %v11119_v13  ;;  %v1750_v19 = vpack.c.bf16 %v1701_v41, %v1701_v41 }
 0x202   : > { %v1722_v44 = vrot.slane %v1713_v34, 4  ;;  %v1754_v51 = vpack.c.bf16 %v1713_v34, %v1713_v34  ;;  %v1725_v59 = vsel %vm1206_vm0, 0.0, %v1724_v46 }
 0x203   : > { %v1757_v0 = vpack.c.bf16 %v1725_v59, %v1725_v59 }
 0x204   : > { %v1723_v48 = vsel %vm1206_vm0, 0.0, %v1722_v44 }
 0x216   : > { %9716 = vxpose.binary.xlu1.c.b16.start.end [1/2] (short) (narrow) %v1743_v61, %v1742_v60, 32  ;;  %v1755_v60 = vpack.c.bf16 %v1723_v48, %v1723_v48  ;;  %v1720_v61 = vrot.slane %v1705_v22, 4 }
 0x217   : > { %9721 = vxpose.binary.xlu0.c.b16.start.end [1/2] (short) (narrow) %v1745_v2, %v1744_v57, 32  ;;  %v1752_v57 = vpack.c.bf16 %v1705_v22, %v1705_v22 }
 0x218   : > { %v1721_v1 = vsel %vm1206_vm0, 0.0, %v1720_v61 }
 0x219   : > { %9726 = vxpose.binary.xlu2.c.b16.start.end [1/2] (short) (narrow) %v1747_v10, %v1746_v14, 32  ;;  %v1753_v2 = vpack.c.bf16 %v1721_v1, %v1721_v1  ;;  %v1718_v14 = vrot.slane %v1701_v41, 4  ;;  %v11286_v10 = vpop.permute.xlu1 %9667 }
 0x21a   : > { %15181 = vst [vmem:[#allocation59_spill] sm:$0xff] %v11286_v10 }
 0x21b   : > { %v1719_v18 = vsel %vm1206_vm0, 0.0, %v1718_v14 }
 0x21c   : > { %v1751_v35 = vpack.c.bf16 %v1719_v18, %v1719_v18 }
 0x236   : > { %9746 = vxpose.binary.xlu1.c.b16.start.end [1/2] (short) (narrow) %v1755_v60, %v1754_v51, 32 }
 0x237   : > { %9731 = vxpose.binary.xlu0.c.b16.start.end [1/2] (short) (narrow) %v1757_v0, %v1756_v58, 32 }
 0x239   : > { %9741 = vxpose.binary.xlu2.c.b16.start.end [1/2] (short) (narrow) %v1753_v2, %v1752_v57, 32 }
 0x257   : > { %9736 = vxpose.binary.xlu0.c.b16.start.end [1/2] (short) (narrow) %v1751_v35, %v1750_v19, 32 }
 0x25a   : > { %v9687_v21 = vpop.trf.xlu2 }
 0x25b   : > { %v2775_v46 = vrot.slane %v9687_v21, 4 }
 0x262   : > { %v9682_v62 = vpop.trf.xlu1  ;;  %v9688_v5 = vpop.trf.xlu2 }
 0x263   : > { %v9672_v23 = vpop.trf.xlu0  ;;  %v2789_v58 = vrot.slane %v9682_v62, 4  ;;  %v2887_v57 = vrot.slane %v9688_v5, 4 }
 0x264   : > { %v2787_v59 = vrot.slane %v9672_v23, 4 }
 0x265   : > { %v2790_v18 = vsel %vm1206_vm0, %v9672_v23, %v2789_v58 }
 0x266   : > { %v2788_v2 = vsel %vm1206_vm0, %v2787_v59, %v9682_v62  ;;  %v11323_v9 = vperm.slane %v2790_v18, %v11107_v3 }
 0x26a   : > { %v9683_v30 = vpop.trf.xlu1  ;;  %v11293_v28 = vpop.trf.xlu2 }
 0x26b   : > { %v9673_v45 = vpop.trf.xlu0  ;;  %v2901_v19 = vrot.slane %v9683_v30, 4 }
 0x26c   : > { %v2899_v35 = vrot.slane %v9673_v45, 4 }
 0x272   : > { %v9684_v34 = vpop.trf.xlu1  ;;  %v11295_v37 = vpop.trf.xlu2 }
 0x273   : > { %v9674_v25 = vpop.trf.xlu0  ;;  %v3237_v6 = vrot.slane %v9684_v34, 4 }
 0x274   : > { %v3235_v8 = vrot.slane %v9674_v25, 4 }
 0x275   : > { %v3238_v59 = vsel %vm1206_vm0, %v9674_v25, %v3237_v6 }
 0x276   : > { %v3236_v62 = vsel %vm1206_vm0, %v3235_v8, %v9684_v34  ;;  %v3223_v34 = vrot.slane %v11293_v28, 4  ;;  %v11339_v18 = vperm.slane %v3238_v59, %v11107_v3 }
 0x277   : > { %v3242_v8 = vperm.slane %v3236_v62, %v11107_v3 }
 0x279   : > { %v3271_v59 = vrot.slane %v3242_v8, 4 }
 0x27a   : > { %v9685_v42 = vpop.trf.xlu1  ;;  %v11297_v44 = vpop.trf.xlu2 }
 0x27b   : > { %v9675_v40 = vpop.trf.xlu0 }
 0x27c   : > { %v3347_v47 = vrot.slane %v9675_v40, 4 }
 0x282   : > { %v11299_v43 = vpop.trf.xlu1  ;;  %v11302_v60 = vpop.trf.xlu2 }
 0x283   : > { %v9677_v48 = vpop.trf.xlu0 }
 0x284   : > { %v2776_v22 = vsel %vm1206_vm0, %v2775_v46, %v9677_v48  ;;  %v2777_v51 = vrot.slane %v9677_v48, 4  ;;  %v11317_v48 = vperm.slane %v2788_v2, %v11107_v3 }
 0x285   : > { %v11305_v61 = vperm.slane %v2776_v22, %v11107_v3 }
 0x286   : > { %v2778_v0 = vsel %vm1206_vm0, %v9687_v21, %v2777_v51 }
 0x287   : > { %v11312_v41 = vperm.slane %v2778_v0, %v11107_v3  ;;  %v2825_v14 = vrot.slane %v11305_v61, 4 }
 0x289   : > { %v2837_v23 = vrot.slane %v11312_v41, 4  ;;  %v11331_v2 = vsel %vm1206_vm0, %v11317_v48, %v2825_v14  ;;  %v3349_v14 = vrot.slane %v9685_v42, 4 }
 0x28a   : > { %v11308_v1 = vpop.trf.xlu1  ;;  %v9694_v51 = vpop.trf.xlu2 }
 0x28b   : > { %v9678_v46 = vpop.trf.xlu0  ;;  %v3259_v0 = vrot.slane %v9694_v51, 4 }
 0x28c   : > { %v2888_v21 = vsel %vm1206_vm0, %v2887_v57, %v9678_v46  ;;  %v2889_v22 = vrot.slane %v9678_v46, 4  ;;  %v2900_v57 = vsel %vm1206_vm0, %v2899_v35, %v9683_v30  ;;  %v2902_v46 = vsel %vm1206_vm0, %v9673_v45, %v2901_v19 }
 0x28d   : > { %v11327_v58 = vperm.slane %v2888_v21, %v11107_v3  ;;  %v11356_v35 = vperm.slane %v2900_v57, %v11107_v3  ;;  %v2811_v57 = vrot.slane %v11297_v44, 4 }
 0x28e   : > { %v2890_v25 = vsel %vm1206_vm0, %v9688_v5, %v2889_v22  ;;  %v11353_v5 = vsel %vm1206_vm0, %v11323_v9, %v2837_v23  ;;  %v11359_v22 = vperm.slane %v2902_v46, %v11107_v3 }
 0x28f   : > { %v11345_v30 = vperm.slane %v2890_v25, %v11107_v3  ;;  %v2937_v45 = vrot.slane %v11327_v58, 4 }
 0x291   : > { %v2949_v46 = vrot.slane %v11345_v30, 4  ;;  %v11372_v39 = vsel %vm1206_vm0, %v11356_v35, %v2937_v45 }
 0x292   : > { %v9704_v6 = vpop.trf.xlu1  ;;  %v9695_v15 = vpop.trf.xlu2 }
 0x293   : > { %v11342_v21 = vsel %vm1206_vm0, %v3259_v0, %v9704_v6  ;;  %v3261_v36 = vrot.slane %v9704_v6, 4  ;;  %v9679_v62 = vpop.trf.xlu0  ;;  %v3283_v0 = vrot.slane %v11339_v18, 4  ;;  %v3371_v27 = vrot.slane %v9695_v15, 4 }
 0x294   : > { %v3224_v25 = vsel %vm1206_vm0, %v3223_v34, %v9679_v62  ;;  %v3225_v6 = vrot.slane %v9679_v62, 4  ;;  %v2813_v34 = vrot.slane %v11299_v43, 4  ;;  %v3335_v62 = vrot.slane %v11295_v37, 4 }
 0x295   : > { %v11349_v19 = vsel %vm1206_vm0, %v9694_v51, %v3261_v36  ;;  %v3348_v36 = vsel %vm1206_vm0, %v3347_v47, %v9685_v42  ;;  %v3350_v51 = vsel %vm1206_vm0, %v9675_v40, %v3349_v14  ;;  %v3230_v23 = vperm.slane %v3224_v25, %v11107_v3 }
 0x296   : > { %v3226_v52 = vsel %vm1206_vm0, %v11293_v28, %v3225_v6  ;;  %v3358_v25 = vperm.slane %v3350_v51, %v11107_v3  ;;  %v3354_v45 = vperm.slane %v3348_v36, %v11107_v3  ;;  %v2923_v6 = vrot.slane %v11302_v60, 4 }
 0x297   : > { %v3234_v47 = vperm.slane %v3226_v52, %v11107_v3  ;;  %v11377_v42 = vsel %vm1206_vm0, %v3271_v59, %v3230_v23  ;;  %v3273_v40 = vrot.slane %v3230_v23, 4  ;;  %v2925_v59 = vrot.slane %v11308_v1, 4 }
 0x298   : > { %v2823_v51 = vrot.slane %v11317_v48, 4  ;;  %v2835_v36 = vrot.slane %v11323_v9, 4  ;;  %v3395_v10 = vrot.slane %v3358_v25, 4  ;;  %v2924_v48 = vsel %vm1206_vm0, %v2923_v6, %v11308_v1 }
 0x299   : > { %v11387_v4 = vsel %vm1206_vm0, %v3242_v8, %v3273_v40  ;;  %v11390_v52 = vsel %vm1206_vm0, %v3283_v0, %v3234_v47  ;;  %v2812_v8 = vsel %vm1206_vm0, %v2811_v57, %v11299_v43  ;;  %v2814_v0 = vsel %vm1206_vm0, %v11297_v44, %v2813_v34 }
 0x29a   : > { %v9705_v14 = vpop.trf.xlu1  ;;  %v3285_v54 = vrot.slane %v3234_v47, 4  ;;  %v9697_v53 = vpop.trf.xlu2  ;;  %v11412_v43 = vperm.slane %v2812_v8, %v11107_v3  ;;  %v2822_v44 = vperm.slane %v2814_v0, %v11107_v3  ;;  %v2824_v34 = vsel %vm1206_vm0, %v2823_v51, %v11305_v61 }
 0x29b   : > { %v11382_v56 = vsel %vm1206_vm0, %v3371_v27, %v9705_v14  ;;  %v3373_v28 = vrot.slane %v9705_v14, 4  ;;  %v11398_v27 = vsel %vm1206_vm0, %v11359_v22, %v2949_v46  ;;  %v9680_v40 = vpop.trf.xlu0  ;;  %v2935_v14 = vrot.slane %v11356_v35, 4 }
 0x29c   : > { %v3383_v46 = vrot.slane %v3354_v45, 4  ;;  %v2926_v35 = vsel %vm1206_vm0, %v11302_v60, %v2925_v59  ;;  %v11428_v8 = vperm.slane %v2924_v48, %v11107_v3  ;;  %v2801_v0 = vrot.slane %v9697_v53, 4 }
 0x29d   : > { %v11394_v23 = vsel %vm1206_vm0, %v9695_v15, %v3373_v28  ;;  %v3336_v15 = vsel %vm1206_vm0, %v3335_v62, %v9680_v40  ;;  %v3337_v28 = vrot.slane %v9680_v40, 4  ;;  %v2836_v60 = vsel %vm1206_vm0, %v2835_v36, %v11312_v41 }
 0x29e   : > { %v3342_v9 = vperm.slane %v3336_v15, %v11107_v3  ;;  %v11435_v61 = vperm.slane %v2926_v35, %v11107_v3  ;;  %v2947_v15 = vrot.slane %v11359_v22, 4  ;;  %v2936_v41 = vsel %vm1206_vm0, %v2935_v14, %v11327_v58 }
 0x29f   : > { %v3338_v57 = vsel %vm1206_vm0, %v11295_v37, %v3337_v28  ;;  %v3286_v37 = vsel %vm1206_vm0, %v11339_v18, %v3285_v54  ;;  %v2830_v28 = vperm.slane %v2824_v34, %v11119_v13  ;;  %v2847_v36 = vrot.slane %v11412_v43, 4 }
 0x2a0   : > { %v3346_v47 = vperm.slane %v3338_v57, %v11107_v3  ;;  %v11423_v1 = vsel %vm1206_vm0, %v3383_v46, %v3342_v9  ;;  %v3385_v62 = vrot.slane %v3342_v9, 4  ;;  %v2859_v54 = vrot.slane %v2822_v44, 4 }
 0x2a1   : > { %v2948_v22 = vsel %vm1206_vm0, %v2947_v15, %v11345_v30  ;;  %v11459_v58 = vperm.slane %v11331_v2, %v11119_v13  ;;  %v2959_v14 = vrot.slane %v11428_v8, 4  ;;  %v11464_v35 = vperm.slane %v2936_v41, %v11119_v13 }
 0x2a2   : > { %v11425_v6 = vpop.trf.xlu1  ;;  %v11438_v59 = vsel %vm1206_vm0, %v3354_v45, %v3385_v62  ;;  %v11441_v51 = vsel %vm1206_vm0, %v3395_v10, %v3346_v47  ;;  %v3397_v40 = vrot.slane %v3346_v47, 4  ;;  %v11452_v45 = vperm.slane %v2836_v60, %v11119_v13  ;;  %v9698_v9 = vpop.trf.xlu2 }
 0x2a3   : > { %v9707_v46 = vpop.trf.xlu0  ;;  %v11469_v34 = vperm.slane %v11349_v19, %v11107_v3  ;;  %v2873_v30 = vrot.slane %v2830_v28, 4  ;;  %v11474_v2 = vperm.slane %v11353_v5, %v11119_v13  ;;  %v11481_v15 = vperm.slane %v2948_v22, %v11119_v13 }
 0x2a4   : > { %v11449_v18 = vsel %vm1206_vm0, %v3358_v25, %v3397_v40  ;;  %v2799_v10 = vrot.slane %v9707_v46, 4  ;;  %v2802_v48 = vsel %vm1206_vm0, %v9707_v46, %v2801_v0  ;;  %v2971_v25 = vrot.slane %v11435_v61, 4 }
 0x2a5   : > { %v2810_v57 = vperm.slane %v2802_v48, %v11107_v3  ;;  %v11485_v19 = vperm.slane %v11342_v21, %v11107_v3  ;;  %v2881_v41 = vrot.slane %v11452_v45, 4  ;;  %v11497_v48 = vperm.slane %v11398_v27, %v11119_v13 }
 0x2a6   : > { %v2800_v47 = vsel %vm1206_vm0, %v2799_v10, %v9697_v53  ;;  %v2913_v53 = vrot.slane %v9698_v9, 4  ;;  %v3307_v21 = vrot.slane %v11469_v34, 4  ;;  %v2993_v27 = vrot.slane %v11481_v15, 4 }
 0x2a7   : > { %v2806_v62 = vperm.slane %v2800_v47, %v11107_v3  ;;  %v2860_v0 = vsel %vm1206_vm0, %v2859_v54, %v2810_v57  ;;  %v2861_v60 = vrot.slane %v2810_v57, 4  ;;  %v11493_v54 = vperm.slane %v11372_v39, %v11119_v13 }
 0x2a8   : > { %v2866_v22 = vperm.slane %v2860_v0, %v11119_v13  ;;  %v11509_v39 = vperm.slane %v11394_v23, %v11107_v3  ;;  %v11518_v50 = vperm.slane %v11387_v4, %v11119_v13 }
 0x2a9   : > { %v2862_v46 = vsel %vm1206_vm0, %v2822_v44, %v2861_v60  ;;  %v2848_v10 = vsel %vm1206_vm0, %v2847_v36, %v2806_v62  ;;  %v11505_v44 = vperm.slane %v11382_v56, %v11107_v3  ;;  %v2985_v60 = vrot.slane %v11464_v35, 4 }
 0x2aa   : > { %v11478_v40 = vpop.trf.xlu1  ;;  %v2854_v57 = vperm.slane %v2848_v10, %v11119_v13  ;;  %v2849_v5 = vrot.slane %v2806_v62, 4  ;;  %v9699_v10 = vpop.trf.xlu2  ;;  %v2882_v11 = vsel %vm1206_vm0, %v2866_v22, %v2881_v41 }
 0x2ab   : > { %v9708_v36 = vpop.trf.xlu0  ;;  %v3249_v16 = vrot.slane %v9699_v10, 4 }
 0x2ac   : > { %v2911_v55 = vrot.slane %v9708_v36, 4  ;;  %v2914_v0 = vsel %vm1206_vm0, %v9708_v36, %v2913_v53  ;;  %v2871_v49 = vrot.slane %v2854_v57, 4  ;;  %v2874_v62 = vsel %vm1206_vm0, %v2854_v57, %v2873_v30 }
 0x2ad   : > { %v2922_v47 = vperm.slane %v2914_v0, %v11107_v3  ;;  %v11525_v53 = vperm.slane %v3286_v37, %v11119_v13  ;;  %v11536_v30 = vperm.slane %v2862_v46, %v11119_v13  ;;  %v3715_v57 = vshrl.u32 %v2882_v11, 16 }
 0x2ae   : > { %v2912_v63 = vsel %vm1206_vm0, %v2911_v55, %v9698_v9  ;;  %v2872_v23 = vsel %vm1206_vm0, %v2871_v49, %v2830_v28  ;;  %v2879_v55 = vrot.slane %v2866_v22, 4  ;;  %v2850_v9 = vsel %vm1206_vm0, %v11412_v43, %v2849_v5 }
 0x2af   : > { %v2918_v36 = vperm.slane %v2912_v63, %v11107_v3  ;;  %v2972_v0 = vsel %vm1206_vm0, %v2971_v25, %v2922_v47  ;;  %v2973_v56 = vrot.slane %v2922_v47, 4  ;;  %v2858_v25 = vperm.slane %v2850_v9, %v11119_v13 }
 0x2b0   : > { %v2978_v4 = vperm.slane %v2972_v0, %v11119_v13  ;;  %v11546_v49 = vsel %vm1206_vm0, %v2879_v55, %v11452_v45  ;;  %v3683_v5 = vshrl.u32 %v2874_v62, 16  ;;  %v3675_v46 = vshrl.u32 %v2872_v23, 16 }
 0x2b1   : > { %v2974_v63 = vsel %vm1206_vm0, %v11435_v61, %v2973_v56  ;;  %v2960_v37 = vsel %vm1206_vm0, %v2959_v14, %v2918_v36  ;;  %v2875_v22 = vrot.slane %v2858_v25, 4 }
 0x2b2   : > { %v11529_v31 = vpop.trf.xlu1  ;;  %v2994_v41 = vsel %vm1206_vm0, %v2978_v4, %v2993_v27  ;;  %v2966_v47 = vperm.slane %v2960_v37, %v11119_v13  ;;  %v9700_v14 = vpop.trf.xlu2  ;;  %v2961_v27 = vrot.slane %v2918_v36, 4 }
 0x2b3   : > { %v9709_v43 = vpop.trf.xlu0  ;;  %v3716_v28 = vshrl.u32 %v2994_v41, 16  ;;  %v3713_v37 = vpack.i.b16 %v2994_v41, %v2882_v11  ;;  %v11556_v12 = vsel %vm1206_vm0, %v2875_v22, %v11459_v58  ;;  %v3361_v11 = vrot.slane %v9700_v14, 4 }
 0x2b4   : > { %v3247_v0 = vrot.slane %v9709_v43, 4  ;;  %v3250_v61 = vsel %vm1206_vm0, %v9709_v43, %v3249_v16  ;;  %v2986_v56 = vsel %vm1206_vm0, %v2966_v47, %v2985_v60  ;;  %v2983_v9 = vrot.slane %v2966_v47, 4 }
 0x2b5   : > { %v3258_v32 = vperm.slane %v3250_v61, %v11107_v3  ;;  %v3717_v17 = vpack.i.b16 %v3716_v28, %v3715_v57  ;;  %v3684_v55 = vshrl.u32 %v2986_v56, 16  ;;  %v11559_v16 = vperm.slane %v2974_v63, %v11119_v13 }
 0x2b6   : > { %v3248_v45 = vsel %vm1206_vm0, %v3247_v0, %v9699_v10  ;;  %v2984_v20 = vsel %vm1206_vm0, %v2983_v9, %v11464_v35  ;;  %v3681_v57 = vpack.i.b16 %v2986_v56, %v2874_v62  ;;  %v2991_v22 = vrot.slane %v2978_v4, 4 }
 0x2b7   : > { %v11562_v60 = vsel %vm1206_vm0, %v3307_v21, %v3258_v32  ;;  %v3309_v36 = vrot.slane %v3258_v32, 4  ;;  %9763 = vxpose.binary.xlu0.c.b16.start [1/4] (short) (narrow) %v3717_v17, %v3713_v37, 16  ;;  %v3254_v10 = vperm.slane %v3248_v45, %v11107_v3  ;;  %v3685_v47 = vpack.i.b16 %v3684_v55, %v3683_v5 }
 0x2b8   : > { %v3676_v35 = vshrl.u32 %v2984_v20, 16  ;;  %v3673_v28 = vpack.i.b16 %v2984_v20, %v2872_v23  ;;  %v2962_v63 = vsel %vm1206_vm0, %v11428_v8, %v2961_v27  ;;  %v3419_v21 = vrot.slane %v11509_v39, 4 }
 0x2b9   : > { %v3310_v43 = vsel %vm1206_vm0, %v11469_v34, %v3309_v36  ;;  %9751 = vxpose.binary.xlu1.c.b16.start [1/4] (short) (narrow) %v3685_v47, %v3681_v57, 16  ;;  %v2970_v17 = vperm.slane %v2962_v63, %v11119_v13  ;;  %v15184_v0 = vrot.slane %v11459_v58, 4  ;;  %v11580_v34 = vsel %vm1206_vm0, %v2991_v22, %v11481_v15 }
 0x2ba   : > { %v11564_v41 = vpop.trf.xlu1  ;;  %v3677_v32 = vpack.i.b16 %v3676_v35, %v3675_v46  ;;  %v3707_v20 = vshrl.u32 %v11546_v49, 16  ;;  %v15186_v8 = vrot.slane %v11474_v2, 4  ;;  %v15188_v4 = vrot.slane %v11497_v48, 4  ;;  %v11596_v15 = vpop.trf.xlu2 }
 0x2bb   : > { %v11576_v62 = vsel %vm1206_vm0, %v2858_v25, %v15184_v0  ;;  %v9710_v5 = vpop.trf.xlu0  ;;  %v3708_v56 = vshrl.u32 %v11580_v34, 16  ;;  %v3297_v9 = vrot.slane %v3254_v10, 4  ;;  %v2987_v37 = vrot.slane %v2970_v17, 4 }
 0x2bc   : > { %15185 = vst [vmem:[#allocation62_spill] sm:$0xff] %v11576_v62  ;;  %v11587_v23 = vsel %vm1206_vm0, %v11536_v30, %v15186_v8  ;;  %v11593_v58 = vsel %vm1206_vm0, %v11559_v16, %v15188_v4  ;;  %v3359_v25 = vrot.slane %v9710_v5, 4  ;;  %v3362_v46 = vsel %vm1206_vm0, %v9710_v5, %v3361_v11 }
 0x2bd   : > { %15187 = vst [vmem:[#allocation63_spill] sm:$0xff] %v11587_v23  ;;  %9755 = vxpose.binary.xlu2.c.b16.start [1/4] (short) (narrow) %v3677_v32, %v3673_v28, 16  ;;  %v3370_v27 = vperm.slane %v3362_v46, %v11107_v3  ;;  %v15190_v45 = vrot.slane %v11493_v54, 4  ;;  %v11608_v11 = vpack.i.b16 %v3708_v56, %v3707_v20  ;;  %v3699_v5 = vshrl.u32 %v11576_v62, 16 }
 0x2be   : > { %15189 = vst [vmem:[#allocation64_spill] sm:$0xff] %v11593_v58  ;;  %v3360_v36 = vsel %vm1206_vm0, %v3359_v25, %v9700_v14  ;;  %v11621_v32 = vsel %vm1206_vm0, %v2987_v37, %v11493_v54  ;;  %v3295_v14 = vrot.slane %v11485_v19, 4  ;;  %v3691_v20 = vshrl.u32 %v11556_v12, 16 }
 0x2bf   : > { %v11605_v55 = vsel %vm1206_vm0, %v2970_v17, %v15190_v45  ;;  %v3366_v35 = vperm.slane %v3360_v36, %v11107_v3  ;;  %v11615_v28 = vsel %vm1206_vm0, %v3419_v21, %v3370_v27  ;;  %v3421_v22 = vrot.slane %v3370_v27, 4 }
 0x2c0   : > { %15191 = vst [vmem:[#allocation65_spill] sm:$0xff] %v11605_v55  ;;  %v3700_v47 = vshrl.u32 %v11605_v55, 16  ;;  %v3011_v17 = vrot.slane %v11425_v6, 4  ;;  %v3692_v8 = vshrl.u32 %v11621_v32, 16  ;;  %v3407_v4 = vrot.slane %v11505_v44, 4 }
 0x2c1   : > { %v3422_v21 = vsel %vm1206_vm0, %v11509_v39, %v3421_v22  ;;  %v3298_v25 = vsel %vm1206_vm0, %v11485_v19, %v3297_v9  ;;  %v3325_v46 = vrot.slane %v11518_v50, 4  ;;  %v3409_v56 = vrot.slane %v3366_v35, 4 }
 0x2c2   : > { %v11617_v63 = vpop.trf.xlu1  ;;  %v11633_v54 = vpack.i.b16 %v3700_v47, %v3699_v5  ;;  %v11638_v37 = vpack.i.b16 %v3692_v8, %v3691_v20  ;;  %v11641_v45 = vperm.slane %v3298_v25, %v11119_v13  ;;  %v3333_v39 = vrot.slane %v11525_v53, 4  ;;  %v11647_v47 = vpop.trf.xlu2 }
 0x2c3   : > { %v9722_v27 = vpop.trf.xlu0  ;;  %v11650_v5 = vperm.slane %v3310_v43, %v11119_v13  ;;  %v3296_v19 = vsel %vm1206_vm0, %v3295_v14, %v3254_v10  ;;  %v11659_v20 = vperm.slane %v11449_v18, %v11119_v13  ;;  %v3408_v43 = vsel %vm1206_vm0, %v3407_v4, %v3366_v35 }
 0x2c4   : > { %15192 = vst [vmem:[#allocation66_spill] sm:$0xff] %v11633_v54  ;;  %v11645_v36 = vsel %vm1206_vm0, %v3011_v17, %v9722_v27  ;;  %v3013_v22 = vrot.slane %v9722_v27, 4  ;;  %v11655_v9 = vsel %vm1206_vm0, %v11641_v45, %v3325_v46  ;;  %v11672_v10 = vperm.slane %v11438_v59, %v11119_v13 }
 0x2c5   : > { %15193 = vst [vmem:[#allocation67_spill] sm:$0xff] %v11638_v37  ;;  %v11667_v8 = vsel %vm1206_vm0, %v11650_v5, %v3333_v39  ;;  %v11675_v14 = vperm.slane %v3422_v21, %v11119_v13  ;;  %v3410_v18 = vsel %vm1206_vm0, %v11505_v44, %v3409_v56  ;;  %v11694_v4 = vperm.slane %v11423_v1, %v11119_v13 }
 0x2c6   : > { %15194 = vst [vmem:[#allocation68_spill] sm:$0xff] %v11655_v9  ;;  %v11663_v17 = vsel %vm1206_vm0, %v11425_v6, %v3013_v22  ;;  %v3445_v6 = vrot.slane %v11659_v20, 4  ;;  %v11683_v46 = vperm.slane %v3410_v18, %v11119_v13  ;;  %v3437_v35 = vrot.slane %v11672_v10, 4 }
 0x2c7   : > { %15195 = vst [vmem:[#allocation69_spill] sm:$0xff] %v11667_v8  ;;  %v11702_v56 = vperm.slane %v11377_v42, %v11119_v13  ;;  %v3795_v18 = vshrl.u32 %v11667_v8, 16  ;;  %v3459_v57 = vrot.slane %v11529_v31, 4  ;;  %v11710_v0 = vperm.slane %v3408_v43, %v11119_v13 }
 0x2c8   : > { %v11690_v59 = vsel %vm1206_vm0, %v11675_v14, %v3445_v6  ;;  %v11698_v44 = vsel %vm1206_vm0, %v11683_v46, %v3437_v35  ;;  %v11716_v42 = vperm.slane %v3296_v19, %v11119_v13  ;;  %v3433_v26 = vrot.slane %v11694_v4, 4 }
 0x2c9   : > { %15196 = vst [vmem:[#allocation70_spill] sm:$0xff] %v11690_v59  ;;  %v3796_v6 = vshrl.u32 %v11690_v59, 16  ;;  %v3321_v38 = vrot.slane %v11702_v56, 4  ;;  %v3732_v33 = vshrl.u32 %v11593_v58, 16  ;;  %v3731_v19 = vshrl.u32 %v11587_v23, 16 }
 0x2ca   : > { %v11677_v25 = vpop.trf.xlu1  ;;  %v9729_v21 = vpop.trf.xlu2  ;;  %v2995_v62 = vrot.slane %v11559_v16, 4 }
 0x2cb   : > { %v11685_v27 = vpop.trf.xlu0  ;;  %v3447_v39 = vrot.slane %v9729_v21, 4  ;;  %v11713_v7 = vpack.i.b16 %v3796_v6, %v3795_v18  ;;  %v11726_v18 = vsel %vm1206_vm0, %v11710_v0, %v3433_v26 }
 0x2cc   : > { %15198 = vst [vmem:[#allocation72_spill] sm:$0xff] %v11726_v18 }
 0x2cd   : > { %15197 = vst [vmem:[#allocation71_spill] sm:$0xff] %v11713_v7 }
 0x2d2   : > { %v9719_v1 = vpop.trf.xlu1 }
 0x2d3   : > { %v3448_v35 = vsel %vm1206_vm0, %v3447_v39, %v9719_v1  ;;  %v3449_v61 = vrot.slane %v9719_v1, 4  ;;  %v9724_v43 = vpop.trf.xlu0 }
 0x2d4   : > { %v3454_v22 = vperm.slane %v3448_v35, %v11107_v3  ;;  %v3460_v6 = vsel %vm1206_vm0, %v3459_v57, %v9724_v43  ;;  %v3461_v1 = vrot.slane %v9724_v43, 4  ;;  %v9730_v35 = vpop.trf.xlu2  ;;  %v2883_v57 = vrot.slane %v11536_v30, 4 }
 0x2d5   : > { %v3450_v29 = vsel %vm1206_vm0, %v9729_v21, %v3449_v61  ;;  %v11732_v61 = vsel %vm1206_vm0, %v11716_v42, %v3321_v38  ;;  %v3466_v21 = vperm.slane %v3460_v6, %v11107_v3  ;;  %v3559_v54 = vrot.slane %v9730_v35, 4 }
 0x2d6   : > { %v3458_v24 = vperm.slane %v3450_v29, %v11107_v3  ;;  %v3497_v39 = vrot.slane %v3454_v22, 4  ;;  %15199 = vst [vmem:[#allocation73_spill] sm:$0xff] %v11732_v61  ;;  %v11735_v29 = vpack.i.b16 %v3732_v33, %v3731_v19  ;;  %v3462_v26 = vsel %vm1206_vm0, %v11529_v31, %v3461_v1 }
 0x2d7   : > { %v3470_v43 = vperm.slane %v3462_v26, %v11107_v3  ;;  %v3495_v55 = vrot.slane %v3466_v21, 4  ;;  %v3571_v33 = vrot.slane %v11564_v41, 4  ;;  %v11752_v1 = vsel %vm1206_vm0, %v2883_v57, %v11474_v2 }
 0x2d8   : > { %v3509_v7 = vrot.slane %v3458_v24, 4  ;;  %15200 = vst [vmem:[#allocation74_spill] sm:$0xff] %v11735_v29  ;;  %v11744_v38 = vsel %vm1206_vm0, %v3466_v21, %v3497_v39 }
 0x2d9   : > { %15201 = vst [vmem:[#allocation75_spill] sm:$0xff] %v11752_v1  ;;  %v3507_v30 = vrot.slane %v3470_v43, 4  ;;  %v11755_v26 = vsel %vm1206_vm0, %v3495_v55, %v3454_v22 }
 0x2da   : > { %v9720_v37 = vpop.trf.xlu1  ;;  %v11758_v39 = vsel %vm1206_vm0, %v3470_v43, %v3509_v7 }
 0x2db   : > { %v3560_v19 = vsel %vm1206_vm0, %v3559_v54, %v9720_v37  ;;  %v3561_v31 = vrot.slane %v9720_v37, 4  ;;  %v11764_v54 = vsel %vm1206_vm0, %v3507_v30, %v3458_v24  ;;  %v9725_v37 = vpop.trf.xlu0  ;;  %v3314_v30 = vperm.slane %v11562_v60, %v11119_v13 }
 0x2dc   : > { %v3566_v21 = vperm.slane %v3560_v19, %v11107_v3  ;;  %v3572_v8 = vsel %vm1206_vm0, %v3571_v33, %v9725_v37  ;;  %v3573_v55 = vrot.slane %v9725_v37, 4  ;;  %v3331_v33 = vrot.slane %v11650_v5, 4 }
 0x2dd   : > { %v3562_v6 = vsel %vm1206_vm0, %v9730_v35, %v3561_v31  ;;  %v3578_v22 = vperm.slane %v3572_v8, %v11107_v3  ;;  %v11773_v35 = vsel %vm1206_vm0, %v2995_v62, %v11497_v48  ;;  %v3290_v48 = vperm.slane %v11390_v52, %v11119_v13 }
 0x2de   : > { %v3570_v2 = vperm.slane %v3562_v6, %v11107_v3  ;;  %v3609_v57 = vrot.slane %v3566_v21, 4  ;;  %v3574_v43 = vsel %vm1206_vm0, %v11564_v41, %v3573_v55  ;;  %15202 = vst [vmem:[#allocation76_spill] sm:$0xff] %v11773_v35  ;;  %v3402_v62 = vperm.slane %v11441_v51, %v11119_v13 }
 0x2df   : > { %v3582_v24 = vperm.slane %v3574_v43, %v11107_v3  ;;  %v3607_v16 = vrot.slane %v3578_v22, 4  ;;  %v3426_v52 = vperm.slane %v11615_v28, %v11119_v13 }
 0x2e0   : > { %v3621_v7 = vrot.slane %v3570_v2, 4  ;;  %v11777_v19 = vsel %vm1206_vm0, %v3578_v22, %v3609_v57  ;;  %v3443_v57 = vrot.slane %v11675_v14, 4 }
 0x2e1   : > { %v3619_v8 = vrot.slane %v3582_v24, 4  ;;  %v11783_v31 = vsel %vm1206_vm0, %v3607_v16, %v3566_v21  ;;  %v11801_v21 = vsel %vm1206_vm0, %v3331_v33, %v11525_v53  ;;  %v3327_v16 = vrot.slane %v3314_v30, 4 }
 0x2e2   : > { %v11786_v41 = vsel %vm1206_vm0, %v3582_v24, %v3621_v7  ;;  %15203 = vst [vmem:[#allocation77_spill] sm:$0xff] %v11801_v21  ;;  %v11808_v51 = vsel %vm1206_vm0, %v3443_v57, %v11659_v20  ;;  %v3787_v55 = vshrl.u32 %v11801_v21, 16  ;;  %v3441_v7 = vrot.slane %v3402_v62, 4 }
 0x2e3   : > { %v11795_v37 = vsel %vm1206_vm0, %v3619_v8, %v3570_v2  ;;  %v11797_v5 = vpop.trf.xlu0  ;;  %15204 = vst [vmem:[#allocation78_spill] sm:$0xff] %v11808_v51  ;;  %v3329_v2 = vrot.slane %v3290_v48, 4  ;;  %v3788_v22 = vshrl.u32 %v11808_v51, 16  ;;  %v3763_v20 = vshrl.u32 %v11655_v9, 16 }
 0x2e4   : > { %v11821_v43 = vsel %vm1206_vm0, %v3426_v52, %v3441_v7  ;;  %v3323_v24 = vrot.slane %v11641_v45, 4  ;;  %v3764_v57 = vshrl.u32 %v11698_v44, 16  ;;  %v11838_v7 = vsel %vm1206_vm0, %v3327_v16, %v3290_v48 }
 0x2e5   : > { %v11815_v53 = vsel %vm1206_vm0, %v3314_v30, %v3329_v2  ;;  %v11817_v14 = vpack.i.b16 %v3788_v22, %v3787_v55  ;;  %15207 = vst [vmem:[#allocation81_spill] sm:$0xff] %v11821_v43  ;;  %v3780_v33 = vshrl.u32 %v11821_v43, 16  ;;  %v3435_v45 = vrot.slane %v11683_v46, 4 }
 0x2e6   : > { %15205 = vst [vmem:[#allocation79_spill] sm:$0xff] %v11815_v53  ;;  %v3779_v28 = vshrl.u32 %v11815_v53, 16  ;;  %v11835_v22 = vsel %vm1206_vm0, %v3323_v24, %v11518_v50  ;;  %v3439_v30 = vrot.slane %v3426_v52, 4  ;;  %v11843_v8 = vpack.i.b16 %v3764_v57, %v3763_v20 }
 0x2e7   : > { %15206 = vst [vmem:[#allocation80_spill] sm:$0xff] %v11817_v14  ;;  %v11847_v6 = vsel %vm1206_vm0, %v3435_v45, %v11672_v10  ;;  %v3755_v50 = vshrl.u32 %v11835_v22, 16  ;;  %v3747_v52 = vshrl.u32 %v11732_v61, 16  ;;  %v3723_v20 = vshrl.u32 %v11752_v1, 16 }
 0x2e8   : > { %15208 = vst [vmem:[#allocation82_spill] sm:$0xff] %v11835_v22  ;;  %v11841_v60 = vpack.i.b16 %v3780_v33, %v3779_v28  ;;  %v11850_v2 = vsel %vm1206_vm0, %v3439_v30, %v3402_v62  ;;  %v3756_v24 = vshrl.u32 %v11847_v6, 16  ;;  %v3748_v28 = vshrl.u32 %v11726_v18, 16  ;;  %v9742_v22 = vpop.trf.xlu2 }
 0x2e9   : > { %15209 = vst [vmem:[#allocation83_spill] sm:$0xff] %v11838_v7  ;;  %v3724_v62 = vshrl.u32 %v11773_v35, 16  ;;  %v3771_v16 = vshrl.u32 %v11838_v7, 16  ;;  %v3772_v57 = vshrl.u32 %v11850_v2, 16  ;;  %v3319_v45 = vrot.slane %v11716_v42, 4 }
 0x2ea   : > { %15210 = vst [vmem:[#allocation84_spill] sm:$0xff] %v11841_v60  ;;  %v11856_v46 = vpack.i.b16 %v3756_v24, %v3755_v50  ;;  %v11865_v33 = vpack.i.b16 %v3748_v28, %v3747_v52  ;;  %v3431_v30 = vrot.slane %v11710_v0, 4  ;;  %v3001_v28 = vrot.slane %v11617_v63, 4 }
 0x2eb   : > { %v11831_v55 = vpop.trf.xlu0  ;;  %15211 = vst [vmem:[#allocation85_spill] sm:$0xff] %v11843_v8  ;;  %v11872_v24 = vpack.i.b16 %v3724_v62, %v3723_v20  ;;  %v11874_v48 = vpack.i.b16 %v3772_v57, %v3771_v16  ;;  %v11878_v10 = vsel %vm1206_vm0, %v3319_v45, %v11702_v56  ;;  %v9747_v20 = vpop.trf.xlu1  ;;  %v3123_v16 = vrot.slane %v11478_v40, 4 }
 0x2ec   : > { %15212 = vst [vmem:[#allocation86_spill] sm:$0xff] %v11847_v6  ;;  %v11882_v52 = vsel %vm1206_vm0, %v3431_v30, %v11694_v4  ;;  %v3739_v42 = vshrl.u32 %v11878_v10, 16  ;;  %v3125_v56 = vrot.slane %v11685_v27, 4  ;;  %v3035_v4 = vrot.slane %v11797_v5, 4 }
 0x2ed   : > { %15213 = vst [vmem:[#allocation87_spill] sm:$0xff] %v11850_v2  ;;  %v3740_v0 = vshrl.u32 %v11882_v52, 16  ;;  %v2999_v45 = vrot.slane %v11596_v15, 4  ;;  %v3124_v30 = vsel %vm1206_vm0, %v3123_v16, %v11685_v27  ;;  %v11912_v27 = vperm.slane %v11663_v17, %v11107_v3 }
 0x2ee   : > { %15214 = vst [vmem:[#allocation88_spill] sm:$0xff] %v11856_v46  ;;  %v3036_v6 = vsel %vm1206_vm0, %v3035_v4, %v9742_v22 }
 0x2ef   : > { %15215 = vst [vmem:[#allocation89_spill] sm:$0xff] %v11865_v33  ;;  %v11888_v62 = vpack.i.b16 %v3740_v0, %v3739_v42  ;;  %v11902_v42 = vperm.slane %v11645_v36, %v11107_v3  ;;  %v3037_v0 = vrot.slane %v9742_v22, 4  ;;  %v3023_v33 = vrot.slane %v9747_v20, 4 }
 0x2f0   : > { %15216 = vst [vmem:[#allocation90_spill] sm:$0xff] %v11872_v24  ;;  %v3000_v16 = vsel %vm1206_vm0, %v2999_v45, %v11617_v63  ;;  %v9743_v24 = vpop.trf.xlu2  ;;  %v3147_v22 = vrot.slane %v11831_v55, 4  ;;  %v11929_v45 = vperm.slane %v3036_v6, %v11107_v3  ;;  %v3059_v7 = vrot.slane %v11912_v27, 4 }
 0x2f1   : > { %15217 = vst [vmem:[#allocation91_spill] sm:$0xff] %v11874_v48  ;;  %v3002_v48 = vsel %vm1206_vm0, %v11596_v15, %v3001_v28  ;;  %v3047_v4 = vrot.slane %v11902_v42, 4  ;;  %v3038_v63 = vsel %vm1206_vm0, %v11797_v5, %v3037_v0  ;;  %v3149_v28 = vrot.slane %v9743_v24, 4 }
 0x2f2   : > { %15218 = vst [vmem:[#allocation92_spill] sm:$0xff] %v11878_v10  ;;  %v3111_v10 = vrot.slane %v11647_v47, 4  ;;  %v11935_v2 = vperm.slane %v3000_v16, %v11107_v3  ;;  %v11944_v5 = vperm.slane %v3038_v63, %v11107_v3  ;;  %v3148_v0 = vsel %vm1206_vm0, %v3147_v22, %v9743_v24 }
 0x2f3   : > { %v11870_v50 = vpop.trf.xlu0  ;;  %15219 = vst [vmem:[#allocation93_spill] sm:$0xff] %v11882_v52  ;;  %v11907_v52 = vperm.slane %v3124_v30, %v11107_v3  ;;  %v9748_v36 = vpop.trf.xlu1 }
 0x2f4   : > { %15220 = vst [vmem:[#allocation94_spill] sm:$0xff] %v11888_v62  ;;  %v3126_v62 = vsel %vm1206_vm0, %v11478_v40, %v3125_v56  ;;  %v3112_v40 = vsel %vm1206_vm0, %v3111_v10, %v11677_v25  ;;  %v3113_v56 = vrot.slane %v11677_v25, 4  ;;  %v3048_v16 = vsel %vm1206_vm0, %v3047_v4, %v11935_v2 }
 0x2f5   : > { %v11924_v17 = vperm.slane %v3126_v62, %v11107_v3  ;;  %v3159_v15 = vrot.slane %v11907_v52, 4  ;;  %v3118_v62 = vperm.slane %v3112_v40, %v11107_v3  ;;  %v3135_v24 = vrot.slane %v9748_v36, 4 }
 0x2f6   : > { %v3114_v6 = vsel %vm1206_vm0, %v11647_v47, %v3113_v56  ;;  %v3150_v47 = vsel %vm1206_vm0, %v11831_v55, %v3149_v28  ;;  %v3054_v4 = vperm.slane %v3048_v16, %v11119_v13 }
 0x2f7   : > { %v3171_v40 = vrot.slane %v11924_v17, 4  ;;  %v3160_v21 = vsel %vm1206_vm0, %v3159_v15, %v3118_v62  ;;  %v3083_v15 = vrot.slane %v11944_v5, 4  ;;  %v3161_v43 = vrot.slane %v3118_v62, 4 }
 0x2f8   : > { %v3166_v55 = vperm.slane %v3160_v21, %v11119_v13  ;;  %v3097_v53 = vrot.slane %v3054_v4, 4 }
 0x2fa   : > { %v3209_v8 = vrot.slane %v3166_v55, 4 }
 0x2fb   : > { %v11891_v57 = vpop.trf.xlu0 }
 0x303   : > { %v9737_v30 = vpop.trf.xlu0 }
 0x304   : > { %v3024_v10 = vsel %vm1206_vm0, %v3023_v33, %v9737_v30  ;;  %v3025_v25 = vrot.slane %v9737_v30, 4  ;;  %v3010_v30 = vperm.slane %v3002_v48, %v11107_v3  ;;  %v11961_v48 = vperm.slane %v3148_v0, %v11107_v3 }
 0x305   : > { %v11939_v46 = vperm.slane %v3024_v10, %v11107_v3  ;;  %v3071_v10 = vrot.slane %v11929_v45, 4 }
 0x306   : > { %v3026_v33 = vsel %vm1206_vm0, %v9747_v20, %v3025_v25  ;;  %v3122_v20 = vperm.slane %v3114_v6, %v11107_v3  ;;  %v3060_v63 = vsel %vm1206_vm0, %v3059_v7, %v3010_v30  ;;  %v11971_v25 = vperm.slane %v3150_v47, %v11107_v3 }
 0x307   : > { %v11957_v56 = vperm.slane %v3026_v33, %v11107_v3  ;;  %v3072_v22 = vsel %vm1206_vm0, %v3071_v10, %v11939_v46  ;;  %v9749_v33 = vpop.trf.xlu1  ;;  %v3061_v7 = vrot.slane %v3010_v30, 4  ;;  %v11978_v60 = vperm.slane %v3060_v63, %v11119_v13 }
 0x308   : > { %v3172_v28 = vsel %vm1206_vm0, %v3171_v40, %v3122_v20  ;;  %v3078_v0 = vperm.slane %v3072_v22, %v11119_v13  ;;  %v3183_v21 = vrot.slane %v11961_v48, 4  ;;  %v11981_v40 = vpop.trf.xlu2  ;;  %v3173_v58 = vrot.slane %v3122_v20, 4 }
 0x309   : > { %v3084_v10 = vsel %vm1206_vm0, %v3083_v15, %v11957_v56  ;;  %v11987_v22 = vperm.slane %v3172_v28, %v11119_v13  ;;  %v3471_v59 = vrot.slane %v9749_v33, 4  ;;  %v3062_v20 = vsel %vm1206_vm0, %v11912_v27, %v3061_v7 }
 0x30a   : > { %v3098_v62 = vsel %vm1206_vm0, %v3078_v0, %v3097_v53  ;;  %v3174_v27 = vsel %vm1206_vm0, %v11924_v17, %v3173_v58  ;;  %v12028_v58 = vperm.slane %v11744_v38, %v11119_v13  ;;  %v3070_v38 = vperm.slane %v3062_v20, %v11119_v13 }
 0x30b   : > { %v9738_v6 = vpop.trf.xlu0  ;;  %v3217_v14 = vrot.slane %v11987_v22, 4 }
 0x30c   : > { %v3136_v16 = vsel %vm1206_vm0, %v3135_v24, %v9738_v6  ;;  %v3137_v51 = vrot.slane %v9738_v6, 4  ;;  %v3195_v24 = vrot.slane %v11971_v25, 4  ;;  %v11995_v6 = vperm.slane %v3084_v10, %v11119_v13 }
 0x30d   : > { %v11984_v47 = vperm.slane %v3136_v16, %v11107_v3  ;;  %v3095_v16 = vrot.slane %v3078_v0, 4  ;;  %v12013_v0 = vsel %vm1206_vm0, %v11907_v52, %v3161_v43  ;;  %v3085_v43 = vrot.slane %v11957_v56, 4 }
 0x30e   : > { %v3138_v15 = vsel %vm1206_vm0, %v9748_v36, %v3137_v51  ;;  %v3105_v36 = vrot.slane %v11978_v60, 4 }
 0x30f   : > { %v3146_v30 = vperm.slane %v3138_v15, %v11107_v3  ;;  %v3184_v63 = vsel %vm1206_vm0, %v3183_v21, %v11984_v47  ;;  %v9750_v18 = vpop.trf.xlu1  ;;  %v3086_v56 = vsel %vm1206_vm0, %v11944_v5, %v3085_v43  ;;  %v3109_v43 = vrot.slane %v3070_v38, 4 }
 0x310   : > { %v3190_v23 = vperm.slane %v3184_v63, %v11119_v13  ;;  %v3811_v63 = vshrl.u32 %v3098_v62, 16  ;;  %v3106_v53 = vsel %vm1206_vm0, %v11995_v6, %v3105_v36  ;;  %v9745_v7 = vpop.trf.xlu2 }
 0x311   : > { %v3196_v51 = vsel %vm1206_vm0, %v3195_v24, %v3146_v30  ;;  %v3197_v29 = vrot.slane %v3146_v30, 4  ;;  %v3843_v36 = vshrl.u32 %v3106_v53, 16  ;;  %v3485_v30 = vrot.slane %v11981_v40, 4 }
 0x312   : > { %v12003_v15 = vperm.slane %v3196_v51, %v11119_v13  ;;  %v3207_v21 = vrot.slane %v3190_v23, 4  ;;  %v3210_v10 = vsel %vm1206_vm0, %v3190_v23, %v3209_v8  ;;  %v3096_v51 = vsel %vm1206_vm0, %v3095_v16, %v3054_v4 }
 0x313   : > { %v9739_v1 = vpop.trf.xlu0  ;;  %v3812_v35 = vshrl.u32 %v3210_v10, 16  ;;  %v3809_v23 = vpack.i.b16 %v3210_v10, %v3098_v62  ;;  %v3803_v4 = vshrl.u32 %v3096_v51, 16  ;;  %v3597_v17 = vrot.slane %v9745_v7, 4 }
 0x314   : > { %v3473_v24 = vrot.slane %v9739_v1, 4  ;;  %v3218_v28 = vsel %vm1206_vm0, %v12003_v15, %v3217_v14  ;;  %v3208_v61 = vsel %vm1206_vm0, %v3207_v21, %v3166_v55  ;;  %v3472_v52 = vsel %vm1206_vm0, %v3471_v59, %v9739_v1 }
 0x315   : > { %v3813_v8 = vpack.i.b16 %v3812_v35, %v3811_v63  ;;  %v3844_v9 = vshrl.u32 %v3218_v28, 16  ;;  %v3804_v35 = vshrl.u32 %v3208_v61, 16  ;;  %v3841_v14 = vpack.i.b16 %v3218_v28, %v3106_v53 }
 0x316   : > { %v3474_v16 = vsel %vm1206_vm0, %v9749_v33, %v3473_v24  ;;  %v3583_v55 = vrot.slane %v9750_v18, 4  ;;  %v3483_v21 = vrot.slane %v11870_v50, 4  ;;  %v3801_v10 = vpack.i.b16 %v3208_v61, %v3096_v51 }
 0x317   : > { %9752 = vxpose.binary.xlu1.c.b16.end [2/4] (short) (narrow) %v3813_v8, %v3809_v23, 16  ;;  %v3845_v62 = vpack.i.b16 %v3844_v9, %v3843_v36  ;;  %v3805_v63 = vpack.i.b16 %v3804_v35, %v3803_v4  ;;  %v3198_v59 = vsel %vm1206_vm0, %v11971_v25, %v3197_v29  ;;  %v3595_v9 = vrot.slane %v11891_v57, 4 }
 0x318   : > { %v12033_v1 = vperm.slane %v3472_v52, %v11107_v3  ;;  %v12039_v61 = vperm.slane %v3474_v16, %v11107_v3  ;;  %v12044_v28 = vperm.slane %v11758_v39, %v11119_v13  ;;  %v3182_v53 = vperm.slane %v3174_v27, %v11119_v13 }
 0x319   : > { %9764 = vxpose.binary.xlu0.c.b16.end [2/4] (short) (narrow) %v3845_v62, %v3841_v14, 16  ;;  %v3484_v24 = vsel %vm1206_vm0, %v3483_v21, %v11981_v40  ;;  %v3486_v5 = vsel %vm1206_vm0, %v11870_v50, %v3485_v30  ;;  %v3206_v51 = vperm.slane %v3198_v59, %v11119_v13  ;;  %v3185_v30 = vrot.slane %v11984_v47, 4 }
 0x31a   : > { %9756 = vxpose.binary.xlu2.c.b16.end [2/4] (short) (narrow) %v3805_v63, %v3801_v10, 16  ;;  %v3598_v39 = vsel %vm1206_vm0, %v11891_v57, %v3597_v17  ;;  %v3521_v20 = vrot.slane %v12033_v1, 4  ;;  %v3094_v36 = vperm.slane %v3086_v56, %v11119_v13  ;;  %v3596_v27 = vsel %vm1206_vm0, %v3595_v9, %v9745_v7 }
 0x31b   : > { %v9740_v33 = vpop.trf.xlu0  ;;  %v3533_v40 = vrot.slane %v12039_v61, 4  ;;  %v12067_v52 = vperm.slane %v3484_v24, %v11107_v3  ;;  %v3221_v35 = vrot.slane %v3182_v53, 4  ;;  %v12071_v16 = vperm.slane %v3486_v5, %v11107_v3 }
 0x31c   : > { %v3584_v29 = vsel %vm1206_vm0, %v3583_v55, %v9740_v33  ;;  %v3585_v25 = vrot.slane %v9740_v33, 4  ;;  %v3107_v57 = vrot.slane %v3094_v36, 4  ;;  %v3219_v14 = vrot.slane %v3206_v51, 4 }
 0x31d   : > { %v12054_v23 = vperm.slane %v3584_v29, %v11107_v3  ;;  %v12078_v62 = vperm.slane %v3596_v27, %v11107_v3  ;;  %v3073_v55 = vrot.slane %v11939_v46, 4  ;;  %v3522_v21 = vsel %vm1206_vm0, %v12067_v52, %v3521_v20 }
 0x31e   : > { %v3586_v8 = vsel %vm1206_vm0, %v9750_v18, %v3585_v25  ;;  %v12074_v18 = vperm.slane %v3598_v39, %v11107_v3  ;;  %v3534_v10 = vsel %vm1206_vm0, %v12071_v16, %v3533_v40  ;;  %v12087_v63 = vsel %vm1206_vm0, %v3107_v57, %v3070_v38  ;;  %v15224_v57 = vld [vmem:[#allocation67_spill] sm:$0xff] }
 0x31f   : > { %v12064_v50 = vperm.slane %v3586_v8, %v11107_v3  ;;  %v3633_v4 = vrot.slane %v12054_v23, 4  ;;  %v12090_v17 = vsel %vm1206_vm0, %v3219_v14, %v3182_v53  ;;  %v12093_v59 = vsel %vm1206_vm0, %v3094_v36, %v3109_v43  ;;  %v15226_v14 = vld [vmem:[#allocation62_spill] sm:$0xff] }
 0x320   : > { %v3849_v9 = vpack.i.b16 %v12090_v17, %v12087_v63  ;;  %v12102_v56 = vsel %vm1206_vm0, %v3206_v51, %v3221_v35  ;;  %v12106_v33 = vperm.slane %v11777_v19, %v11119_v13  ;;  %v12110_v38 = vperm.slane %v11786_v41, %v11119_v13 }
 0x321   : > { %v3645_v7 = vrot.slane %v12064_v50, 4  ;;  %v3634_v46 = vsel %vm1206_vm0, %v12078_v62, %v3633_v4  ;;  %v3859_v29 = vshrl.u32 %v12093_v59, 16  ;;  %v3860_v25 = vshrl.u32 %v12102_v56, 16 }
 0x322   : > { %v3074_v53 = vsel %vm1206_vm0, %v11929_v45, %v3073_v55  ;;  %v3186_v24 = vsel %vm1206_vm0, %v11961_v48, %v3185_v30  ;;  %v12119_v5 = vperm.slane %v3522_v21, %v11119_v13  ;;  %v12122_v19 = vperm.slane %v3534_v10, %v11119_v13  ;;  %v15228_v30 = vld [vmem:[#allocation66_spill] sm:$0xff] }
 0x323   : > { %v3646_v47 = vsel %vm1206_vm0, %v12074_v18, %v3645_v7  ;;  %v12125_v51 = vperm.slane %v3634_v46, %v11119_v13  ;;  %v15221_v39 = vpack.i.b16 %v11580_v34, %v11546_v49  ;;  %v3557_v45 = vrot.slane %v12044_v28, 4  ;;  %v15225_v7 = vld [vmem:[#allocation65_spill] sm:$0xff] }
 0x324   : > { %v12128_v41 = vperm.slane %v3646_v47, %v11119_v13  ;;  %v12135_v48 = vpack.i.b16 %v3860_v25, %v3859_v29  ;;  %v3549_v20 = vrot.slane %v12028_v58, 4  ;;  %v3661_v8 = vrot.slane %v12106_v33, 4 }
 0x325   : > { %v3194_v36 = vperm.slane %v3186_v24, %v11119_v13  ;;  %v12142_v27 = vsel %vm1206_vm0, %v12122_v19, %v3557_v45  ;;  %v3669_v40 = vrot.slane %v12110_v38, 4  ;;  %v15222_v49 = vrot.slane %v11935_v2, 4 }
 0x326   : > { %v3082_v43 = vperm.slane %v3074_v53, %v11119_v13  ;;  %v15223_v4 = vpack.i.b16 %v11621_v32, %v11556_v12  ;;  %v3215_v35 = vrot.slane %v12003_v15, 4  ;;  %v15227_v55 = vpack.i.b16 %v15225_v7, %v15226_v14 }
 0x327   : > { %9771 = vxpose.binary.xlu1.c.b16.start [1/4] (short) (narrow) %v11608_v11, %v15221_v39, 16  ;;  %v3050_v34 = vsel %vm1206_vm0, %v11902_v42, %v15222_v49  ;;  %v3170_v11 = vperm.slane %v12013_v0, %v11119_v13  ;;  %v12163_v2 = vsel %vm1206_vm0, %v12119_v5, %v3549_v20  ;;  %v3103_v32 = vrot.slane %v11995_v6, 4 }
 0x328   : > { %v12167_v42 = vsel %vm1206_vm0, %v12125_v51, %v3661_v8  ;;  %v12171_v12 = vsel %vm1206_vm0, %v12128_v41, %v3669_v40  ;;  %v3923_v0 = vshrl.u32 %v12142_v27, 16  ;;  %v3211_v10 = vrot.slane %v3194_v36, 4 }
 0x329   : > { %9767 = vxpose.binary.xlu0.c.b16.start [1/4] (short) (narrow) %v15224_v57, %v15223_v4, 16  ;;  %v3889_v15 = vpack.i.b16 %v12167_v42, %v12163_v2  ;;  %v3924_v21 = vshrl.u32 %v12171_v12, 16  ;;  %v3058_v46 = vperm.slane %v3050_v34, %v11119_v13  ;;  %v3216_v47 = vsel %vm1206_vm0, %v3215_v35, %v11987_v22 }
 0x32a   : > { %9759 = vxpose.binary.xlu2.c.b16.start [1/4] (short) (narrow) %v15228_v30, %v15227_v55, 16  ;;  %v3099_v25 = vrot.slane %v3082_v43, 4  ;;  %v3104_v53 = vsel %vm1206_vm0, %v3103_v32, %v11978_v60  ;;  %v3213_v6 = vrot.slane %v3170_v11, 4  ;;  %v3836_v24 = vshrl.u32 %v3216_v47, 16 }
 0x32b   : > { %v12181_v29 = vpack.i.b16 %v3924_v21, %v3923_v0  ;;  %v3212_v39 = vsel %vm1206_vm0, %v3211_v10, %v3170_v11  ;;  %v3921_v45 = vpack.i.b16 %v12171_v12, %v12142_v27  ;;  %v3101_v20 = vrot.slane %v3058_v46, 4  ;;  %v15258_v12 = vld [vmem:[#allocation52_spill] sm:$0xff] }
 0x32c   : > { %v3214_v8 = vsel %vm1206_vm0, %v3194_v36, %v3213_v6  ;;  %v3835_v40 = vshrl.u32 %v3104_v53, 16  ;;  %v3100_v49 = vsel %vm1206_vm0, %v3099_v25, %v3058_v46  ;;  %v3820_v22 = vshrl.u32 %v3212_v39, 16 }
 0x32d   : > { %v3102_v34 = vsel %vm1206_vm0, %v3082_v43, %v3101_v20  ;;  %v3833_v4 = vpack.i.b16 %v3216_v47, %v3104_v53  ;;  %v3828_v35 = vshrl.u32 %v3214_v8, 16  ;;  %v3519_v60 = vrot.slane %v12067_v52, 4 }
 0x32e   : > { %v3837_v57 = vpack.i.b16 %v3836_v24, %v3835_v40  ;;  %v3819_v7 = vshrl.u32 %v3100_v49, 16  ;;  %v3531_v11 = vrot.slane %v12071_v16, 4  ;;  %v3827_v14 = vshrl.u32 %v3102_v34, 16 }
 0x32f   : > { %v3520_v55 = vsel %vm1206_vm0, %v3519_v60, %v12033_v1  ;;  %v3817_v36 = vpack.i.b16 %v3212_v39, %v3100_v49  ;;  %v3825_v0 = vpack.i.b16 %v3214_v8, %v3102_v34  ;;  %v3631_v21 = vrot.slane %v12078_v62, 4 }
 0x330   : > { %v3821_v30 = vpack.i.b16 %v3820_v22, %v3819_v7  ;;  %v3532_v32 = vsel %vm1206_vm0, %v3531_v11, %v12039_v61  ;;  %v3829_v43 = vpack.i.b16 %v3828_v35, %v3827_v14  ;;  %v3857_v52 = vpack.i.b16 %v12102_v56, %v12093_v59  ;;  %v15229_v7 = vld [vmem:[#allocation71_spill] sm:$0xff]  ;;  %v15230_v11 = vld [vmem:[#allocation68_spill] sm:$0xff]  ;;  %v15266_v59 = vld [vmem:[#allocation82_spill] sm:$0xff] }
 0x331   : > { %v12201_v16 = vperm.slane %v3520_v55, %v11119_v13  ;;  %v3538_v10 = vperm.slane %v3532_v32, %v11119_v13  ;;  %v3632_v1 = vsel %vm1206_vm0, %v3631_v21, %v12054_v23  ;;  %v3851_v46 = vshrl.u32 %v12087_v63, 16  ;;  %v15254_v63 = vld [vmem:[#allocation88_spill] sm:$0xff] }
 0x332   : > { %v3852_v61 = vshrl.u32 %v12090_v17, 16  ;;  %v3514_v62 = vperm.slane %v11764_v54, %v11119_v13  ;;  %v3643_v47 = vrot.slane %v12074_v18, 4  ;;  %v3547_v6 = vrot.slane %v12119_v5, 4  ;;  %v15255_v17 = vld [vmem:[#allocation87_spill] sm:$0xff] }
 0x333   : > { %v3543_v53 = vrot.slane %v12201_v16, 4  ;;  %v3638_v24 = vperm.slane %v3632_v1, %v11119_v13  ;;  %v3551_v39 = vrot.slane %v3538_v10, 4  ;;  %v3502_v20 = vperm.slane %v11755_v26, %v11119_v13  ;;  %v15232_v1 = vld [vmem:[#allocation74_spill] sm:$0xff] }
 0x334   : > { %v12211_v25 = vpack.i.b16 %v3852_v61, %v3851_v46  ;;  %v3644_v23 = vsel %vm1206_vm0, %v3643_v47, %v12064_v50  ;;  %v3553_v8 = vrot.slane %v3514_v62, 4  ;;  %v3626_v54 = vperm.slane %v11795_v37, %v11119_v13  ;;  %v15233_v46 = vld [vmem:[#allocation72_spill] sm:$0xff]  ;;  %v15234_v61 = vld [vmem:[#allocation73_spill] sm:$0xff] }
 0x335   : > { %v3650_v18 = vperm.slane %v3644_v23, %v11119_v13  ;;  %v3655_v40 = vrot.slane %v3638_v24, 4  ;;  %v12226_v5 = vsel %vm1206_vm0, %v3547_v6, %v12028_v58  ;;  %v12229_v22 = vsel %vm1206_vm0, %v3543_v53, %v3502_v20  ;;  %v15236_v23 = vld [vmem:[#allocation76_spill] sm:$0xff] }
 0x336   : > { %v3554_v49 = vsel %vm1206_vm0, %v3538_v10, %v3553_v8  ;;  %v3555_v50 = vrot.slane %v12122_v19, 4  ;;  %v12233_v26 = vsel %vm1206_vm0, %v3551_v39, %v3514_v62  ;;  %v3614_v37 = vperm.slane %v11783_v31, %v11119_v13  ;;  %v15239_v8 = vld [vmem:[#allocation70_spill] sm:$0xff] }
 0x337   : > { %9772 = vxpose.binary.xlu1.c.b16.end [2/4] (short) (narrow) %v3837_v57, %v3833_v4, 16  ;;  %v3665_v34 = vrot.slane %v3626_v54, 4  ;;  %v3659_v4 = vrot.slane %v12125_v51, 4  ;;  %v3907_v57 = vshrl.u32 %v3554_v49, 16  ;;  %v3891_v35 = vshrl.u32 %v12163_v2, 16  ;;  %v15246_v2 = vld [vmem:[#allocation85_spill] sm:$0xff] }
 0x338   : > { %v3883_v58 = vshrl.u32 %v12226_v5, 16  ;;  %v3867_v60 = vshrl.u32 %v12229_v22, 16  ;;  %v15231_v19 = vpack.i.b16 %v11698_v44, %v15230_v11  ;;  %v3663_v55 = vrot.slane %v3650_v18, 4 }
 0x339   : > { %9768 = vxpose.binary.xlu0.c.b16.end [2/4] (short) (narrow) %v3821_v30, %v3817_v36, 16  ;;  %v3666_v14 = vsel %vm1206_vm0, %v3650_v18, %v3665_v34  ;;  %v3899_v31 = vshrl.u32 %v12233_v26, 16  ;;  %v12248_v36 = vsel %vm1206_vm0, %v3655_v40, %v3614_v37  ;;  %v3556_v51 = vsel %vm1206_vm0, %v3555_v50, %v12044_v28 }
 0x33a   : > { %9760 = vxpose.binary.xlu2.c.b16.end [2/4] (short) (narrow) %v3829_v43, %v3825_v0, 16  ;;  %v3908_v30 = vshrl.u32 %v3666_v14, 16  ;;  %v3892_v32 = vshrl.u32 %v12167_v42, 16  ;;  %v3905_v0 = vpack.i.b16 %v3666_v14, %v3554_v49  ;;  %v3667_v43 = vrot.slane %v12128_v41, 4  ;;  %v15237_v41 = vld [vmem:[#allocation75_spill] sm:$0xff]  ;;  %v15247_v42 = vld [vmem:[#allocation81_spill] sm:$0xff] }
 0x33b   : > { %v3660_v44 = vsel %vm1206_vm0, %v3659_v4, %v12106_v33  ;;  %v3664_v21 = vsel %vm1206_vm0, %v3663_v55, %v3626_v54  ;;  %v3865_v10 = vpack.i.b16 %v12248_v36, %v12229_v22  ;;  %v15235_v62 = vpack.i.b16 %v15233_v46, %v15234_v61  ;;  %v15240_v33 = vld [vmem:[#allocation69_spill] sm:$0xff]  ;;  %v15265_v46 = vld [vmem:[#allocation86_spill] sm:$0xff]  ;;  %v15269_v61 = vld [vmem:[#allocation48_spill] sm:$0xff] }
 0x33c   : > { %v3909_v28 = vpack.i.b16 %v3908_v30, %v3907_v57  ;;  %v3893_v47 = vpack.i.b16 %v3892_v32, %v3891_v35  ;;  %v3884_v53 = vshrl.u32 %v3660_v44, 16  ;;  %v3897_v6 = vpack.i.b16 %v3664_v21, %v12233_v26  ;;  %v15260_v30 = vld [vmem:[#allocation91_spill] sm:$0xff]  ;;  %v15261_v32 = vld [vmem:[#allocation90_spill] sm:$0xff] }
 0x33d   : > { %v15238_v39 = vpack.i.b16 %v15236_v23, %v15237_v41  ;;  %v15241_v18 = vpack.i.b16 %v15239_v8, %v15240_v33  ;;  %v3668_v54 = vsel %vm1206_vm0, %v3667_v43, %v12110_v38  ;;  %v3881_v40 = vpack.i.b16 %v3660_v44, %v12226_v5  ;;  %v15262_v43 = vld [vmem:[#allocation49_spill] sm:$0xff]  ;;  %v15277_v22 = vld [vmem:[#allocation51_spill] sm:$0xff] }
 0x33e   : > { %v3900_v49 = vshrl.u32 %v3664_v21, 16  ;;  %v3868_v50 = vshrl.u32 %v12248_v36, 16  ;;  %v3915_v34 = vshrl.u32 %v3556_v51, 16  ;;  %v3916_v4 = vshrl.u32 %v3668_v54, 16 }
 0x33f   : > { %v3913_v57 = vpack.i.b16 %v3668_v54, %v3556_v51  ;;  %v3885_v35 = vpack.i.b16 %v3884_v53, %v3883_v58  ;;  %v3545_v14 = vrot.slane %v3502_v20, 4  ;;  %v15242_v20 = vld [vmem:[#allocation80_spill] sm:$0xff]  ;;  %v15263_v44 = vunpack.i.l.bf16 %v15262_v43  ;;  %v15280_v43 = vld [vmem:[#allocation37_spill] sm:$0xff] }
 0x340   : > { %v3901_v26 = vpack.i.b16 %v3900_v49, %v3899_v31  ;;  %v3917_v11 = vpack.i.b16 %v3916_v4, %v3915_v34  ;;  %v15267_v56 = vpack.i.b16 %v15265_v46, %v15266_v59  ;;  %v9620_v36 = vunpack.i.h.bf16 %v15277_v22 }
 0x341   : > { %v3546_v38 = vsel %vm1206_vm0, %v12201_v16, %v3545_v14  ;;  %v15250_v16 = vld [vmem:[#allocation84_spill] sm:$0xff]  ;;  %v1810_v21 = vrot.slane %v15263_v44, 4  ;;  %v1264_v44 = vrot.slane %v15280_v43, 4  ;;  %v9619_v59 = vunpack.i.l.bf16 %v15277_v22 }
 0x342   : > { %v3875_v8 = vshrl.u32 %v3546_v38, 16 }
 0x347   : > { %9783 = vxpose.binary.xlu1.c.b16.start [1/4] (short) (narrow) %v15231_v19, %v15229_v7, 16  ;;  %v3869_v7 = vpack.i.b16 %v3868_v50, %v3867_v60  ;;  %v3657_v19 = vrot.slane %v3614_v37, 4  ;;  %v15244_v37 = vld [vmem:[#allocation63_spill] sm:$0xff]  ;;  %v15251_v60 = vld [vmem:[#allocation78_spill] sm:$0xff] }
 0x349   : > { %9775 = vxpose.binary.xlu0.c.b16.start [1/4] (short) (narrow) %v15235_v62, %v15232_v1, 16  ;;  %v3658_v55 = vsel %vm1206_vm0, %v3638_v24, %v3657_v19  ;;  %v15243_v24 = vld [vmem:[#allocation64_spill] sm:$0xff]  ;;  %v15264_v1 = vld [vmem:[#allocation89_spill] sm:$0xff]  ;;  %v15270_v62 = vunpack.i.l.bf16 %v15269_v61 }
 0x34a   : > { %9779 = vxpose.binary.xlu2.c.b16.start [1/4] (short) (narrow) %v15241_v18, %v15238_v39, 16  ;;  %v3873_v5 = vpack.i.b16 %v3658_v55, %v3546_v38  ;;  %v15245_v58 = vpack.i.b16 %v15243_v24, %v15244_v37  ;;  %v3876_v23 = vshrl.u32 %v3658_v55, 16  ;;  %v15274_v38 = vld [vmem:[#allocation94_spill] sm:$0xff] }
 0x34c   : > { %v3877_v18 = vpack.i.b16 %v3876_v23, %v3875_v8 }
 0x357   : > { %9784 = vxpose.binary.xlu1.c.b16.end [2/4] (short) (narrow) %v3889_v15, %v12181_v29, 16  ;;  %v15248_v15 = vld [vmem:[#allocation79_spill] sm:$0xff] }
 0x358   : > { %v15249_v29 = vpack.i.b16 %v15247_v42, %v15248_v15 }
 0x359   : > { %9776 = vxpose.binary.xlu0.c.b16.end [2/4] (short) (narrow) %v3873_v5, %v12135_v48, 16  ;;  %v15252_v48 = vld [vmem:[#allocation77_spill] sm:$0xff] }
 0x35a   : > { %9780 = vxpose.binary.xlu2.c.b16.end [2/4] (short) (narrow) %v3921_v45, %v3849_v9, 16  ;;  %v15253_v31 = vpack.i.b16 %v15251_v60, %v15252_v48  ;;  %v15256_v9 = vld [vmem:[#allocation83_spill] sm:$0xff]  ;;  %v15259_v45 = vunpack.i.l.bf16 %v15258_v12 }
 0x35b   : > { %v15257_v27 = vpack.i.b16 %v15255_v17, %v15256_v9 }
 0x35c   : > { %v1798_v51 = vrot.slane %v15259_v45, 4  ;;  %v1274_v45 = vrot.slane %v9620_v36, 4 }
 0x367   : > { %9808 = vxpose.binary.xlu1.c.b16.start [1/4] (short) (narrow) %v15245_v58, %v15242_v20, 16  ;;  %v15276_v20 = vld [vmem:[#allocation55_spill] sm:$0xff] }
 0x369   : > { %9787 = vxpose.binary.xlu0.c.b16.start [1/4] (short) (narrow) %v15249_v29, %v15246_v2, 16 }
 0x36a   : > { %9791 = vxpose.binary.xlu2.c.b16.start [1/4] (short) (narrow) %v15253_v31, %v15250_v16, 16 }
 0x377   : > { %9809 = vxpose.binary.xlu1.c.b16.end [2/4] (short) (narrow) %v3857_v52, %v3917_v11, 16  ;;  %v15268_v52 = vld [vmem:[#allocation38_spill] sm:$0xff] }
 0x379   : > { %9788 = vxpose.binary.xlu0.c.b16.end [2/4] (short) (narrow) %v3905_v0, %v3893_v47, 16  ;;  %v1799_v0 = vsel %vm1206_vm0, %v1798_v51, %v15268_v52 }
 0x37a   : > { %9792 = vxpose.binary.xlu2.c.b16.end [2/4] (short) (narrow) %v3913_v57, %v3909_v28, 16  ;;  %v1811_v28 = vsel %vm1206_vm0, %v1810_v21, %v15270_v62  ;;  %v1805_v47 = vperm.slane %v1799_v0, %v11107_v3 }
 0x37b   : > { %v1817_v53 = vperm.slane %v1811_v28, %v11107_v3 }
 0x37c   : > { %v1824_v41 = vrot.slane %v1805_v47, 4 }
 0x37d   : > { %v1822_v39 = vrot.slane %v1817_v53, 4 }
 0x37e   : > { %v1825_v33 = vsel %vm1206_vm0, %v1817_v53, %v1824_v41  ;;  %v1218_v53 = vrot.slane %v9619_v59, 4 }
 0x37f   : > { %v1833_v54 = vperm.slane %v1825_v33, %v11119_v13  ;;  %v1823_v49 = vsel %vm1206_vm0, %v1822_v39, %v1805_v47 }
 0x380   : > { %v1829_v50 = vperm.slane %v1823_v49, %v11119_v13 }
 0x381   : > { %v1848_v34 = vrot.slane %v1833_v54, 4  ;;  %v2024_v11 = vpack.c.bf16 %v1833_v54, %v1833_v54 }
 0x382   : > { %v1846_v4 = vrot.slane %v1829_v50, 4 }
 0x383   : > { %v1849_v57 = vsel %vm1206_vm0, 0.0, %v1848_v34 }
 0x384   : > { %v2025_v19 = vpack.c.bf16 %v1849_v57, %v1849_v57 }
 0x387   : > { %9812 = vxpose.binary.xlu1.c.b16.start [1/4] (short) (narrow) %v15257_v27, %v15254_v63, 16 }
 0x389   : > { %9816 = vxpose.binary.xlu0.c.b16.start [1/4] (short) (narrow) %v15261_v32, %v15260_v30, 16  ;;  %v15279_v30 = vld [vmem:[#allocation46_spill] sm:$0xff] }
 0x38a   : > { %9795 = vxpose.binary.xlu2.c.b16.start [1/4] (short) (narrow) %v15267_v56, %v15264_v1, 16  ;;  %v9610_v32 = vunpack.i.h.bf16 %v15279_v30  ;;  %v9609_v23 = vunpack.i.l.bf16 %v15279_v30 }
 0x38c   : > { %v1275_v1 = vsel %vm1206_vm0, %v1274_v45, %v9610_v32  ;;  %v1276_v46 = vrot.slane %v9610_v32, 4  ;;  %v1219_v57 = vsel %vm1206_vm0, %v1218_v53, %v9609_v23 }
 0x38d   : > { %v1281_v61 = vperm.slane %v1275_v1, %v11107_v3 }
 0x38e   : > { %v1277_v47 = vsel %vm1206_vm0, %v9620_v36, %v1276_v46 }
 0x38f   : > { %v1285_v49 = vperm.slane %v1277_v47, %v11107_v3 }
 0x397   : > { %9813 = vxpose.binary.xlu1.c.b16.end [2/4] (short) (narrow) %v3897_v6, %v3885_v35, 16  ;;  %v1847_v6 = vsel %vm1206_vm0, 0.0, %v1846_v4  ;;  %v2022_v35 = vpack.c.bf16 %v1829_v50, %v1829_v50  ;;  %v1286_v50 = vrot.slane %v1281_v61, 4 }
 0x398   : > { %v2023_v14 = vpack.c.bf16 %v1847_v6, %v1847_v6 }
 0x399   : > { %9817 = vxpose.binary.xlu0.c.b16.end [2/4] (short) (narrow) %v12211_v25, %v3901_v26, 16  ;;  %v15271_v25 = vld [vmem:[#allocation93_spill] sm:$0xff]  ;;  %v15272_v26 = vld [vmem:[#allocation92_spill] sm:$0xff] }
 0x39a   : > { %9796 = vxpose.binary.xlu2.c.b16.end [2/4] (short) (narrow) %v3881_v40, %v3877_v18, 16  ;;  %v15273_v55 = vpack.i.b16 %v15271_v25, %v15272_v26  ;;  %v15275_v40 = vld [vmem:[#allocation56_spill] sm:$0xff] }
 0x39b   : > { %v1880_v5 = vrot.slane %v15275_v40, 4  ;;  %v15281_v18 = vld [vmem:[#allocation36_spill] sm:$0xff] }
 0x39c   : > { %v1208_v54 = vrot.slane %v15281_v18, 4 }
 0x39d   : > { %v1881_v24 = vsel %vm1206_vm0, %v15276_v20, %v1880_v5  ;;  %v1225_v20 = vperm.slane %v1219_v57, %v11107_v3 }
 0x39e   : > { %v1889_v37 = vperm.slane %v1881_v24, %v11119_v13  ;;  %v15284_v24 = vld [vmem:[#allocation61_spill] sm:$0xff] }
 0x3a0   : > { %v1904_v58 = vrot.slane %v1889_v37, 4  ;;  %v2032_v42 = vpack.c.bf16 %v1889_v37, %v1889_v37  ;;  %v9655_v37 = vunpack.i.h.bf16 %v15284_v24 }
 0x3a2   : > { %v1905_v2 = vsel %vm1206_vm0, 0.0, %v1904_v58 }
 0x3a3   : > { %v2033_v15 = vpack.c.bf16 %v1905_v2, %v1905_v2 }
 0x3a7   : > { %9830 = vxpose.binary.xlu1.c.b16.start.end [1/2] (short) (narrow) %v2025_v19, %v2024_v11, 32  ;;  %v15282_v11 = vld [vmem:[#allocation60_spill] sm:$0xff] }
 0x3a8   : > { %v9665_v19 = vunpack.i.h.bf16 %v15282_v11  ;;  %v9664_v32 = vunpack.i.l.bf16 %v15282_v11 }
 0x3a9   : > { %9820 = vxpose.binary.xlu0.c.b16.start.end [1/2] (short) (narrow) %v2023_v14, %v2022_v35, 32  ;;  %v1220_v35 = vrot.slane %v9609_v23, 4  ;;  %v15283_v14 = vld [vmem:[#allocation58_spill] sm:$0xff] }
 0x3aa   : > { %9799 = vxpose.binary.xlu2.c.b16.start [1/4] (short) (narrow) %v15274_v38, %v15273_v55, 16  ;;  %v9660_v25 = vunpack.i.h.bf16 %v15283_v14  ;;  %v1298_v38 = vrot.slane %v1285_v49, 4  ;;  %v1386_v2 = vrot.slane %v9665_v19, 4 }
 0x3ab   : > { %v12347_v60 = vpop.trf.xlu2 }
 0x3ac   : > { %v1374_v45 = vrot.slane %v9660_v25, 4  ;;  %v1387_v47 = vsel %vm1206_vm0, %v1386_v2, %v9655_v37 }
 0x3b3   : > { %v12345_v16 = vpop.trf.xlu1  ;;  %v12353_v63 = vpop.trf.xlu2 }
 0x3b5   : > { %v12343_v29 = vpop.trf.xlu0 }
 0x3ba   : > { %9800 = vxpose.binary.xlu2.c.b16.end [2/4] (short) (narrow) %v3869_v7, %v3865_v10, 16  ;;  %v15278_v10 = vld [vmem:[#allocation47_spill] sm:$0xff] }
 0x3bb   : > { %v12351_v31 = vpop.trf.xlu1  ;;  %v9615_v7 = vunpack.i.h.bf16 %v15278_v10  ;;  %v9614_v52 = vunpack.i.l.bf16 %v15278_v10 }
 0x3bd   : > { %v12349_v48 = vpop.trf.xlu0  ;;  %v1262_v51 = vrot.slane %v9615_v7, 4  ;;  %v1265_v56 = vsel %vm1206_vm0, %v9615_v7, %v1264_v44  ;;  %v1205_v8 = vrot.slane %v9614_v52, 4  ;;  %v1209_v4 = vsel %vm1206_vm0, %v9614_v52, %v1208_v54 }
 0x3be   : > { %v1273_v28 = vperm.slane %v1265_v56, %v11107_v3  ;;  %v12393_v40 = vperm.slane %v1209_v4, %v11107_v3  ;;  %v1221_v7 = vsel %vm1206_vm0, %v9619_v59, %v1220_v35  ;;  %v1230_v56 = vrot.slane %v1225_v20, 4 }
 0x3bf   : > { %v1263_v21 = vsel %vm1206_vm0, %v1262_v51, %v15280_v43  ;;  %v1207_v6 = vsel %vm1206_vm0, %v1205_v8, %v15281_v18  ;;  %v15286_v43 = vld [vmem:[#allocation40_spill] sm:$0xff]  ;;  %v1330_v54 = vrot.slane %v9664_v32, 4 }
 0x3c0   : > { %v1269_v0 = vperm.slane %v1263_v21, %v11107_v3  ;;  %v1300_v34 = vrot.slane %v1273_v28, 4  ;;  %v1213_v58 = vperm.slane %v1207_v6, %v11107_v3  ;;  %v1299_v51 = vsel %vm1206_vm0, %v1298_v38, %v1273_v28 }
 0x3c1   : > { %v1320_v44 = vrot.slane %v15286_v43, 4  ;;  %v1244_v46 = vrot.slane %v12393_v40, 4  ;;  %v9659_v28 = vunpack.i.l.bf16 %v15283_v14  ;;  %v1305_v53 = vperm.slane %v1299_v51, %v11119_v13 }
 0x3c2   : > { %v1288_v33 = vrot.slane %v1269_v0, 4  ;;  %v1287_v26 = vsel %vm1206_vm0, %v1286_v50, %v1269_v0  ;;  %v1301_v5 = vsel %vm1206_vm0, %v1285_v49, %v1300_v34  ;;  %v1388_v0 = vrot.slane %v9655_v37, 4 }
 0x3c3   : > { %v12403_v36 = vperm.slane %v1287_v26, %v11119_v13  ;;  %v1309_v30 = vperm.slane %v1301_v5, %v11119_v13  ;;  %v1232_v59 = vrot.slane %v1213_v58, 4  ;;  %v9654_v50 = vunpack.i.l.bf16 %v15284_v24 }
 0x3c4   : > { %v1289_v55 = vsel %vm1206_vm0, %v1281_v61, %v1288_v33  ;;  %v1229_v61 = vperm.slane %v1221_v7, %v11107_v3  ;;  %v1231_v4 = vsel %vm1206_vm0, %v1230_v56, %v1213_v58  ;;  %v1389_v57 = vsel %vm1206_vm0, %v9665_v19, %v1388_v0 }
 0x3c5   : > { %v12406_v10 = vperm.slane %v1289_v55, %v11119_v13  ;;  %v1310_v23 = vrot.slane %v12403_v36, 4  ;;  %v1316_v18 = vrot.slane %v1309_v30, 4  ;;  %v1393_v6 = vperm.slane %v1387_v47, %v11107_v3 }
 0x3c6   : > { %v1233_v14 = vsel %vm1206_vm0, %v1225_v20, %v1232_v59  ;;  %v1318_v26 = vrot.slane %v9659_v28, 4  ;;  %v1314_v5 = vrot.slane %v1305_v53, 4  ;;  %v1444_v24 = vpack.c.bf16 %v1309_v30, %v1309_v30 }
 0x3c7   : > { %9835 = vxpose.binary.xlu1.c.b16.start.end [1/2] (short) (narrow) %v2033_v15, %v2032_v42, 32  ;;  %v15285_v42 = vld [vmem:[#allocation41_spill] sm:$0xff]  ;;  %v1312_v8 = vrot.slane %v12406_v10, 4  ;;  %v12441_v55 = vsel %vm1206_vm0, 0.0, %v1310_v23  ;;  %v1317_v19 = vsel %vm1206_vm0, 0.0, %v1316_v18  ;;  %v1397_v58 = vperm.slane %v1389_v57, %v11107_v3 }
 0x3c8   : > { %v1376_v15 = vrot.slane %v15285_v42, 4  ;;  %v1375_v33 = vsel %vm1206_vm0, %v1374_v45, %v15285_v42  ;;  %v1331_v2 = vsel %vm1206_vm0, %v1330_v54, %v9654_v50  ;;  %v12452_v20 = vperm.slane %v1231_v4, %v11119_v13 }
 0x3c9   : > { %v12444_v38 = vsel %vm1206_vm0, 0.0, %v1312_v8  ;;  %v1245_v7 = vsel %vm1206_vm0, %v1229_v61, %v1244_v46  ;;  %v1398_v45 = vrot.slane %v1393_v6, 4  ;;  %v1442_v51 = vpack.c.bf16 %v1305_v53, %v1305_v53 }
 0x3ca   : > { %v1377_v52 = vsel %vm1206_vm0, %v9660_v25, %v1376_v15  ;;  %v1381_v25 = vperm.slane %v1375_v33, %v11107_v3  ;;  %v1242_v15 = vrot.slane %v1229_v61, 4  ;;  %v12456_v56 = vperm.slane %v1233_v14, %v11119_v13 }
 0x3cb   : > { %v12361_v27 = vpop.trf.xlu2  ;;  %v1385_v49 = vperm.slane %v1377_v52, %v11107_v3  ;;  %v1319_v52 = vsel %vm1206_vm0, %v1318_v26, %v15286_v43  ;;  %v1445_v46 = vpack.c.bf16 %v1317_v19, %v1317_v19  ;;  %v1337_v61 = vperm.slane %v1331_v2, %v11107_v3 }
 0x3cc   : > { %v1400_v30 = vrot.slane %v1381_v25, 4  ;;  %v12470_v53 = vsel %vm1206_vm0, 0.0, %v1314_v5  ;;  %v12472_v8 = vrot.slane %v1444_v24, 4  ;;  %v1253_v33 = vperm.slane %v1245_v7, %v11119_v13 }
 0x3cd   : > { %v1412_v37 = vrot.slane %v1385_v49, 4  ;;  %v1243_v54 = vsel %vm1206_vm0, %v1242_v15, %v12393_v40  ;;  %v1254_v4 = vrot.slane %v12452_v20, 4  ;;  %v1325_v57 = vperm.slane %v1319_v52, %v11107_v3 }
 0x3ce   : > { %v1399_v14 = vsel %vm1206_vm0, %v1398_v45, %v1381_v25  ;;  %v12481_v26 = vrot.slane %v1442_v51, 4  ;;  %v1401_v5 = vsel %vm1206_vm0, %v1393_v6, %v1400_v30  ;;  %v1410_v19 = vrot.slane %v1397_v58, 4 }
 0x3cf   : > { %v1413_v18 = vsel %vm1206_vm0, %v1397_v58, %v1412_v37  ;;  %v1332_v24 = vrot.slane %v9654_v50, 4  ;;  %v12484_v2 = vrot.slane %v1445_v46, 4  ;;  %v1321_v37 = vsel %vm1206_vm0, %v9659_v28, %v1320_v44 }
 0x3d0   : > { %v1421_v40 = vperm.slane %v1413_v18, %v11119_v13  ;;  %v1342_v15 = vrot.slane %v1337_v61, 4  ;;  %v1249_v7 = vperm.slane %v1243_v54, %v11119_v13  ;;  %v1256_v52 = vrot.slane %v12456_v56, 4 }
 0x3d1   : > { %v1260_v25 = vrot.slane %v1253_v33, 4  ;;  %v12493_v45 = vperm.slane %v1399_v14, %v11119_v13  ;;  %v12496_v6 = vsel %vm1206_vm0, 0.0, %v1254_v4  ;;  %v1344_v43 = vrot.slane %v1325_v57, 4 }
 0x3d2   : > { %v12501_v44 = vperm.slane %v1401_v5, %v11119_v13  ;;  %v1329_v28 = vperm.slane %v1321_v37, %v11107_v3  ;;  %v1411_v58 = vsel %vm1206_vm0, %v1410_v19, %v1385_v49  ;;  %v1333_v51 = vsel %vm1206_vm0, %v9664_v32, %v1332_v24  ;;  %v15287_v32 = vld [vmem:[#allocation44_spill] sm:$0xff] }
 0x3d3   : > { %v12359_v9 = vpop.trf.xlu1  ;;  %v12380_v39 = vpop.trf.xlu2  ;;  %v1432_v46 = vpack.c.bf16 %v12456_v56, %v12456_v56  ;;  %v1436_v18 = vpack.c.bf16 %v1253_v33, %v1253_v33  ;;  %v1428_v54 = vrot.slane %v1421_v40, 4  ;;  %v1343_v4 = vsel %vm1206_vm0, %v1342_v15, %v1325_v57 }
 0x3d4   : > { %v12514_v14 = vsel %vm1206_vm0, 0.0, %v1256_v52  ;;  %v1258_v5 = vrot.slane %v1249_v7, 4  ;;  %v1261_v37 = vsel %vm1206_vm0, 0.0, %v1260_v25  ;;  %v1422_v49 = vrot.slane %v12493_v45, 4 }
 0x3d5   : > { %v12357_v17 = vpop.trf.xlu0  ;;  %v1417_v56 = vperm.slane %v1411_v58, %v11119_v13  ;;  %v1424_v33 = vrot.slane %v12501_v44, 4  ;;  %v1341_v57 = vperm.slane %v1333_v51, %v11107_v3  ;;  %v1345_v24 = vsel %vm1206_vm0, %v1337_v61, %v1344_v43 }
 0x3d6   : > { %v1356_v52 = vrot.slane %v1329_v28, 4  ;;  %v12531_v25 = vperm.slane %v1343_v4, %v11119_v13  ;;  %v1434_v47 = vpack.c.bf16 %v1249_v7, %v1249_v7  ;;  %v1437_v23 = vpack.c.bf16 %v1261_v37, %v1261_v37 }
 0x3d7   : > { %v2061_v34 = vrot.slane %v1436_v18, 4  ;;  %v1429_v35 = vsel %vm1206_vm0, 0.0, %v1428_v54  ;;  %v1259_v58 = vsel %vm1206_vm0, 0.0, %v1258_v5  ;;  %v1433_v50 = vpack.c.bf16 %v12514_v14, %v12514_v14 }
 0x3d8   : > { %v12538_v51 = vsel %vm1206_vm0, 0.0, %v1422_v49  ;;  %v12541_v61 = vperm.slane %v1345_v24, %v11119_v13  ;;  %v12546_v7 = vsel %vm1206_vm0, 0.0, %v1424_v33  ;;  %v1426_v43 = vrot.slane %v1417_v56, 4 }
 0x3d9   : > { %v1460_v18 = vpack.c.bf16 %v1421_v40, %v1421_v40  ;;  %v1354_v54 = vrot.slane %v1341_v57, 4  ;;  %v1458_v4 = vpack.c.bf16 %v1417_v56, %v1417_v56  ;;  %v1461_v5 = vpack.c.bf16 %v1429_v35, %v1429_v35 }
 0x3da   : > { %v1357_v37 = vsel %vm1206_vm0, %v1341_v57, %v1356_v52  ;;  %v1366_v14 = vrot.slane %v12531_v25, 4  ;;  %v2054_v49 = vrot.slane %v1434_v47, 4  ;;  %v2081_v15 = vrot.slane %v1437_v23, 4 }
 0x3db   : > { %v12378_v41 = vpop.trf.xlu1  ;;  %v2062_v12 = vsel %vm1206_vm0, %v2061_v34, %v1432_v46  ;;  %v1368_v56 = vrot.slane %v12541_v61, 4  ;;  %v12563_v47 = vsel %vm1206_vm0, 0.0, %v1426_v43  ;;  %v12565_v23 = vrot.slane %v1460_v18, 4 }
 0x3dc   : > { %v1355_v34 = vsel %vm1206_vm0, %v1354_v54, %v1329_v28  ;;  %v12569_v46 = vperm.slane %v1357_v37, %v11119_v13  ;;  %v12571_v57 = vrot.slane %v1458_v4, 4  ;;  %v12573_v52 = vrot.slane %v1461_v5, 4 }
 0x3dd   : > { %v12373_v62 = vpop.trf.xlu0  ;;  %v12576_v24 = vsel %vm1206_vm0, 0.0, %v1366_v14  ;;  %v2066_v43 = vperm.slane %v2062_v12, %v11107_v3  ;;  %v1435_v35 = vpack.c.bf16 %v1259_v58, %v1259_v58  ;;  %v15288_v28 = vpack.c.bf16 %v12452_v20, %v12452_v20 }
 0x3de   : > { %v15289_v4 = vpack.c.bf16 %v12406_v10, %v12406_v10  ;;  %v12593_v37 = vperm.slane %v1355_v34, %v11119_v13  ;;  %v12596_v12 = vsel %vm1206_vm0, 0.0, %v1368_v56  ;;  %v1448_v58 = vpack.c.bf16 %v12541_v61, %v12541_v61 }
 0x3df   : > { %v2056_v54 = vsel %vm1206_vm0, %v2054_v49, %v15288_v28  ;;  %v4445_v14 = vrot.slane %v12361_v27, 4  ;;  %v1372_v20 = vrot.slane %v12569_v46, 4  ;;  %v4485_v49 = vrot.slane %v12380_v39, 4 }
 0x3e0   : > { %v2102_v5 = vsel %vm1206_vm0, %v12472_v8, %v15289_v4  ;;  %v15290_v10 = vpack.c.bf16 %v12403_v36, %v12403_v36  ;;  %v1443_v56 = vpack.c.bf16 %v12470_v53, %v12470_v53  ;;  %v2060_v34 = vperm.slane %v2056_v54, %v11107_v3 }
 0x3e1   : > { %v2067_v4 = vrot.slane %v2066_v43, 4  ;;  %v2106_v18 = vperm.slane %v2102_v5, %v11107_v3  ;;  %v1449_v39 = vpack.c.bf16 %v12596_v12, %v12596_v12  ;;  %v2082_v36 = vsel %vm1206_vm0, %v2081_v15, %v1433_v50 }
 0x3e2   : > { %v2096_v8 = vsel %vm1206_vm0, %v12481_v26, %v15290_v10  ;;  %v1452_v26 = vpack.c.bf16 %v12569_v46, %v12569_v46  ;;  %v4446_v53 = vsel %vm1206_vm0, %v4445_v14, %v12345_v16  ;;  %v4439_v54 = vrot.slane %v12357_v17, 4 }
 0x3e3   : > { %v2100_v43 = vperm.slane %v2096_v8, %v11107_v3  ;;  %v4486_v5 = vsel %vm1206_vm0, %v4485_v49, %v12351_v31  ;;  %v4479_v10 = vrot.slane %v12373_v62, 4  ;;  %v2086_v16 = vperm.slane %v2082_v36, %v11107_v3 }
 0x3e4   : > { %v2107_v46 = vrot.slane %v2106_v18, 4  ;;  %v2115_v17 = vrot.slane %v1443_v56, 4  ;;  %v1370_v14 = vrot.slane %v12593_v37, 4  ;;  %v4450_v8 = vperm.slane %v4446_v53, %v11107_v3 }
 0x3e5   : > { %v15291_v62 = vpack.c.bf16 %v12496_v6, %v12496_v6  ;;  %v4490_v49 = vperm.slane %v4486_v5, %v11107_v3  ;;  %v15292_v56 = vpack.c.bf16 %v12444_v38, %v12444_v38  ;;  %v4480_v6 = vsel %vm1206_vm0, %v4479_v10, %v12353_v63 }
 0x3e6   : > { %v2087_v36 = vrot.slane %v2086_v16, 4  ;;  %v2108_v53 = vsel %vm1206_vm0, %v2107_v46, %v2100_v43  ;;  %v15293_v38 = vpack.c.bf16 %v12441_v55, %v12441_v55  ;;  %v4484_v5 = vperm.slane %v4480_v6, %v11107_v3 }
 0x3e7   : > { %v12672_v43 = vsel %vm1206_vm0, 0.0, %v1370_v14  ;;  %v1450_v55 = vpack.c.bf16 %v12593_v37, %v12593_v37  ;;  %v12676_v16 = vrot.slane %v1452_v26, 4  ;;  %v15297_v61 = vpack.c.bf16 %v12538_v51, %v12538_v51 }
 0x3e8   : > { %v15298_v51 = vpack.c.bf16 %v12531_v25, %v12531_v25 }
 0x3e9   : > { %v2142_v12 = vsel %vm1206_vm0, %v12676_v16, %v1448_v58 }
 0x3eb   : > { %v12415_v1 = vpop.trf.xlu2 }
 0x3ec   : > { %v4451_v27 = vrot.slane %v12415_v1, 4 }
 0x3f3   : > { %v12413_v21 = vpop.trf.xlu1  ;;  %v12462_v59 = vpop.trf.xlu2 }
 0x3f4   : > { %v4577_v26 = vrot.slane %v12413_v21, 4 }
 0x3f5   : > { %v12400_v22 = vpop.trf.xlu0 }
 0x3f6   : > { %v4497_v31 = vrot.slane %v12400_v22, 4  ;;  %v2122_v22 = vsel %vm1206_vm0, %v12484_v2, %v15292_v56  ;;  %v2116_v2 = vsel %vm1206_vm0, %v2115_v17, %v15293_v38 }
 0x3f8   : > { %v4498_v63 = vsel %vm1206_vm0, %v4497_v31, %v12349_v48  ;;  %v2120_v31 = vperm.slane %v2116_v2, %v11107_v3 }
 0x3f9   : > { %v4502_v46 = vperm.slane %v4498_v63, %v11107_v3 }
 0x3fb   : > { %v12460_v0 = vpop.trf.xlu1 }
 0x3fc   : > { %v4525_v14 = vrot.slane %v12460_v0, 4 }
 0x3fd   : > { %v12449_v42 = vpop.trf.xlu0 }
 0x40b   : > { %v12522_v19 = vpop.trf.xlu2 }
 0x413   : > { %v12518_v11 = vpop.trf.xlu1  ;;  %v12578_v40 = vpop.trf.xlu2 }
 0x415   : > { %v12508_v30 = vpop.trf.xlu0 }
 0x41d   : > { %v12560_v33 = vpop.trf.xlu0 }
 0x423   : > { %9804 = vrot.lane.b32.xlu2 %v15287_v32, %s10591_s9 }
 0x427   : > { %9826 = vrot.lane.b32.xlu0 %v15287_v32, %s10592_s20  ;;  %v9811_v32 = vpop.trf.xlu1 }
 0x428   : > { %v4457_v28 = vrot.slane %v9811_v32, 4  ;;  %v2075_v32 = vrot.slane %v1435_v35, 4  ;;  %v2068_v35 = vsel %vm1206_vm0, %v2067_v4, %v2060_v34  ;;  %v1373_v34 = vsel %vm1206_vm0, 0.0, %v1372_v20 }
 0x429   : > { %v12657_v4 = vperm.slane %v2068_v35, %v11119_v13  ;;  %v4463_v20 = vrot.slane %v4450_v8, 4  ;;  %v1453_v35 = vpack.c.bf16 %v1373_v34, %v1373_v34  ;;  %v12682_v8 = vperm.slane %v2108_v53, %v11119_v13 }
 0x42a   : > { %v4458_v50 = vsel %vm1206_vm0, %v4457_v28, %v12343_v29  ;;  %v2076_v1 = vsel %vm1206_vm0, %v2075_v32, %v15291_v62  ;;  %v4440_v29 = vsel %vm1206_vm0, %v4439_v54, %v12347_v60  ;;  %v4452_v60 = vsel %vm1206_vm0, %v4451_v27, %v12359_v9 }
 0x42b   : > { %v4462_v28 = vperm.slane %v4458_v50, %v11107_v3  ;;  %v12644_v18 = vpop.trf.xlu2  ;;  %v2080_v32 = vperm.slane %v2076_v1, %v11107_v3  ;;  %v4444_v54 = vperm.slane %v4440_v29, %v11107_v3  ;;  %v2126_v9 = vperm.slane %v2122_v22, %v11107_v3 }
 0x42c   : > { %v4503_v27 = vrot.slane %v4490_v49, 4  ;;  %v4456_v10 = vperm.slane %v4452_v60, %v11107_v3  ;;  %v2073_v62 = vrot.slane %v12657_v4, 4  ;;  %v4509_v53 = vrot.slane %v4502_v46, 4 }
 0x42d   : > { %v4469_v50 = vrot.slane %v4462_v28, 4  ;;  %v2088_v29 = vsel %vm1206_vm0, %v2087_v36, %v2080_v32  ;;  %v2127_v49 = vrot.slane %v2126_v9, 4  ;;  %v4464_v28 = vsel %vm1206_vm0, %v4463_v20, %v4444_v54 }
 0x42e   : > { %v4504_v22 = vsel %vm1206_vm0, %v4503_v27, %v4484_v5  ;;  %v4468_v6 = vperm.slane %v4464_v28, %v11119_v13  ;;  %v4537_v32 = vrot.slane %v12462_v59, 4  ;;  %v2113_v38 = vrot.slane %v12682_v8, 4 }
 0x42f   : > { %v4470_v56 = vsel %vm1206_vm0, %v4469_v50, %v4456_v10  ;;  %v4508_v0 = vperm.slane %v4504_v22, %v11119_v13  ;;  %v2161_v2 = vrot.slane %v1453_v35, 4  ;;  %v4526_v20 = vsel %vm1206_vm0, %v4525_v14, %v12449_v42 }
 0x430   : > { %v4474_v60 = vperm.slane %v4470_v56, %v11119_v13  ;;  %v12704_v9 = vperm.slane %v2088_v29, %v11119_v13  ;;  %v2128_v27 = vsel %vm1206_vm0, %v2127_v49, %v2120_v31  ;;  %v12708_v59 = vsel %vm1206_vm0, 0, %v2073_v62 }
 0x431   : > { %v4578_v5 = vsel %vm1206_vm0, %v4577_v26, %v12522_v19  ;;  %v4517_v42 = vrot.slane %v4508_v0, 4  ;;  %v4571_v35 = vrot.slane %v12518_v11, 4  ;;  %v4530_v46 = vperm.slane %v4526_v20, %v11107_v3 }
 0x432   : > { %v4475_v54 = vrot.slane %v4474_v60, 4  ;;  %v12719_v31 = vsel %vm1206_vm0, 0, %v2113_v38  ;;  %v4531_v62 = vrot.slane %v12578_v40, 4  ;;  %v4582_v29 = vperm.slane %v4578_v5, %v11107_v3 }
 0x433   : > { %v12679_v48 = vpop.trf.xlu1  ;;  %v9798_v36 = vpop.trf.xlu2  ;;  %v2093_v5 = vrot.slane %v12704_v9, 4  ;;  %v2162_v37 = vsel %vm1206_vm0, %v2161_v2, %v1449_v39  ;;  %v15295_v39 = vpack.c.bf16 %v12501_v44, %v12501_v44 }
 0x434   : > { %v12723_v14 = vsel %vm1206_vm0, %v4475_v54, %v4468_v6  ;;  %v4519_v22 = vrot.slane %v9798_v36, 4  ;;  %v4543_v36 = vrot.slane %v4530_v46, 4  ;;  %v1451_v54 = vpack.c.bf16 %v12672_v43, %v12672_v43 }
 0x435   : > { %v12629_v15 = vpop.trf.xlu0  ;;  %v2135_v43 = vrot.slane %v1450_v55, 4  ;;  %v2224_v46 = vshrl.u32 %v12708_v59, 16  ;;  %v2182_v2 = vsel %vm1206_vm0, %v12565_v23, %v15295_v39 }
 0x43b   : > { %v9815_v49 = vpop.trf.xlu1 }
 0x43d   : > { %v9819_v17 = vpop.trf.xlu0 }
 0x43e   : > { %v4491_v1 = vrot.slane %v9819_v17, 4  ;;  %v4538_v17 = vsel %vm1206_vm0, %v4537_v32, %v12560_v33  ;;  %v4565_v33 = vrot.slane %v12508_v30, 4  ;;  %v4572_v32 = vsel %vm1206_vm0, %v4571_v35, %v12629_v15 }
 0x43f   : > { %v4542_v56 = vperm.slane %v4538_v17, %v11107_v3  ;;  %v4532_v30 = vsel %vm1206_vm0, %v4531_v62, %v9815_v49 }
 0x440   : > { %v4492_v34 = vsel %vm1206_vm0, %v4491_v1, %v12378_v41  ;;  %v4477_v41 = vrot.slane %v4468_v6, 4  ;;  %v4566_v15 = vsel %vm1206_vm0, %v4565_v33, %v12644_v18  ;;  %v2236_v18 = vshrl.u32 %v12719_v31, 16 }
 0x441   : > { %v4496_v21 = vperm.slane %v4492_v34, %v11107_v3  ;;  %v4570_v17 = vperm.slane %v4566_v15, %v11107_v3  ;;  %v2094_v33 = vsel %vm1206_vm0, 0, %v2093_v5  ;;  %v2136_v15 = vsel %vm1206_vm0, %v2135_v43, %v15298_v51 }
 0x442   : > { %v4478_v50 = vsel %vm1206_vm0, %v4474_v60, %v4477_v41  ;;  %v4603_v60 = vshrl.u32 %v12723_v14, 16  ;;  %v1459_v41 = vpack.c.bf16 %v12563_v47, %v12563_v47  ;;  %v2140_v43 = vperm.slane %v2136_v15, %v11107_v3 }
 0x443   : > { %v4510_v63 = vsel %vm1206_vm0, %v4509_v53, %v4496_v21  ;;  %v4611_v26 = vshrl.u32 %v4478_v50, 16  ;;  %v12744_v21 = vperm.slane %v2128_v27, %v11119_v13 }
 0x444   : > { %v4514_v10 = vperm.slane %v4510_v63, %v11119_v13  ;;  %v4589_v63 = vrot.slane %v4582_v29, 4  ;;  %v4559_v29 = vrot.slane %v12679_v48, 4 }
 0x445   : > { %v2133_v47 = vrot.slane %v12744_v21, 4  ;;  %v2229_v49 = vpack.i.b16 %v12744_v21, %v12682_v8 }
 0x446   : > { %v4515_v19 = vrot.slane %v4514_v10, 4  ;;  %v4518_v1 = vsel %vm1206_vm0, %v4514_v10, %v4517_v42  ;;  %v4549_v10 = vrot.slane %v4542_v56, 4  ;;  %v4536_v42 = vperm.slane %v4532_v30, %v11107_v3 }
 0x447   : > { %v12727_v11 = vpack.i.b16 %v4518_v1, %v4478_v50  ;;  %v4612_v28 = vshrl.u32 %v4518_v1, 16  ;;  %v4576_v50 = vperm.slane %v4572_v32, %v11107_v3  ;;  %v2195_v1 = vrot.slane %v1459_v41, 4 }
 0x448   : > { %v12732_v40 = vsel %vm1206_vm0, %v4515_v19, %v4508_v0  ;;  %v2217_v0 = vpack.i.b16 %v12704_v9, %v12657_v4  ;;  %v2155_v19 = vrot.slane %v1451_v54, 4  ;;  %v15294_v56 = vpack.c.bf16 %v12546_v7, %v12546_v7 }
 0x449   : > { %v4601_v34 = vpack.i.b16 %v12732_v40, %v12723_v14  ;;  %v12736_v6 = vpack.i.b16 %v4612_v28, %v4611_v26  ;;  %v4604_v53 = vshrl.u32 %v12732_v40, 16  ;;  %v4590_v55 = vsel %vm1206_vm0, %v4589_v63, %v4576_v50 }
 0x44a   : > { %v12772_v26 = vunpack.c.l.b16 %v2217_v0  ;;  %v4550_v28 = vsel %vm1206_vm0, %v4549_v10, %v4536_v42  ;;  %v2202_v48 = vsel %vm1206_vm0, %v12573_v52, %v15294_v56  ;;  %v4583_v7 = vrot.slane %v4570_v17, 4 }
 0x44b   : > { %v9801_v38 = vpop.trf.xlu2  ;;  %v12748_v20 = vpack.i.b16 %v4604_v53, %v4603_v60  ;;  %v2134_v60 = vsel %vm1206_vm0, 0, %v2133_v47  ;;  %v15296_v52 = vpack.c.bf16 %v12576_v24, %v12576_v24  ;;  %v2166_v30 = vperm.slane %v2162_v37, %v11107_v3 }
 0x44c   : > { %v4520_v27 = vsel %vm1206_vm0, %v4519_v22, %v9801_v38  ;;  %v2196_v58 = vsel %vm1206_vm0, %v2195_v1, %v15297_v61  ;;  %v4554_v44 = vperm.slane %v4550_v28, %v11119_v13  ;;  %v4594_v23 = vperm.slane %v4590_v55, %v11119_v13 }
 0x44d   : > { %v4524_v35 = vperm.slane %v4520_v27, %v11107_v3  ;;  %v2156_v32 = vsel %vm1206_vm0, %v2155_v19, %v15296_v52  ;;  %v2206_v0 = vperm.slane %v2202_v48, %v11107_v3  ;;  %v2225_v24 = vshrl.u32 %v2094_v33, 16 }
 0x44e   : > { %v2146_v38 = vperm.slane %v2142_v12, %v11107_v3  ;;  %v2186_v54 = vperm.slane %v2182_v2, %v11107_v3  ;;  %v2237_v63 = vshrl.u32 %v2134_v60, 16  ;;  %v15299_v27 = vpack.c.bf16 %v12493_v45, %v12493_v45 }
 0x44f   : > { %v4544_v62 = vsel %vm1206_vm0, %v4543_v36, %v4524_v35  ;;  %v2160_v50 = vperm.slane %v2156_v32, %v11107_v3  ;;  %v2167_v42 = vrot.slane %v2166_v30, 4  ;;  %v2200_v35 = vperm.slane %v2196_v58, %v11107_v3 }
 0x450   : > { %v4548_v22 = vperm.slane %v4544_v62, %v11119_v13  ;;  %v2176_v5 = vsel %vm1206_vm0, %v12571_v57, %v15299_v27  ;;  %v4555_v47 = vrot.slane %v4554_v44, 4  ;;  %v4595_v62 = vrot.slane %v4594_v23, 4 }
 0x451   : > { %v2207_v25 = vrot.slane %v2206_v0, 4  ;;  %v2147_v19 = vrot.slane %v2146_v38, 4  ;;  %v2180_v45 = vperm.slane %v2176_v5, %v11107_v3  ;;  %v2187_v1 = vrot.slane %v2186_v54, 4 }
 0x452   : > { %v4557_v41 = vrot.slane %v4548_v22, 4  ;;  %v4556_v57 = vsel %vm1206_vm0, %v4555_v47, %v4548_v22  ;;  %v4632_v56 = vunpack.c.l.b16 %v2229_v49  ;;  %v2223_v48 = vpack.i.b16 %v2094_v33, %v12708_v59 }
 0x453   : > { %v9802_v53 = vpop.trf.xlu2  ;;  %v2235_v12 = vpack.i.b16 %v2134_v60, %v12719_v31  ;;  %v2226_v30 = vpack.i.b16 %v2225_v24, %v2224_v46  ;;  %v4619_v61 = vshrl.u32 %v4556_v57, 16  ;;  %v2238_v49 = vpack.i.b16 %v2237_v63, %v2236_v18 }
 0x454   : > { %v4560_v16 = vsel %vm1206_vm0, %v4559_v29, %v9802_v53  ;;  %v4558_v37 = vsel %vm1206_vm0, %v4554_v44, %v4557_v41  ;;  %v2208_v53 = vsel %vm1206_vm0, %v2207_v25, %v2200_v35  ;;  %v2148_v33 = vsel %vm1206_vm0, %v2147_v19, %v2140_v43 }
 0x455   : > { %v4564_v36 = vperm.slane %v4560_v16, %v11107_v3  ;;  %v4627_v52 = vshrl.u32 %v4558_v37, 16  ;;  %v2188_v60 = vsel %vm1206_vm0, %v2187_v1, %v2180_v45  ;;  %v12847_v44 = vperm.slane %v2208_v53, %v11119_v13 }
 0x456   : > { %v4694_v0 = vunpack.c.l.b16 %v2223_v48  ;;  %v4695_v59 = vunpack.c.l.b16 %v2235_v12  ;;  %v2152_v31 = vperm.slane %v2148_v33, %v11119_v13  ;;  %v2192_v46 = vperm.slane %v2188_v60, %v11119_v13  ;;  %v15300_v33 = vld [vmem:[#allocation59_spill] sm:$0xff] }
 0x457   : > { %v4584_v10 = vsel %vm1206_vm0, %v4583_v7, %v4564_v36  ;;  %v2168_v7 = vsel %vm1206_vm0, %v2167_v42, %v2160_v50  ;;  %v4635_v18 = vpack.c.b16 %v4632_v56, %v12772_v26  ;;  %v4725_v36 = vunpack.c.l.b16 %v2226_v30 }
 0x458   : > { %v4588_v17 = vperm.slane %v4584_v10, %v11119_v13  ;;  %v12844_v16 = vperm.slane %v2168_v7, %v11119_v13  ;;  %v4726_v24 = vunpack.c.l.b16 %v2238_v49  ;;  %v2213_v54 = vrot.slane %v12847_v44, 4 }
 0x459   : > { %v4698_v14 = vpack.c.b16 %v4695_v59, %v4694_v0  ;;  %v2153_v40 = vrot.slane %v2152_v31, 4  ;;  %v2253_v27 = vpack.i.b16 %v12847_v44, %v2192_v46  ;;  %v2219_v1 = vshrl.u32 %v12704_v9, 16 }
 0x45a   : > { %v4596_v29 = vsel %vm1206_vm0, %v4595_v62, %v4588_v17  ;;  %v4597_v55 = vrot.slane %v4588_v17, 4  ;;  %v2173_v38 = vrot.slane %v12844_v16, 4  ;;  %v4729_v26 = vpack.c.b16 %v4726_v24, %v4725_v36  ;;  %v12870_v62 = vpop.trf.xlu0  ;;  %v15301_v36 = vld [vmem:[#allocation42_spill] sm:$0xff] }
 0x45b   : > { %v4617_v28 = vpack.i.b16 %v4596_v29, %v4556_v57  ;;  %v4620_v39 = vshrl.u32 %v4596_v29, 16  ;;  %v2214_v63 = vsel %vm1206_vm0, 0, %v2213_v54  ;;  %v2154_v51 = vsel %vm1206_vm0, 0, %v2153_v40 }
 0x45c   : > { %v4598_v2 = vsel %vm1206_vm0, %v4594_v23, %v4597_v55  ;;  %v2174_v41 = vsel %vm1206_vm0, 0, %v2173_v38  ;;  %v2248_v10 = vshrl.u32 %v2154_v51, 16  ;;  %v4634_v35 = vunpack.c.l.b16 %v2253_v27 }
 0x45d   : > { %4650 = vmatpush.bf16.msra.mxu3 %v4617_v28  ;;  %v4625_v22 = vpack.i.b16 %v4598_v2, %v4558_v37  ;;  %v4628_v32 = vshrl.u32 %v4598_v2, 16  ;;  %v4621_v23 = vpack.i.b16 %v4620_v39, %v4619_v61  ;;  %v2249_v5 = vshrl.u32 %v2174_v41, 16 }
 0x45e   : > { %v2231_v57 = vshrl.u32 %v12744_v21, 16  ;;  %v2230_v29 = vshrl.u32 %v12682_v8, 16  ;;  %v2243_v9 = vshrl.u32 %v12844_v16, 16  ;;  %v2255_v21 = vshrl.u32 %v12847_v44, 16 }
 0x45f   : > { %4712 = vmatpush.bf16.msrb.mxu0 %v4625_v22  ;;  %v4629_v58 = vpack.i.b16 %v4628_v32, %v4627_v52  ;;  %v2250_v47 = vpack.i.b16 %v2249_v5, %v2248_v10  ;;  %v2242_v2 = vshrl.u32 %v2152_v31, 16  ;;  %v2254_v7 = vshrl.u32 %v2192_v46, 16 }
 0x460   : > { %v2232_v55 = vpack.i.b16 %v2231_v57, %v2230_v29  ;;  %v9669_v60 = vunpack.i.l.bf16 %v15300_v33  ;;  %v2247_v44 = vpack.i.b16 %v2174_v41, %v2154_v51  ;;  %v1912_v10 = vrot.slane %v15301_v36, 4 }
 0x461   : > { %4651 = vmatpush.bf16.msra.mxu3 %v4601_v34  ;;  %4743 = vmatpush.bf16.msrb.mxu1 %v4629_v58  ;;  %v2193_v34 = vrot.slane %v2192_v46, 4  ;;  %v4727_v43 = vunpack.c.l.b16 %v2250_v47  ;;  %v2256_v53 = vpack.i.b16 %v2255_v21, %v2254_v7  ;;  %v922_v21 = vld [vmem:[#allocation6] sm:$0xff] }
 0x462   : > { %v12878_v28 = vpop.trf.xlu0  ;;  %v4664_v48 = vunpack.c.l.b16 %v2232_v55  ;;  %v4696_v46 = vunpack.c.l.b16 %v2247_v44 }
 0x463   : > { %4713 = vmatpush.bf16.msrb.mxu0 %v12727_v11  ;;  %v2194_v15 = vsel %vm1206_vm0, 0, %v2193_v34  ;;  %v4666_v52 = vunpack.c.l.b16 %v2256_v53 }
 0x464   : > { %9163 = vmatmul.msk.bf16.vlgmr.msra.gmra.mxu3 %vm4637_vm1, %v4635_v18  ;;  %v2260_v50 = vshrl.u32 %v2194_v15, 16 }
 0x465   : > { %4681 = vmatpush.bf16.msrb.mxu3 %v4621_v23  ;;  %4744 = vmatpush.bf16.msrb.mxu1 %v12736_v6  ;;  %v2241_v6 = vpack.i.b16 %v12844_v16, %v2152_v31  ;;  %v2259_v23 = vpack.i.b16 %v2214_v63, %v2194_v15  ;;  %v15053_v15 = vunpack.i.h.bf16 %v15300_v33 }
 0x466   : > { %9167 = vmatmul.msk.bf16.vlgmr.msrb.gmra.mxu0 %vm4637_vm1, %v4698_v14 }
 0x467   : > { %v4633_v42 = vunpack.c.l.b16 %v2241_v6  ;;  %v4697_v18 = vunpack.c.l.b16 %v2259_v23  ;;  %v1980_v5 = vrot.slane %v15053_v15, 4 }
 0x468   : > { %9169 = vmatmul.msk.bf16.vlgmr.msrb.gmra.mxu1 %vm4637_vm1, %v4729_v26 }
 0x469   : > { %4682 = vmatpush.bf16.msrb.mxu3 %v12748_v20  ;;  %v2261_v20 = vshrl.u32 %v2214_v63, 16  ;;  %v4636_v25 = vpack.c.b16 %v4634_v35, %v4633_v42  ;;  %v4699_v40 = vpack.c.b16 %v4697_v18, %v4696_v46 }
 0x46a   : > { %v12881_v39 = vpop.trf.xlu0 }
 0x46b   : > { %v2262_v17 = vpack.i.b16 %v2261_v20, %v2260_v50  ;;  %v1924_v20 = vrot.slane %v9669_v60, 4  ;;  %v15302_v50 = vld [vmem:[#allocation43_spill] sm:$0xff] }
 0x46c   : > { %v1968_v42 = vrot.slane %v15302_v50, 4 }
 0x46d   : > { %9414 = vmatpush.bf16.msra.mxu3 %v4625_v22  ;;  %v4728_v19 = vunpack.c.l.b16 %v2262_v17 }
 0x46f   : > { %v4730_v45 = vpack.c.b16 %v4728_v19, %v4727_v43 }
 0x471   : > { %9415 = vmatpush.bf16.msra.mxu3 %v12727_v11  ;;  %v2218_v11 = vshrl.u32 %v12657_v4, 16  ;;  %v2244_v4 = vpack.i.b16 %v2243_v9, %v2242_v2  ;;  %v10055_v9 = vld [vmem:[%s15303_s26] ss:$0 sm:$0xff] }
 0x472   : > { %v12887_v32 = vpop.trf.xlu0  ;;  %v930_v2 = vadd.f32 %v10055_v9, %v922_v21 }
 0x473   : > { %v2220_v37 = vpack.i.b16 %v2219_v1, %v2218_v11  ;;  %v4665_v22 = vunpack.c.l.b16 %v2244_v4 }
 0x474   : > { %9164 = vmatmul.msk.bf16.gmra.mxu3 %vm4637_vm1, %v4636_v25 }
 0x475   : > { %v4663_v56 = vunpack.c.l.b16 %v2220_v37  ;;  %v4668_v61 = vpack.c.b16 %v4666_v52, %v4665_v22  ;;  %v923_v22 = vld [vmem:[#allocation6 + $0x8] sm:$0xff] }
 0x477   : > { %v4667_v12 = vpack.c.b16 %v4664_v48, %v4663_v56 }
 0x478   : > { %9170 = vmatmul.msk.bf16.gmra.mxu1 %vm4637_vm1, %v4730_v45 }
 0x47d   : > { %v12885_v8 = vpop.permute.xlu2 %9804 }
 0x47e   : > { %v9806_v30 = vunpack.i.l.bf16 %v12885_v8  ;;  %v9807_v6 = vunpack.i.h.bf16 %v12885_v8 }
 0x480   : > { %v1922_v49 = vrot.slane %v9806_v30, 4  ;;  %v1981_v35 = vsel %vm1206_vm0, %v9807_v6, %v1980_v5  ;;  %v1925_v47 = vsel %vm1206_vm0, %v9806_v30, %v1924_v20 }
 0x481   : > { %v1989_v43 = vperm.slane %v1981_v35, %v11107_v3  ;;  %v1933_v19 = vperm.slane %v1925_v47, %v11107_v3 }
 0x482   : > { %v1923_v58 = vsel %vm1206_vm0, %v1922_v49, %v9669_v60 }
 0x483   : > { %v12897_v59 = vperm.slane %v1923_v58, %v11107_v3  ;;  %v2002_v57 = vrot.slane %v1989_v43, 4  ;;  %v1946_v11 = vrot.slane %v1933_v19, 4 }
 0x484   : > { %9165 = vmatmul.msk.bf16.vlgmr.msrb.gmra.mxu3 %vm4637_vm1, %v4667_v12 }
 0x485   : > { %v1934_v38 = vrot.slane %v12897_v59, 4 }
 0x494   : > { %9166 = vmatmul.msk.bf16.gmra.mxu3 %vm4637_vm1, %v4668_v61  ;;  %v931_v61 = vadd.f32 %v10055_v9, %v923_v22 }
 0x499   : > { %v12893_v16 = vpop.permute.xlu0 %9826 }
 0x49a   : > { %v9828_v0 = vunpack.i.l.bf16 %v12893_v16  ;;  %v9829_v27 = vunpack.i.h.bf16 %v12893_v16 }
 0x49c   : > { %v1910_v31 = vrot.slane %v9828_v0, 4  ;;  %v1969_v17 = vsel %vm1206_vm0, %v9829_v27, %v1968_v42  ;;  %v1913_v25 = vsel %vm1206_vm0, %v9828_v0, %v1912_v10 }
 0x49d   : > { %v1977_v45 = vperm.slane %v1969_v17, %v11107_v3  ;;  %v1921_v1 = vperm.slane %v1913_v25, %v11107_v3  ;;  %v12972_v17 = vpop.trf.xlu1 }
 0x49e   : > { %v1911_v24 = vsel %vm1206_vm0, %v1910_v31, %v15301_v36  ;;  %v924_v31 = vld [vmem:[#allocation6 + $0x10] sm:$0xff] }
 0x49f   : > { %v12903_v54 = vperm.slane %v1911_v24, %v11107_v3  ;;  %v2004_v29 = vrot.slane %v1977_v45, 4  ;;  %v1948_v37 = vrot.slane %v1921_v1, 4  ;;  %v12930_v55 = vsel %vm1206_vm0, %v1946_v11, %v1921_v1 }
 0x4a0   : > { %v12933_v56 = vsel %vm1206_vm0, %v2002_v57, %v1977_v45  ;;  %v932_v18 = vadd.f32 %v10055_v9, %v924_v31 }
 0x4a1   : > { %v1935_v14 = vsel %vm1206_vm0, %v1934_v38, %v12903_v54  ;;  %v12936_v48 = vsel %vm1206_vm0, %v1933_v19, %v1948_v37  ;;  %v12939_v12 = vsel %vm1206_vm0, %v1989_v43, %v2004_v29 }
 0x4a2   : > { %v1941_v34 = vperm.slane %v1935_v14, %v11119_v13 }
 0x4a4   : > { %9168 = vmatmul.msk.bf16.vlgmr.msra.gmra.mxu3 %vm4637_vm1, %v4699_v40  ;;  %v1958_v26 = vrot.slane %v1941_v34, 4  ;;  %v2038_v63 = vpack.c.bf16 %v1941_v34, %v1941_v34 }
 0x4a5   : > { %v12980_v45 = vpop.trf.xlu1 }
 0x4a6   : > { %v1959_v41 = vsel %vm1206_vm0, 0.0, %v1958_v26  ;;  %v925_v26 = vld [vmem:[#allocation6 + $0x18] sm:$0xff] }
 0x4a7   : > { %v2039_v51 = vpack.c.bf16 %v1959_v41, %v1959_v41 }
 0x4a9   : > { %9840 = vxpose.binary.xlu1.c.b16.start.end [1/2] (short) (narrow) %v2039_v51, %v2038_v63, 32  ;;  %v933_v63 = vadd.f32 %v10055_v9, %v925_v26 }
 0x4ad   : > { %v12986_v37 = vpop.trf.xlu1 }
 0x4e3   : > { %v4715_v7 = vpop.f32.mrf.mxu0 }
 0x4e4   : > { %v12943_v4 = vadd.f32 %v4715_v7, %v930_v2 }
 0x4e5   : > { %v4746_v53 = vpop.f32.mrf.mxu1 }
 0x4e6   : > { %v4780_v52 = vsel %vm4637_vm1, %v12943_v4, -inf  ;;  %v12974_v25 = vadd.f32 %v4746_v53, %v930_v2  ;;  %v12994_v53 = vpop.trf.xlu1 }
 0x4e7   : > { %v4653_v30 = vpop.f32.mrf.mxu3  ;;  %4781 = vmax.xlane.f32.xlu2 %v4780_v52 }
 0x4e8   : > { %v4792_v43 = vsel %vm4637_vm1, %v12974_v25, -inf  ;;  %v12978_v19 = vadd.f32 %v4653_v30, %v930_v2 }
 0x4ea   : > { %v4756_v1 = vsel %vm4637_vm1, %v12978_v19, -inf }
 0x4eb   : > { %v4717_v49 = vpop.f32.mrf.mxu0 }
 0x4ec   : > { %v12947_v60 = vadd.f32 %v4717_v49, %v931_v61 }
 0x4ed   : > { %v4748_v58 = vpop.f32.mrf.mxu1 }
 0x4ee   : > { %v12949_v44 = vadd.f32 %v4748_v58, %v931_v61  ;;  %v4783_v23 = vsel %vm4637_vm1, %v12947_v60, -inf  ;;  %v13000_v49 = vpop.trf.xlu1 }
 0x4ef   : > { %v4655_v0 = vpop.f32.mrf.mxu3  ;;  %4784 = vmax.xlane.f32.xlu0 %v4783_v23 }
 0x4f0   : > { %v4795_v46 = vsel %vm4637_vm1, %v12949_v44, -inf  ;;  %v12955_v36 = vadd.f32 %v4655_v0, %v931_v61 }
 0x4f1   : > { %4796 = vmax.xlane.f32.xlu2 %v4795_v46 }
 0x4f2   : > { %v4759_v34 = vsel %vm4637_vm1, %v12955_v36, -inf }
 0x4f5   : > { %v4751_v24 = vpop.f32.mrf.mxu1 }
 0x4f6   : > { %v12957_v38 = vadd.f32 %v4751_v24, %v932_v18  ;;  %v13008_v31 = vpop.trf.xlu1 }
 0x4f7   : > { %v4658_v14 = vpop.f32.mrf.mxu3 }
 0x4f8   : > { %v4798_v40 = vsel %vm4637_vm1, %v12957_v38, -inf  ;;  %v4659_v41 = vadd.f32 %v4658_v14, %v932_v18 }
 0x4f9   : > { %4799 = vmax.xlane.f32.xlu0 %v4798_v40  ;;  %4760 = vmax.xlane.f32.xlu2 %v4759_v34 }
 0x4fa   : > { %v4762_v20 = vsel %vm4637_vm1, %v4659_v41, -inf }
 0x4fd   : > { %v4753_v57 = vpop.f32.mrf.mxu1 }
 0x4fe   : > { %v12984_v29 = vadd.f32 %v4753_v57, %v933_v63  ;;  %v13014_v40 = vpop.trf.xlu1 }
 0x4ff   : > { %v4660_v51 = vpop.f32.mrf.mxu3 }
 0x500   : > { %v12963_v5 = vadd.f32 %v4660_v51, %v933_v63  ;;  %v4801_v9 = vsel %vm4637_vm1, %v12984_v29, -inf }
 0x501   : > { %4763 = vmax.xlane.f32.xlu0 %v4762_v20 }
 0x502   : > { %v4765_v10 = vsel %vm4637_vm1, %v12963_v5, -inf }
 0x503   : > { %4766 = vmax.xlane.f32.xlu2 %v4765_v10 }
 0x506   : > { %v13018_v26 = vpop.trf.xlu1 }
 0x507   : > { %v4684_v42 = vpop.f32.mrf.mxu3 }
 0x508   : > { %v12968_v35 = vadd.f32 %v4684_v42, %v930_v2 }
 0x50a   : > { %v4768_v47 = vsel %vm4637_vm1, %v12968_v35, -inf }
 0x50b   : > { %4769 = vmax.xlane.f32.xlu0 %v4768_v47 }
 0x50f   : > { %v4686_v11 = vpop.f32.mrf.mxu3 }
 0x510   : > { %v12990_v7 = vadd.f32 %v4686_v11, %v931_v61 }
 0x512   : > { %v4771_v2 = vsel %vm4637_vm1, %v12990_v7, -inf }
 0x517   : > { %v4689_v21 = vpop.f32.mrf.mxu3 }
 0x518   : > { %v12996_v22 = vadd.f32 %v4689_v21, %v932_v18 }
 0x519   : > { %4793 = vmax.xlane.f32.xlu1 %v4792_v43 }
 0x51a   : > { %v4774_v30 = vsel %vm4637_vm1, %v12996_v22, -inf }
 0x51f   : > { %v4691_v52 = vpop.f32.mrf.mxu3 }
 0x520   : > { %v13002_v58 = vadd.f32 %v4691_v52, %v933_v63 }
 0x521   : > { %4757 = vmax.xlane.f32.xlu1 %v4756_v1 }
 0x522   : > { %v4777_v61 = vsel %vm4637_vm1, %v13002_v58, -inf }
 0x527   : > { %v4720_v23 = vpop.f32.mrf.mxu3 }
 0x528   : > { %v13006_v0 = vadd.f32 %v4720_v23, %v932_v18 }
 0x529   : > { %4802 = vmax.xlane.f32.xlu1 %v4801_v9 }
 0x52a   : > { %v4786_v46 = vsel %vm4637_vm1, %v13006_v0, -inf }
 0x52f   : > { %v4722_v24 = vpop.f32.mrf.mxu3 }
 0x530   : > { %v13012_v14 = vadd.f32 %v4722_v24, %v933_v63 }
 0x531   : > { %4772 = vmax.xlane.f32.xlu1 %v4771_v2 }
 0x532   : > { %v4789_v34 = vsel %vm4637_vm1, %v13012_v14, -inf }
 0x539   : > { %4775 = vmax.xlane.f32.xlu1 %v4774_v30 }
 0x541   : > { %4778 = vmax.xlane.f32.xlu1 %v4777_v61 }
 0x549   : > { %4787 = vmax.xlane.f32.xlu1 %v4786_v46 }
 0x551   : > { %4790 = vmax.xlane.f32.xlu1 %v4789_v34 }
 0x555   : > { %v13022_v18 = vpop.trf.xlu1 }
 0x55a   : > { %v13020_v51 = vpop.xlane.xlu2 %4781 }
 0x55d   : > { %v13028_v63 = vpop.trf.xlu1 }
 0x562   : > { %v13024_v20 = vpop.xlane.xlu0 %4784 }
 0x564   : > { %v13026_v10 = vpop.xlane.xlu2 %4796 }
 0x565   : > { %v13032_v2 = vpop.trf.xlu1 }
 0x56c   : > { %v4800_v42 = vpop.xlane.xlu0 %4799  ;;  %v4761_v47 = vpop.xlane.xlu2 %4760 }
 0x56d   : > { %v4818_v11 = vsub.f32 %v12957_v38, %v4800_v42  ;;  %v4805_v52 = vsub.f32 %v12955_v36, %v4761_v47 }
 0x56f   : > { %v4848_v23 = vmul.f32 1.442695, %v4818_v11  ;;  %v4822_v61 = vmul.f32 1.442695, %v4805_v52 }
 0x574   : > { %v4764_v43 = vpop.xlane.xlu0 %4763 }
 0x575   : > { %v4806_v1 = vsub.f32 %v4659_v41, %v4764_v43 }
 0x576   : > { %v4767_v57 = vpop.xlane.xlu2 %4766 }
 0x577   : > { %v4824_v9 = vmul.f32 1.442695, %v4806_v1  ;;  %v4807_v21 = vsub.f32 %v12963_v5, %v4767_v57  ;;  %v13043_v5 = vpop.trf.xlu1 }
 0x579   : > { %10062 = vpow2.f32 %v4824_v9  ;;  %v4826_v30 = vmul.f32 1.442695, %v4807_v21 }
 0x57b   : > { %10064 = vpow2.f32 %v4826_v30 }
 0x57c   : > { %10066 = vpow2.f32 %v4848_v23 }
 0x57d   : > { %10068 = vpow2.f32 %v4822_v61 }
 0x57e   : > { %v4770_v30 = vpop.xlane.xlu0 %4769 }
 0x57f   : > { %v13035_v46 = vpop.eup %10062 }
 0x580   : > { %v4858_v41 = vsel %vm4637_vm1, %v13035_v46, 0.0 }
 0x581   : > { %v13039_v24 = vpop.eup %10064  ;;  %4859 = vadd.xlane.f32.xlu0 %v4858_v41  ;;  %v4808_v41 = vsub.f32 %v12968_v35, %v4770_v30 }
 0x582   : > { %v4861_v38 = vsel %vm4637_vm1, %v13039_v24, 0.0  ;;  %v13045_v36 = vpop.eup %10066 }
 0x583   : > { %4862 = vadd.xlane.f32.xlu2 %v4861_v38  ;;  %v13047_v34 = vpop.eup %10068  ;;  %v4894_v42 = vsel %vm4637_vm1, %v13045_v36, 0.0  ;;  %v15304_v38 = vld [vmem:[#allocation54_spill] sm:$0xff] }
 0x584   : > { %v4855_v47 = vsel %vm4637_vm1, %v13047_v34, 0.0 }
 0x589   : > { %4895 = vadd.xlane.f32.xlu0 %v4894_v42  ;;  %v1841_v42 = vperm.slane %v15304_v38, %v11119_v13 }
 0x58b   : > { %4856 = vadd.xlane.f32.xlu2 %v4855_v47  ;;  %v2026_v30 = vpack.c.bf16 %v1841_v42, %v1841_v42 }
 0x58c   : > { %v4794_v43 = vpop.xlane.xlu1 %4793 }
 0x594   : > { %v4758_v1 = vpop.xlane.xlu1 %4757 }
 0x595   : > { %v4804_v9 = vsub.f32 %v12978_v19, %v4758_v1 }
 0x597   : > { %v4820_v52 = vmul.f32 1.442695, %v4804_v9 }
 0x59c   : > { %v4803_v57 = vpop.xlane.xlu1 %4802 }
 0x59d   : > { %v4819_v11 = vsub.f32 %v12984_v29, %v4803_v57  ;;  %v4828_v29 = vmul.f32 1.442695, %v4808_v41  ;;  %v1850_v57 = vrot.slane %v1841_v42, 4 }
 0x59f   : > { %v4850_v21 = vmul.f32 1.442695, %v4819_v11  ;;  %v1851_v35 = vsel %vm1206_vm0, 0.0, %v1850_v57  ;;  %v4813_v57 = vsub.f32 %v12947_v60, %v13024_v20  ;;  %v4817_v20 = vsub.f32 %v12949_v44, %v13026_v10 }
 0x5a0   : > { %v2027_v38 = vpack.c.bf16 %v1851_v35, %v1851_v35  ;;  %v1966_v10 = vrot.slane %v9829_v27, 4 }
 0x5a1   : > { %10070 = vpow2.f32 %v4850_v21 }
 0x5a2   : > { %10072 = vpow2.f32 %v4820_v52  ;;  %v1967_v16 = vsel %vm1206_vm0, %v1966_v10, %v15302_v50 }
 0x5a3   : > { %10074 = vpow2.f32 %v4828_v29 }
 0x5a4   : > { %v4773_v23 = vpop.xlane.xlu1 %4772 }
 0x5a5   : > { %v4809_v9 = vsub.f32 %v12990_v7, %v4773_v23 }
 0x5a7   : > { %v13055_v61 = vpop.eup %10070  ;;  %v4830_v41 = vmul.f32 1.442695, %v4809_v9  ;;  %v15305_v9 = vld [vmem:[#allocation53_spill] sm:$0xff] }
 0x5a8   : > { %v4897_v47 = vsel %vm4637_vm1, %v13055_v61, 0.0  ;;  %v13062_v1 = vpop.eup %10072 }
 0x5a9   : > { %4898 = vadd.xlane.f32.xlu0 %v4897_v47  ;;  %v4852_v52 = vsel %vm4637_vm1, %v13062_v1, 0.0  ;;  %v13069_v47 = vpop.eup %10074 }
 0x5aa   : > { %v4864_v23 = vsel %vm4637_vm1, %v13069_v47, 0.0 }
 0x5ac   : > { %v4776_v19 = vpop.xlane.xlu1 %4775 }
 0x5ad   : > { %v4810_v11 = vsub.f32 %v12996_v22, %v4776_v19  ;;  %v4812_v22 = vsub.f32 %v12943_v4, %v13020_v51  ;;  %v4838_v4 = vmul.f32 1.442695, %v4813_v57 }
 0x5af   : > { %v4832_v21 = vmul.f32 1.442695, %v4810_v11  ;;  %v4836_v42 = vmul.f32 1.442695, %v4812_v22  ;;  %v4816_v11 = vsub.f32 %v12974_v25, %v4794_v43 }
 0x5b1   : > { %10076 = vpow2.f32 %v4832_v21  ;;  %4853 = vadd.xlane.f32.xlu0 %v4852_v52  ;;  %v1845_v21 = vperm.slane %v15305_v9, %v11119_v13  ;;  %v4844_v52 = vmul.f32 1.442695, %v4816_v11  ;;  %v15307_v11 = vunpack.i.h.bf16 %v15300_v33 }
 0x5b2   : > { %10078 = vpow2.f32 %v4830_v41  ;;  %v13126_v33 = vperm.slane %v1967_v16, %v11107_v3 }
 0x5b3   : > { %10080 = vpow2.f32 %v4836_v42  ;;  %v2028_v43 = vpack.c.bf16 %v1845_v21, %v1845_v21  ;;  %v1978_v42 = vrot.slane %v9807_v6, 4 }
 0x5b4   : > { %9865 = vxpose.binary.xlu2.c.b16.start.end [1/2] (short) (narrow) %v2027_v38, %v2026_v30, 32  ;;  %10082 = vpow2.f32 %v4838_v4  ;;  %v1852_v30 = vrot.slane %v1845_v21, 4  ;;  %v4779_v41 = vpop.xlane.xlu1 %4778 }
 0x5b5   : > { %10084 = vpow2.f32 %v4844_v52  ;;  %v4811_v44 = vsub.f32 %v13002_v58, %v4779_v41  ;;  %v1979_v9 = vsel %vm1206_vm0, %v1978_v42, %v15307_v11 }
 0x5b6   : > { %v1853_v38 = vsel %vm1206_vm0, 0.0, %v1852_v30  ;;  %v13120_v58 = vperm.slane %v1979_v9, %v11107_v3 }
 0x5b7   : > { %v13071_v15 = vpop.eup %10076  ;;  %v2029_v22 = vpack.c.bf16 %v1853_v38, %v1853_v38  ;;  %v4834_v52 = vmul.f32 1.442695, %v4811_v44  ;;  %v15310_v38 = vld [vmem:[#allocation50_spill] sm:$0xff] }
 0x5b8   : > { %v4870_v7 = vsel %vm4637_vm1, %v13071_v15, 0.0  ;;  %v13079_v29 = vpop.eup %10078  ;;  %v13131_v41 = vperm.slane %v15310_v38, %v11107_v3 }
 0x5b9   : > { %4871 = vadd.xlane.f32.xlu1 %v4870_v7  ;;  %4865 = vadd.xlane.f32.xlu0 %v4864_v23  ;;  %v4867_v19 = vsel %vm4637_vm1, %v13079_v29, 0.0  ;;  %v13085_v51 = vpop.eup %10080  ;;  %v4846_v7 = vmul.f32 1.442695, %v4817_v20 }
 0x5ba   : > { %v4876_v35 = vsel %vm4637_vm1, %v13085_v51, 0.0  ;;  %v13092_v60 = vpop.eup %10082 }
 0x5bb   : > { %v4879_v25 = vsel %vm4637_vm1, %v13092_v60, 0.0  ;;  %v13099_v23 = vpop.eup %10084  ;;  %10086 = vpow2.f32 %v4846_v7 }
 0x5bc   : > { %v4888_v57 = vsel %vm4637_vm1, %v13099_v23, 0.0  ;;  %v4788_v21 = vpop.xlane.xlu1 %4787  ;;  %10088 = vpow2.f32 %v4834_v52 }
 0x5bd   : > { %v4814_v20 = vsub.f32 %v13006_v0, %v4788_v21 }
 0x5c1   : > { %4868 = vadd.xlane.f32.xlu0 %v4867_v19  ;;  %v15306_v19 = vld [vmem:[#allocation39_spill] sm:$0xff]  ;;  %v13117_v27 = vpop.eup %10086 }
 0x5c2   : > { %v1856_v4 = vrot.slane %v15306_v19, 4  ;;  %v4891_v50 = vsel %vm4637_vm1, %v13117_v27, 0.0  ;;  %v13141_v44 = vpop.eup %10088 }
 0x5c4   : > { %v4791_v42 = vpop.xlane.xlu1 %4790 }
 0x5c9   : > { %4877 = vadd.xlane.f32.xlu0 %v4876_v35  ;;  %v15308_v35 = vld [vmem:[#allocation52_spill] sm:$0xff] }
 0x5ca   : > { %v15309_v8 = vunpack.i.h.bf16 %v15308_v35 }
 0x5cc   : > { %v1857_v6 = vsel %vm1206_vm0, %v15309_v8, %v1856_v4  ;;  %v4873_v4 = vsel %vm4637_vm1, %v13141_v44, 0.0 }
 0x5cd   : > { %v13123_v30 = vperm.slane %v1857_v6, %v11107_v3 }
 0x5d1   : > { %4880 = vadd.xlane.f32.xlu0 %v4879_v25  ;;  %v1990_v25 = vrot.slane %v13120_v58, 4 }
 0x5d3   : > { %v1991_v7 = vsel %vm1206_vm0, %v1990_v25, %v13126_v33 }
 0x5d4   : > { %9870 = vxpose.binary.xlu2.c.b16.start.end [1/2] (short) (narrow) %v2029_v22, %v2028_v43, 32  ;;  %v1892_v43 = vrot.slane %v13123_v30, 4  ;;  %v4840_v22 = vmul.f32 1.442695, %v4814_v20  ;;  %v1997_v10 = vperm.slane %v1991_v7, %v11119_v13 }
 0x5d6   : > { %v1893_v0 = vsel %vm1206_vm0, %v13131_v41, %v1892_v43  ;;  %10090 = vpow2.f32 %v4840_v22  ;;  %v2014_v11 = vrot.slane %v1997_v10, 4 }
 0x5d7   : > { %v1901_v19 = vperm.slane %v1893_v0, %v11119_v13 }
 0x5d8   : > { %v2015_v8 = vsel %vm1206_vm0, 0.0, %v2014_v11 }
 0x5d9   : > { %4889 = vadd.xlane.f32.xlu0 %v4888_v57  ;;  %v4815_v57 = vsub.f32 %v13012_v14, %v4791_v42  ;;  %v1908_v21 = vrot.slane %v1901_v19, 4  ;;  %v2046_v14 = vpack.c.bf16 %v1997_v10, %v1997_v10  ;;  %v2047_v16 = vpack.c.bf16 %v2015_v8, %v2015_v8 }
 0x5da   : > { %v2036_v20 = vpack.c.bf16 %v1901_v19, %v1901_v19  ;;  %v1957_v8 = vperm.slane %v12936_v48, %v11119_v13 }
 0x5db   : > { %v4842_v9 = vmul.f32 1.442695, %v4815_v57  ;;  %v1909_v6 = vsel %vm1206_vm0, 0.0, %v1908_v21 }
 0x5dc   : > { %v13148_v35 = vpop.eup %10090  ;;  %v2037_v38 = vpack.c.bf16 %v1909_v6, %v1909_v6  ;;  %v1953_v6 = vperm.slane %v12930_v55, %v11119_v13 }
 0x5dd   : > { %10092 = vpow2.f32 %v4842_v9  ;;  %v4882_v52 = vsel %vm4637_vm1, %v13148_v35, 0.0 }
 0x5e1   : > { %4892 = vadd.xlane.f32.xlu0 %v4891_v50 }
 0x5e3   : > { %v13154_v25 = vpop.eup %10092 }
 0x5e4   : > { %v4885_v22 = vsel %vm4637_vm1, %v13154_v25, 0.0 }
 0x5e9   : > { %4874 = vadd.xlane.f32.xlu0 %v4873_v4 }
 0x5f1   : > { %4883 = vadd.xlane.f32.xlu0 %v4882_v52  ;;  %v1964_v52 = vrot.slane %v1957_v8, 4 }
 0x5f3   : > { %9845 = vxpose.binary.xlu1.c.b16.start.end [1/2] (short) (narrow) %v2047_v16, %v2046_v14, 32  ;;  %v1962_v14 = vrot.slane %v1953_v6, 4  ;;  %v2044_v16 = vpack.c.bf16 %v1957_v8, %v1957_v8 }
 0x5f4   : > { %v4860_v50 = vpop.xlane.xlu0 %4859  ;;  %9875 = vxpose.binary.xlu2.c.b16.start.end [1/2] (short) (narrow) %v2037_v38, %v2036_v20, 32  ;;  %v2042_v38 = vpack.c.bf16 %v1953_v6, %v1953_v6 }
 0x5f5   : > { %10094 = vrcp.f32 %v4860_v50 }
 0x5f6   : > { %v4863_v43 = vpop.xlane.xlu2 %4862 }
 0x5f7   : > { %10096 = vrcp.f32 %v4863_v43 }
 0x5f9   : > { %4886 = vadd.xlane.f32.xlu0 %v4885_v22  ;;  %v15311_v22 = vld [vmem:[#allocation57_spill] sm:$0xff] }
 0x5fa   : > { %v1885_v48 = vperm.slane %v15311_v22, %v11119_v13 }
 0x5fb   : > { %v10095_v7 = vpop.eup %10094 }
 0x5fc   : > { %v4918_v42 = vmul.f32 %v10095_v7, %v13035_v46  ;;  %v1965_v46 = vsel %vm1206_vm0, 0.0, %v1964_v52  ;;  %v4896_v43 = vpop.xlane.xlu0 %4895  ;;  %v1902_v7 = vrot.slane %v1885_v48, 4 }
 0x5fd   : > { %v10097_v0 = vpop.eup %10096  ;;  %v2045_v20 = vpack.c.bf16 %v1965_v46, %v1965_v46  ;;  %10098 = vrcp.f32 %v4896_v43 }
 0x5fe   : > { %v4919_v10 = vmul.f32 %v10097_v0, %v13039_v24  ;;  %v4934_v57 = vpack.c.bf16 %v4918_v42, %v4918_v42  ;;  %v1963_v24 = vsel %vm1206_vm0, 0.0, %v1962_v14  ;;  %v4857_v42 = vpop.xlane.xlu2 %4856 }
 0x5ff   : > { %v2043_v50 = vpack.c.bf16 %v1963_v24, %v1963_v24 }
 0x600   : > { %v4935_v19 = vpack.c.bf16 %v4919_v10, %v4919_v10  ;;  %v7314_v4 = vunpack.c.l.b16 %v4934_v57  ;;  %v1903_v10 = vsel %vm1206_vm0, 0.0, %v1902_v7  ;;  %v1992_v57 = vrot.slane %v13126_v33, 4 }
 0x601   : > { %v2013_v33 = vperm.slane %v12939_v12, %v11119_v13 }
 0x602   : > { %v7315_v11 = vunpack.c.l.b16 %v4935_v19 }
 0x603   : > { %v10099_v0 = vpop.eup %10098 }
 0x604   : > { %v7317_v9 = vpack.c.b16 %v7315_v11, %v7314_v4  ;;  %v4930_v19 = vmul.f32 %v10099_v0, %v13045_v36  ;;  %v2030_v4 = vpack.c.bf16 %v1885_v48, %v1885_v48  ;;  %v2031_v11 = vpack.c.bf16 %v1903_v10, %v1903_v10 }
 0x606   : > { %v7328_v21 = vsel %vm4637_vm1, %v7317_v9, 0  ;;  %v4946_v52 = vpack.c.bf16 %v4930_v19, %v4930_v19 }
 0x607   : > { %7336 = vmatpush.bf16.xpose.msrb.mxu2 %v7328_v21  ;;  %v1993_v21 = vsel %vm1206_vm0, %v13120_v58, %v1992_v57  ;;  %v2020_v58 = vrot.slane %v2013_v33, 4 }
 0x608   : > { %v2001_v24 = vperm.slane %v1993_v21, %v11119_v13  ;;  %v7437_v36 = vunpack.c.l.b16 %v4946_v52 }
 0x609   : > { %v2021_v0 = vsel %vm1206_vm0, 0.0, %v2020_v58 }
 0x60a   : > { %v2048_v57 = vpack.c.bf16 %v2001_v24, %v2001_v24 }
 0x613   : > { %9850 = vxpose.binary.xlu1.c.b16.start.end [1/2] (short) (narrow) %v2045_v20, %v2044_v16, 32 }
 0x614   : > { %9880 = vxpose.binary.xlu2.c.b16.start.end [1/2] (short) (narrow) %v2043_v50, %v2042_v38, 32  ;;  %v2016_v50 = vrot.slane %v2001_v24, 4 }
 0x61c   : > { %v4899_v55 = vpop.xlane.xlu0 %4898 }
 0x61d   : > { %10100 = vrcp.f32 %v4899_v55  ;;  %v2017_v55 = vsel %vm1206_vm0, 0.0, %v2016_v50 }
 0x61e   : > { %10102 = vrcp.f32 %v4857_v42  ;;  %v1890_v42 = vrot.slane %v13131_v41, 4  ;;  %v2049_v19 = vpack.c.bf16 %v2017_v55, %v2017_v55 }
 0x620   : > { %v1891_v21 = vsel %vm1206_vm0, %v1890_v42, %v13123_v30 }
 0x622   : > { %9890 = vxpose.binary.xlu0.c.b16.start.end [1/2] (short) (narrow) %v2031_v11, %v2030_v4, 32  ;;  %v2052_v4 = vpack.c.bf16 %v2013_v33, %v2013_v33  ;;  %v2053_v11 = vpack.c.bf16 %v2021_v0, %v2021_v0 }
 0x623   : > { %v10101_v9 = vpop.eup %10100 }
 0x624   : > { %v4931_v8 = vmul.f32 %v10101_v9, %v13055_v61  ;;  %v4854_v6 = vpop.xlane.xlu0 %4853  ;;  %v10103_v14 = vpop.eup %10102 }
 0x625   : > { %10104 = vrcp.f32 %v4854_v6  ;;  %v4917_v20 = vmul.f32 %v10103_v14, %v13047_v34 }
 0x626   : > { %v4947_v46 = vpack.c.bf16 %v4931_v8, %v4931_v8  ;;  %v1897_v8 = vperm.slane %v1891_v21, %v11119_v13 }
 0x627   : > { %v4933_v7 = vpack.c.bf16 %v4917_v20, %v4917_v20  ;;  %v1936_v20 = vrot.slane %v12903_v54, 4 }
 0x628   : > { %v7438_v16 = vunpack.c.l.b16 %v4947_v46  ;;  %v1906_v6 = vrot.slane %v1897_v8, 4  ;;  %v2034_v46 = vpack.c.bf16 %v1897_v8, %v1897_v8 }
 0x629   : > { %v7313_v34 = vunpack.c.l.b16 %v4933_v7  ;;  %v1937_v58 = vsel %vm1206_vm0, %v12897_v59, %v1936_v20 }
 0x62a   : > { %v7440_v38 = vpack.c.b16 %v7438_v16, %v7437_v36  ;;  %v1907_v14 = vsel %vm1206_vm0, 0.0, %v1906_v6  ;;  %v2009_v36 = vperm.slane %v12933_v56, %v11119_v13  ;;  %v1945_v56 = vperm.slane %v1937_v58, %v11119_v13 }
 0x62b   : > { %v10105_v43 = vpop.eup %10104  ;;  %v2035_v24 = vpack.c.bf16 %v1907_v14, %v1907_v14 }
 0x62c   : > { %v4866_v22 = vpop.xlane.xlu0 %4865  ;;  %v7451_v61 = vsel %vm4637_vm1, %v7440_v38, 0  ;;  %v4916_v48 = vmul.f32 %v10105_v43, %v13062_v1  ;;  %v2018_v30 = vrot.slane %v2009_v36, 4  ;;  %v2050_v50 = vpack.c.bf16 %v2009_v36, %v2009_v36 }
 0x62d   : > { %7459 = vmatpush.bf16.xpose.msra.mxu1 %v7451_v61  ;;  %v4872_v61 = vpop.xlane.xlu1 %4871  ;;  %v1960_v54 = vrot.slane %v1945_v56, 4 }
 0x62e   : > { %v4932_v12 = vpack.c.bf16 %v4916_v48, %v4916_v48  ;;  %v2019_v38 = vsel %vm1206_vm0, 0.0, %v2018_v30 }
 0x62f   : > { %v2051_v43 = vpack.c.bf16 %v2019_v38, %v2019_v38 }
 0x630   : > { %v7312_v10 = vunpack.c.l.b16 %v4932_v12 }
 0x632   : > { %v7316_v9 = vpack.c.b16 %v7313_v34, %v7312_v10 }
 0x633   : > { %9855 = vxpose.binary.xlu1.c.b16.start.end [1/2] (short) (narrow) %v2049_v19, %v2048_v57, 32  ;;  %v1961_v19 = vsel %vm1206_vm0, 0.0, %v1960_v54 }
 0x634   : > { %9885 = vxpose.binary.xlu2.c.b16.start.end [1/2] (short) (narrow) %v2053_v11, %v2052_v4, 32  ;;  %v4869_v1 = vpop.xlane.xlu0 %4868  ;;  %v7325_v41 = vsel %vm4637_vm1, %v7316_v9, 0  ;;  %v2040_v11 = vpack.c.bf16 %v1945_v56, %v1945_v56  ;;  %v2041_v21 = vpack.c.bf16 %v1961_v19, %v1961_v19  ;;  %v5462_v56 = vrot.slane %v12870_v62, 4 }
 0x635   : > { %7337 = vmatpush.bf16.xpose.msrb.mxu2 %v7325_v41 }
 0x63c   : > { %v4878_v52 = vpop.xlane.xlu0 %4877 }
 0x642   : > { %9895 = vxpose.binary.xlu0.c.b16.start.end [1/2] (short) (narrow) %v2035_v24, %v2034_v46, 32 }
 0x644   : > { %v4881_v33 = vpop.xlane.xlu0 %4880 }
 0x64c   : > { %v4890_v16 = vpop.xlane.xlu0 %4889 }
 0x64d   : > { %10106 = vrcp.f32 %v4890_v16 }
 0x653   : > { %9860 = vxpose.binary.xlu1.c.b16.start.end [1/2] (short) (narrow) %v2051_v43, %v2050_v50, 32  ;;  %v10107_v7 = vpop.eup %10106 }
 0x654   : > { %v4893_v48 = vpop.xlane.xlu0 %4892  ;;  %v4928_v55 = vmul.f32 %v10107_v7, %v13099_v23 }
 0x655   : > { %10108 = vrcp.f32 %v4893_v48  ;;  %v9866_v42 = vpop.trf.xlu2 }
 0x656   : > { %10110 = vrcp.f32 %v4872_v61  ;;  %v4944_v34 = vpack.c.bf16 %v4928_v55, %v4928_v55  ;;  %v5463_v54 = vsel %vm1206_vm0, %v9866_v42, %v5462_v56 }
 0x657   : > { %10112 = vrcp.f32 %v4869_v1  ;;  %v5471_v19 = vperm.slane %v5463_v54, %v11107_v3  ;;  %v5922_v54 = vrot.slane %v12986_v37, 4 }
 0x658   : > { %10114 = vrcp.f32 %v4866_v22  ;;  %v7435_v23 = vunpack.c.l.b16 %v4944_v34 }
 0x65b   : > { %v10109_v12 = vpop.eup %10108 }
 0x65c   : > { %v4875_v0 = vpop.xlane.xlu0 %4874  ;;  %v4929_v10 = vmul.f32 %v10109_v12, %v13117_v27  ;;  %v10111_v59 = vpop.eup %10110 }
 0x65d   : > { %10116 = vrcp.f32 %v4875_v0  ;;  %v13198_v57 = vpop.trf.xlu2  ;;  %v4922_v9 = vmul.f32 %v10111_v59, %v13071_v15  ;;  %v10113_v8 = vpop.eup %10112  ;;  %v5474_v59 = vrot.slane %v12972_v17, 4 }
 0x65e   : > { %v4945_v4 = vpack.c.bf16 %v4929_v10, %v4929_v10  ;;  %v10115_v1 = vpop.eup %10114  ;;  %v4921_v36 = vmul.f32 %v10113_v8, %v13079_v29 }
 0x65f   : > { %v4938_v24 = vpack.c.bf16 %v4922_v9, %v4922_v9  ;;  %v4920_v16 = vmul.f32 %v10115_v1, %v13069_v47  ;;  %v5460_v47 = vrot.slane %v9866_v42, 4  ;;  %v5522_v1 = vrot.slane %v5471_v19, 4 }
 0x660   : > { %v7436_v41 = vunpack.c.l.b16 %v4945_v4  ;;  %v4937_v50 = vpack.c.bf16 %v4921_v36, %v4921_v36 }
 0x661   : > { %v7355_v20 = vunpack.c.l.b16 %v4938_v24  ;;  %v4936_v58 = vpack.c.bf16 %v4920_v16, %v4920_v16  ;;  %v5461_v10 = vsel %vm1206_vm0, %v5460_v47, %v12870_v62 }
 0x662   : > { %9900 = vxpose.binary.xlu0.c.b16.start.end [1/2] (short) (narrow) %v2041_v21, %v2040_v11, 32  ;;  %v7439_v22 = vpack.c.b16 %v7436_v41, %v7435_v23  ;;  %v7354_v48 = vunpack.c.l.b16 %v4937_v50 }
 0x663   : > { %v10117_v6 = vpop.eup %10116  ;;  %v7353_v55 = vunpack.c.l.b16 %v4936_v58 }
 0x664   : > { %v4923_v27 = vmul.f32 %v10117_v6, %v13141_v44  ;;  %v4884_v14 = vpop.xlane.xlu0 %4883  ;;  %v7448_v46 = vsel %vm4637_vm1, %v7439_v22, 0 }
 0x665   : > { %v13205_v30 = vpop.trf.xlu2  ;;  %7460 = vmatpush.bf16.xpose.msra.mxu1 %v7448_v46  ;;  %10118 = vrcp.f32 %v4884_v14  ;;  %v7357_v0 = vpack.c.b16 %v7354_v48, %v7353_v55 }
 0x666   : > { %v4939_v15 = vpack.c.bf16 %v4923_v27, %v4923_v27  ;;  %10120 = vrcp.f32 %v4881_v33 }
 0x667   : > { %10122 = vrcp.f32 %v4878_v52  ;;  %v7366_v11 = vsel %vm4637_vm1, %v7357_v0, 0 }
 0x668   : > { %v7356_v38 = vunpack.c.l.b16 %v4939_v15 }
 0x66a   : > { %v7358_v43 = vpack.c.b16 %v7356_v38, %v7355_v20 }
 0x66b   : > { %v10119_v7 = vpop.eup %10118 }
 0x66c   : > { %v4887_v44 = vpop.xlane.xlu0 %4886  ;;  %v7369_v61 = vsel %vm4637_vm1, %v7358_v43, 0  ;;  %v4926_v12 = vmul.f32 %v10119_v7, %v13148_v35  ;;  %v10121_v33 = vpop.eup %10120  ;;  %v5467_v35 = vperm.slane %v5461_v10, %v11107_v3 }
 0x66d   : > { %10124 = vrcp.f32 %v4887_v44  ;;  %v13209_v29 = vpop.trf.xlu2  ;;  %7377 = vmatpush.bf16.xpose.msrb.mxu3 %v7369_v61  ;;  %v10123_v52 = vpop.eup %10122  ;;  %v4925_v42 = vmul.f32 %v10121_v33, %v13092_v60  ;;  %v5910_v44 = vrot.slane %v12881_v39, 4  ;;  %v5908_v61 = vrot.slane %v13205_v30, 4 }
 0x66e   : > { %v4942_v9 = vpack.c.bf16 %v4926_v12, %v4926_v12  ;;  %v4924_v8 = vmul.f32 %v10123_v52, %v13085_v51  ;;  %v5510_v60 = vrot.slane %v5467_v35, 4  ;;  %v6022_v52 = vrot.slane %v12887_v32, 4 }
 0x66f   : > { %v4941_v14 = vpack.c.bf16 %v4925_v42, %v4925_v42  ;;  %v5911_v7 = vsel %vm1206_vm0, %v13205_v30, %v5910_v44  ;;  %v5909_v47 = vsel %vm1206_vm0, %v5908_v61, %v12881_v39  ;;  %v6020_v10 = vrot.slane %v13209_v29, 4 }
 0x670   : > { %v7396_v6 = vunpack.c.l.b16 %v4942_v9  ;;  %v4940_v16 = vpack.c.bf16 %v4924_v8, %v4924_v8  ;;  %v5919_v55 = vperm.slane %v5911_v7, %v11107_v3  ;;  %v5915_v0 = vperm.slane %v5909_v47, %v11107_v3 }
 0x671   : > { %v7395_v50 = vunpack.c.l.b16 %v4941_v14 }
 0x672   : > { %v7394_v48 = vunpack.c.l.b16 %v4940_v16 }
 0x673   : > { %v10125_v34 = vpop.eup %10124 }
 0x674   : > { %v4927_v4 = vmul.f32 %v10125_v34, %v13154_v25  ;;  %v7398_v56 = vpack.c.b16 %v7395_v50, %v7394_v48 }
 0x675   : > { %v9871_v21 = vpop.trf.xlu2  ;;  %7378 = vmatpush.bf16.xpose.msrb.mxu3 %v7366_v11  ;;  %v5958_v11 = vrot.slane %v5915_v0, 4 }
 0x676   : > { %v5472_v23 = vrot.slane %v9871_v21, 4  ;;  %v5475_v41 = vsel %vm1206_vm0, %v9871_v21, %v5474_v59  ;;  %v4943_v62 = vpack.c.bf16 %v4927_v4, %v4927_v4  ;;  %v7407_v12 = vsel %vm4637_vm1, %v7398_v56, 0 }
 0x677   : > { %v5483_v22 = vperm.slane %v5475_v41, %v11107_v3  ;;  %v5970_v59 = vrot.slane %v5919_v55, 4  ;;  %v6021_v21 = vsel %vm1206_vm0, %v6020_v10, %v12887_v32 }
 0x678   : > { %v5473_v25 = vsel %vm1206_vm0, %v5472_v23, %v12972_v17  ;;  %v7397_v27 = vunpack.c.l.b16 %v4943_v62  ;;  %v6027_v8 = vperm.slane %v6021_v21, %v11107_v3 }
 0x679   : > { %v5479_v46 = vperm.slane %v5473_v25, %v11107_v3  ;;  %v5520_v24 = vrot.slane %v5483_v22, 4  ;;  %v13229_v36 = vsel %vm1206_vm0, %v5483_v22, %v5522_v1 }
 0x67a   : > { %v7399_v15 = vpack.c.b16 %v7397_v27, %v7396_v6 }
 0x67b   : > { %v5508_v20 = vrot.slane %v5479_v46, 4  ;;  %v13232_v51 = vsel %vm1206_vm0, %v5479_v46, %v5510_v60  ;;  %v13235_v38 = vsel %vm1206_vm0, %v5520_v24, %v5471_v19  ;;  %v6023_v19 = vsel %vm1206_vm0, %v13209_v29, %v6022_v52 }
 0x67c   : > { %v7410_v17 = vsel %vm4637_vm1, %v7399_v15, 0  ;;  %v6031_v23 = vperm.slane %v6023_v19, %v11107_v3  ;;  %v6070_v60 = vrot.slane %v6027_v8, 4  ;;  %v5586_v52 = vrot.slane %v12980_v45, 4 }
 0x67d   : > { %v13239_v43 = vsel %vm1206_vm0, %v5508_v20, %v5467_v35  ;;  %v13241_v58 = vpop.trf.xlu2  ;;  %7418 = vmatpush.bf16.xpose.msra.mxu0 %v7410_v17  ;;  %v5572_v19 = vrot.slane %v13198_v57, 4 }
 0x67e   : > { %v6082_v6 = vrot.slane %v6031_v23, 4 }
 0x685   : > { %v9873_v33 = vpop.trf.xlu2  ;;  %7419 = vmatpush.bf16.xpose.msra.mxu0 %v7407_v12 }
 0x686   : > { %v5920_v34 = vrot.slane %v9873_v33, 4  ;;  %v5923_v30 = vsel %vm1206_vm0, %v9873_v33, %v5922_v54 }
 0x687   : > { %v5931_v39 = vperm.slane %v5923_v30, %v11107_v3  ;;  %v5584_v30 = vrot.slane %v13241_v58, 4 }
 0x688   : > { %v5921_v4 = vsel %vm1206_vm0, %v5920_v34, %v12986_v37  ;;  %v6034_v37 = vrot.slane %v12994_v53, 4  ;;  %v5574_v34 = vrot.slane %v12878_v28, 4 }
 0x689   : > { %v5927_v9 = vperm.slane %v5921_v4, %v11107_v3  ;;  %v5968_v42 = vrot.slane %v5931_v39, 4  ;;  %v13263_v35 = vsel %vm1206_vm0, %v5931_v39, %v5970_v59  ;;  %v5587_v39 = vsel %vm1206_vm0, %v13241_v58, %v5586_v52 }
 0x68a   : > { %v5575_v4 = vsel %vm1206_vm0, %v13198_v57, %v5574_v34  ;;  %v5798_v52 = vrot.slane %v13028_v63, 4 }
 0x68b   : > { %v5956_v41 = vrot.slane %v5927_v9, 4  ;;  %v13269_v62 = vsel %vm1206_vm0, %v5927_v9, %v5958_v11  ;;  %v13272_v29 = vsel %vm1206_vm0, %v5968_v42, %v5919_v55  ;;  %v5585_v11 = vsel %vm1206_vm0, %v5584_v30, %v12980_v45 }
 0x68c   : > { %v5595_v9 = vperm.slane %v5587_v39, %v11107_v3  ;;  %v5583_v42 = vperm.slane %v5575_v4, %v11107_v3 }
 0x68d   : > { %v13277_v1 = vsel %vm1206_vm0, %v5956_v41, %v5915_v0  ;;  %v9874_v22 = vpop.trf.xlu2  ;;  %v5591_v41 = vperm.slane %v5585_v11, %v11107_v3  ;;  %v6134_v11 = vrot.slane %v13032_v2, 4 }
 0x68e   : > { %v6032_v25 = vrot.slane %v9874_v22, 4  ;;  %v6035_v32 = vsel %vm1206_vm0, %v9874_v22, %v6034_v37  ;;  %v5632_v37 = vrot.slane %v5595_v9, 4  ;;  %v5634_v22 = vrot.slane %v5583_v42, 4 }
 0x68f   : > { %v6043_v27 = vperm.slane %v6035_v32, %v11107_v3  ;;  %v5620_v45 = vrot.slane %v5591_v41, 4  ;;  %v5498_v32 = vrot.slane %v13000_v49, 4 }
 0x690   : > { %v6033_v14 = vsel %vm1206_vm0, %v6032_v25, %v12994_v53  ;;  %v5635_v25 = vsel %vm1206_vm0, %v5595_v9, %v5634_v22 }
 0x691   : > { %v6039_v46 = vperm.slane %v6033_v14, %v11107_v3  ;;  %v6080_v24 = vrot.slane %v6043_v27, 4  ;;  %v13285_v15 = vsel %vm1206_vm0, %v6043_v27, %v6082_v6  ;;  %v5610_v6 = vrot.slane %v13008_v31, 4 }
 0x692   : > { %v5633_v27 = vsel %vm1206_vm0, %v5632_v37, %v5583_v42  ;;  %v13363_v34 = vperm.slane %v5635_v25, %v11119_v13  ;;  %v13379_v42 = vperm.slane %v13232_v51, %v11119_v13  ;;  %v13389_v37 = vperm.slane %v13239_v43, %v11119_v13 }
 0x693   : > { %v6068_v16 = vrot.slane %v6039_v46, 4  ;;  %v13288_v20 = vsel %vm1206_vm0, %v6039_v46, %v6070_v60  ;;  %v13291_v17 = vsel %vm1206_vm0, %v6080_v24, %v6031_v23  ;;  %v5573_v23 = vsel %vm1206_vm0, %v5572_v19, %v12878_v28 }
 0x694   : > { %v5579_v57 = vperm.slane %v5573_v23, %v11107_v3  ;;  %v5946_v28 = vrot.slane %v13014_v40, 4  ;;  %v13353_v60 = vperm.slane %v13235_v38, %v11119_v13  ;;  %v13357_v46 = vperm.slane %v13229_v36, %v11119_v13  ;;  %15314 = vst [vmem:[#allocation62_spill] sm:$0xff] %v13379_v42 }
 0x695   : > { %v13294_v50 = vsel %vm1206_vm0, %v6068_v16, %v6027_v8  ;;  %v13296_v44 = vpop.trf.xlu2  ;;  %v6058_v24 = vrot.slane %v13018_v26, 4  ;;  %v5686_v16 = vrot.slane %v13022_v18, 4  ;;  %v13368_v38 = vperm.slane %v5633_v27, %v11119_v13  ;;  %15316 = vst [vmem:[#allocation71_spill] sm:$0xff] %v13389_v37 }
 0x696   : > { %v5622_v14 = vrot.slane %v5579_v57, 4  ;;  %15312 = vst [vmem:[#allocation67_spill] sm:$0xff] %v13353_v60  ;;  %v5621_v30 = vsel %vm1206_vm0, %v5620_v45, %v5579_v57  ;;  %v5496_v19 = vrot.slane %v13296_v44, 4  ;;  %v13383_v23 = vperm.slane %v13263_v35, %v11119_v13 }
 0x697   : > { %15313 = vst [vmem:[#allocation65_spill] sm:$0xff] %v13368_v38  ;;  %v13395_v25 = vperm.slane %v5621_v30, %v11119_v13  ;;  %v13405_v43 = vperm.slane %v13272_v29, %v11119_v13  ;;  %v5499_v30 = vsel %vm1206_vm0, %v13296_v44, %v5498_v32  ;;  %v13421_v29 = vperm.slane %v13277_v1, %v11119_v13 }
 0x698   : > { %v5623_v39 = vsel %vm1206_vm0, %v5591_v41, %v5622_v14  ;;  %15315 = vst [vmem:[#allocation66_spill] sm:$0xff] %v13383_v23  ;;  %v5497_v57 = vsel %vm1206_vm0, %v5496_v19, %v13000_v49  ;;  %v13425_v49 = vperm.slane %v13285_v15, %v11119_v13  ;;  %v13433_v32 = vperm.slane %v13291_v17, %v11119_v13 }
 0x699   : > { %15317 = vst [vmem:[#allocation68_spill] sm:$0xff] %v13395_v25  ;;  %v13398_v51 = vperm.slane %v5623_v39, %v11119_v13  ;;  %v13413_v39 = vperm.slane %v13269_v62, %v11119_v13  ;;  %v13439_v1 = vperm.slane %v5499_v30, %v11107_v3 }
 0x69a   : > { %15318 = vst [vmem:[#allocation74_spill] sm:$0xff] %v13405_v43 }
 0x69b   : > { %15319 = vst [vmem:[#allocation72_spill] sm:$0xff] %v13413_v39 }
 0x69c   : > { %15320 = vst [vmem:[#allocation73_spill] sm:$0xff] %v13421_v29 }
 0x69d   : > { %v13300_v61 = vpop.trf.xlu2  ;;  %15321 = vst [vmem:[#allocation76_spill] sm:$0xff] %v13425_v49  ;;  %v15330_v49 = vrot.slane %v13357_v46, 4 }
 0x69e   : > { %v5608_v45 = vrot.slane %v13300_v61, 4  ;;  %v5611_v22 = vsel %vm1206_vm0, %v13300_v61, %v5610_v6  ;;  %15322 = vst [vmem:[#allocation75_spill] sm:$0xff] %v13433_v32  ;;  %v13436_v61 = vperm.slane %v5497_v57, %v11107_v3 }
 0x69f   : > { %v13298_v53 = vpop.trf.xlu1 }
 0x6a0   : > { %v5609_v44 = vsel %vm1206_vm0, %v5608_v45, %v13008_v31  ;;  %v13446_v31 = vperm.slane %v13288_v20, %v11119_v13 }
 0x6a1   : > { %v13457_v57 = vperm.slane %v5609_v44, %v11107_v3 }
 0x6a2   : > { %15323 = vst [vmem:[#allocation70_spill] sm:$0xff] %v13446_v31 }
 0x6a5   : > { %v13304_v7 = vpop.trf.xlu2 }
 0x6a6   : > { %v5944_v27 = vrot.slane %v13304_v7, 4  ;;  %v5947_v62 = vsel %vm1206_vm0, %v13304_v7, %v5946_v28  ;;  %v13449_v7 = vperm.slane %v5611_v22, %v11107_v3 }
 0x6a7   : > { %v13302_v48 = vpop.trf.xlu1 }
 0x6a8   : > { %v5945_v15 = vsel %vm1206_vm0, %v5944_v27, %v13014_v40  ;;  %v13460_v40 = vperm.slane %v5947_v62, %v11107_v3  ;;  %v13470_v27 = vperm.slane %v13294_v50, %v11119_v13 }
 0x6a9   : > { %v13474_v44 = vperm.slane %v5945_v15, %v11107_v3 }
 0x6aa   : > { %15324 = vst [vmem:[#allocation69_spill] sm:$0xff] %v13470_v27 }
 0x6ad   : > { %v13308_v47 = vpop.trf.xlu2 }
 0x6ae   : > { %v6056_v14 = vrot.slane %v13308_v47, 4  ;;  %v6059_v20 = vsel %vm1206_vm0, %v13308_v47, %v6058_v24 }
 0x6af   : > { %v13306_v56 = vpop.trf.xlu1  ;;  %v13485_v50 = vperm.slane %v6059_v20, %v11107_v3 }
 0x6b0   : > { %v6057_v45 = vsel %vm1206_vm0, %v6056_v14, %v13018_v26 }
 0x6b1   : > { %v13482_v24 = vperm.slane %v6057_v45, %v11107_v3 }
 0x6b5   : > { %v13314_v12 = vpop.trf.xlu2 }
 0x6b6   : > { %v5684_v17 = vrot.slane %v13314_v12, 4  ;;  %v5687_v30 = vsel %vm1206_vm0, %v13314_v12, %v5686_v16 }
 0x6b7   : > { %v13310_v55 = vpop.trf.xlu1 }
 0x6b8   : > { %v5685_v15 = vsel %vm1206_vm0, %v5684_v17, %v13022_v18  ;;  %v13507_v17 = vperm.slane %v5687_v30, %v11107_v3 }
 0x6b9   : > { %v13504_v16 = vperm.slane %v5685_v15, %v11107_v3 }
 0x6bd   : > { %v13318_v33 = vpop.trf.xlu2 }
 0x6be   : > { %v5796_v62 = vrot.slane %v13318_v33, 4  ;;  %v5799_v18 = vsel %vm1206_vm0, %v13318_v33, %v5798_v52 }
 0x6bf   : > { %v13312_v54 = vpop.trf.xlu1  ;;  %v13519_v15 = vperm.slane %v5799_v18, %v11107_v3 }
 0x6c0   : > { %v5797_v20 = vsel %vm1206_vm0, %v5796_v62, %v13028_v63 }
 0x6c1   : > { %v13516_v52 = vperm.slane %v5797_v20, %v11107_v3 }
 0x6c5   : > { %v13336_v21 = vpop.trf.xlu2 }
 0x6c6   : > { %v6132_v30 = vrot.slane %v13336_v21, 4 }
 0x6c7   : > { %v13316_v0 = vpop.trf.xlu1 }
 0x6c8   : > { %v6133_v43 = vsel %vm1206_vm0, %v6132_v30, %v13032_v2 }
 0x6cd   : > { %v13371_v36 = vpop.trf.xlu2 }
 0x6ce   : > { %v13321_v10 = vpop.trf.xlu0  ;;  %v6244_v62 = vrot.slane %v13371_v36, 4 }
 0x6cf   : > { %v13325_v59 = vpop.trf.xlu1  ;;  %v5486_v47 = vrot.slane %v13321_v10, 4 }
 0x6d5   : > { %v13454_v19 = vpop.trf.xlu2 }
 0x6d6   : > { %v13341_v58 = vpop.trf.xlu0  ;;  %v5720_v45 = vrot.slane %v13454_v19, 4 }
 0x6d7   : > { %v13343_v8 = vpop.trf.xlu1  ;;  %v5598_v18 = vrot.slane %v13341_v58, 4 }
 0x6dd   : > { %v13530_v33 = vpop.trf.xlu2 }
 0x6de   : > { %v13373_v4 = vpop.trf.xlu0 }
 0x6df   : > { %v13385_v41 = vpop.trf.xlu1 }
 0x6e0   : > { %v5722_v26 = vrot.slane %v13385_v41, 4  ;;  %v5721_v20 = vsel %vm1206_vm0, %v5720_v45, %v13385_v41 }
 0x6e6   : > { %v13452_v28 = vpop.trf.xlu0 }
 0x6e7   : > { %v13466_v22 = vpop.trf.xlu1 }
 0x6ee   : > { %v9896_v14 = vpop.trf.xlu0 }
 0x6ef   : > { %v5487_v12 = vsel %vm1206_vm0, %v9896_v14, %v5486_v47  ;;  %v13523_v35 = vpop.trf.xlu1  ;;  %v6135_v47 = vsel %vm1206_vm0, %v13336_v21, %v6134_v11  ;;  %v5484_v9 = vrot.slane %v9896_v14, 4  ;;  %v6245_v11 = vsel %vm1206_vm0, %v6244_v62, %v13043_v5 }
 0x6f0   : > { %v13528_v63 = vperm.slane %v5487_v12, %v11107_v3  ;;  %v13549_v21 = vperm.slane %v6135_v47, %v11107_v3  ;;  %v15325_v14 = vrot.slane %v13043_v5, 4  ;;  %v13564_v47 = vperm.slane %v6133_v43, %v11107_v3 }
 0x6f1   : > { %v5485_v5 = vsel %vm1206_vm0, %v5484_v9, %v13321_v10  ;;  %v13572_v6 = vperm.slane %v6245_v11, %v11107_v3  ;;  %v13584_v9 = vperm.slane %v5721_v20, %v11107_v3  ;;  %v5832_v11 = vrot.slane %v13530_v33, 4 }
 0x6f2   : > { %v6247_v32 = vsel %vm1206_vm0, %v13371_v36, %v15325_v14  ;;  %v5546_v12 = vrot.slane %v13528_v63, 4  ;;  %v5723_v36 = vsel %vm1206_vm0, %v13454_v19, %v5722_v26  ;;  %v5491_v26 = vperm.slane %v5485_v5, %v11107_v3 }
 0x6f3   : > { %15326 = vst [vmem:[#allocation80_spill] sm:$0xff] %v13572_v6  ;;  %v13575_v41 = vperm.slane %v6247_v32, %v11107_v3  ;;  %v13591_v32 = vperm.slane %v5723_v36, %v11107_v3  ;;  %v5833_v5 = vsel %vm1206_vm0, %v5832_v11, %v13466_v22  ;;  %v15328_v36 = vrot.slane %v13436_v61, 4 }
 0x6f4   : > { %v5547_v10 = vsel %vm1206_vm0, %v13439_v1, %v5546_v12  ;;  %v5534_v12 = vrot.slane %v5491_v26, 4  ;;  %v15331_v11 = vrot.slane %v13363_v34, 4 }
 0x6f5   : > { %15327 = vst [vmem:[#allocation64_spill] sm:$0xff] %v13575_v41  ;;  %v13604_v27 = vperm.slane %v5547_v10, %v11119_v13  ;;  %v6046_v10 = vrot.slane %v13452_v28, 4  ;;  %v5533_v6 = vsel %vm1206_vm0, %v15328_v36, %v5491_v26  ;;  %v13638_v36 = vperm.slane %v5833_v5, %v11107_v3 }
 0x6f6   : > { %v9897_v14 = vpop.trf.xlu0  ;;  %v5535_v23 = vsel %vm1206_vm0, %v13436_v61, %v5534_v12  ;;  %v13644_v38 = vperm.slane %v5533_v6, %v11119_v13  ;;  %v15334_v5 = vrot.slane %v13460_v40, 4  ;;  %v15335_v61 = vrot.slane %v13439_v1, 4 }
 0x6f7   : > { %v5596_v45 = vrot.slane %v9897_v14, 4  ;;  %v5599_v30 = vsel %vm1206_vm0, %v9897_v14, %v5598_v18  ;;  %v13578_v43 = vpop.trf.xlu1  ;;  %v15329_v14 = vrot.slane %v13457_v57, 4  ;;  %v13674_v1 = vperm.slane %v5535_v23, %v11119_v13 }
 0x6f8   : > { %v13587_v19 = vperm.slane %v5599_v30, %v11107_v3  ;;  %v9888_v30 = vpop.trf.xlu2  ;;  %15332 = vst [vmem:[#allocation63_spill] sm:$0xff] %v13644_v38  ;;  %v5545_v6 = vsel %vm1206_vm0, %v15335_v61, %v13528_v63 }
 0x6f9   : > { %v5597_v18 = vsel %vm1206_vm0, %v5596_v45, %v13341_v58  ;;  %v5934_v58 = vrot.slane %v13373_v4, 4  ;;  %v5834_v45 = vrot.slane %v13466_v22, 4  ;;  %v6168_v39 = vrot.slane %v9888_v30, 4 }
 0x6fa   : > { %v5603_v20 = vperm.slane %v5597_v18, %v11107_v3  ;;  %v5658_v2 = vrot.slane %v13587_v19, 4  ;;  %v5571_v22 = vsel %vm1206_vm0, %v13604_v27, %v15330_v49 }
 0x6fb   : > { %v6169_v12 = vsel %vm1206_vm0, %v6168_v39, %v13523_v35  ;;  %v6416_v61 = vshrl.u32 %v5571_v22, 16 }
 0x6fc   : > { %v5659_v18 = vsel %vm1206_vm0, %v13449_v7, %v5658_v2  ;;  %v5645_v31 = vsel %vm1206_vm0, %v15329_v14, %v5603_v20  ;;  %v5835_v14 = vsel %vm1206_vm0, %v13530_v33, %v5834_v45  ;;  %v5646_v60 = vrot.slane %v5603_v20, 4 }
 0x6fd   : > { %v13613_v62 = vperm.slane %v5659_v18, %v11119_v13  ;;  %v13647_v49 = vperm.slane %v5645_v31, %v11119_v13  ;;  %v6170_v31 = vrot.slane %v13523_v35, 4  ;;  %v15337_v35 = vrot.slane %v13389_v37, 4 }
 0x6fe   : > { %v9898_v2 = vpop.trf.xlu0 }
 0x6ff   : > { %v5932_v41 = vrot.slane %v9898_v2, 4  ;;  %v5935_v29 = vsel %vm1206_vm0, %v9898_v2, %v5934_v58  ;;  %v13625_v18 = vpop.trf.xlu1  ;;  %v5683_v26 = vsel %vm1206_vm0, %v13613_v62, %v15331_v11  ;;  %15333 = vst [vmem:[#allocation85_spill] sm:$0xff] %v13647_v49  ;;  %v5559_v39 = vsel %vm1206_vm0, %v13644_v38, %v15337_v35 }
 0x700   : > { %v5943_v58 = vperm.slane %v5935_v29, %v11107_v3  ;;  %v6414_v2 = vpack.i.b16 %v5683_v26, %v5571_v22  ;;  %v9889_v63 = vpop.trf.xlu2  ;;  %v15339_v22 = vrot.slane %v13298_v53, 4  ;;  %v13701_v35 = vperm.slane %v5545_v6, %v11119_v13 }
 0x701   : > { %v5933_v11 = vsel %vm1206_vm0, %v5932_v41, %v13373_v4  ;;  %v6417_v4 = vshrl.u32 %v5683_v26, 16  ;;  %v15336_v41 = vrot.slane %v13474_v44, 4  ;;  %v15338_v26 = vrot.slane %v13395_v25, 4 }
 0x702   : > { %v5939_v33 = vperm.slane %v5933_v11, %v11107_v3  ;;  %v13655_v29 = vsel %vm1206_vm0, %v15334_v5, %v5943_v58  ;;  %v5994_v45 = vrot.slane %v5943_v58, 4  ;;  %v13677_v5 = vperm.slane %v5835_v14, %v11107_v3 }
 0x703   : > { %v13694_v14 = vperm.slane %v6169_v12, %v11107_v3  ;;  %v6418_v37 = vpack.i.b16 %v6417_v4, %v6416_v61  ;;  %v6368_v25 = vshrl.u32 %v5559_v39, 16  ;;  %v15340_v12 = vrot.slane %v13379_v42, 4 }
 0x704   : > { %v13667_v20 = vsel %vm1206_vm0, %v15336_v41, %v5939_v33  ;;  %v5982_v11 = vrot.slane %v5939_v33, 4  ;;  %v13671_v58 = vsel %vm1206_vm0, %v13460_v40, %v5994_v45  ;;  %v5671_v33 = vsel %vm1206_vm0, %v13647_v49, %v15338_v26 }
 0x705   : > { %v5647_v40 = vsel %vm1206_vm0, %v13457_v57, %v5646_v60  ;;  %v5711_v45 = vsel %vm1206_vm0, %v13625_v18, %v15339_v22  ;;  %v6171_v26 = vsel %vm1206_vm0, %v9888_v30, %v6170_v31  ;;  %v6280_v60 = vrot.slane %v9889_v63, 4  ;;  %9905 = vxpose.binary.xlu0.c.b16.start [1/4] (short) (narrow) %v6418_v37, %v6414_v2, 16 }
 0x706   : > { %v13691_v23 = vsel %vm1206_vm0, %v13474_v44, %v5982_v11  ;;  %v9899_v41 = vpop.trf.xlu0  ;;  %v6369_v44 = vshrl.u32 %v5671_v33, 16  ;;  %v5563_v38 = vsel %vm1206_vm0, %v13674_v1, %v15340_v12  ;;  %v5708_v49 = vrot.slane %v13625_v18, 4 }
 0x707   : > { %v9862_v57 = vpop.trf.xlu1  ;;  %v6044_v11 = vrot.slane %v9899_v41, 4  ;;  %v5719_v22 = vperm.slane %v5711_v45, %v11107_v3  ;;  %v6047_v6 = vsel %vm1206_vm0, %v9899_v41, %v6046_v10  ;;  %v13712_v30 = vperm.slane %v5647_v40, %v11119_v13 }
 0x708   : > { %v6366_v31 = vpack.i.b16 %v5671_v33, %v5559_v39  ;;  %v6370_v4 = vpack.i.b16 %v6369_v44, %v6368_v25  ;;  %v6055_v42 = vperm.slane %v6047_v6, %v11107_v3  ;;  %v15341_v12 = vrot.slane %v13449_v7, 4 }
 0x709   : > { %v6045_v61 = vsel %vm1206_vm0, %v6044_v11, %v13452_v28  ;;  %v6282_v45 = vrot.slane %v13578_v43, 4  ;;  %v15342_v10 = vrot.slane %v13398_v51, 4  ;;  %v15343_v25 = vrot.slane %v13485_v50, 4 }
 0x70a   : > { %v5657_v18 = vsel %vm1206_vm0, %v15341_v12, %v13587_v19  ;;  %v6051_v37 = vperm.slane %v6045_v61, %v11107_v3  ;;  %9921 = vxpose.binary.xlu2.c.b16.start [1/4] (short) (narrow) %v6370_v4, %v6366_v31, 16  ;;  %v6106_v39 = vrot.slane %v6055_v42, 4  ;;  %v6384_v33 = vshrl.u32 %v5563_v38, 16 }
 0x70b   : > { %v5675_v2 = vsel %vm1206_vm0, %v13712_v30, %v15342_v10  ;;  %v6105_v28 = vsel %vm1206_vm0, %v15343_v25, %v6055_v42  ;;  %v13731_v7 = vperm.slane %v6171_v26, %v11107_v3  ;;  %v5709_v19 = vsel %vm1206_vm0, %v5708_v49, %v13298_v53 }
 0x70c   : > { %v6385_v40 = vshrl.u32 %v5675_v2, 16  ;;  %v15344_v41 = vrot.slane %v13482_v24, 4  ;;  %v6094_v11 = vrot.slane %v6051_v37, 4  ;;  %v5770_v6 = vrot.slane %v5719_v22, 4 }
 0x70d   : > { %v13740_v31 = vsel %vm1206_vm0, %v13485_v50, %v6106_v39  ;;  %v6382_v4 = vpack.i.b16 %v5675_v2, %v5563_v38  ;;  %v13743_v12 = vperm.slane %v5657_v18, %v11119_v13  ;;  %v6281_v53 = vsel %vm1206_vm0, %v6280_v60, %v13578_v43 }
 0x70e   : > { %v6093_v44 = vsel %vm1206_vm0, %v15344_v41, %v6051_v37  ;;  %v6386_v42 = vpack.i.b16 %v6385_v40, %v6384_v33  ;;  %v9901_v61 = vpop.trf.xlu0  ;;  %v13747_v26 = vsel %vm1206_vm0, %v13482_v24, %v6094_v11  ;;  %v6283_v49 = vsel %vm1206_vm0, %v9889_v63, %v6282_v45 }
 0x70f   : > { %v5868_v50 = vrot.slane %v13638_v36, 4  ;;  %v5880_v38 = vrot.slane %v13677_v5, 4  ;;  %v6204_v10 = vrot.slane %v13694_v14, 4  ;;  %v9863_v18 = vpop.trf.xlu1  ;;  %v6216_v2 = vrot.slane %v13731_v7, 4 }
 0x710   : > { %9909 = vxpose.binary.xlu1.c.b16.start [1/4] (short) (narrow) %v6386_v42, %v6382_v4, 16  ;;  %v5715_v24 = vperm.slane %v5709_v19, %v11107_v3  ;;  %v5820_v25 = vrot.slane %v9862_v57, 4  ;;  %v15345_v39 = vrot.slane %v13312_v54, 4  ;;  %v5771_v60 = vsel %vm1206_vm0, %v13591_v32, %v5770_v6 }
 0x711   : > { %v13765_v45 = vperm.slane %v6281_v53, %v11107_v3  ;;  %v13768_v33 = vperm.slane %v6283_v49, %v11107_v3  ;;  %v13773_v19 = vperm.slane %v13655_v29, %v11119_v13  ;;  %v15347_v41 = vrot.slane %v13302_v48, 4 }
 0x712   : > { %v5697_v43 = vsel %vm1206_vm0, %v15345_v39, %v9901_v61  ;;  %v15348_v4 = vrot.slane %v13306_v56, 4  ;;  %v13783_v42 = vperm.slane %v13671_v58, %v11119_v13  ;;  %v15349_v53 = vrot.slane %v13591_v32, 4 }
 0x713   : > { %15346 = vst [vmem:[#allocation81_spill] sm:$0xff] %v13765_v45  ;;  %v5823_v11 = vsel %vm1206_vm0, %v9862_v57, %v15347_v41  ;;  %v5698_v39 = vrot.slane %v9901_v61, 4  ;;  %v5703_v29 = vperm.slane %v5697_v43, %v11107_v3  ;;  %v5758_v40 = vrot.slane %v5715_v24, 4 }
 0x714   : > { %v6159_v6 = vsel %vm1206_vm0, %v9863_v18, %v15348_v4  ;;  %v5769_v49 = vsel %vm1206_vm0, %v15349_v53, %v5719_v22  ;;  %v13790_v37 = vperm.slane %v5771_v60, %v11119_v13  ;;  %v5821_v57 = vsel %vm1206_vm0, %v5820_v25, %v13302_v48 }
 0x715   : > { %v13795_v41 = vperm.slane %v6159_v6, %v11107_v3  ;;  %v15350_v4 = vrot.slane %v13584_v9, 4  ;;  %v5831_v61 = vperm.slane %v5823_v11, %v11107_v3  ;;  %v13805_v60 = vperm.slane %v13667_v20, %v11119_v13 }
 0x716   : > { %v9902_v43 = vpop.trf.xlu0  ;;  %v13809_v25 = vperm.slane %v5769_v49, %v11119_v13  ;;  %v6156_v6 = vrot.slane %v9863_v18, 4  ;;  %v5827_v53 = vperm.slane %v5821_v57, %v11107_v3  ;;  %v5759_v49 = vsel %vm1206_vm0, %v13584_v9, %v5758_v40 }
 0x717   : > { %v5757_v32 = vsel %vm1206_vm0, %v15350_v4, %v5715_v24  ;;  %15351 = vst [vmem:[#allocation79_spill] sm:$0xff] %v13805_v60  ;;  %v5699_v24 = vsel %vm1206_vm0, %v13312_v54, %v5698_v39  ;;  %v15352_v4 = vrot.slane %v13504_v16, 4  ;;  %v13819_v22 = vsel %vm1206_vm0, %v6216_v2, %v13795_v41 }
 0x718   : > { %v13825_v18 = vperm.slane %v5757_v32, %v11119_v13  ;;  %v13829_v54 = vperm.slane %v6105_v28, %v11119_v13  ;;  %v5882_v39 = vrot.slane %v5831_v61, 4  ;;  %v5810_v2 = vrot.slane %v9902_v43, 4 }
 0x719   : > { %v5735_v11 = vsel %vm1206_vm0, %v5703_v29, %v15352_v4  ;;  %v15353_v4 = vrot.slane %v13316_v0, 4  ;;  %v5707_v58 = vperm.slane %v5699_v24, %v11107_v3  ;;  %v6157_v9 = vsel %vm1206_vm0, %v6156_v6, %v13306_v56 }
 0x71a   : > { %v13836_v20 = vperm.slane %v5735_v11, %v11119_v13  ;;  %v13842_v32 = vperm.slane %v6093_v44, %v11119_v13  ;;  %v5870_v28 = vrot.slane %v5827_v53, 4  ;;  %v5732_v57 = vrot.slane %v5703_v29, 4 }
 0x71b   : > { %v5809_v48 = vsel %vm1206_vm0, %v15353_v4, %v9902_v43  ;;  %v5811_v63 = vsel %vm1206_vm0, %v13316_v0, %v5810_v2  ;;  %v5869_v43 = vsel %vm1206_vm0, %v5868_v50, %v5827_v53  ;;  %v15356_v4 = vrot.slane %v13516_v52, 4 }
 0x71c   : > { %15354 = vst [vmem:[#allocation84_spill] sm:$0xff] %v13836_v20  ;;  %v5815_v40 = vperm.slane %v5809_v48, %v11107_v3  ;;  %v13848_v24 = vperm.slane %v5811_v63, %v11107_v3  ;;  %v13855_v48 = vperm.slane %v13740_v31, %v11119_v13  ;;  %v5881_v44 = vsel %vm1206_vm0, %v5880_v38, %v5831_v61 }
 0x71d   : > { %15355 = vst [vmem:[#allocation78_spill] sm:$0xff] %v13842_v32  ;;  %v13859_v29 = vperm.slane %v6157_v9, %v11107_v3  ;;  %v5883_v6 = vsel %vm1206_vm0, %v13677_v5, %v5882_v39  ;;  %v15358_v53 = vrot.slane %v13507_v17, 4  ;;  %v5786_v31 = vrot.slane %v13836_v20, 4 }
 0x71e   : > { %v5844_v11 = vrot.slane %v5815_v40, 4  ;;  %v5847_v56 = vsel %vm1206_vm0, %v5815_v40, %v15356_v4  ;;  %v9903_v50 = vpop.trf.xlu0  ;;  %v5871_v38 = vsel %vm1206_vm0, %v13638_v36, %v5870_v28  ;;  %v13874_v61 = vperm.slane %v5869_v43, %v11119_v13 }
 0x71f   : > { %v13862_v0 = vperm.slane %v5847_v56, %v11119_v13  ;;  %v5747_v2 = vsel %vm1206_vm0, %v5707_v58, %v15358_v53  ;;  %v5733_v9 = vsel %vm1206_vm0, %v5732_v57, %v13504_v16  ;;  %v13879_v40 = vperm.slane %v5759_v49, %v11119_v13 }
 0x720   : > { %v5744_v4 = vrot.slane %v5707_v58, 4  ;;  %v5845_v5 = vsel %vm1206_vm0, %v5844_v11, %v13516_v52  ;;  %v15359_v39 = vrot.slane %v13519_v15, 4  ;;  %v13889_v28 = vperm.slane %v5881_v44, %v11119_v13  ;;  %v9864_v58 = vpop.trf.xlu1 }
 0x721   : > { %15357 = vst [vmem:[#allocation77_spill] sm:$0xff] %v13862_v0  ;;  %v5898_v36 = vrot.slane %v13862_v0, 4  ;;  %v13892_v43 = vperm.slane %v5883_v6, %v11119_v13  ;;  %v13895_v16 = vperm.slane %v5747_v2, %v11119_v13  ;;  %v6205_v52 = vsel %vm1206_vm0, %v6204_v10, %v13859_v29 }
 0x722   : > { %v5859_v56 = vsel %vm1206_vm0, %v13848_v24, %v15359_v39  ;;  %v15360_v49 = vrot.slane %v13325_v59, 4  ;;  %v6146_v11 = vrot.slane %v9903_v50, 4  ;;  %v5787_v44 = vsel %vm1206_vm0, %v13879_v40, %v5786_v31 }
 0x723   : > { %v13907_v6 = vperm.slane %v5871_v38, %v11119_v13  ;;  %v13910_v53 = vperm.slane %v5733_v9, %v11119_v13  ;;  %v13913_v2 = vperm.slane %v5845_v5, %v11119_v13  ;;  %v13916_v10 = vperm.slane %v5859_v56, %v11119_v13 }
 0x724   : > { %v6145_v57 = vsel %vm1206_vm0, %v15360_v49, %v9903_v50  ;;  %v5745_v50 = vsel %vm1206_vm0, %v5744_v4, %v13507_v17  ;;  %v6218_v49 = vrot.slane %v13795_v41, 4  ;;  %v6268_v31 = vrot.slane %v9864_v58, 4 }
 0x725   : > { %15361 = vst [vmem:[#allocation88_spill] sm:$0xff] %v13907_v6  ;;  %v6151_v39 = vperm.slane %v6145_v57, %v11107_v3  ;;  %v5899_v38 = vsel %vm1206_vm0, %v13907_v6, %v5898_v36  ;;  %v15364_v9 = vrot.slane %v13310_v55, 4  ;;  %v15365_v45 = vrot.slane %v13564_v47, 4 }
 0x726   : > { %15362 = vst [vmem:[#allocation87_spill] sm:$0xff] %v13910_v53  ;;  %v6512_v57 = vshrl.u32 %v5787_v44, 16  ;;  %v13932_v0 = vpop.trf.xlu0  ;;  %v6147_v17 = vsel %vm1206_vm0, %v13325_v59, %v6146_v11  ;;  %v6513_v41 = vshrl.u32 %v5899_v38, 16  ;;  %v5794_v36 = vrot.slane %v13895_v16, 4 }
 0x727   : > { %15363 = vst [vmem:[#allocation83_spill] sm:$0xff] %v13913_v2  ;;  %v6271_v63 = vsel %vm1206_vm0, %v9864_v58, %v15364_v9  ;;  %v6180_v5 = vrot.slane %v6151_v39, 4  ;;  %v13930_v56 = vsel %vm1206_vm0, %v6151_v39, %v15365_v45  ;;  %v6258_v4 = vrot.slane %v13932_v0, 4 }
 0x728   : > { %v5782_v32 = vrot.slane %v13910_v53, 4  ;;  %v5894_v58 = vrot.slane %v13913_v2, 4  ;;  %v5906_v45 = vrot.slane %v13916_v10, 4  ;;  %v5856_v39 = vrot.slane %v13848_v24, 4 }
 0x729   : > { %v13942_v9 = vsel %vm1206_vm0, %v6180_v5, %v13564_v47  ;;  %v6279_v60 = vperm.slane %v6271_v63, %v11107_v3  ;;  %v6510_v59 = vpack.i.b16 %v5899_v38, %v5787_v44  ;;  %v6514_v11 = vpack.i.b16 %v6513_v41, %v6512_v57 }
 0x72a   : > { %v6269_v53 = vsel %vm1206_vm0, %v6268_v31, %v13310_v55  ;;  %v13952_v2 = vperm.slane %v6147_v17, %v11107_v3  ;;  %v6206_v47 = vrot.slane %v13859_v29, 4  ;;  %v13956_v5 = vperm.slane %v6205_v52, %v11119_v13 }
 0x72b   : > { %9910 = vxpose.binary.xlu1.c.b16.end [2/4] (short) (narrow) %v6514_v11, %v6510_v59, 16  ;;  %v6259_v24 = vsel %vm1206_vm0, %v13343_v8, %v6258_v4  ;;  %v5795_v63 = vsel %vm1206_vm0, %v13790_v37, %v5794_v36  ;;  %v13963_v44 = vperm.slane %v5745_v50, %v11119_v13  ;;  %v6330_v50 = vrot.slane %v6279_v60, 4 }
 0x72c   : > { %v5907_v55 = vsel %vm1206_vm0, %v13892_v43, %v5906_v45  ;;  %v5783_v31 = vsel %vm1206_vm0, %v13825_v18, %v5782_v32  ;;  %v5895_v29 = vsel %vm1206_vm0, %v13874_v61, %v5894_v58  ;;  %v6219_v52 = vsel %vm1206_vm0, %v13731_v7, %v6218_v49 }
 0x72d   : > { %v5857_v38 = vsel %vm1206_vm0, %v5856_v39, %v13519_v15  ;;  %v13976_v57 = vperm.slane %v6269_v53, %v11107_v3  ;;  %v15366_v17 = vrot.slane %v13549_v21, 4  ;;  %v13983_v32 = vperm.slane %v6259_v24, %v11107_v3 }
 0x72e   : > { %v6544_v4 = vshrl.u32 %v5795_v63, 16  ;;  %v6545_v36 = vshrl.u32 %v5907_v55, 16  ;;  %v6542_v58 = vpack.i.b16 %v5907_v55, %v5795_v63  ;;  %v6494_v45 = vpack.i.b16 %v5895_v29, %v5783_v31 }
 0x72f   : > { %v6195_v41 = vsel %vm1206_vm0, %v13952_v2, %v15366_v17  ;;  %v6496_v7 = vshrl.u32 %v5783_v31, 16  ;;  %v6497_v49 = vshrl.u32 %v5895_v29, 16  ;;  %v15367_v15 = vrot.slane %v13604_v27, 4  ;;  %v15369_v17 = vld [vmem:[#allocation67_spill] sm:$0xff] }
 0x730   : > { %v6546_v59 = vpack.i.b16 %v6545_v36, %v6544_v4  ;;  %v15368_v39 = vrot.slane %v13613_v62, 4  ;;  %v15370_v24 = vrot.slane %v15369_v17, 4  ;;  %v15371_v4 = vld [vmem:[#allocation65_spill] sm:$0xff]  ;;  %v15381_v20 = vrot.slane %v13768_v33, 4 }
 0x731   : > { %v5569_v53 = vsel %vm1206_vm0, %v15367_v15, %v13357_v46  ;;  %v6498_v63 = vpack.i.b16 %v6497_v49, %v6496_v7  ;;  %v15372_v27 = vrot.slane %v15371_v4, 4 }
 0x732   : > { %v5681_v11 = vsel %vm1206_vm0, %v15368_v39, %v13363_v34  ;;  %v13997_v6 = vsel %vm1206_vm0, %v13701_v35, %v15370_v24  ;;  %v6408_v31 = vshrl.u32 %v5569_v53, 16  ;;  %9906 = vxpose.binary.xlu0.c.b16.end [2/4] (short) (narrow) %v6546_v59, %v6542_v58, 16  ;;  %v15373_v34 = vld [vmem:[#allocation66_spill] sm:$0xff]  ;;  %v15375_v39 = vld [vmem:[#allocation76_spill] sm:$0xff]  ;;  %v14025_v24 = vsel %vm1206_vm0, %v13694_v14, %v6206_v47 }
 0x733   : > { %v6406_v55 = vpack.i.b16 %v5681_v11, %v5569_v53  ;;  %v6409_v29 = vshrl.u32 %v5681_v11, 16  ;;  %v14003_v46 = vsel %vm1206_vm0, %v13743_v12, %v15372_v27  ;;  %v6400_v62 = vshrl.u32 %v13997_v6, 16  ;;  %9922 = vxpose.binary.xlu2.c.b16.end [2/4] (short) (narrow) %v6498_v63, %v6494_v45, 16 }
 0x734   : > { %v15374_v36 = vrot.slane %v15373_v34, 4  ;;  %v15376_v7 = vrot.slane %v15375_v39, 4  ;;  %v6398_v59 = vpack.i.b16 %v14003_v46, %v13997_v6  ;;  %v6401_v53 = vshrl.u32 %v14003_v46, 16  ;;  %v15379_v46 = vld [vmem:[#allocation64_spill] sm:$0xff] }
 0x735   : > { %v6410_v58 = vpack.i.b16 %v6409_v29, %v6408_v31  ;;  %v14029_v27 = vperm.slane %v13819_v22, %v11119_v13  ;;  %v14034_v63 = vperm.slane %v6219_v52, %v11119_v13  ;;  %v14037_v6 = vperm.slane %v5857_v38, %v11119_v13 }
 0x736   : > { %v14010_v15 = vsel %vm1206_vm0, %v13783_v42, %v15374_v36  ;;  %v14016_v49 = vsel %vm1206_vm0, %v13855_v48, %v15376_v7  ;;  %v6331_v31 = vsel %vm1206_vm0, %v13768_v33, %v6330_v50  ;;  %v6402_v29 = vpack.i.b16 %v6401_v53, %v6400_v62 }
 0x737   : > { %v6480_v36 = vshrl.u32 %v14010_v15, 16  ;;  %v6481_v45 = vshrl.u32 %v14016_v49, 16  ;;  %v14042_v14 = vperm.slane %v6195_v41, %v11119_v13  ;;  %v15378_v22 = vrot.slane %v13343_v8, 4 }
 0x738   : > { %v15380_v7 = vrot.slane %v15379_v46, 4  ;;  %v14056_v50 = vsel %vm1206_vm0, %v15381_v20, %v6279_v60  ;;  %v15382_v41 = vrot.slane %v13701_v35, 4  ;;  %v14071_v53 = vperm.slane %v6331_v31, %v11119_v13 }
 0x739   : > { %15377 = vst [vmem:[#allocation91_spill] sm:$0xff] %v14042_v14  ;;  %v6257_v47 = vsel %vm1206_vm0, %v15378_v22, %v13932_v0  ;;  %v6482_v11 = vpack.i.b16 %v6481_v45, %v6480_v36  ;;  %v15383_v0 = vrot.slane %v13743_v12, 4  ;;  %v14075_v33 = vperm.slane %v13930_v56, %v11119_v13 }
 0x73a   : > { %v6307_v52 = vsel %vm1206_vm0, %v13983_v32, %v15380_v7  ;;  %v14062_v8 = vsel %vm1206_vm0, %v15382_v41, %v15369_v17  ;;  %v14081_v20 = vperm.slane %v6257_v47, %v11107_v3  ;;  %v15385_v17 = vrot.slane %v13790_v37, 4 }
 0x73b   : > { %v14068_v62 = vsel %vm1206_vm0, %v15383_v0, %v15371_v4  ;;  %v14084_v12 = vperm.slane %v6307_v52, %v11119_v13  ;;  %v15386_v56 = vrot.slane %v13892_v43, 4  ;;  %v14100_v45 = vperm.slane %v13942_v9, %v11119_v13  ;;  %9917 = vxpose.binary.xlu1.c.b16.start [1/4] (short) (narrow) %v6410_v58, %v6406_v55, 16 }
 0x73c   : > { %v14090_v4 = vsel %vm1206_vm0, %v15385_v17, %v13895_v16  ;;  %v5790_v31 = vrot.slane %v13963_v44, 4  ;;  %v5902_v22 = vrot.slane %v14037_v6, 4  ;;  %v6242_v47 = vrot.slane %v14042_v14, 4 }
 0x73d   : > { %15384 = vst [vmem:[#allocation90_spill] sm:$0xff] %v14084_v12  ;;  %v14096_v36 = vsel %vm1206_vm0, %v15386_v56, %v13916_v10  ;;  %v6392_v37 = vshrl.u32 %v14062_v8, 16  ;;  %v6393_v16 = vshrl.u32 %v14068_v62, 16  ;;  %v5560_v43 = vrot.slane %v13674_v1, 4  ;;  %v15388_v1 = vld [vmem:[#allocation62_spill] sm:$0xff] }
 0x73e   : > { %v5672_v10 = vrot.slane %v13712_v30, 4  ;;  %v6536_v7 = vshrl.u32 %v14090_v4, 16  ;;  %v6537_v9 = vshrl.u32 %v14096_v36, 16  ;;  %v15387_v52 = vrot.slane %v13783_v42, 4 }
 0x73f   : > { %v14119_v55 = vperm.slane %v13691_v23, %v11119_v13  ;;  %v6354_v58 = vrot.slane %v14084_v12, 4  ;;  %v14122_v0 = vpack.i.b16 %v6393_v16, %v6392_v37  ;;  %v14126_v30 = vsel %vm1206_vm0, %v5560_v43, %v15388_v1 }
 0x740   : > { %v14115_v41 = vsel %vm1206_vm0, %v15387_v52, %v15373_v34  ;;  %v14130_v17 = vsel %vm1206_vm0, %v5672_v10, %v13398_v51  ;;  %v14134_v42 = vsel %vm1206_vm0, %v13809_v25, %v5790_v31  ;;  %v6376_v34 = vshrl.u32 %v14126_v30, 16  ;;  %v15389_v51 = vld [vmem:[#allocation72_spill] sm:$0xff] }
 0x741   : > { %v6377_v56 = vshrl.u32 %v14130_v17, 16  ;;  %v14142_v37 = vsel %vm1206_vm0, %v13889_v28, %v5902_v22  ;;  %v14146_v16 = vsel %vm1206_vm0, %v14034_v63, %v6242_v47  ;;  %v15390_v43 = vrot.slane %v15389_v51, 4  ;;  %v15392_v47 = vld [vmem:[#allocation74_spill] sm:$0xff] }
 0x742   : > { %v14156_v10 = vperm.slane %v13747_v26, %v11119_v13  ;;  %v15391_v22 = vrot.slane %v13855_v48, 4  ;;  %v15393_v23 = vrot.slane %v13773_v19, 4  ;;  %v15396_v60 = vrot.slane %v13829_v54, 4  ;;  %9913 = vxpose.binary.xlu0.c.b16.start [1/4] (short) (narrow) %v6402_v29, %v6398_v59, 16 }
 0x743   : > { %v14152_v31 = vsel %vm1206_vm0, %v14119_v55, %v15390_v43  ;;  %v14158_v52 = vpack.i.b16 %v6377_v56, %v6376_v34  ;;  %v15395_v43 = vld [vmem:[#allocation75_spill] sm:$0xff]  ;;  %v6472_v48 = vshrl.u32 %v14115_v41, 16  ;;  %v15398_v56 = vld [vmem:[#allocation70_spill] sm:$0xff]  ;;  %v15401_v12 = vpack.i.b16 %v14016_v49, %v14010_v15 }
 0x744   : > { %v14164_v1 = vsel %vm1206_vm0, %v15391_v22, %v15375_v39  ;;  %v14170_v35 = vsel %vm1206_vm0, %v15393_v23, %v15392_v47  ;;  %v14176_v26 = vsel %vm1206_vm0, %v15396_v60, %v15395_v43  ;;  %v15399_v22 = vrot.slane %v15398_v56, 4 }
 0x745   : > { %15394 = vst [vmem:[#allocation49_spill] sm:$0xff] %v14170_v35  ;;  %v6473_v39 = vshrl.u32 %v14164_v1, 16  ;;  %v14190_v23 = vsel %vm1206_vm0, %v14071_v53, %v6354_v58  ;;  %v5784_v60 = vrot.slane %v13879_v40, 4  ;;  %9937 = vxpose.binary.xlu2.c.b16.start [1/4] (short) (narrow) %v6482_v11, %v15401_v12, 16  ;;  %v6448_v29 = vshrl.u32 %v14152_v31, 16 }
 0x746   : > { %15397 = vst [vmem:[#allocation89_spill] sm:$0xff] %v14176_v26  ;;  %v14186_v38 = vsel %vm1206_vm0, %v14156_v10, %v15399_v22  ;;  %v6529_v22 = vshrl.u32 %v14142_v37, 16  ;;  %v6534_v40 = vpack.i.b16 %v14096_v36, %v14090_v4  ;;  %v6538_v58 = vpack.i.b16 %v6537_v9, %v6536_v7  ;;  %v15404_v9 = vld [vmem:[#allocation88_spill] sm:$0xff]  ;;  %v15409_v4 = vld [vmem:[#allocation69_spill] sm:$0xff] }
 0x747   : > { %15400 = vst [vmem:[#allocation86_spill] sm:$0xff] %v14186_v38  ;;  %v6449_v3 = vshrl.u32 %v14186_v38, 16  ;;  %v14201_v59 = vpack.i.b16 %v6473_v39, %v6472_v48  ;;  %v6526_v34 = vpack.i.b16 %v14142_v37, %v14134_v42  ;;  %v15402_v38 = vld [vmem:[#allocation84_spill] sm:$0xff]  ;;  %v6528_v15 = vshrl.u32 %v14134_v42, 16 }
 0x748   : > { %v14210_v14 = vsel %vm1206_vm0, %v5784_v60, %v15402_v38  ;;  %v6606_v49 = vpack.i.b16 %v14190_v23, %v14146_v16  ;;  %v6608_v11 = vshrl.u32 %v14146_v16, 16  ;;  %v6609_v48 = vshrl.u32 %v14190_v23, 16 }
 0x749   : > { %v14216_v12 = vpack.i.b16 %v6449_v3, %v6448_v29  ;;  %v6456_v36 = vshrl.u32 %v14170_v35, 16  ;;  %v6457_v7 = vshrl.u32 %v14176_v26, 16  ;;  %v6530_v38 = vpack.i.b16 %v6529_v22, %v6528_v15  ;;  %v15406_v3 = vld [vmem:[#allocation73_spill] sm:$0xff]  ;;  %v15408_v29 = vld [vmem:[#allocation79_spill] sm:$0xff]  ;;  %v15411_v35 = vld [vmem:[#allocation78_spill] sm:$0xff] }
 0x74a   : > { %v5896_v37 = vrot.slane %v15404_v9, 4  ;;  %v6504_v42 = vshrl.u32 %v14210_v14, 16  ;;  %v5780_v39 = vrot.slane %v13825_v18, 4  ;;  %v15407_v16 = vrot.slane %v15406_v3, 4  ;;  %v15414_v18 = vld [vmem:[#allocation87_spill] sm:$0xff] }
 0x74b   : > { %15403 = vst [vmem:[#allocation82_spill] sm:$0xff] %v14216_v12  ;;  %v14226_v60 = vpack.i.b16 %v6457_v7, %v6456_v36  ;;  %v15410_v12 = vrot.slane %v15409_v4, 4  ;;  %v15412_v22 = vrot.slane %v15392_v47, 4  ;;  %9918 = vxpose.binary.xlu1.c.b16.end [2/4] (short) (narrow) %v6538_v58, %v6534_v40, 16  ;;  %v6116_v40 = vrot.slane %v15411_v35, 4 }
 0x74c   : > { %v14232_v23 = vsel %vm1206_vm0, %v15408_v29, %v15407_v16  ;;  %v14248_v36 = vsel %vm1206_vm0, %v5780_v39, %v15414_v18  ;;  %v6004_v39 = vrot.slane %v15408_v29, 4  ;;  %v6610_v58 = vpack.i.b16 %v6609_v48, %v6608_v11 }
 0x74d   : > { %15405 = vst [vmem:[#allocation38_spill] sm:$0xff] %v14226_v60  ;;  %v14238_v26 = vsel %vm1206_vm0, %v15411_v35, %v15410_v12  ;;  %v14244_v15 = vsel %vm1206_vm0, %v13773_v19, %v15412_v22  ;;  %v6432_v9 = vshrl.u32 %v14232_v23, 16  ;;  %v5892_v12 = vrot.slane %v13874_v61, 4  ;;  %v15416_v22 = vld [vmem:[#allocation77_spill] sm:$0xff] }
 0x74e   : > { %15413 = vst [vmem:[#allocation48_spill] sm:$0xff] %v14244_v15  ;;  %v6433_v16 = vshrl.u32 %v14238_v26, 16  ;;  %v15415_v60 = vrot.slane %v15395_v43, 4  ;;  %v6464_v19 = vshrl.u32 %v14244_v15, 16  ;;  %v14265_v18 = vsel %vm1206_vm0, %v5896_v37, %v15416_v22 }
 0x74f   : > { %v14277_v29 = vsel %vm1206_vm0, %v6004_v39, %v15406_v3  ;;  %v6215_v61 = vperm.slane %v14025_v24, %v11119_v13  ;;  %v14294_v3 = vsel %vm1206_vm0, %v6116_v40, %v15409_v4  ;;  %v15423_v11 = vrot.slane %v13952_v2, 4 }
 0x750   : > { %v14259_v47 = vsel %vm1206_vm0, %v13829_v54, %v15415_v60  ;;  %v14267_v7 = vpack.i.b16 %v6433_v16, %v6432_v9  ;;  %v6505_v60 = vshrl.u32 %v14265_v18, 16  ;;  %v6008_v9 = vrot.slane %v14119_v55, 4  ;;  %v15417_v54 = vld [vmem:[#allocation83_spill] sm:$0xff] }
 0x751   : > { %v6465_v43 = vshrl.u32 %v14259_v47, 16  ;;  %v6120_v16 = vrot.slane %v14156_v10, 4  ;;  %v14290_v15 = vsel %vm1206_vm0, %v5892_v12, %v15417_v54  ;;  %v6488_v55 = vshrl.u32 %v14248_v36, 16 }
 0x752   : > { %v14284_v22 = vpack.i.b16 %v6505_v60, %v6504_v42  ;;  %v6489_v10 = vshrl.u32 %v14290_v15, 16  ;;  %v6424_v24 = vshrl.u32 %v14277_v29, 16  ;;  %v6425_v48 = vshrl.u32 %v14294_v3, 16  ;;  %v15419_v60 = vld [vmem:[#allocation80_spill] sm:$0xff]  ;;  %9914 = vxpose.binary.xlu0.c.b16.end [2/4] (short) (narrow) %v6530_v38, %v6526_v34, 16 }
 0x753   : > { %v14280_v37 = vpack.i.b16 %v6465_v43, %v6464_v19  ;;  %v14306_v42 = vsel %vm1206_vm0, %v6008_v9, %v15389_v51  ;;  %v14310_v4 = vsel %vm1206_vm0, %v6120_v16, %v15398_v56  ;;  %v6234_v54 = vrot.slane %v14075_v33, 4  ;;  %v15421_v16 = vld [vmem:[#allocation81_spill] sm:$0xff] }
 0x754   : > { %15418 = vst [vmem:[#allocation93_spill] sm:$0xff] %v14306_v42  ;;  %v14312_v12 = vpack.i.b16 %v6489_v10, %v6488_v55  ;;  %v6440_v39 = vshrl.u32 %v14306_v42, 16  ;;  %v6441_v43 = vshrl.u32 %v14310_v4, 16  ;;  %v15420_v40 = vrot.slane %v15419_v60, 4 }
 0x755   : > { %v14323_v9 = vpack.i.b16 %v6425_v48, %v6424_v24  ;;  %v6232_v56 = vrot.slane %v6215_v61, 4  ;;  %v6316_v55 = vrot.slane %v15421_v16, 4  ;;  %v15422_v10 = vrot.slane %v13976_v57, 4  ;;  %9938 = vxpose.binary.xlu2.c.b16.end [2/4] (short) (narrow) %v6610_v58, %v6606_v49, 16 }
 0x756   : > { %v6295_v51 = vsel %vm1206_vm0, %v14081_v20, %v15420_v40  ;;  %v6193_v35 = vsel %vm1206_vm0, %v15423_v11, %v13549_v21  ;;  %v14334_v42 = vpack.i.b16 %v6441_v43, %v6440_v39  ;;  %v6230_v34 = vrot.slane %v14100_v45, 4 }
 0x757   : > { %v6319_v19 = vsel %vm1206_vm0, %v15421_v16, %v15422_v10  ;;  %v15424_v38 = vrot.slane %v14081_v20, 4  ;;  %v6228_v48 = vrot.slane %v13956_v5, 4  ;;  %v14344_v40 = vsel %vm1206_vm0, %v6232_v56, %v14075_v33 }
 0x758   : > { %v6236_v2 = vrot.slane %v14029_v27, 4  ;;  %v6317_v21 = vsel %vm1206_vm0, %v6316_v55, %v13976_v57  ;;  %v6303_v49 = vperm.slane %v6295_v51, %v11119_v13  ;;  %v14351_v58 = vsel %vm1206_vm0, %v6215_v61, %v6234_v54 }
 0x759   : > { %v6293_v24 = vsel %vm1206_vm0, %v15424_v38, %v15419_v60  ;;  %v6327_v20 = vperm.slane %v6319_v19, %v11119_v13  ;;  %v6199_v11 = vperm.slane %v6193_v35, %v11119_v13  ;;  %v14357_v39 = vsel %vm1206_vm0, %v6228_v48, %v14100_v45 }
 0x75a   : > { %v6335_v33 = vperm.slane %v14056_v50, %v11119_v13  ;;  %v6299_v43 = vperm.slane %v6293_v24, %v11119_v13  ;;  %v6304_v57 = vrot.slane %v13983_v32, 4  ;;  %v6323_v60 = vperm.slane %v6317_v21, %v11119_v13 }
 0x75b   : > { %v14365_v61 = vsel %vm1206_vm0, %v6236_v2, %v6199_v11  ;;  %v14369_v19 = vsel %vm1206_vm0, %v13956_v5, %v6230_v34  ;;  %v6238_v35 = vrot.slane %v6199_v11, 4  ;;  %v5900_v45 = vrot.slane %v13889_v28, 4 }
 0x75c   : > { %v6346_v54 = vrot.slane %v6303_v49, 4  ;;  %v6344_v51 = vrot.slane %v6327_v20, 4  ;;  %v5788_v32 = vrot.slane %v13809_v25, 4  ;;  %v6348_v56 = vrot.slane %v6335_v33, 4 }
 0x75d   : > { %v14374_v50 = vsel %vm1206_vm0, %v14029_v27, %v6238_v35  ;;  %v6305_v16 = vsel %vm1206_vm0, %v6304_v57, %v15379_v46  ;;  %v6342_v55 = vrot.slane %v6299_v43, 4  ;;  %v15425_v5 = vpack.i.b16 %v14068_v62, %v14062_v8 }
 0x75e   : > { %v5901_v28 = vsel %vm1206_vm0, %v5900_v45, %v14037_v6  ;;  %v6340_v10 = vrot.slane %v6323_v60, 4  ;;  %v14386_v27 = vsel %vm1206_vm0, %v6344_v51, %v6303_v49  ;;  %v6568_v34 = vshrl.u32 %v14344_v40, 16 }
 0x75f   : > { %9929 = vxpose.binary.xlu1.c.b16.start [1/4] (short) (narrow) %v14122_v0, %v15425_v5, 16  ;;  %v6576_v25 = vshrl.u32 %v14351_v58, 16  ;;  %v6552_v38 = vshrl.u32 %v14357_v39, 16  ;;  %v6566_v46 = vpack.i.b16 %v14386_v27, %v14344_v40  ;;  %v6569_v8 = vshrl.u32 %v14386_v27, 16 }
 0x760   : > { %v6347_v62 = vsel %vm1206_vm0, %v6327_v20, %v6346_v54  ;;  %v6311_v0 = vperm.slane %v6305_v16, %v11119_v13  ;;  %v6584_v6 = vshrl.u32 %v14365_v61, 16  ;;  %v6341_v24 = vsel %vm1206_vm0, %v6340_v10, %v6299_v43 }
 0x761   : > { %v6574_v48 = vpack.i.b16 %v6347_v62, %v14351_v58  ;;  %v6577_v2 = vshrl.u32 %v6347_v62, 16  ;;  %v6550_v21 = vpack.i.b16 %v6341_v24, %v14357_v39  ;;  %v6553_v49 = vshrl.u32 %v6341_v24, 16  ;;  %v15429_v62 = vld [vmem:[#allocation91_spill] sm:$0xff] }
 0x762   : > { %v6349_v11 = vsel %vm1206_vm0, %v6348_v56, %v6311_v0  ;;  %v6343_v57 = vsel %vm1206_vm0, %v6323_v60, %v6342_v55  ;;  %v6350_v35 = vrot.slane %v6311_v0, 4  ;;  %v6570_v45 = vpack.i.b16 %v6569_v8, %v6568_v34 }
 0x763   : > { %v6578_v51 = vpack.i.b16 %v6577_v2, %v6576_v25  ;;  %v6582_v20 = vpack.i.b16 %v6349_v11, %v14365_v61  ;;  %v6585_v54 = vshrl.u32 %v6349_v11, 16  ;;  %v6558_v16 = vpack.i.b16 %v6343_v57, %v14369_v19 }
 0x764   : > { %v15426_v43 = vpack.i.b16 %v14130_v17, %v14126_v30  ;;  %v6560_v58 = vshrl.u32 %v14369_v19, 16  ;;  %v6561_v39 = vshrl.u32 %v6343_v57, 16  ;;  %v6351_v56 = vsel %vm1206_vm0, %v6335_v33, %v6350_v35  ;;  %v15434_v57 = vld [vmem:[#allocation86_spill] sm:$0xff] }
 0x765   : > { %v6554_v5 = vpack.i.b16 %v6553_v49, %v6552_v38  ;;  %v15427_v60 = vpack.i.b16 %v14164_v1, %v14115_v41  ;;  %v6586_v61 = vpack.i.b16 %v6585_v54, %v6584_v6  ;;  %v6590_v55 = vpack.i.b16 %v6351_v56, %v14374_v50  ;;  %v15428_v1 = vld [vmem:[#allocation90_spill] sm:$0xff]  ;;  %v15433_v49 = vld [vmem:[#allocation68_spill] sm:$0xff] }
 0x766   : > { %9925 = vxpose.binary.xlu0.c.b16.start [1/4] (short) (narrow) %v14158_v52, %v15426_v43, 16  ;;  %v6592_v10 = vshrl.u32 %v14374_v50, 16  ;;  %v6593_v34 = vshrl.u32 %v6351_v56, 16  ;;  %v5789_v30 = vsel %vm1206_vm0, %v5788_v32, %v13963_v44  ;;  %v6562_v17 = vpack.i.b16 %v6561_v39, %v6560_v58  ;;  %v15436_v54 = vld [vmem:[#allocation82_spill] sm:$0xff]  ;;  %v15437_v43 = vld [vmem:[#allocation71_spill] sm:$0xff]  ;;  %v15438_v56 = vld [vmem:[#allocation89_spill] sm:$0xff] }
 0x767   : > { %9949 = vxpose.binary.xlu2.c.b16.start [1/4] (short) (narrow) %v14201_v59, %v15427_v60, 16  ;;  %v6521_v52 = vshrl.u32 %v5901_v28, 16  ;;  %v6520_v25 = vshrl.u32 %v5789_v30, 16  ;;  %v6352_v33 = vrot.slane %v14071_v53, 4  ;;  %v6518_v38 = vpack.i.b16 %v5901_v28, %v5789_v30  ;;  %v15431_v53 = vld [vmem:[#allocation85_spill] sm:$0xff] }
 0x768   : > { %v6594_v19 = vpack.i.b16 %v6593_v34, %v6592_v10  ;;  %v6240_v41 = vrot.slane %v14034_v63, 4  ;;  %v15430_v24 = vpack.i.b16 %v14265_v18, %v14210_v14  ;;  %v5668_v28 = vrot.slane %v15431_v53, 4  ;;  %v15432_v63 = vld [vmem:[#allocation63_spill] sm:$0xff]  ;;  %v15439_v60 = vld [vmem:[#allocation49_spill] sm:$0xff]  ;;  %v15441_v34 = vld [vmem:[#allocation38_spill] sm:$0xff] }
 0x769   : > { %v6522_v8 = vpack.i.b16 %v6521_v52, %v6520_v25  ;;  %v6353_v59 = vsel %vm1206_vm0, %v6352_v33, %v15428_v1  ;;  %v5556_v2 = vrot.slane %v15432_v63, 4  ;;  %v15435_v35 = vpack.i.b16 %v15434_v57, %v14152_v31  ;;  %v15444_v52 = vld [vmem:[#allocation48_spill] sm:$0xff] }
 0x76a   : > { %v6241_v50 = vsel %vm1206_vm0, %v6240_v41, %v15429_v62  ;;  %v6601_v0 = vshrl.u32 %v6353_v59, 16  ;;  %v5669_v11 = vsel %vm1206_vm0, %v5668_v28, %v15433_v49  ;;  %v15440_v10 = vpack.i.b16 %v15438_v56, %v15439_v60 }
 0x76b   : > { %v6600_v6 = vshrl.u32 %v6241_v50, 16  ;;  %v6598_v44 = vpack.i.b16 %v6353_v59, %v6241_v50  ;;  %v5557_v58 = vsel %vm1206_vm0, %v5556_v2, %v15437_v43  ;;  %v6361_v39 = vshrl.u32 %v5669_v11, 16 }
 0x76c   : > { %v6360_v14 = vshrl.u32 %v5557_v58, 16  ;;  %v6358_v18 = vpack.i.b16 %v5669_v11, %v5557_v58  ;;  %v15442_v30 = vpack.i.b16 %v14290_v15, %v14248_v36  ;;  %v15443_v31 = vpack.i.b16 %v14238_v26, %v14232_v23  ;;  %v15447_v15 = vld [vmem:[#allocation93_spill] sm:$0xff] }
 0x76d   : > { %v6602_v32 = vpack.i.b16 %v6601_v0, %v6600_v6  ;;  %v15445_v25 = vpack.i.b16 %v14259_v47, %v15444_v52  ;;  %v15448_v36 = vpack.i.b16 %v14310_v4, %v15447_v15 }
 0x76f   : > { %9930 = vxpose.binary.xlu1.c.b16.end [2/4] (short) (narrow) %v6522_v8, %v6518_v38, 16 }
 0x776   : > { %9926 = vxpose.binary.xlu0.c.b16.end [2/4] (short) (narrow) %v14284_v22, %v15430_v24, 16  ;;  %v6362_v22 = vpack.i.b16 %v6361_v39, %v6360_v14 }
 0x777   : > { %9950 = vxpose.binary.xlu2.c.b16.end [2/4] (short) (narrow) %v6602_v32, %v6598_v44, 16 }
 0x77f   : > { %9941 = vxpose.binary.xlu1.c.b16.start [1/4] (short) (narrow) %v15436_v54, %v15435_v35, 16 }
 0x786   : > { %9933 = vxpose.binary.xlu0.c.b16.start [1/4] (short) (narrow) %v6362_v22, %v6358_v18, 16 }
 0x787   : > { %9961 = vxpose.binary.xlu2.c.b16.start [1/4] (short) (narrow) %v15441_v34, %v15440_v10, 16 }
 0x78f   : > { %9942 = vxpose.binary.xlu1.c.b16.end [2/4] (short) (narrow) %v6578_v51, %v6574_v48, 16  ;;  %v15446_v48 = vpack.i.b16 %v14294_v3, %v14277_v29 }
 0x796   : > { %9934 = vxpose.binary.xlu0.c.b16.end [2/4] (short) (narrow) %v14312_v12, %v15442_v30, 16 }
 0x797   : > { %9962 = vxpose.binary.xlu2.c.b16.end [2/4] (short) (narrow) %v6586_v61, %v6582_v20, 16 }
 0x79f   : > { %9953 = vxpose.binary.xlu1.c.b16.start [1/4] (short) (narrow) %v14267_v7, %v15443_v31, 16 }
 0x7a6   : > { %9945 = vxpose.binary.xlu0.c.b16.start [1/4] (short) (narrow) %v14280_v37, %v15445_v25, 16 }
 0x7af   : > { %9954 = vxpose.binary.xlu1.c.b16.end [2/4] (short) (narrow) %v6562_v17, %v6558_v16, 16 }
 0x7b6   : > { %9946 = vxpose.binary.xlu0.c.b16.end [2/4] (short) (narrow) %v6594_v19, %v6590_v55, 16 }
 0x7bf   : > { %9965 = vxpose.binary.xlu1.c.b16.start [1/4] (short) (narrow) %v14323_v9, %v15446_v48, 16 }
 0x7c4   : > { %v9923_v16 = vpop.trf.xlu2 }
 0x7c6   : > { %9957 = vxpose.binary.xlu0.c.b16.start [1/4] (short) (narrow) %v14334_v42, %v15448_v36, 16 }
 0x7c7   : > { %v9911_v23 = vpop.trf.xlu1 }
 0x7c8   : > { %v7130_v61 = vrot.slane %v9911_v23, 4 }
 0x7cc   : > { %v9924_v50 = vpop.trf.xlu2 }
 0x7ce   : > { %v9907_v26 = vpop.trf.xlu0 }
 0x7cf   : > { %9966 = vxpose.binary.xlu1.c.b16.end [2/4] (short) (narrow) %v6554_v5, %v6550_v21, 16  ;;  %v9912_v47 = vpop.trf.xlu1  ;;  %v7142_v20 = vrot.slane %v9907_v26, 4 }
 0x7d0   : > { %v7170_v41 = vrot.slane %v9912_v47, 4 }
 0x7d2   : > { %v7171_v28 = vsel %vm1206_vm0, %v7170_v41, %v9924_v50 }
 0x7d6   : > { %9958 = vxpose.binary.xlu0.c.b16.end [2/4] (short) (narrow) %v6570_v45, %v6566_v46, 16  ;;  %v9908_v7 = vpop.trf.xlu0  ;;  %v7131_v46 = vsel %vm1206_vm0, %v7130_v61, %v9923_v16  ;;  %v15449_v45 = vld [vmem:[#allocation45_spill] sm:$0xff] }
 0x7d7   : > { %v7182_v42 = vrot.slane %v9908_v7, 4  ;;  %v7135_v8 = vperm.slane %v7131_v46, %v15449_v45  ;;  %v7175_v57 = vperm.slane %v7171_v28, %v15449_v45 }
 0x7d9   : > { %v7148_v32 = vrot.slane %v7135_v8, 4  ;;  %v7188_v14 = vrot.slane %v7175_v57, 4 }
 0x7e6   : > { %v9939_v60 = vpop.trf.xlu2 }
 0x7e7   : > { %v9919_v12 = vpop.trf.xlu1 }
 0x7e8   : > { %v7136_v5 = vrot.slane %v9919_v12, 4 }
 0x7ee   : > { %v9915_v37 = vpop.trf.xlu0 }
 0x7ef   : > { %v9920_v29 = vpop.trf.xlu1  ;;  %v7143_v21 = vsel %vm1206_vm0, %v7142_v20, %v9915_v37 }
 0x7f0   : > { %v7176_v27 = vrot.slane %v9920_v29, 4  ;;  %v7147_v55 = vperm.slane %v7143_v21, %v15449_v45  ;;  %v9940_v29 = vpop.trf.xlu2 }
 0x7f2   : > { %v7154_v59 = vrot.slane %v7147_v55, 4 }
 0x7f6   : > { %v9916_v51 = vpop.trf.xlu0 }
 0x7f7   : > { %v7183_v40 = vsel %vm1206_vm0, %v7182_v42, %v9916_v51 }
 0x7f8   : > { %v7187_v38 = vperm.slane %v7183_v40, %v15449_v45 }
 0x7fa   : > { %v7194_v44 = vrot.slane %v7187_v38, 4 }
 0x80b   : > { %v9931_v9 = vpop.trf.xlu1 }
 0x80c   : > { %v7137_v33 = vsel %vm1206_vm0, %v7136_v5, %v9931_v9  ;;  %v9951_v9 = vpop.trf.xlu2  ;;  %v7222_v5 = vrot.slane %v9939_v60, 4 }
 0x80d   : > { %v7141_v62 = vperm.slane %v7137_v33, %v15449_v45  ;;  %v7216_v55 = vrot.slane %v9951_v9, 4 }
 0x80f   : > { %v7155_v63 = vsel %vm1206_vm0, %v7154_v59, %v7141_v62 }
 0x810   : > { %v7159_v35 = vperm.slane %v7155_v63, %v11119_v13 }
 0x812   : > { %v9927_v3 = vpop.trf.xlu0  ;;  %v7160_v22 = vrot.slane %v7159_v35, 4 }
 0x813   : > { %v9932_v17 = vpop.trf.xlu1  ;;  %v7124_v19 = vrot.slane %v9927_v3, 4 }
 0x814   : > { %v7177_v1 = vsel %vm1206_vm0, %v7176_v27, %v9932_v17  ;;  %v9952_v16 = vpop.trf.xlu2  ;;  %v7262_v27 = vrot.slane %v9940_v29, 4 }
 0x815   : > { %v7181_v24 = vperm.slane %v7177_v1, %v15449_v45 }
 0x817   : > { %v7195_v11 = vsel %vm1206_vm0, %v7194_v44, %v7181_v24 }
 0x818   : > { %v7199_v58 = vperm.slane %v7195_v11, %v11119_v13 }
 0x81a   : > { %v9928_v4 = vpop.trf.xlu0  ;;  %v7200_v34 = vrot.slane %v7199_v58, 4 }
 0x81b   : > { %v7164_v49 = vrot.slane %v9928_v4, 4 }
 0x828   : > { %v9963_v42 = vpop.trf.xlu2 }
 0x829   : > { %v7217_v59 = vsel %vm1206_vm0, %v7216_v55, %v9963_v42 }
 0x82b   : > { %v9943_v3 = vpop.trf.xlu1 }
 0x82c   : > { %v7210_v46 = vrot.slane %v9943_v3, 4 }
 0x830   : > { %v9964_v41 = vpop.trf.xlu2 }
 0x832   : > { %v9935_v0 = vpop.trf.xlu0 }
 0x833   : > { %v7125_v6 = vsel %vm1206_vm0, %v7124_v19, %v9935_v0  ;;  %v9944_v20 = vpop.trf.xlu1  ;;  %v7256_v19 = vrot.slane %v9952_v16, 4 }
 0x834   : > { %v7129_v53 = vperm.slane %v7125_v6, %v15449_v45  ;;  %v7250_v6 = vrot.slane %v9944_v20, 4 }
 0x835   : > { %v7257_v44 = vsel %vm1206_vm0, %v7256_v19, %v9964_v41 }
 0x836   : > { %v7149_v2 = vsel %vm1206_vm0, %v7148_v32, %v7129_v53  ;;  %v7221_v53 = vperm.slane %v7217_v59, %v15449_v45 }
 0x837   : > { %v7153_v54 = vperm.slane %v7149_v2, %v11119_v13 }
 0x839   : > { %v7162_v56 = vrot.slane %v7153_v54, 4  ;;  %v7161_v31 = vsel %vm1206_vm0, %v7160_v22, %v7153_v54 }
 0x83a   : > { %v9936_v43 = vpop.trf.xlu0  ;;  %v7287_v36 = vshrl.u32 %v7161_v31, 16 }
 0x83b   : > { %v7165_v39 = vsel %vm1206_vm0, %v7164_v49, %v9936_v43  ;;  %v7163_v48 = vsel %vm1206_vm0, %v7159_v35, %v7162_v56  ;;  %v7261_v49 = vperm.slane %v7257_v44, %v15449_v45 }
 0x83c   : > { %v7169_v18 = vperm.slane %v7165_v39, %v15449_v45  ;;  %v7293_v37 = vshrl.u32 %v7163_v48, 16 }
 0x83e   : > { %v7189_v10 = vsel %vm1206_vm0, %v7188_v14, %v7169_v18 }
 0x83f   : > { %v7193_v30 = vperm.slane %v7189_v10, %v11119_v13 }
 0x841   : > { %v7202_v52 = vrot.slane %v7193_v30, 4  ;;  %v7201_v25 = vsel %vm1206_vm0, %v7200_v34, %v7193_v30 }
 0x842   : > { %v7286_v15 = vpack.i.b16 %v7201_v25, %v7161_v31  ;;  %v7288_v26 = vshrl.u32 %v7201_v25, 16 }
 0x843   : > { %v7203_v23 = vsel %vm1206_vm0, %v7199_v58, %v7202_v52 }
 0x844   : > { %v7289_v7 = vpack.i.b16 %v7288_v26, %v7287_v36  ;;  %9171 = vmatmul.msk.bf16.vlgmr.msrb.gmra.mxu2 %vm4637_vm1, %v7286_v15  ;;  %v7292_v47 = vpack.i.b16 %v7203_v23, %v7163_v48  ;;  %v7294_v12 = vshrl.u32 %v7203_v23, 16 }
 0x846   : > { %9173 = vmatmul.msk.bf16.vlgmr.msrb.gmra.mxu3 %vm4637_vm1, %v7289_v7  ;;  %9175 = vmatmul.msk.bf16.vlgmr.msra.gmra.mxu0 %vm4637_vm1, %v7292_v47  ;;  %v7295_v51 = vpack.i.b16 %v7294_v12, %v7293_v37 }
 0x848   : > { %9177 = vmatmul.msk.bf16.vlgmr.msra.gmra.mxu1 %vm4637_vm1, %v7295_v51 }
 0x84b   : > { %v9955_v4 = vpop.trf.xlu1 }
 0x84c   : > { %v7211_v33 = vsel %vm1206_vm0, %v7210_v46, %v9955_v4 }
 0x84d   : > { %v7215_v62 = vperm.slane %v7211_v33, %v15449_v45 }
 0x84f   : > { %v7228_v63 = vrot.slane %v7215_v62, 4 }
 0x852   : > { %v9947_v61 = vpop.trf.xlu0 }
 0x853   : > { %v9956_v21 = vpop.trf.xlu1  ;;  %v7223_v17 = vsel %vm1206_vm0, %v7222_v5, %v9947_v61 }
 0x854   : > { %v7227_v8 = vperm.slane %v7223_v17, %v15449_v45  ;;  %v7251_v57 = vsel %vm1206_vm0, %v7250_v6, %v9956_v21 }
 0x855   : > { %v7255_v43 = vperm.slane %v7251_v57, %v15449_v45 }
 0x856   : > { %v7234_v24 = vrot.slane %v7227_v8, 4 }
 0x857   : > { %v7268_v34 = vrot.slane %v7255_v43, 4 }
 0x858   : > { %v7235_v35 = vsel %vm1206_vm0, %v7234_v24, %v7221_v53 }
 0x859   : > { %v7239_v18 = vperm.slane %v7235_v35, %v11119_v13 }
 0x85a   : > { %v9948_v40 = vpop.trf.xlu0 }
 0x85b   : > { %v7263_v38 = vsel %vm1206_vm0, %v7262_v27, %v9948_v40  ;;  %v7240_v31 = vrot.slane %v7239_v18, 4 }
 0x85c   : > { %v7267_v50 = vperm.slane %v7263_v38, %v15449_v45 }
 0x85e   : > { %v7274_v2 = vrot.slane %v7267_v50, 4 }
 0x860   : > { %v7275_v58 = vsel %vm1206_vm0, %v7274_v2, %v7261_v49 }
 0x861   : > { %v7279_v60 = vperm.slane %v7275_v58, %v11119_v13 }
 0x863   : > { %v7280_v36 = vrot.slane %v7279_v60, 4 }
 0x86b   : > { %v9967_v1 = vpop.trf.xlu1 }
 0x872   : > { %v9959_v0 = vpop.trf.xlu0 }
 0x873   : > { %v7204_v32 = vrot.slane %v9959_v0, 4  ;;  %v9968_v14 = vpop.trf.xlu1 }
 0x875   : > { %v7205_v28 = vsel %vm1206_vm0, %v7204_v32, %v9967_v1 }
 0x876   : > { %v7209_v11 = vperm.slane %v7205_v28, %v15449_v45 }
 0x878   : > { %v7229_v54 = vsel %vm1206_vm0, %v7228_v63, %v7209_v11 }
 0x879   : > { %v7233_v22 = vperm.slane %v7229_v54, %v11119_v13 }
 0x87a   : > { %v9960_v39 = vpop.trf.xlu0 }
 0x87b   : > { %v7244_v56 = vrot.slane %v9960_v39, 4  ;;  %v7242_v52 = vrot.slane %v7233_v22, 4  ;;  %v7241_v15 = vsel %vm1206_vm0, %v7240_v31, %v7233_v22 }
 0x87c   : > { %v7299_v37 = vshrl.u32 %v7241_v15, 16 }
 0x87d   : > { %v7245_v10 = vsel %vm1206_vm0, %v7244_v56, %v9968_v14  ;;  %v7243_v23 = vsel %vm1206_vm0, %v7239_v18, %v7242_v52 }
 0x87e   : > { %v7249_v30 = vperm.slane %v7245_v10, %v15449_v45  ;;  %v7305_v9 = vshrl.u32 %v7243_v23, 16 }
 0x880   : > { %v7269_v25 = vsel %vm1206_vm0, %v7268_v34, %v7249_v30 }
 0x881   : > { %v7273_v48 = vperm.slane %v7269_v25, %v11119_v13 }
 0x883   : > { %v7281_v26 = vsel %vm1206_vm0, %v7280_v36, %v7273_v48  ;;  %v7282_v7 = vrot.slane %v7273_v48, 4 }
 0x884   : > { %v7298_v47 = vpack.i.b16 %v7281_v26, %v7241_v15  ;;  %v7300_v12 = vshrl.u32 %v7281_v26, 16 }
 0x885   : > { %v7283_v51 = vsel %vm1206_vm0, %v7279_v60, %v7282_v7 }
 0x886   : > { %9172 = vmatmul.msk.bf16.gmra.mxu2 %vm4637_vm1, %v7298_v47  ;;  %v7301_v29 = vpack.i.b16 %v7300_v12, %v7299_v37  ;;  %v7304_v3 = vpack.i.b16 %v7283_v51, %v7243_v23  ;;  %v7306_v20 = vshrl.u32 %v7283_v51, 16 }
 0x888   : > { %9174 = vmatmul.msk.bf16.gmra.mxu3 %vm4637_vm1, %v7301_v29  ;;  %9176 = vmatmul.msk.bf16.gmra.mxu0 %vm4637_vm1, %v7304_v3  ;;  %v7307_v16 = vpack.i.b16 %v7306_v20, %v7305_v9 }
 0x88a   : > { %9178 = vmatmul.msk.bf16.gmra.mxu1 %vm4637_vm1, %v7307_v16 }
 0x8c3   : > { %v7421_v4 = vpop.f32.mrf.mxu0 }
 0x8c5   : > { %v7462_v61 = vpop.f32.mrf.mxu1 }
 0x8c7   : > { %v7339_v42 = vpop.f32.mrf.mxu2 }
 0x8c8   : > { %v9969_v21 = vpack.i.bf16 %v7339_v42, %v7421_v4 }
 0x8c9   : > { %v7380_v5 = vpop.f32.mrf.mxu3 }
 0x8ca   : > { %v9997_v40 = vpack.i.bf16 %v7380_v5, %v7462_v61  ;;  %9970 = vxpose.xlu0.b32.start [1/4] (short) (narrow) %v9969_v21, 32 }
 0x8cb   : > { %v7423_v27 = vpop.f32.mrf.mxu0 }
 0x8cc   : > { %9998 = vxpose.xlu2.b32.start [1/4] (short) (narrow) %v9997_v40, 32 }
 0x8cd   : > { %v7464_v17 = vpop.f32.mrf.mxu1 }
 0x8cf   : > { %v7341_v46 = vpop.f32.mrf.mxu2 }
 0x8d0   : > { %v9971_v55 = vpack.i.bf16 %v7341_v46, %v7423_v27 }
 0x8d1   : > { %v7382_v19 = vpop.f32.mrf.mxu3 }
 0x8d2   : > { %v9999_v33 = vpack.i.bf16 %v7382_v19, %v7464_v17  ;;  %9972 = vxpose.xlu0.b32.cont [2/4] (short) (narrow) %v9971_v55, 32 }
 0x8d4   : > { %10000 = vxpose.xlu2.b32.cont [2/4] (short) (narrow) %v9999_v33, 32 }
 0x905   : > { %v7426_v38 = vpop.f32.mrf.mxu0 }
 0x907   : > { %v7467_v8 = vpop.f32.mrf.mxu1 }
 0x909   : > { %v7344_v41 = vpop.f32.mrf.mxu2 }
 0x90a   : > { %v9973_v1 = vpack.i.bf16 %v7344_v41, %v7426_v38 }
 0x90b   : > { %v7385_v59 = vpop.f32.mrf.mxu3 }
 0x90c   : > { %v10001_v62 = vpack.i.bf16 %v7385_v59, %v7467_v8  ;;  %9974 = vxpose.xlu0.b32.cont [3/4] (short) (narrow) %v9973_v1, 32 }
 0x90d   : > { %v7428_v50 = vpop.f32.mrf.mxu0 }
 0x90e   : > { %10002 = vxpose.xlu2.b32.cont [3/4] (short) (narrow) %v10001_v62, 32 }
 0x90f   : > { %v7469_v44 = vpop.f32.mrf.mxu1 }
 0x911   : > { %v7346_v0 = vpop.f32.mrf.mxu2 }
 0x912   : > { %v9975_v6 = vpack.i.bf16 %v7346_v0, %v7428_v50 }
 0x913   : > { %v7387_v32 = vpop.f32.mrf.mxu3 }
 0x914   : > { %v10003_v24 = vpack.i.bf16 %v7387_v32, %v7469_v44  ;;  %9976 = vxpose.xlu0.b32.end [4/4] (short) (narrow) %v9975_v6, 32 }
 0x916   : > { %10004 = vxpose.xlu2.b32.end [4/4] (short) (narrow) %v10003_v24, 32 }
 0x997   : > { %v10005_v53 = vpop.trf.xlu2 }
 0x998   : > { %v10009_v28 = vunpack.i.h.bf16 %v10005_v53  ;;  %v10006_v63 = vunpack.i.l.bf16 %v10005_v53 }
 0x99a   : > { %v7614_v2 = vrot.slane %v10009_v28, 4  ;;  %v7612_v49 = vrot.slane %v10006_v63, 4 }
 0x99c   : > { %v7613_v11 = vsel %vm1206_vm0, %v7612_v49, %v10009_v28  ;;  %v7615_v57 = vsel %vm1206_vm0, %v10006_v63, %v7614_v2 }
 0x99d   : > { %v7619_v35 = vperm.slane %v7613_v11, %v15449_v45  ;;  %v7623_v54 = vperm.slane %v7615_v57, %v15449_v45 }
 0x99f   : > { %v10010_v43 = vpop.trf.xlu2  ;;  %v7624_v30 = vrot.slane %v7619_v35, 4  ;;  %v7636_v31 = vrot.slane %v7623_v54, 4 }
 0x9a0   : > { %v9977_v58 = vpop.trf.xlu0  ;;  %v10014_v39 = vunpack.i.h.bf16 %v10010_v43  ;;  %v10011_v14 = vunpack.i.l.bf16 %v10010_v43 }
 0x9a1   : > { %v9981_v18 = vunpack.i.h.bf16 %v9977_v58  ;;  %v9978_v22 = vunpack.i.l.bf16 %v9977_v58 }
 0x9a2   : > { %v7670_v56 = vrot.slane %v10014_v39, 4  ;;  %v7668_v60 = vrot.slane %v10011_v14, 4 }
 0x9a3   : > { %v7602_v10 = vrot.slane %v9981_v18, 4  ;;  %v7600_v34 = vrot.slane %v9978_v22, 4 }
 0x9a4   : > { %v7669_v52 = vsel %vm1206_vm0, %v7668_v60, %v10014_v39  ;;  %v7671_v25 = vsel %vm1206_vm0, %v10011_v14, %v7670_v56 }
 0x9a5   : > { %v7601_v48 = vsel %vm1206_vm0, %v7600_v34, %v9981_v18  ;;  %v7603_v15 = vsel %vm1206_vm0, %v9978_v22, %v7602_v10  ;;  %v7675_v23 = vperm.slane %v7669_v52, %v15449_v45  ;;  %v7679_v7 = vperm.slane %v7671_v25, %v15449_v45 }
 0x9a6   : > { %v7607_v36 = vperm.slane %v7601_v48, %v15449_v45  ;;  %v7611_v26 = vperm.slane %v7603_v15, %v15449_v45 }
 0x9a7   : > { %v10015_v16 = vpop.trf.xlu2  ;;  %v7680_v38 = vrot.slane %v7675_v23, 4  ;;  %v7692_v8 = vrot.slane %v7679_v7, 4 }
 0x9a8   : > { %v7625_v47 = vsel %vm1206_vm0, %v7624_v30, %v7607_v36  ;;  %v7626_v37 = vrot.slane %v7607_v36, 4  ;;  %v7637_v12 = vsel %vm1206_vm0, %v7636_v31, %v7611_v26  ;;  %v7638_v51 = vrot.slane %v7611_v26, 4  ;;  %v9982_v29 = vpop.trf.xlu0 }
 0x9a9   : > { %v7631_v3 = vperm.slane %v7625_v47, %v11119_v13  ;;  %v7643_v9 = vperm.slane %v7637_v12, %v11119_v13  ;;  %v9986_v20 = vunpack.i.h.bf16 %v9982_v29  ;;  %v9983_v42 = vunpack.i.l.bf16 %v9982_v29 }
 0x9aa   : > { %v7627_v4 = vsel %vm1206_vm0, %v7619_v35, %v7626_v37  ;;  %v7639_v61 = vsel %vm1206_vm0, %v7623_v54, %v7638_v51  ;;  %v10019_v17 = vunpack.i.h.bf16 %v10015_v16  ;;  %v10016_v2 = vunpack.i.l.bf16 %v10015_v16 }
 0x9ab   : > { %v7635_v21 = vperm.slane %v7627_v4, %v11119_v13  ;;  %v7647_v5 = vperm.slane %v7639_v61, %v11119_v13  ;;  %v7648_v40 = vrot.slane %v7631_v3, 4  ;;  %v7652_v27 = vrot.slane %v7643_v9, 4 }
 0x9ac   : > { %v7658_v46 = vrot.slane %v9986_v20, 4  ;;  %v7656_v55 = vrot.slane %v9983_v42, 4  ;;  %v7726_v6 = vrot.slane %v10019_v17, 4  ;;  %v7724_v39 = vrot.slane %v10016_v2, 4 }
 0x9ad   : > { %v7650_v19 = vrot.slane %v7635_v21, 4  ;;  %v7654_v33 = vrot.slane %v7647_v5, 4  ;;  %v14550_v41 = vsel %vm1206_vm0, 0.0, %v7648_v40  ;;  %v14558_v50 = vsel %vm1206_vm0, 0.0, %v7652_v27 }
 0x9ae   : > { %v7657_v1 = vsel %vm1206_vm0, %v7656_v55, %v9986_v20  ;;  %v7659_v59 = vsel %vm1206_vm0, %v9983_v42, %v7658_v46  ;;  %v7727_v22 = vsel %vm1206_vm0, %v10016_v2, %v7726_v6  ;;  %v7725_v30 = vsel %vm1206_vm0, %v7724_v39, %v10019_v17 }
 0x9af   : > { %v14555_v62 = vsel %vm1206_vm0, 0.0, %v7650_v19  ;;  %v7824_v0 = vsel %vm1206_vm0, %v7650_v19, %v7631_v3  ;;  %v14562_v44 = vsel %vm1206_vm0, 0.0, %v7654_v33  ;;  %v14568_v24 = vsel %vm1206_vm0, %v7654_v33, %v7643_v9  ;;  %v10020_v20 = vpop.trf.xlu2 }
 0x9b0   : > { %v14565_v32 = vperm.slane %v7824_v0, %v15449_v45  ;;  %v7663_v53 = vperm.slane %v7657_v1, %v15449_v45  ;;  %v9987_v28 = vpop.trf.xlu0  ;;  %v7667_v63 = vperm.slane %v7659_v59, %v15449_v45  ;;  %v7731_v25 = vperm.slane %v7725_v30, %v15449_v45 }
 0x9b1   : > { %v9991_v49 = vunpack.i.h.bf16 %v9987_v28  ;;  %v9988_v35 = vunpack.i.l.bf16 %v9987_v28  ;;  %v7735_v48 = vperm.slane %v7727_v22, %v15449_v45  ;;  %v7829_v15 = vrot.slane %v14555_v62, 4 }
 0x9b2   : > { %v7681_v11 = vsel %vm1206_vm0, %v7680_v38, %v7663_v53  ;;  %v7682_v57 = vrot.slane %v7663_v53, 4  ;;  %v7693_v43 = vsel %vm1206_vm0, %v7692_v8, %v7667_v63  ;;  %v7694_v58 = vrot.slane %v7667_v63, 4 }
 0x9b3   : > { %v7687_v54 = vperm.slane %v7681_v11, %v11119_v13  ;;  %v7699_v18 = vperm.slane %v7693_v43, %v11119_v13  ;;  %v7714_v56 = vrot.slane %v9991_v49, 4  ;;  %v7712_v26 = vrot.slane %v9988_v35, 4 }
 0x9b4   : > { %v7683_v14 = vsel %vm1206_vm0, %v7675_v23, %v7682_v57  ;;  %v7695_v10 = vsel %vm1206_vm0, %v7679_v7, %v7694_v58  ;;  %v7840_v47 = vrot.slane %v14562_v44, 4  ;;  %v7736_v7 = vrot.slane %v7731_v25, 4 }
 0x9b5   : > { %v7691_v60 = vperm.slane %v7683_v14, %v11119_v13  ;;  %v7704_v34 = vrot.slane %v7687_v54, 4  ;;  %v7703_v31 = vperm.slane %v7695_v10, %v11119_v13  ;;  %v7708_v52 = vrot.slane %v7699_v18, 4 }
 0x9b6   : > { %v7715_v23 = vsel %vm1206_vm0, %v9988_v35, %v7714_v56  ;;  %v7748_v12 = vrot.slane %v7735_v48, 4  ;;  %v7713_v3 = vsel %vm1206_vm0, %v7712_v26, %v9991_v49  ;;  %v10024_v55 = vunpack.i.h.bf16 %v10020_v20 }
 0x9b7   : > { %v7706_v36 = vrot.slane %v7691_v60, 4  ;;  %v7710_v37 = vrot.slane %v7703_v31, 4  ;;  %v7723_v9 = vperm.slane %v7715_v23, %v15449_v45  ;;  %v7705_v16 = vsel %vm1206_vm0, 0.0, %v7704_v34 }
 0x9b8   : > { %v14593_v4 = vsel %vm1206_vm0, 0.0, %v7708_v52  ;;  %v7719_v5 = vperm.slane %v7713_v3, %v15449_v45  ;;  %v9992_v17 = vpop.trf.xlu0  ;;  %v10021_v8 = vunpack.i.l.bf16 %v10020_v20  ;;  %v7782_v0 = vrot.slane %v10024_v55, 4 }
 0x9b9   : > { %v7707_v51 = vsel %vm1206_vm0, 0.0, %v7706_v36  ;;  %v7878_v29 = vsel %vm1206_vm0, %v7706_v36, %v7687_v54  ;;  %v14596_v61 = vsel %vm1206_vm0, 0.0, %v7710_v37  ;;  %v7749_v40 = vsel %vm1206_vm0, %v7748_v12, %v7723_v9 }
 0x9ba   : > { %v14599_v42 = vperm.slane %v7878_v29, %v15449_v45  ;;  %v7883_v21 = vrot.slane %v7707_v51, 4  ;;  %v7750_v27 = vrot.slane %v7723_v9, 4  ;;  %v14604_v46 = vperm.slane %v7749_v40, %v11119_v13 }
 0x9bb   : > { %v7737_v19 = vsel %vm1206_vm0, %v7736_v7, %v7719_v5  ;;  %v7738_v33 = vrot.slane %v7719_v5, 4  ;;  %v7780_v44 = vrot.slane %v10021_v8, 4  ;;  %v9996_v53 = vunpack.i.h.bf16 %v9992_v17 }
 0x9bc   : > { %v7751_v38 = vsel %vm1206_vm0, %v7735_v48, %v7750_v27  ;;  %v7743_v1 = vperm.slane %v7737_v19, %v11119_v13  ;;  %v7764_v62 = vrot.slane %v14604_v46, 4  ;;  %v7889_v28 = vsel %vm1206_vm0, %v7710_v37, %v7699_v18 }
 0x9bd   : > { %v7759_v59 = vperm.slane %v7751_v38, %v11119_v13  ;;  %v7739_v6 = vsel %vm1206_vm0, %v7731_v25, %v7738_v33  ;;  %v7781_v11 = vsel %vm1206_vm0, %v7780_v44, %v10024_v55  ;;  %v7783_v57 = vsel %vm1206_vm0, %v10021_v8, %v7782_v0 }
 0x9be   : > { %v7747_v63 = vperm.slane %v7739_v6, %v11119_v13  ;;  %v7760_v2 = vrot.slane %v7743_v1, 4  ;;  %v7770_v35 = vrot.slane %v9996_v53, 4  ;;  %v7894_v54 = vrot.slane %v14596_v61, 4 }
 0x9bf   : > { %v14614_v49 = vrot.slane %v7759_v59, 4  ;;  %v7787_v39 = vperm.slane %v7781_v11, %v15449_v45  ;;  %v14625_v14 = vsel %vm1206_vm0, 0.0, %v7764_v62  ;;  %v7791_v18 = vperm.slane %v7783_v57, %v15449_v45 }
 0x9c0   : > { %v7762_v43 = vrot.slane %v7747_v63, 4  ;;  %v9993_v22 = vunpack.i.l.bf16 %v9992_v17  ;;  %v7830_v56 = vsel %vm1206_vm0, %v7829_v15, %v14550_v41  ;;  %v7761_v60 = vsel %vm1206_vm0, 0.0, %v7760_v2 }
 0x9c1   : > { %v14621_v58 = vsel %vm1206_vm0, 0.0, %v14614_v49  ;;  %v7834_v30 = vperm.slane %v7830_v56, %v15449_v45  ;;  %v7792_v31 = vrot.slane %v7787_v39, 4  ;;  %v7804_v52 = vrot.slane %v7791_v18, 4 }
 0x9c2   : > { %v7763_v10 = vsel %vm1206_vm0, 0.0, %v7762_v43  ;;  %v7948_v34 = vrot.slane %v14621_v58, 4  ;;  %v7768_v25 = vrot.slane %v9993_v22, 4  ;;  %v7771_v48 = vsel %vm1206_vm0, %v9993_v22, %v7770_v35 }
 0x9c3   : > { %v7779_v36 = vperm.slane %v7771_v48, %v15449_v45  ;;  %v7839_v26 = vperm.slane %v14568_v24, %v15449_v45  ;;  %v7841_v41 = vsel %vm1206_vm0, %v7840_v47, %v14558_v50  ;;  %v7848_v15 = vrot.slane %v14565_v32, 4 }
 0x9c4   : > { %v14642_v23 = vsel %vm1206_vm0, %v7762_v43, %v7743_v1  ;;  %v7769_v37 = vsel %vm1206_vm0, %v7768_v25, %v9996_v53  ;;  %v7845_v7 = vperm.slane %v7841_v41, %v15449_v45  ;;  %v7884_v12 = vsel %vm1206_vm0, %v7883_v21, %v7705_v16 }
 0x9c5   : > { %v7775_v51 = vperm.slane %v7769_v37, %v15449_v45  ;;  %v7805_v29 = vsel %vm1206_vm0, %v7804_v52, %v7779_v36  ;;  %v7806_v3 = vrot.slane %v7779_v36, 4  ;;  %v7849_v24 = vsel %vm1206_vm0, %v7834_v30, %v7848_v15 }
 0x9c6   : > { %v7937_v9 = vrot.slane %v7763_v10, 4  ;;  %v14651_v50 = vperm.slane %v7805_v29, %v11119_v13  ;;  %v7857_v47 = vperm.slane %v7849_v24, %v11119_v13  ;;  %v7860_v20 = vrot.slane %v7839_v26, 4 }
 0x9c7   : > { %v7793_v61 = vsel %vm1206_vm0, %v7792_v31, %v7775_v51  ;;  %v7794_v5 = vrot.slane %v7775_v51, 4  ;;  %v7807_v40 = vsel %vm1206_vm0, %v7791_v18, %v7806_v3  ;;  %v7893_v16 = vperm.slane %v7889_v28, %v15449_v45 }
 0x9c8   : > { %v7799_v21 = vperm.slane %v7793_v61, %v11119_v13  ;;  %v7815_v27 = vperm.slane %v7807_v40, %v11119_v13  ;;  %v7861_v55 = vsel %vm1206_vm0, %v7845_v7, %v7860_v20  ;;  %v7888_v17 = vperm.slane %v7884_v12, %v15449_v45 }
 0x9c9   : > { %v7795_v19 = vsel %vm1206_vm0, %v7787_v39, %v7794_v5  ;;  %v7869_v33 = vperm.slane %v7861_v55, %v11119_v13  ;;  %v7876_v38 = vrot.slane %v7857_v47, 4  ;;  %v7895_v8 = vsel %vm1206_vm0, %v7894_v54, %v14593_v4 }
 0x9ca   : > { %v7938_v1 = vsel %vm1206_vm0, %v7937_v9, %v7761_v60  ;;  %v7803_v59 = vperm.slane %v7795_v19, %v11119_v13  ;;  %v7816_v62 = vrot.slane %v7799_v21, 4  ;;  %v7822_v0 = vrot.slane %v7815_v27, 4 }
 0x9cb   : > { %v7820_v6 = vrot.slane %v14651_v50, 4  ;;  %v7899_v44 = vperm.slane %v7895_v8, %v15449_v45  ;;  %v7902_v53 = vrot.slane %v14599_v42, 4  ;;  %v7914_v28 = vrot.slane %v7893_v16, 4 }
 0x9cc   : > { %v7817_v63 = vsel %vm1206_vm0, 0.0, %v7816_v62  ;;  %v7818_v2 = vrot.slane %v7803_v59, 4  ;;  %v7823_v11 = vsel %vm1206_vm0, 0.0, %v7822_v0  ;;  %v7877_v4 = vsel %vm1206_vm0, %v7869_v33, %v7876_v38 }
 0x9cd   : > { %v7903_v57 = vsel %vm1206_vm0, %v7888_v17, %v7902_v53  ;;  %v7915_v35 = vsel %vm1206_vm0, %v7899_v44, %v7914_v28  ;;  %v7874_v54 = vrot.slane %v7869_v33, 4  ;;  %v7846_v43 = vrot.slane %v7834_v30, 4 }
 0x9ce   : > { %v7819_v39 = vsel %vm1206_vm0, 0.0, %v7818_v2  ;;  %v8002_v18 = vrot.slane %v7823_v11, 4  ;;  %v7911_v22 = vperm.slane %v7903_v57, %v11119_v13  ;;  %v7923_v56 = vperm.slane %v7915_v35, %v11119_v13 }
 0x9cf   : > { %v7986_v60 = vsel %vm1206_vm0, %v7818_v2, %v7799_v21  ;;  %v7991_v10 = vrot.slane %v7819_v39, 4  ;;  %v7847_v31 = vsel %vm1206_vm0, %v7846_v43, %v14565_v32  ;;  %v7858_v52 = vrot.slane %v7845_v7, 4 }
 0x9d0   : > { %v7930_v25 = vrot.slane %v7911_v22, 4  ;;  %v7928_v48 = vrot.slane %v7923_v56, 4  ;;  %v14682_v36 = vperm.slane %v7847_v31, %v11119_v13  ;;  %v7900_v30 = vrot.slane %v7888_v17, 4 }
 0x9d1   : > { %v7992_v41 = vsel %vm1206_vm0, %v7991_v10, %v7817_v63  ;;  %v7875_v15 = vsel %vm1206_vm0, %v7874_v54, %v7857_v47  ;;  %v7859_v37 = vsel %vm1206_vm0, %v7858_v52, %v7839_v26  ;;  %v7912_v12 = vrot.slane %v7899_v44, 4 }
 0x9d2   : > { %v7931_v51 = vsel %vm1206_vm0, %v7923_v56, %v7930_v25  ;;  %v7929_v29 = vsel %vm1206_vm0, %v7928_v48, %v7911_v22  ;;  %v7865_v32 = vperm.slane %v7859_v37, %v11119_v13  ;;  %v7872_v7 = vrot.slane %v14682_v36, 4 }
 0x9d3   : > { %v10035_v3 = vpack.i.bf16 %v7931_v51, %v7877_v4  ;;  %v10030_v24 = vpack.i.bf16 %v7929_v29, %v7875_v15  ;;  %v7901_v9 = vsel %vm1206_vm0, %v7900_v30, %v14599_v42  ;;  %v7913_v20 = vsel %vm1206_vm0, %v7912_v12, %v7893_v16 }
 0x9d4   : > { %v7873_v47 = vsel %vm1206_vm0, %v7865_v32, %v7872_v7  ;;  %v7907_v26 = vperm.slane %v7901_v9, %v11119_v13  ;;  %v7936_v61 = vperm.slane %v14642_v23, %v15449_v45  ;;  %v7942_v5 = vperm.slane %v7938_v1, %v15449_v45 }
 0x9d5   : > { %v7821_v40 = vsel %vm1206_vm0, 0.0, %v7820_v6  ;;  %10036 = vrot.lane.b32.xlu2 %v10035_v3, %s10593_s21  ;;  %10031 = vrot.lane.b32.xlu0 %v10030_v24, %s10592_s20  ;;  %v7919_v21 = vperm.slane %v7913_v20, %v11119_v13  ;;  %v7943_v42 = vsel %vm1206_vm0, %v14614_v49, %v14604_v46  ;;  %v7949_v16 = vsel %vm1206_vm0, %v7948_v34, %v14625_v14 }
 0x9d6   : > { %v7926_v23 = vrot.slane %v7907_v26, 4  ;;  %v7947_v27 = vperm.slane %v7943_v42, %v15449_v45  ;;  %v7953_v55 = vperm.slane %v7949_v16, %v15449_v45  ;;  %v7954_v17 = vrot.slane %v7942_v5, 4  ;;  %v9376_v42 = vld [vmem:[%s10975_s6 + $0x18] sm:$0xff]  ;;  %v9375_v16 = vld [vmem:[%s10975_s6 + $0x10] sm:$0xff] }
 0x9d7   : > { %v7990_v19 = vperm.slane %v7986_v60, %v15449_v45  ;;  %v7996_v33 = vperm.slane %v7992_v41, %v15449_v45  ;;  %v7997_v38 = vsel %vm1206_vm0, %v7822_v0, %v14651_v50  ;;  %v8003_v46 = vsel %vm1206_vm0, %v8002_v18, %v7821_v40  ;;  %v9378_v40 = vld [vmem:[%s10975_s6 + $0x28] sm:$0xff] }
 0x9d8   : > { %v7927_v49 = vsel %vm1206_vm0, %v7919_v21, %v7926_v23  ;;  %v7955_v58 = vsel %vm1206_vm0, %v7954_v17, %v7936_v61  ;;  %v7966_v14 = vrot.slane %v7953_v55, 4  ;;  %v8001_v34 = vperm.slane %v7997_v38, %v15449_v45  ;;  %v9374_v23 = vld [vmem:[%s10975_s6 + $0x8] sm:$0xff] }
 0x9d9   : > { %v10025_v8 = vpack.i.bf16 %v7927_v49, %v7873_v47  ;;  %v7961_v1 = vperm.slane %v7955_v58, %v11119_v13  ;;  %v8007_v59 = vperm.slane %v8003_v46, %v15449_v45  ;;  %v8008_v62 = vrot.slane %v7996_v33, 4 }
 0x9da   : > { %v7968_v6 = vrot.slane %v7947_v27, 4  ;;  %v7967_v50 = vsel %vm1206_vm0, %v7966_v14, %v7947_v27  ;;  %v8022_v63 = vrot.slane %v8001_v34, 4  ;;  %v8010_v4 = vrot.slane %v7990_v19, 4  ;;  %v9373_v27 = vld [vmem:[%s10975_s6] sm:$0xff] }
 0x9db   : > { %10026 = vrot.lane.b32.xlu1 %v10025_v8, %s10591_s9  ;;  %v8009_v0 = vsel %vm1206_vm0, %v8008_v62, %v7990_v19  ;;  %v8020_v44 = vrot.slane %v8007_v59, 4  ;;  %v7980_v53 = vrot.slane %v7961_v1, 4  ;;  %v7973_v45 = vperm.slane %v7967_v50, %v11119_v13 }
 0x9dc   : > { %v8015_v28 = vperm.slane %v8009_v0, %v11119_v13  ;;  %v7969_v11 = vsel %vm1206_vm0, %v7953_v55, %v7968_v6  ;;  %v8023_v54 = vsel %vm1206_vm0, %v8007_v59, %v8022_v63  ;;  %v7956_v43 = vrot.slane %v7936_v61, 4  ;;  %v9380_v61 = vld [vmem:[%s10975_s6 + $0x38] sm:$0xff] }
 0x9dd   : > { %v8021_v2 = vsel %vm1206_vm0, %v8020_v44, %v8001_v34  ;;  %v8031_v39 = vperm.slane %v8023_v54, %v11119_v13  ;;  %v7870_v18 = vrot.slane %v7865_v32, 4  ;;  %v7981_v22 = vsel %vm1206_vm0, %v7973_v45, %v7980_v53  ;;  %8172 = vmatpush.bf16.msra.mxu2 %v9380_v61 }
 0x9de   : > { %v8027_v57 = vperm.slane %v8021_v2, %v11119_v13  ;;  %v8034_v35 = vrot.slane %v8015_v28, 4  ;;  %v7977_v60 = vperm.slane %v7969_v11, %v11119_v13  ;;  %v8011_v31 = vsel %vm1206_vm0, %v7996_v33, %v8010_v4 }
 0x9df   : > { %v8036_v52 = vrot.slane %v8031_v39, 4  ;;  %v7924_v25 = vrot.slane %v7919_v21, 4  ;;  %v7871_v48 = vsel %vm1206_vm0, %v7870_v18, %v14682_v36  ;;  %v7957_v30 = vsel %vm1206_vm0, %v7942_v5, %v7956_v43  ;;  %v9379_v5 = vld [vmem:[%s10975_s6 + $0x30] sm:$0xff]  ;;  %v9377_v21 = vld [vmem:[%s10975_s6 + $0x20] sm:$0xff] }
 0x9e0   : > { %v8035_v56 = vsel %vm1206_vm0, %v8027_v57, %v8034_v35  ;;  %v7982_v41 = vrot.slane %v7977_v60, 4  ;;  %v8019_v15 = vperm.slane %v8011_v31, %v11119_v13  ;;  %v7965_v12 = vperm.slane %v7957_v30, %v11119_v13  ;;  %v10144_v31 = vld [vmem:[#allocation2 + $0x10] sm:$0xff]  ;;  %v10145_v30 = vld [vmem:[#allocation2] sm:$0xff] }
 0x9e1   : > { %v10040_v10 = vpack.i.bf16 %v8035_v56, %v7981_v22  ;;  %v7925_v37 = vsel %vm1206_vm0, %v7924_v25, %v7907_v26  ;;  %v7978_v7 = vrot.slane %v7973_v45, 4  ;;  %v8032_v47 = vrot.slane %v8027_v57, 4  ;;  %8173 = vmatpush.bf16.msra.mxu2 %v9379_v5  ;;  %v10056_v56 = vld [vmem:[%s15451_s29] ss:$0 sm:$0xff] }
 0x9e2   : > { %v8037_v51 = vsel %vm1206_vm0, %v8036_v52, %v8019_v15  ;;  %v7983_v29 = vsel %vm1206_vm0, %v7982_v41, %v7965_v12  ;;  %v8038_v36 = vrot.slane %v8019_v15, 4  ;;  %v7984_v3 = vrot.slane %v7965_v12, 4  ;;  %v10146_v12 = vld [vmem:[#allocation2 + $0x18] sm:$0xff] }
 0x9e3   : > { %10041 = vrot.lane.b32.xlu1 %v10040_v10, %s10591_s9  ;;  %v10045_v32 = vpack.i.bf16 %v8037_v51, %v7983_v29  ;;  %v7979_v24 = vsel %vm1206_vm0, %v7978_v7, %v7961_v1  ;;  %v8033_v26 = vsel %vm1206_vm0, %v8032_v47, %v8015_v28 }
 0x9e4   : > { %v8039_v9 = vsel %vm1206_vm0, %v8031_v39, %v8038_v36  ;;  %v7985_v13 = vsel %vm1206_vm0, %v7977_v60, %v7984_v3  ;;  %v10147_v36 = vld [vmem:[#allocation2 + $0x8] sm:$0xff]  ;;  %v10596_v3 = vmov 128.0  }
 0x9e5   : > { %v10050_v20 = vpack.i.bf16 %v8039_v9, %v7985_v13  ;;  %8174 = vmatpush.bf16.msra.mxu2 %v9378_v40  ;;  %10126 = vrcp.f32 %v10596_v3  ;;  %v9231_v3 = vld [vmem:[%s10977_s4 + $0x28] sm:$0xf0] }
 0x9e9   : > { %8175 = vmatpush.bf16.msra.mxu2 %v9377_v21 }
 0x9eb   : > { %10046 = vrot.lane.b32.xlu1 %v10045_v32, %s10592_s20 }
 0x9ed   : > { %8176 = vmatpush.bf16.msra.mxu2 %v9376_v42 }
 0x9f1   : > { %8177 = vmatpush.bf16.msra.mxu2 %v9375_v16 }
 0x9f3   : > { %10051 = vrot.lane.b32.xlu1 %v10050_v20, %s10593_s21 }
 0x9f5   : > { %8178 = vmatpush.bf16.msra.mxu2 %v9374_v23 }
 0x9f9   : > { %8179 = vmatpush.bf16.msra.mxu2 %v9373_v27 }
 0xa2f   : > { %v10037_v17 = vpop.permute.xlu2 %10036 }
 0xa30   : > { %v10039_v58 = vunpack.i.h.bf16 %v10037_v17  ;;  %v10038_v14 = vunpack.i.l.bf16 %v10037_v17 }
 0xa47   : > { %v10032_v55 = vpop.permute.xlu0 %10031 }
 0xa48   : > { %v10034_v46 = vunpack.i.h.bf16 %v10032_v55  ;;  %v10033_v49 = vunpack.i.l.bf16 %v10032_v55 }
 0xa4d   : > { %v10027_v19 = vpop.permute.xlu1 %10026 }
 0xa4e   : > { %v10029_v33 = vunpack.i.h.bf16 %v10027_v19  ;;  %v10028_v38 = vunpack.i.l.bf16 %v10027_v19 }
 0xa50   : > { %v8089_v34 = vsel %vm4637_vm1, %v7925_v37, %v10029_v33  ;;  %v8088_v8 = vsel %vm4637_vm1, %v7871_v48, %v10028_v38 }
 0xa51   : > { %v8094_v1 = vsel %vm8092_vm2, %v8089_v34, %v10034_v46  ;;  %v8093_v59 = vsel %vm8092_vm2, %v8088_v8, %v10033_v49  ;;  %v9396_v34 = vld [vmem:[%s10977_s4 + $0x74] sm:$0xf0]  ;;  %v9395_v8 = vld [vmem:[%s10977_s4 + $0x74] sm:$0xf] }
 0xa52   : > { %v8098_v62 = vsel %vm8097_vm3, %v8093_v59, %v10038_v14  ;;  %v8099_v6 = vsel %vm8097_vm3, %v8094_v1, %v10039_v58  ;;  %v9269_v14 = vld [vmem:[%s10977_s4 + $0x70] sm:$0xf]  ;;  %v9271_v59 = vld [vmem:[%s10977_s4 + $0x78] sm:$0xf0] }
 0xa53   : > { %v8102_v50 = vpack.c.bf16 %v8099_v6, %v8098_v62  ;;  %v9270_v1 = vor.u32 %v9396_v34, %v9269_v14  ;;  %v9274_v62 = vor.u32 %v9395_v8, %v9271_v59  ;;  %v9261_v6 = vld [vmem:[%s10977_s4 + $0x60] sm:$0xf]  ;;  %v9215_v14 = vld [vmem:[%s10977_s4 + $0x8] sm:$0xf0] }
 0xa55   : > { %8180 = vmatmul.bf16.vlgmr.msra.gmra.mxu2 %v8102_v50  ;;  %v10042_v0 = vpop.permute.xlu1 %10041  ;;  %8402 = vmatpush.bf16.msra.mxu3 %v9270_v1  ;;  %v9394_v50 = vld [vmem:[%s10977_s4 + $0x64] sm:$0xf0] }
 0xa56   : > { %v10044_v53 = vunpack.i.h.bf16 %v10042_v0  ;;  %v10043_v28 = vunpack.i.l.bf16 %v10042_v0  ;;  %8421 = vmatpush.bf16.msrb.mxu0 %v9274_v62  ;;  %v9393_v0 = vld [vmem:[%s10977_s4 + $0x64] sm:$0xf] }
 0xa58   : > { %v8091_v4 = vsel %vm4637_vm1, %v8033_v26, %v10044_v53  ;;  %v8090_v45 = vsel %vm4637_vm1, %v7979_v24, %v10043_v28  ;;  %v10127_v24 = vpop.eup %10126  ;;  %v9262_v53 = vor.u32 %v9394_v50, %v9261_v6  ;;  %v9263_v28 = vld [vmem:[%s10977_s4 + $0x68] sm:$0xf0] }
 0xa59   : > { %v8204_v9 = vmul.f32 128.0, %v10127_v24  ;;  %vm8208_vm4 = vweird.f32 %v10127_v24 }
 0xa5a   : > { %8403 = vmatpush.bf16.msra.mxu3 %v9262_v53 }
 0xa5b   : > { %v8205_v13 = vsub.f32 1.0, %v8204_v9 }
 0xa5d   : > { %v10047_v44 = vpop.permute.xlu1 %10046  ;;  %v8206_v20 = vmul.f32 %v10127_v24, %v8205_v13 }
 0xa5e   : > { %v10049_v63 = vunpack.i.h.bf16 %v10047_v44  ;;  %v10048_v2 = vunpack.i.l.bf16 %v10047_v44 }
 0xa5f   : > { %v8207_v47 = vadd.f32 %v10127_v24, %v8206_v20  ;;  %v9221_v20 = vld [vmem:[%s10977_s4 + $0x10] sm:$0xf] }
 0xa60   : > { %v8095_v54 = vsel %vm8092_vm2, %v8090_v45, %v10048_v2  ;;  %v8096_v43 = vsel %vm8092_vm2, %v8091_v4, %v10049_v63  ;;  %v9253_v63 = vld [vmem:[%s10977_s4 + $0x50] sm:$0xf]  ;;  %v9392_v2 = vld [vmem:[%s10977_s4 + $0x54] sm:$0xf0]  ;;  %v9266_v4 = vor.u32 %v9393_v0, %v9263_v28  ;;  %v9391_v45 = vld [vmem:[%s10977_s4 + $0x54] sm:$0xf] }
 0xa61   : > { %v14776_v26 = vsel %vm8208_vm4, %v10127_v24, %v8207_v47  ;;  %v9384_v47 = vld [vmem:[%s10977_s4 + $0x14] sm:$0xf0] }
 0xa62   : > { %8422 = vmatpush.bf16.msrb.mxu0 %v9266_v4  ;;  %v10057_v28 = vld [vmem:[%s901_s22] ss:$0 sm:$0xff] }
 0xa65   : > { %v10052_v11 = vpop.permute.xlu1 %10051 }
 0xa66   : > { %v10054_v57 = vunpack.i.h.bf16 %v10052_v11  ;;  %v10053_v35 = vunpack.i.l.bf16 %v10052_v11 }
 0xa68   : > { %v8100_v39 = vsel %vm8097_vm3, %v8095_v54, %v10053_v35  ;;  %v8101_v18 = vsel %vm8097_vm3, %v8096_v43, %v10054_v57  ;;  %v9255_v57 = vld [vmem:[%s10977_s4 + $0x58] sm:$0xf0]  ;;  %v9254_v35 = vor.u32 %v9392_v2, %v9253_v63 }
 0xa69   : > { %v8103_v22 = vpack.c.bf16 %v8101_v18, %v8100_v39  ;;  %v9258_v43 = vor.u32 %v9391_v45, %v9255_v57  ;;  %v9245_v39 = vld [vmem:[%s10977_s4 + $0x40] sm:$0xf]  ;;  %v9390_v18 = vld [vmem:[%s10977_s4 + $0x44] sm:$0xf0]  ;;  %v9412_v2 = vld [vmem:[%s10979_s18 + $0x78] sm:$0xff] }
 0xa6a   : > { %8404 = vmatpush.bf16.msra.mxu3 %v9254_v35  ;;  %8603 = vmatpush.bf16.msrb.mxu2 %v9412_v2 }
 0xa6b   : > { %8185 = vmatmul.bf16.gmra.mxu2 %v8103_v22  ;;  %v9389_v22 = vld [vmem:[%s10977_s4 + $0x44] sm:$0xf]  ;;  %8423 = vmatpush.bf16.msrb.mxu0 %v9258_v43  ;;  %v9411_v43 = vld [vmem:[%s10979_s18 + $0x70] sm:$0xff] }
 0xa6e   : > { %8604 = vmatpush.bf16.msrb.mxu2 %v9411_v43 }
 0xad8   : > { %v8181_v60 = vpop.f32.mrf.mxu2 }
 0xad9   : > { %v8182_v10 = vadd.f32 %v10056_v56, %v8181_v60  ;;  %v9246_v60 = vor.u32 %v9390_v18, %v9245_v39  ;;  %v9403_v39 = vld [vmem:[%s10979_s18 + $0x30] sm:$0xff] }
 0xadb   : > { %v8191_v52 = vadd.f32 %v10144_v31, %v8182_v10  ;;  %v9237_v31 = vld [vmem:[%s10977_s4 + $0x30] sm:$0xf]  ;;  %8405 = vmatpush.bf16.msra.mxu3 %v9246_v60 }
 0xadd   : > { %8195 = vadd.xlane.f32.xlu1 %v8191_v52 }
 0xae0   : > { %v8183_v25 = vpop.f32.mrf.mxu2 }
 0xae1   : > { %v8184_v48 = vadd.f32 %v10056_v56, %v8183_v25 }
 0xae3   : > { %v8192_v41 = vadd.f32 %v10145_v30, %v8184_v48  ;;  %v9387_v48 = vld [vmem:[%s10977_s4 + $0x34] sm:$0xf]  ;;  %v9239_v30 = vld [vmem:[%s10977_s4 + $0x38] sm:$0xf0] }
 0xae5   : > { %8197 = vadd.xlane.f32.xlu0 %v8192_v41 }
 0xaee   : > { %v8186_v15 = vpop.f32.mrf.mxu2 }
 0xaef   : > { %v8187_v37 = vadd.f32 %v10056_v56, %v8186_v15 }
 0xaf1   : > { %v8193_v51 = vadd.f32 %v10146_v12, %v8187_v37 }
 0xaf3   : > { %8199 = vadd.xlane.f32.xlu2 %v8193_v51 }
 0xaf6   : > { %v8188_v29 = vpop.f32.mrf.mxu2 }
 0xaf7   : > { %v8189_v32 = vadd.f32 %v10056_v56, %v8188_v29  ;;  %v9247_v56 = vld [vmem:[%s10977_s4 + $0x48] sm:$0xf0]  ;;  %v9229_v29 = vld [vmem:[%s10977_s4 + $0x20] sm:$0xf] }
 0xaf8   : > { %v9250_v10 = vor.u32 %v9389_v22, %v9247_v56 }
 0xaf9   : > { %v8194_v7 = vadd.f32 %v10147_v36, %v8189_v32  ;;  %v9386_v32 = vld [vmem:[%s10977_s4 + $0x24] sm:$0xf0] }
 0xafa   : > { %8424 = vmatpush.bf16.msrb.mxu0 %v9250_v10  ;;  %v9230_v9 = vor.u32 %v9386_v32, %v9229_v29 }
 0xafb   : > { %8201 = vadd.xlane.f32.xlu1 %v8194_v7 }
 0xb50   : > { %v8196_v61 = vpop.xlane.xlu1 %8195 }
 0xb51   : > { %v8210_v5 = vmul.f32 %v14776_v26, %v8196_v61 }
 0xb53   : > { %v14779_v40 = vsub.f32 %v8191_v52, %v8210_v5  ;;  %v9388_v52 = vld [vmem:[%s10977_s4 + $0x34] sm:$0xf0]  ;;  %v9383_v5 = vld [vmem:[%s10977_s4 + $0x14] sm:$0xf] }
 0xb54   : > { %v9238_v15 = vor.u32 %v9388_v52, %v9237_v31  ;;  %v9410_v52 = vld [vmem:[%s10979_s18 + $0x68] sm:$0xff] }
 0xb55   : > { %v8218_v21 = vmul.f32 %v14779_v40, %v14779_v40  ;;  %8605 = vmatpush.bf16.msrb.mxu2 %v9410_v52 }
 0xb56   : > { %8406 = vmatpush.bf16.msra.mxu3 %v9238_v15  ;;  %v9409_v15 = vld [vmem:[%s10979_s18 + $0x60] sm:$0xff] }
 0xb57   : > { %8222 = vadd.xlane.f32.xlu1 %v8218_v21  ;;  %v9223_v21 = vld [vmem:[%s10977_s4 + $0x18] sm:$0xf0] }
 0xb58   : > { %v8198_v42 = vpop.xlane.xlu0 %8197 }
 0xb59   : > { %v8211_v16 = vmul.f32 %v14776_v26, %v8198_v42  ;;  %8606 = vmatpush.bf16.msrb.mxu2 %v9409_v15 }
 0xb5a   : > { %8407 = vmatpush.bf16.msra.mxu3 %v9230_v9 }
 0xb5b   : > { %v14784_v23 = vsub.f32 %v8192_v41, %v8211_v16  ;;  %v9222_v16 = vor.u32 %v9384_v47, %v9221_v20 }
 0xb5d   : > { %v8219_v27 = vmul.f32 %v14784_v23, %v14784_v23 }
 0xb5e   : > { %8408 = vmatpush.bf16.msra.mxu3 %v9222_v16  ;;  %v9400_v16 = vld [vmem:[%s10979_s18 + $0x18] sm:$0xff] }
 0xb5f   : > { %8224 = vadd.xlane.f32.xlu1 %v8219_v27 }
 0xb66   : > { %v8200_v55 = vpop.xlane.xlu2 %8199 }
 0xb67   : > { %v8212_v17 = vmul.f32 %v14776_v26, %v8200_v55  ;;  %v9226_v55 = vor.u32 %v9383_v5, %v9223_v21  ;;  %v9408_v21 = vld [vmem:[%s10979_s18 + $0x58] sm:$0xff] }
 0xb68   : > { %8607 = vmatpush.bf16.msrb.mxu2 %v9408_v21 }
 0xb69   : > { %v14789_v19 = vsub.f32 %v8193_v51, %v8212_v17  ;;  %v9242_v51 = vor.u32 %v9387_v48, %v9239_v30  ;;  %v9213_v17 = vld [vmem:[%s10977_s4] sm:$0xf] }
 0xb6b   : > { %v8220_v33 = vmul.f32 %v14789_v19, %v14789_v19  ;;  %8425 = vmatpush.bf16.msrb.mxu0 %v9242_v51 }
 0xb6d   : > { %8226 = vadd.xlane.f32.xlu0 %v8220_v33  ;;  %v9382_v33 = vld [vmem:[%s10977_s4 + $0x4] sm:$0xf0] }
 0xb6e   : > { %v8202_v38 = vpop.xlane.xlu1 %8201  ;;  %v9214_v1 = vor.u32 %v9382_v33, %v9213_v17  ;;  %v9405_v17 = vld [vmem:[%s10979_s18 + $0x40] sm:$0xff]  ;;  %v9398_v33 = vld [vmem:[%s10979_s18 + $0x8] sm:$0xff] }
 0xb6f   : > { %v8213_v46 = vmul.f32 %v14776_v26, %v8202_v38 }
 0xb70   : > { %8409 = vmatpush.bf16.msra.mxu3 %v9214_v1 }
 0xb71   : > { %v14794_v49 = vsub.f32 %v8194_v7, %v8213_v46  ;;  %v9385_v7 = vld [vmem:[%s10977_s4 + $0x24] sm:$0xf] }
 0xb72   : > { %v9234_v13 = vor.u32 %v9385_v7, %v9231_v3 }
 0xb73   : > { %v8221_v58 = vmul.f32 %v14794_v49, %v14794_v49 }
 0xb74   : > { %8426 = vmatpush.bf16.msrb.mxu0 %v9234_v13 }
 0xb75   : > { %8228 = vadd.xlane.f32.xlu1 %v8221_v58  ;;  %v9381_v58 = vld [vmem:[%s10977_s4 + $0x4] sm:$0xf] }
 0xb76   : > { %v9218_v62 = vor.u32 %v9381_v58, %v9215_v14 }
 0xb78   : > { %8427 = vmatpush.bf16.msrb.mxu0 %v9226_v55  ;;  %v9399_v55 = vld [vmem:[%s10979_s18 + $0x10] sm:$0xff] }
 0xb7c   : > { %8428 = vmatpush.bf16.msrb.mxu0 %v9218_v62 }
 0xbca   : > { %v8223_v44 = vpop.xlane.xlu1 %8222 }
 0xbcb   : > { %v8230_v11 = vmul.f32 %v8223_v44, %v14776_v26 }
 0xbcd   : > { %v8234_v54 = vadd.f32 1e-05, %v8230_v11  ;;  %v9404_v11 = vld [vmem:[%s10979_s18 + $0x38] sm:$0xff] }
 0xbce   : > { %8584 = vmatpush.bf16.msrb.mxu1 %v9404_v11 }
 0xbcf   : > { %10128 = vrsqrt.f32 %v8234_v54  ;;  %vm8244_vm6 = vweird.f32 %v8234_v54 }
 0xbd2   : > { %v8225_v25 = vpop.xlane.xlu1 %8224  ;;  %8585 = vmatpush.bf16.msrb.mxu1 %v9403_v39 }
 0xbd3   : > { %v8231_v41 = vmul.f32 %v8225_v25, %v14776_v26  ;;  %v9402_v25 = vld [vmem:[%s10979_s18 + $0x28] sm:$0xff] }
 0xbd5   : > { %v10129_v37 = vpop.eup %10128  ;;  %v8235_v12 = vadd.f32 1e-05, %v8231_v41 }
 0xbd6   : > { %v8239_v36 = vmul.f32 %v10129_v37, %v8234_v54  ;;  %vm8245_vm5 = vweird.f32 %v10129_v37  ;;  %v10058_v54 = vld [vmem:[%s779_s11] ss:$0 sm:$0xff]  ;;  %8586 = vmatpush.bf16.msrb.mxu1 %v9402_v25 }
 0xbd7   : > { %10130 = vrsqrt.f32 %v8235_v12  ;;  %vm8246_vm7 = vmor %vm8244_vm6, %vm8245_vm5  ;;  %vm8254_vm9 = vweird.f32 %v8235_v12  ;;  %v10059_v25 = vld [vmem:[%s898_s7] ss:$0 sm:$0xff] }
 0xbd8   : > { %v8240_v24 = vmul.f32 %v10129_v37, %v8239_v36 }
 0xbda   : > { %v8241_v61 = vmul.f32 0.5, %v8240_v24 }
 0xbdc   : > { %v8242_v42 = vsub.f32 1.5, %v8241_v61 }
 0xbdd   : > { %v10131_v27 = vpop.eup %10130 }
 0xbde   : > { %v8243_v38 = vmul.f32 %v10129_v37, %v8242_v42  ;;  %v8249_v46 = vmul.f32 %v10131_v27, %v8235_v12  ;;  %vm8255_vm8 = vweird.f32 %v10131_v27  ;;  %v9401_v42 = vld [vmem:[%s10979_s18 + $0x20] sm:$0xff] }
 0xbdf   : > { %vm8256_vm10 = vmor %vm8254_vm9, %vm8255_vm8  ;;  %8587 = vmatpush.bf16.msrb.mxu1 %v9401_v42 }
 0xbe0   : > { %v8250_v34 = vmul.f32 %v10131_v27, %v8249_v46  ;;  %v8227_v8 = vpop.xlane.xlu0 %8226  ;;  %v8247_v6 = vsel %vm8246_vm7, %v10129_v37, %v8243_v38  ;;  %v9397_v38 = vld [vmem:[%s10979_s18] sm:$0xff]  ;;  %v8316_v46 = vld [vmem:[%s10959_s23] sm:$0x3] }
 0xbe1   : > { %v8232_v59 = vmul.f32 %v8227_v8, %v14776_v26  ;;  %v8278_v53 = vmul.f32 %v8247_v6, %v14779_v40  ;;  %v8319_v14 = vperm.slane %v8316_v46, 1 }
 0xbe2   : > { %v8251_v50 = vmul.f32 0.5, %v8250_v34 }
 0xbe3   : > { %v8236_v0 = vadd.f32 1e-05, %v8232_v59  ;;  %v8286_v35 = vmul.f32 %v10057_v28, %v8278_v53  ;;  %8588 = vmatpush.bf16.msrb.mxu1 %v9400_v16  ;;  %v8318_v59 = vperm.slane %v8316_v46, 0 }
 0xbe4   : > { %v8252_v44 = vsub.f32 1.5, %v8251_v50 }
 0xbe5   : > { %10132 = vrsqrt.f32 %v8236_v0  ;;  %v14847_v10 = vadd.f32 %v10058_v54, %v8286_v35  ;;  %vm8264_vm12 = vweird.f32 %v8236_v0 }
 0xbe6   : > { %v8253_v63 = vmul.f32 %v10131_v27, %v8252_v44 }
 0xbe7   : > { %8589 = vmatpush.bf16.msrb.mxu1 %v9399_v55 }
 0xbe8   : > { %v8257_v4 = vsel %vm8256_vm10, %v10131_v27, %v8253_v63  ;;  %v8229_v45 = vpop.xlane.xlu1 %8228  ;;  %v9406_v27 = vld [vmem:[%s10979_s18 + $0x48] sm:$0xff] }
 0xbe9   : > { %v8279_v57 = vmul.f32 %v8257_v4, %v14784_v23  ;;  %v8233_v40 = vmul.f32 %v8229_v45, %v14776_v26 }
 0xbeb   : > { %v10133_v18 = vpop.eup %10132  ;;  %v8237_v22 = vadd.f32 1e-05, %v8233_v40  ;;  %v8287_v56 = vmul.f32 %v10057_v28, %v8279_v57  ;;  %8590 = vmatpush.bf16.msrb.mxu1 %v9398_v33 }
 0xbec   : > { %v8259_v60 = vmul.f32 %v10133_v18, %v8236_v0  ;;  %vm8265_vm11 = vweird.f32 %v10133_v18 }
 0xbed   : > { %10134 = vrsqrt.f32 %v8237_v22  ;;  %v14849_v23 = vadd.f32 %v10058_v54, %v8287_v56  ;;  %vm8266_vm13 = vmor %vm8264_vm12, %vm8265_vm11  ;;  %vm8274_vm15 = vweird.f32 %v8237_v22 }
 0xbee   : > { %v8260_v31 = vmul.f32 %v10133_v18, %v8259_v60 }
 0xbef   : > { %v8298_v48 = vpack.c.bf16 %v14849_v23, %v14847_v10  ;;  %8591 = vmatpush.bf16.msrb.mxu1 %v9397_v38 }
 0xbf0   : > { %v8261_v30 = vmul.f32 0.5, %v8260_v31 }
 0xbf1   : > { %8410 = vmatmul.bf16.vlgmr.msra.gmra.mxu3 %v8298_v48  ;;  %8429 = vmatmul.bf16.vlgmr.msrb.gmra.mxu0 %v8298_v48 }
 0xbf2   : > { %v8262_v41 = vsub.f32 1.5, %v8261_v30 }
 0xbf3   : > { %v10135_v37 = vpop.eup %10134 }
 0xbf4   : > { %v8263_v12 = vmul.f32 %v10133_v18, %v8262_v41  ;;  %v8269_v51 = vmul.f32 %v10135_v37, %v8237_v22  ;;  %vm8275_vm14 = vweird.f32 %v10135_v37 }
 0xbf5   : > { %vm8276_vm0 = vmor %vm8274_vm15, %vm8275_vm14 }
 0xbf6   : > { %v8270_v29 = vmul.f32 %v10135_v37, %v8269_v51  ;;  %v8267_v36 = vsel %vm8266_vm13, %v10133_v18, %v8263_v12 }
 0xbf7   : > { %v8280_v3 = vmul.f32 %v8267_v36, %v14789_v19 }
 0xbf8   : > { %v8271_v32 = vmul.f32 0.5, %v8270_v29 }
 0xbf9   : > { %v8288_v20 = vmul.f32 %v10057_v28, %v8280_v3 }
 0xbfa   : > { %v8272_v7 = vsub.f32 1.5, %v8271_v32 }
 0xbfb   : > { %v14858_v61 = vadd.f32 %v10058_v54, %v8288_v20 }
 0xbfc   : > { %v8273_v24 = vmul.f32 %v10135_v37, %v8272_v7 }
 0xbfe   : > { %v8277_v9 = vsel %vm8276_vm0, %v10135_v37, %v8273_v24 }
 0xbff   : > { %v8281_v13 = vmul.f32 %v8277_v9, %v14794_v49  ;;  %v9407_v49 = vld [vmem:[%s10979_s18 + $0x50] sm:$0xff] }
 0xc00   : > { %8608 = vmatpush.bf16.msrb.mxu2 %v9407_v49 }
 0xc01   : > { %v8289_v47 = vmul.f32 %v10057_v28, %v8281_v13 }
 0xc03   : > { %v14860_v5 = vadd.f32 %v10058_v54, %v8289_v47 }
 0xc04   : > { %8609 = vmatpush.bf16.msrb.mxu2 %v9406_v27 }
 0xc05   : > { %v8299_v19 = vpack.c.bf16 %v14860_v5, %v14858_v61 }
 0xc07   : > { %8415 = vmatmul.bf16.gmra.mxu3 %v8299_v19  ;;  %8434 = vmatmul.bf16.gmra.mxu0 %v8299_v19 }
 0xc08   : > { %8610 = vmatpush.bf16.msrb.mxu2 %v9405_v17 }
 0xc6e   : > { %v8430_v58 = vpop.f32.mrf.mxu0 }
 0xc6f   : > { %v8431_v8 = vadd.f32 %v8430_v58, %v8319_v14 }
 0xc71   : > { %v8441_v6 = vmax.f32 %v8431_v8, 0.0 }
 0xc74   : > { %v8411_v34 = vpop.f32.mrf.mxu3 }
 0xc75   : > { %v8412_v0 = vadd.f32 %v8411_v34, %v8318_v59 }
 0xc76   : > { %v8432_v1 = vpop.f32.mrf.mxu0 }
 0xc77   : > { %v8433_v62 = vadd.f32 %v8432_v1, %v8319_v14  ;;  %v8440_v63 = vmax.f32 %v8412_v0, 0.0 }
 0xc79   : > { %v8443_v50 = vmax.f32 %v8433_v62, 0.0 }
 0xc7b   : > { %v8449_v44 = vpack.c.bf16 %v8443_v50, %v8441_v6 }
 0xc7c   : > { %v8413_v53 = vpop.f32.mrf.mxu3 }
 0xc7d   : > { %v8414_v28 = vadd.f32 %v8413_v53, %v8318_v59  ;;  %8611 = vmatmul.bf16.vlgmr.msrb.gmra.mxu2 %v8449_v44 }
 0xc7f   : > { %v8442_v2 = vmax.f32 %v8414_v28, 0.0 }
 0xc81   : > { %v8448_v11 = vpack.c.bf16 %v8442_v2, %v8440_v63 }
 0xc83   : > { %8592 = vmatmul.bf16.vlgmr.msrb.gmra.mxu1 %v8448_v11 }
 0xc84   : > { %v8435_v4 = vpop.f32.mrf.mxu0 }
 0xc85   : > { %v8436_v57 = vadd.f32 %v8435_v4, %v8319_v14 }
 0xc87   : > { %v8445_v54 = vmax.f32 %v8436_v57, 0.0  ;;  %v10060_v57 = vld [vmem:[%s904_s19] ss:$0 sm:$0xff]  ;;  %s15455_s19 = sld [smem:[#allocation27_spill]] }
 0xc8a   : > { %v8416_v45 = vpop.f32.mrf.mxu3 }
 0xc8b   : > { %v8417_v39 = vadd.f32 %v8416_v45, %v8318_v59 }
 0xc8c   : > { %v8437_v40 = vpop.f32.mrf.mxu0 }
 0xc8d   : > { %v8438_v35 = vadd.f32 %v8437_v40, %v8319_v14  ;;  %v8444_v60 = vmax.f32 %v8417_v39, 0.0  ;;  %p9339_p2 = scmp.ne.s32.totalorder %s15455_s19, 1 }
 0xc8f   : > { %v8447_v43 = vmax.f32 %v8438_v35, 0.0 }
 0xc91   : > { %v8451_v18 = vpack.c.bf16 %v8447_v43, %v8445_v54  ;;  %v10061_v43 = vld [vmem:[%s788_s10] ss:$0 sm:$0xff] }
 0xc92   : > { %v8418_v22 = vpop.f32.mrf.mxu3 }
 0xc93   : > { %v8419_v56 = vadd.f32 %v8418_v22, %v8318_v59  ;;  %8616 = vmatmul.bf16.gmra.mxu2 %v8451_v18 }
 0xc95   : > { %v8446_v31 = vmax.f32 %v8419_v56, 0.0 }
 0xc97   : > { %v8450_v52 = vpack.c.bf16 %v8446_v31, %v8444_v60 }
 0xc99   : > { %8597 = vmatmul.bf16.gmra.mxu1 %v8450_v52 }
 0xd00   : > { %v8593_v48 = vpop.f32.mrf.mxu1  ;;  %v8612_v30 = vpop.f32.mrf.mxu2 }
 0xd01   : > { %v8594_v41 = vadd.f32 %v10059_v25, %v8593_v48 }
 0xd03   : > { %v8613_v15 = vadd.f32 %v8612_v30, %v8594_v41 }
 0xd05   : > { %v8622_v37 = vadd.f32 %v8613_v15, %v14847_v10 }
 0xd07   : > { %8626 = vadd.xlane.f32.xlu0 %v8622_v37 }
 0xd08   : > { %v8595_v12 = vpop.f32.mrf.mxu1  ;;  %v8614_v29 = vpop.f32.mrf.mxu2 }
 0xd09   : > { %v8596_v51 = vadd.f32 %v10059_v25, %v8595_v12 }
 0xd0b   : > { %v8615_v32 = vadd.f32 %v8614_v29, %v8596_v51 }
 0xd0d   : > { %v8623_v36 = vadd.f32 %v8615_v32, %v14849_v23 }
 0xd0f   : > { %8628 = vadd.xlane.f32.xlu2 %v8623_v36 }
 0xd16   : > { %v8598_v7 = vpop.f32.mrf.mxu1  ;;  %v8617_v3 = vpop.f32.mrf.mxu2 }
 0xd17   : > { %v8599_v24 = vadd.f32 %v10059_v25, %v8598_v7 }
 0xd19   : > { %v8618_v9 = vadd.f32 %v8617_v3, %v8599_v24 }
 0xd1b   : > { %v8624_v13 = vadd.f32 %v8618_v9, %v14858_v61 }
 0xd1d   : > { %8630 = vadd.xlane.f32.xlu1 %v8624_v13 }
 0xd1e   : > { %v8600_v20 = vpop.f32.mrf.mxu1  ;;  %v8619_v19 = vpop.f32.mrf.mxu2 }
 0xd1f   : > { %v8601_v47 = vadd.f32 %v10059_v25, %v8600_v20 }
 0xd21   : > { %v8620_v21 = vadd.f32 %v8619_v19, %v8601_v47 }
 0xd23   : > { %v8625_v10 = vadd.f32 %v8620_v21, %v14860_v5 }
 0xd25   : > { %8632 = vadd.xlane.f32.xlu0 %v8625_v10 }
 0xd7a   : > { %v8627_v42 = vpop.xlane.xlu0 %8626 }
 0xd7b   : > { %v8634_v49 = vmul.f32 %v8627_v42, %v14776_v26 }
 0xd7d   : > { %v8638_v16 = vsub.f32 %v8622_v37, %v8634_v49 }
 0xd7f   : > { %v8642_v23 = vmul.f32 %v8638_v16, %v8638_v16 }
 0xd81   : > { %8646 = vadd.xlane.f32.xlu2 %v8642_v23 }
 0xd82   : > { %v8629_v27 = vpop.xlane.xlu2 %8628 }
 0xd83   : > { %v8635_v55 = vmul.f32 %v8629_v27, %v14776_v26 }
 0xd85   : > { %v8639_v17 = vsub.f32 %v8623_v36, %v8635_v55 }
 0xd87   : > { %v8643_v33 = vmul.f32 %v8639_v17, %v8639_v17 }
 0xd89   : > { %8648 = vadd.xlane.f32.xlu1 %v8643_v33 }
 0xd90   : > { %v8631_v61 = vpop.xlane.xlu1 %8630 }
 0xd91   : > { %v8636_v38 = vmul.f32 %v8631_v61, %v14776_v26 }
 0xd93   : > { %v14886_v46 = vsub.f32 %v8624_v13, %v8636_v38 }
 0xd95   : > { %v8644_v5 = vmul.f32 %v14886_v46, %v14886_v46 }
 0xd97   : > { %8650 = vadd.xlane.f32.xlu0 %v8644_v5 }
 0xd98   : > { %v8633_v58 = vpop.xlane.xlu0 %8632 }
 0xd99   : > { %v8637_v14 = vmul.f32 %v8633_v58, %v14776_v26 }
 0xd9b   : > { %v14891_v34 = vsub.f32 %v8625_v10, %v8637_v14 }
 0xd9d   : > { %v8645_v8 = vmul.f32 %v14891_v34, %v14891_v34 }
 0xd9f   : > { %8652 = vadd.xlane.f32.xlu2 %v8645_v8 }
 0xdf4   : > { %v8647_v1 = vpop.xlane.xlu2 %8646 }
 0xdf5   : > { %v8654_v59 = vmul.f32 %v8647_v1, %v14776_v26 }
 0xdf7   : > { %v8658_v62 = vadd.f32 1e-05, %v8654_v59 }
 0xdf9   : > { %10136 = vrsqrt.f32 %v8658_v62  ;;  %vm8668_vm2 = vweird.f32 %v8658_v62 }
 0xdfc   : > { %v8649_v6 = vpop.xlane.xlu1 %8648 }
 0xdfd   : > { %v8655_v50 = vmul.f32 %v8649_v6, %v14776_v26 }
 0xdff   : > { %v10137_v0 = vpop.eup %10136  ;;  %v8659_v44 = vadd.f32 1e-05, %v8655_v50 }
 0xe00   : > { %v8663_v53 = vmul.f32 %v10137_v0, %v8658_v62  ;;  %vm8669_vm1 = vweird.f32 %v10137_v0 }
 0xe01   : > { %10138 = vrsqrt.f32 %v8659_v44  ;;  %vm8670_vm3 = vmor %vm8668_vm2, %vm8669_vm1  ;;  %vm8678_vm5 = vweird.f32 %v8659_v44 }
 0xe02   : > { %v8664_v28 = vmul.f32 %v10137_v0, %v8663_v53 }
 0xe04   : > { %v8665_v63 = vmul.f32 0.5, %v8664_v28 }
 0xe06   : > { %v8666_v2 = vsub.f32 1.5, %v8665_v63 }
 0xe07   : > { %v10139_v11 = vpop.eup %10138 }
 0xe08   : > { %v8667_v4 = vmul.f32 %v10137_v0, %v8666_v2  ;;  %v8673_v45 = vmul.f32 %v10139_v11, %v8659_v44  ;;  %vm8679_vm4 = vweird.f32 %v10139_v11 }
 0xe09   : > { %vm8680_vm6 = vmor %vm8678_vm5, %vm8679_vm4 }
 0xe0a   : > { %v8671_v40 = vsel %vm8670_vm3, %v10137_v0, %v8667_v4  ;;  %v8674_v35 = vmul.f32 %v10139_v11, %v8673_v45  ;;  %v8651_v54 = vpop.xlane.xlu0 %8650 }
 0xe0b   : > { %v8702_v39 = vmul.f32 %v8671_v40, %v8638_v16  ;;  %v8656_v18 = vmul.f32 %v8651_v54, %v14776_v26 }
 0xe0c   : > { %v8675_v22 = vmul.f32 0.5, %v8674_v35 }
 0xe0d   : > { %v8710_v56 = vmul.f32 %v10060_v57, %v8702_v39  ;;  %v8660_v60 = vadd.f32 1e-05, %v8656_v18 }
 0xe0e   : > { %v8676_v31 = vsub.f32 1.5, %v8675_v22 }
 0xe0f   : > { %v8718_v52 = vadd.f32 %v10061_v43, %v8710_v56  ;;  %10140 = vrsqrt.f32 %v8660_v60  ;;  %vm8688_vm8 = vweird.f32 %v8660_v60 }
 0xe10   : > { %v8677_v25 = vmul.f32 %v10139_v11, %v8676_v31 }
 0xe11   : > { %8722 = vst [vmem:[#allocation2 + $0x10] sm:$0xff] %v8718_v52 }
 0xe12   : > { %v8681_v48 = vsel %vm8680_vm6, %v10139_v11, %v8677_v25  ;;  %v8653_v30 = vpop.xlane.xlu2 %8652 }
 0xe13   : > { %v8703_v41 = vmul.f32 %v8681_v48, %v8639_v17  ;;  %v8657_v15 = vmul.f32 %v8653_v30, %v14776_v26 }
 0xe15   : > { %v10141_v37 = vpop.eup %10140  ;;  %v8711_v12 = vmul.f32 %v10060_v57, %v8703_v41  ;;  %v8661_v51 = vadd.f32 1e-05, %v8657_v15 }
 0xe16   : > { %v8683_v29 = vmul.f32 %v10141_v37, %v8660_v60  ;;  %vm8689_vm7 = vweird.f32 %v10141_v37 }
 0xe17   : > { %v8719_v32 = vadd.f32 %v10061_v43, %v8711_v12  ;;  %10142 = vrsqrt.f32 %v8661_v51  ;;  %vm8690_vm9 = vmor %vm8688_vm8, %vm8689_vm7  ;;  %vm8698_vm11 = vweird.f32 %v8661_v51 }
 0xe18   : > { %v8684_v36 = vmul.f32 %v10141_v37, %v8683_v29 }
 0xe19   : > { %8723 = vst [vmem:[#allocation2] sm:$0xff] %v8719_v32 }
 0xe1a   : > { %v8685_v7 = vmul.f32 0.5, %v8684_v36 }
 0xe1c   : > { %v8686_v3 = vsub.f32 1.5, %v8685_v7 }
 0xe1d   : > { %v10143_v24 = vpop.eup %10142 }
 0xe1e   : > { %v8687_v9 = vmul.f32 %v10141_v37, %v8686_v3  ;;  %v8693_v13 = vmul.f32 %v10143_v24, %v8661_v51  ;;  %vm8699_vm10 = vweird.f32 %v10143_v24 }
 0xe1f   : > { %vm8700_vm12 = vmor %vm8698_vm11, %vm8699_vm10 }
 0xe20   : > { %v8691_v20 = vsel %vm8690_vm9, %v10141_v37, %v8687_v9  ;;  %v8694_v47 = vmul.f32 %v10143_v24, %v8693_v13 }
 0xe21   : > { %v8704_v26 = vmul.f32 %v8691_v20, %v14886_v46 }
 0xe22   : > { %v8695_v19 = vmul.f32 0.5, %v8694_v47 }
 0xe23   : > { %v8712_v21 = vmul.f32 %v10060_v57, %v8704_v26 }
 0xe24   : > { %v8696_v10 = vsub.f32 1.5, %v8695_v19 }
 0xe25   : > { %v8720_v42 = vadd.f32 %v10061_v43, %v8712_v21 }
 0xe26   : > { %v8697_v49 = vmul.f32 %v10143_v24, %v8696_v10 }
 0xe27   : > { %8724 = vst [vmem:[#allocation2 + $0x18] sm:$0xff] %v8720_v42 }
 0xe28   : > { %v8701_v16 = vsel %vm8700_vm12, %v10143_v24, %v8697_v49 }
 0xe29   : > { %v8705_v23 = vmul.f32 %v8701_v16, %v14891_v34 }
 0xe2b   : > { %v8713_v27 = vmul.f32 %v10060_v57, %v8705_v23  ;;  %8729 = sbr.rel (%p9339_p2) target bundleno = 3636 (0xe34), region = 128 }
 0xe2d   : > { %v8721_v55 = vadd.f32 %v10061_v43, %v8713_v27 }
 0xe2f   : > { %8725 = vst [vmem:[#allocation2 + $0x8] sm:$0xff] %v8721_v55 }
 0xe30   : > { %8730 = vst [vmem:[%s10985_s5] sm:$0xff] %v8718_v52 }
 0xe31   : > { %8731 = vst [vmem:[%s10985_s5 + $0x8] sm:$0xff] %v8719_v32 }
 0xe32   : > { %8732 = vst [vmem:[%s10985_s5 + $0x10] sm:$0xff] %v8720_v42 }
 0xe33   : > { %8733 = vst [vmem:[%s10985_s5 + $0x18] sm:$0xff] %v8721_v55 }
 0xe34 PF: > { %s15456_s14 = sld [smem:[#allocation28_spill]]  ;;  %s8747_s11 = sshll.u32 %s10985_s5, 4  ;;  %s8748_s11 = int_to_ptr.vmem [resolvable:$true] %s8747_s11 }
 0xe35   : > { %s15457_s6 = sld [smem:[#allocation110_spill]]  ;;  %s8735_s8 = scalar_lea.sflag [#allocation5], %s10914_s2 }
 0xe3a   : > { %s9413_s13 = sshll.u32 %s15456_s14, 5 }
 0xe3b   : > { %s8746_s18 = scalar_lea.hbm %s15457_s6, %s9413_s13  ;;  %s10468_s27 = scalar_lea.hbm %s15457_s6, 64 }
 0xe3c   : > { %s8749_s10 = sshll.u32 %s8746_s18, 4  ;;  %s8750_s10 = int_to_ptr.hbm [resolvable:$true] %s8749_s10 }
 0xe3d   : > { %s10462_s9 = sshra.s32 %s8750_s10, 4  ;;  %s10463_s9 = int_to_ptr.hbm [resolvable:$true] %s10462_s9 }
 0xe3e   : > { %s10464_s20 = scalar_lea.hbm %s10463_s9, 32  ;;  %p10469_p7 = scmp.lt.s32.totalorder %s10463_s9, %s15457_s6 }
 0xe3f   : > { %p10465_p4 = scmp.ne.s32.totalorder %s10463_s9, %s10464_s20  ;;  %p10470_p8 = scmp.lt.s32.totalorder %s10468_s27, %s10464_s20 }
 0xe41   : > { %p10466_p5 = pnand %p10465_p4, %p10883_p9  ;;  %p10471_p10 = por %p10470_p8, %p10469_p7 }
 0xe43   : > { %p10467_p6 = pneg %p10466_p5 }
 0xe45   : > { %p10472_p3 = pnand %p10471_p10, %p10467_p6 }
 0xe47   : > { %10475 = shalt.err (!%p10472_p3)
}
 0xe48   : > { %s10597_s2 = smov 128   ;;  %s10598_s5 = smov 8  }
 0xe49   : > { %9444 = dma.vmem_to_hbm [thread:$0]  (%p10883_p9), %s8748_s11, 512, %s8750_s10, %s8735_s8, %s10597_s2, %s10597_s2, %s10598_s5  }
 0xe4a PF: > { %s15458_s29 = sld [smem:[#allocation24_spill]]  ;;  %p9485_p12 = scmp.ge.s32.totalorder %s10582_s28, 2 }
 0xe4c   : > { %p9479_p1 = pnand %p9485_p12, %p10775_p11 }
 0xe4e   : > { %p9480_p13 = pneg %p9479_p1 }
 0xe50   : > { %s8764_s3 = sand.u32 1, %s15458_s29  }
 0xe51   : > { %s8765_s16 = scalar_lea.sflag [#allocation5], %s8764_s3 }
 0xe52   : > { %10537 = dma.done.wait (%p9480_p13), %s8765_s16, 512  }
 0xe53   : > { %10539 = vsyncadd (%p9480_p13), %s8765_s16, 4294966784  ;;  %s32_s28 = sadd.s32 1, %s10582_s28   ;;  %s15460_s18 = sld [smem:[#allocation22_spill]] }
 0xe54   : > { %p29_p0 = scmp.ge.s32.totalorder %s32_s28, 6   ;;  %s15461_s19 = sld [smem:[#allocation23_spill]] }
 0xe55   : > { %s15462_s20 = sld [smem:[#allocation33_spill]] }
 0xe56   : > { %s15463_s21 = sld [smem:[#allocation25_spill]] }
 0xe57   : > { %s15464_s22 = sld [smem:[#allocation26_spill]] }
 0xe58   : > { %s15465_s23 = sld [smem:[#allocation34_spill]]  ;;  %31 = sbr.rel (!%p29_p0) target bundleno = 27 (0x1b), region = 240 }
 0xe59   : > { %s15466_s24 = sld [smem:[#allocation29_spill]] }
 0xe5a   : > { %s15467_s25 = sld [smem:[#allocation30_spill]] }
 0xe5b   : > { %s15468_s26 = sld [smem:[#allocation31_spill]] }
 0xe5c   : > { %s15469_s27 = sld [smem:[#allocation32_spill]] }
 0xe5d   :  { %8771 = vsyncpa [#allocation4], 1 }
 0xe5e   :  { %8773 = vsyncpa [#allocation4 + $0x1], 1 }
 0xe5f   :  { %8774 = vsyncpa [#allocation7], 1 }
 0xe60   :  { %8775 = vsyncpa [#allocation5], 1 }
 0xe61   :  { %8777 = vsyncpa [#allocation5 + $0x1], 1 }

</bundles_post_ra>
